<compile_context>
chip_gen: v7x
topology: tpu7x:2x2x1
jax: 0.10.0
libtpu: 0.0.40
codegen_flags: <defaults>
</compile_context>

<pallas_src>
import jax
import jax.numpy as jnp
import numpy as np
from jax.experimental import pallas as pl
from jax.experimental.pallas import tpu as pltpu


def _round_up(x, m):
    return (x + m - 1) // m * m


def _make_decoder_kernel(T, F, Fq, C1, C2, has_skip):
    """Fused ConvTranspose2d((2,5), s=(1,2)) + BN + ELU for one batch element."""
    Cin = C1 + C2

    def kernel(*refs):
        if has_skip:
            x_ref, s_ref, w_ref, scale_ref, shift_ref, out_ref, az = refs
        else:
            x_ref, w_ref, scale_ref, shift_ref, out_ref, az = refs
            s_ref = None

        # ---- zero only the rows read by valid output slots (q in [0, F+2) of
        # every time block).  Rows q >= F+2 feed only discarded output slots,
        # so they may keep stale VMEM contents.  No cross-step scratch state.
        zero_band = jnp.zeros((F + 2, 6 * Cin), jnp.bfloat16)
        for to in range(T):
            az[to * Fq:to * Fq + F + 2, :] = zero_band

        # ---- direct scatter (im2col-free): input row t is written once per
        # (kt, m) tap into time block (t+kt)*Fq, rows [m, m+F), K-column block
        # (kt*3+m)*Cin.  x channels -> [:C1], skip channels -> [C1:Cin].
        # (Unrolled Python loop: T is small here; see TODO for long sequences.)
        for t in range(T):
            xrow = x_ref[t].astype(jnp.bfloat16)                  # (F, C1)
            srow = s_ref[t].astype(jnp.bfloat16) if has_skip else None
            for kt in (0, 1):
                to = t + kt
                if to >= T:          # Chomp_T: output time row T never computed
                    continue
                base = to * Fq
                for m in range(3):
                    col = (kt * 3 + m) * Cin
                    az[base + m:base + m + F, col:col + C1] = xrow
                    if has_skip:
                        az[base + m:base + m + F, col + C1:col + Cin] = srow

        # ---- one MXU matmul: the 6 taps folded into K (=6*Cin); the even/odd
        # output-frequency phases (stride-2 upsampling) folded into lanes.
        acc = jnp.dot(az[...], w_ref[...], preferred_element_type=jnp.float32)

        # ---- fused conv-bias + BatchNorm (inference) + ELU epilogue, f32
        # math, bf16 store.  (exp(y)-1 kept for guaranteed Mosaic lowering.)
        y = acc * scale_ref[...] + shift_ref[...]
        y = jnp.where(y > 0, y, jnp.exp(y) - 1.0)
        out_ref[...] = y.astype(out_ref.dtype)

    return kernel


def _fold_params(w, b, gamma, beta, mean, var, eps):
    """Fold taps into K, even/odd phases into lanes, and bias+BN into scale/shift."""
    Cin, Cout = w.shape[0], w.shape[1]
    # even taps kf = 0,2,4 -> output columns [0:Cout]
    w_e = jnp.transpose(w[:, :, :, 0::2], (2, 3, 0, 1)).reshape(6 * Cin, Cout)
    # odd taps kf = 1,3 (missing m=2 tap zero-padded) -> columns [Cout:2*Cout]
    w_o = jnp.transpose(w[:, :, :, 1::2], (2, 3, 0, 1))        # (2, 2, Cin, Cout)
    w_o = jnp.pad(w_o, ((0, 0), (0, 1), (0, 0), (0, 0))).reshape(6 * Cin, Cout)
    w_comb = jnp.concatenate([w_e, w_o], axis=-1).astype(jnp.bfloat16)

    scale = gamma / jnp.sqrt(var + eps)
    shift = beta + (b - mean) * scale        # conv bias folded into the BN shift
    scale2 = jnp.concatenate([scale, scale]).reshape(1, 2 * Cout)
    shift2 = jnp.concatenate([shift, shift]).reshape(1, 2 * Cout)
    return w_comb, scale2, shift2


def decoder_block(x, skip, w, b, gamma, beta, mean, var, *, last, eps=1e-5):
    """One de{1..5} block.  x: (N, T, F, C1) NTFC; skip: (N, T, F, C2) or None.
    w: torch ConvTranspose2d weight (Cin, Cout, 2, 5) with Cin = C1 + C2."""
    N, T, F, C1 = x.shape
    C2 = 0 if skip is None else skip.shape[-1]
    Cin, Cout = C1 + C2, w.shape[1]
    assert w.shape[0] == Cin and tuple(w.shape[2:]) == (2, 5)
    if skip is not None:
        assert skip.shape[:3] == (N, T, F)

    w_comb, scale2, shift2 = _fold_params(w, b, gamma, beta, mean, var, eps)

    Fq = _round_up(F + 4, 16)   # sublane-aligned (bf16) per-time-row stride
    M = T * Fq                  # matmul M; slots with q >= F+2 are junk/discarded

    in_specs = [pl.BlockSpec((None, T, F, C1), lambda n: (n, 0, 0, 0))]
    operands = [x]
    if skip is not None:
        in_specs.append(pl.BlockSpec((None, T, F, C2), lambda n: (n, 0, 0, 0)))
        operands.append(skip)
    in_specs += [
        pl.BlockSpec((6 * Cin, 2 * Cout), lambda n: (0, 0)),
        pl.BlockSpec((1, 2 * Cout), lambda n: (0, 0)),
        pl.BlockSpec((1, 2 * Cout), lambda n: (0, 0)),
    ]
    operands += [w_comb, scale2, shift2]

    bytes_in = (x.size * x.dtype.itemsize
                + (0 if skip is None else skip.size * skip.dtype.itemsize)
                + 6 * Cin * 2 * Cout * 2 + 2 * (2 * Cout) * 4)
    bytes_out = N * M * 2 * Cout * 2
    cost = pl.CostEstimate(
        flops=2 * N * M * (6 * Cin) * (2 * Cout),
        transcendentals=N * M * 2 * Cout,
        bytes_accessed=bytes_in + bytes_out)

    out = pl.pallas_call(
        _make_decoder_kernel(T, F, Fq, C1, C2, skip is not None),
        grid=(N,),
        in_specs=in_specs,
        out_specs=pl.BlockSpec((None, M, 2 * Cout), lambda n: (n, 0, 0)),
        out_shape=jax.ShapeDtypeStruct((N, M, 2 * Cout), jnp.bfloat16),
        scratch_shapes=[
            pltpu.VMEM((M, 6 * Cin), jnp.bfloat16),   # direct-scatter im2col slab
        ],
        compiler_params=pltpu.CompilerParams(
            dimension_semantics=("parallel",),
            vmem_limit_bytes=32 * 1024 * 1024),
        cost_estimate=cost,
    )(*operands)

    # even/odd phase interleave is a pure reshape; then apply the chomps.
    # (Kept host-side: de_list must materialize the chomped activation anyway.)
    full = out.reshape(N, T, Fq, 2, Cout).reshape(N, T, 2 * Fq, Cout)
    if last:
        return full[:, :, :2 * F + 3, :]          # Chomp_T only (de5)
    return full[:, :, 1:2 * F + 2, :]             # up/down Chomp_F + Chomp_T


def adecoder_forward(params, x, x_list):
    """params: list of 5 tuples (w, b, gamma, beta, mean, var); NTFC tensors."""
    de_list = []
    h = decoder_block(x, None, *params[0], last=False)
    de_list.append(h)
    h = decoder_block(h, x_list[-1], *params[1], last=False)
    de_list.append(h)
    h = decoder_block(h, x_list[-2], *params[2], last=False)
    de_list.append(h)
    h = decoder_block(h, x_list[-3], *params[3], last=False)
    de_list.append(h)
    h = decoder_block(h, x_list[-4], *params[4], last=True)
    de_list.append(h)
    return de_list


# ----------------------- pure-JAX reference (for checking) -----------------------
def _convtranspose_ref(x, w, b):
    # ConvTranspose2d(k=(2,5), s=(1,2)) via dilated conv with flipped kernel.
    rhs = jnp.transpose(w[:, :, ::-1, ::-1], (2, 3, 0, 1))       # (2,5,Cin,Cout)
    y = jax.lax.conv_general_dilated(
        x, rhs, window_strides=(1, 1), padding=[(1, 1), (4, 4)],
        lhs_dilation=(1, 2), dimension_numbers=('NHWC', 'HWIO', 'NHWC'),
        precision=jax.lax.Precision.HIGHEST)
    return y + b


def _block_ref(x, w, b, gamma, beta, mean, var, *, last, eps=1e-5, quant_bf16=False):
    if quant_bf16:      # mimic the kernel's bf16 matmul operands (f32 accumulation)
        x = x.astype(jnp.bfloat16).astype(jnp.float32)
        w = w.astype(jnp.bfloat16).astype(jnp.float32)
    y = _convtranspose_ref(x, w, b)
    if not last:
        y = y[:, :, 1:-1, :]          # up_Chomp_F(1) then down_Chomp_F(1)
    y = y[:, :-1, :, :]               # Chomp_T(1)
    y = (y - mean) / jnp.sqrt(var + eps) * gamma + beta
    y = jnp.where(y > 0, y, jnp.exp(y) - 1.0)
    if quant_bf16:      # kernel stores bf16 activations
        y = y.astype(jnp.bfloat16).astype(jnp.float32)
    return y


def adecoder_forward_ref(params, x, x_list, quant_bf16=False):
    de_list = []
    h = _block_ref(x, *params[0], last=False, quant_bf16=quant_bf16)
    de_list.append(h)
    h = _block_ref(jnp.concatenate([h, x_list[-1]], axis=-1), *params[1],
                   last=False, quant_bf16=quant_bf16)
    de_list.append(h)
    h = _block_ref(jnp.concatenate([h, x_list[-2]], axis=-1), *params[2],
                   last=False, quant_bf16=quant_bf16)
    de_list.append(h)
    h = _block_ref(jnp.concatenate([h, x_list[-3]], axis=-1), *params[3],
                   last=False, quant_bf16=quant_bf16)
    de_list.append(h)
    h = _block_ref(jnp.concatenate([h, x_list[-4]], axis=-1), *params[4],
                   last=True, quant_bf16=quant_bf16)
    de_list.append(h)
    return de_list


if __name__ == "__main__":
    key = jax.random.PRNGKey(0)
    kiter = iter(jax.random.split(key, 64))
    nxt = lambda: next(kiter)

    N, T, F0 = 2, 4, 3
    layer_defs = [(64, 64), (128, 32), (64, 32), (64, 16), (32, 16)]

    params = []
    for cin, cout in layer_defs:
        w = 0.05 * jax.random.normal(nxt(), (cin, cout, 2, 5), jnp.float32)
        b = 0.05 * jax.random.normal(nxt(), (cout,), jnp.float32)
        gamma = 1.0 + 0.1 * jax.random.normal(nxt(), (cout,), jnp.float32)
        beta = 0.1 * jax.random.normal(nxt(), (cout,), jnp.float32)
        mean = 0.1 * jax.random.normal(nxt(), (cout,), jnp.float32)
        var = 1.0 + 0.1 * jnp.abs(jax.random.normal(nxt(), (cout,), jnp.float32))
        params.append((w, b, gamma, beta, mean, var))

    # PyTorch-style NCHW inputs (N, C, T, F)
    x_nchw = jax.random.normal(nxt(), (N, 64, T, F0), jnp.float32)
    # x_list = [e4, e3, e2, e1]; x_list[-1] is concatenated first.
    skip_shapes = [(16, 63), (32, 31), (32, 15), (64, 7)]
    x_list_nchw = [jax.random.normal(nxt(), (N, c, T, f), jnp.float32)
                   for c, f in skip_shapes]

    # layout: NCHW -> NTFC for the Pallas kernels
    to_ntfc = lambda a: jnp.transpose(a, (0, 2, 3, 1))
    x = to_ntfc(x_nchw)
    x_list = [to_ntfc(a) for a in x_list_nchw]

    fwd = jax.jit(adecoder_forward)
    outs = jax.block_until_ready(fwd(params, x, x_list))

    # tight check vs a reference that models the kernel's bf16 operands and
    # bf16 stored activations
    refs_q = adecoder_forward_ref(params, x, x_list, quant_bf16=True)
    for o, r in zip(outs, refs_q):
        np.testing.assert_allclose(np.asarray(o.astype(jnp.float32)),
                                   np.asarray(r), rtol=1e-2, atol=1e-2)

    # loose check vs the full-f32 reference (bounds total bf16 quantization drift)
    refs_f = adecoder_forward_ref(params, x, x_list, quant_bf16=False)
    for o, r in zip(outs, refs_f):
        np.testing.assert_allclose(np.asarray(o.astype(jnp.float32)),
                                   np.asarray(r), rtol=6e-2, atol=6e-2)

    print("KERNEL_OK")
</pallas_src>

<mosaic_0001>
module attributes {stable_mosaic.version = 11 : i64} {
  func.func @kernel(%arg0: i32, %arg1: memref<1x4x3x64xf32, #tpu.memory_space<vmem>>, %arg2: memref<384x128xbf16, #tpu.memory_space<vmem>>, %arg3: memref<1x128xf32, #tpu.memory_space<vmem>>, %arg4: memref<1x128xf32, #tpu.memory_space<vmem>>, %arg5: memref<1x64x128xbf16, #tpu.memory_space<vmem>>, %arg6: memref<64x384xbf16, #tpu.memory_space<vmem>>) attributes {dimension_semantics = [#tpu.dimension_semantics<parallel>], iteration_bounds = array<i64: 2>, scalar_prefetch = 0 : i64, scratch_operands = 1 : i64, tpu.core_type = #tpu.core_type<tc>, window_params = [{transform_indices = @transform_0, window_bounds = array<i64: 1, 4, 3, 64>}, {pipeline_mode = #tpu.pipeline_mode<synchronous>, transform_indices = @transform_1, window_bounds = array<i64: 384, 128>}, {pipeline_mode = #tpu.pipeline_mode<synchronous>, transform_indices = @transform_2, window_bounds = array<i64: 1, 128>}, {pipeline_mode = #tpu.pipeline_mode<synchronous>, transform_indices = @transform_3, window_bounds = array<i64: 1, 128>}, {transform_indices = @transform_4, window_bounds = array<i64: 1, 64, 128>}]} {
    %cst = arith.constant 0.000000e+00 : bf16
    %0 = vector.broadcast %cst : bf16 to vector<5x384xbf16>
    %c0 = arith.constant 0 : index
    %c0_0 = arith.constant 0 : index
    %1 = vector.load %arg6[%c0, %c0_0] : memref<64x384xbf16, #tpu.memory_space<vmem>>, vector<5x384xbf16>
    tpu.vector_store %arg6[%c0, %c0_0], %0 {strides = array<i32>} : memref<64x384xbf16, #tpu.memory_space<vmem>>, vector<5x384xbf16>,
    %c16 = arith.constant 16 : index
    %c0_1 = arith.constant 0 : index
    %2 = vector.load %arg6[%c16, %c0_1] : memref<64x384xbf16, #tpu.memory_space<vmem>>, vector<5x384xbf16>
    tpu.vector_store %arg6[%c16, %c0_1], %0 {strides = array<i32>} : memref<64x384xbf16, #tpu.memory_space<vmem>>, vector<5x384xbf16>,
    %c32 = arith.constant 32 : index
    %c0_2 = arith.constant 0 : index
    %3 = vector.load %arg6[%c32, %c0_2] : memref<64x384xbf16, #tpu.memory_space<vmem>>, vector<5x384xbf16>
    tpu.vector_store %arg6[%c32, %c0_2], %0 {strides = array<i32>} : memref<64x384xbf16, #tpu.memory_space<vmem>>, vector<5x384xbf16>,
    %c48 = arith.constant 48 : index
    %c0_3 = arith.constant 0 : index
    %4 = vector.load %arg6[%c48, %c0_3] : memref<64x384xbf16, #tpu.memory_space<vmem>>, vector<5x384xbf16>
    tpu.vector_store %arg6[%c48, %c0_3], %0 {strides = array<i32>} : memref<64x384xbf16, #tpu.memory_space<vmem>>, vector<5x384xbf16>,
    %c0_4 = arith.constant 0 : index
    %c0_5 = arith.constant 0 : index
    %c0_6 = arith.constant 0 : index
    %c0_7 = arith.constant 0 : index
    %5 = vector.load %arg1[%c0_4, %c0_5, %c0_6, %c0_7] : memref<1x4x3x64xf32, #tpu.memory_space<vmem>>, vector<1x1x3x64xf32>
    %6 = vector.shape_cast %5 : vector<1x1x3x64xf32> to vector<3x64xf32>
    %7 = arith.truncf %6 : vector<3x64xf32> to vector<3x64xbf16>
    %c0_8 = arith.constant 0 : index
    %c0_9 = arith.constant 0 : index
    %8 = vector.load %arg6[%c0_8, %c0_9] : memref<64x384xbf16, #tpu.memory_space<vmem>>, vector<3x64xbf16>
    tpu.vector_store %arg6[%c0_8, %c0_9], %7 {strides = array<i32>} : memref<64x384xbf16, #tpu.memory_space<vmem>>, vector<3x64xbf16>,
    %c1 = arith.constant 1 : index
    %c64 = arith.constant 64 : index
    %9 = vector.load %arg6[%c1, %c64] : memref<64x384xbf16, #tpu.memory_space<vmem>>, vector<3x64xbf16>
    tpu.vector_store %arg6[%c1, %c64], %7 {strides = array<i32>} : memref<64x384xbf16, #tpu.memory_space<vmem>>, vector<3x64xbf16>,
    %c2 = arith.constant 2 : index
    %c128 = arith.constant 128 : index
    %10 = vector.load %arg6[%c2, %c128] : memref<64x384xbf16, #tpu.memory_space<vmem>>, vector<3x64xbf16>
    tpu.vector_store %arg6[%c2, %c128], %7 {strides = array<i32>} : memref<64x384xbf16, #tpu.memory_space<vmem>>, vector<3x64xbf16>,
    %c16_10 = arith.constant 16 : index
    %c192 = arith.constant 192 : index
    %11 = vector.load %arg6[%c16_10, %c192] : memref<64x384xbf16, #tpu.memory_space<vmem>>, vector<3x64xbf16>
    tpu.vector_store %arg6[%c16_10, %c192], %7 {strides = array<i32>} : memref<64x384xbf16, #tpu.memory_space<vmem>>, vector<3x64xbf16>,
    %c17 = arith.constant 17 : index
    %c256 = arith.constant 256 : index
    %12 = vector.load %arg6[%c17, %c256] : memref<64x384xbf16, #tpu.memory_space<vmem>>, vector<3x64xbf16>
    tpu.vector_store %arg6[%c17, %c256], %7 {strides = array<i32>} : memref<64x384xbf16, #tpu.memory_space<vmem>>, vector<3x64xbf16>,
    %c18 = arith.constant 18 : index
    %c320 = arith.constant 320 : index
    %13 = vector.load %arg6[%c18, %c320] : memref<64x384xbf16, #tpu.memory_space<vmem>>, vector<3x64xbf16>
    tpu.vector_store %arg6[%c18, %c320], %7 {strides = array<i32>} : memref<64x384xbf16, #tpu.memory_space<vmem>>, vector<3x64xbf16>,
    %c0_11 = arith.constant 0 : index
    %c1_12 = arith.constant 1 : index
    %c0_13 = arith.constant 0 : index
    %c0_14 = arith.constant 0 : index
    %14 = vector.load %arg1[%c0_11, %c1_12, %c0_13, %c0_14] : memref<1x4x3x64xf32, #tpu.memory_space<vmem>>, vector<1x1x3x64xf32>
    %15 = vector.shape_cast %14 : vector<1x1x3x64xf32> to vector<3x64xf32>
    %16 = arith.truncf %15 : vector<3x64xf32> to vector<3x64xbf16>
    %c16_15 = arith.constant 16 : index
    %c0_16 = arith.constant 0 : index
    %17 = vector.load %arg6[%c16_15, %c0_16] : memref<64x384xbf16, #tpu.memory_space<vmem>>, vector<3x64xbf16>
    tpu.vector_store %arg6[%c16_15, %c0_16], %16 {strides = array<i32>} : memref<64x384xbf16, #tpu.memory_space<vmem>>, vector<3x64xbf16>,
    %c17_17 = arith.constant 17 : index
    %c64_18 = arith.constant 64 : index
    %18 = vector.load %arg6[%c17_17, %c64_18] : memref<64x384xbf16, #tpu.memory_space<vmem>>, vector<3x64xbf16>
    tpu.vector_store %arg6[%c17_17, %c64_18], %16 {strides = array<i32>} : memref<64x384xbf16, #tpu.memory_space<vmem>>, vector<3x64xbf16>,
    %c18_19 = arith.constant 18 : index
    %c128_20 = arith.constant 128 : index
    %19 = vector.load %arg6[%c18_19, %c128_20] : memref<64x384xbf16, #tpu.memory_space<vmem>>, vector<3x64xbf16>
    tpu.vector_store %arg6[%c18_19, %c128_20], %16 {strides = array<i32>} : memref<64x384xbf16, #tpu.memory_space<vmem>>, vector<3x64xbf16>,
    %c32_21 = arith.constant 32 : index
    %c192_22 = arith.constant 192 : index
    %20 = vector.load %arg6[%c32_21, %c192_22] : memref<64x384xbf16, #tpu.memory_space<vmem>>, vector<3x64xbf16>
    tpu.vector_store %arg6[%c32_21, %c192_22], %16 {strides = array<i32>} : memref<64x384xbf16, #tpu.memory_space<vmem>>, vector<3x64xbf16>,
    %c33 = arith.constant 33 : index
    %c256_23 = arith.constant 256 : index
    %21 = vector.load %arg6[%c33, %c256_23] : memref<64x384xbf16, #tpu.memory_space<vmem>>, vector<3x64xbf16>
    tpu.vector_store %arg6[%c33, %c256_23], %16 {strides = array<i32>} : memref<64x384xbf16, #tpu.memory_space<vmem>>, vector<3x64xbf16>,
    %c34 = arith.constant 34 : index
    %c320_24 = arith.constant 320 : index
    %22 = vector.load %arg6[%c34, %c320_24] : memref<64x384xbf16, #tpu.memory_space<vmem>>, vector<3x64xbf16>
    tpu.vector_store %arg6[%c34, %c320_24], %16 {strides = array<i32>} : memref<64x384xbf16, #tpu.memory_space<vmem>>, vector<3x64xbf16>,
    %c0_25 = arith.constant 0 : index
    %c2_26 = arith.constant 2 : index
    %c0_27 = arith.constant 0 : index
    %c0_28 = arith.constant 0 : index
    %23 = vector.load %arg1[%c0_25, %c2_26, %c0_27, %c0_28] : memref<1x4x3x64xf32, #tpu.memory_space<vmem>>, vector<1x1x3x64xf32>
    %24 = vector.shape_cast %23 : vector<1x1x3x64xf32> to vector<3x64xf32>
    %25 = arith.truncf %24 : vector<3x64xf32> to vector<3x64xbf16>
    %c32_29 = arith.constant 32 : index
    %c0_30 = arith.constant 0 : index
    %26 = vector.load %arg6[%c32_29, %c0_30] : memref<64x384xbf16, #tpu.memory_space<vmem>>, vector<3x64xbf16>
    tpu.vector_store %arg6[%c32_29, %c0_30], %25 {strides = array<i32>} : memref<64x384xbf16, #tpu.memory_space<vmem>>, vector<3x64xbf16>,
    %c33_31 = arith.constant 33 : index
    %c64_32 = arith.constant 64 : index
    %27 = vector.load %arg6[%c33_31, %c64_32] : memref<64x384xbf16, #tpu.memory_space<vmem>>, vector<3x64xbf16>
    tpu.vector_store %arg6[%c33_31, %c64_32], %25 {strides = array<i32>} : memref<64x384xbf16, #tpu.memory_space<vmem>>, vector<3x64xbf16>,
    %c34_33 = arith.constant 34 : index
    %c128_34 = arith.constant 128 : index
    %28 = vector.load %arg6[%c34_33, %c128_34] : memref<64x384xbf16, #tpu.memory_space<vmem>>, vector<3x64xbf16>
    tpu.vector_store %arg6[%c34_33, %c128_34], %25 {strides = array<i32>} : memref<64x384xbf16, #tpu.memory_space<vmem>>, vector<3x64xbf16>,
    %c48_35 = arith.constant 48 : index
    %c192_36 = arith.constant 192 : index
    %29 = vector.load %arg6[%c48_35, %c192_36] : memref<64x384xbf16, #tpu.memory_space<vmem>>, vector<3x64xbf16>
    tpu.vector_store %arg6[%c48_35, %c192_36], %25 {strides = array<i32>} : memref<64x384xbf16, #tpu.memory_space<vmem>>, vector<3x64xbf16>,
    %c49 = arith.constant 49 : index
    %c256_37 = arith.constant 256 : index
    %30 = vector.load %arg6[%c49, %c256_37] : memref<64x384xbf16, #tpu.memory_space<vmem>>, vector<3x64xbf16>
    tpu.vector_store %arg6[%c49, %c256_37], %25 {strides = array<i32>} : memref<64x384xbf16, #tpu.memory_space<vmem>>, vector<3x64xbf16>,
    %c50 = arith.constant 50 : index
    %c320_38 = arith.constant 320 : index
    %31 = vector.load %arg6[%c50, %c320_38] : memref<64x384xbf16, #tpu.memory_space<vmem>>, vector<3x64xbf16>
    tpu.vector_store %arg6[%c50, %c320_38], %25 {strides = array<i32>} : memref<64x384xbf16, #tpu.memory_space<vmem>>, vector<3x64xbf16>,
    %c0_39 = arith.constant 0 : index
    %c3 = arith.constant 3 : index
    %c0_40 = arith.constant 0 : index
    %c0_41 = arith.constant 0 : index
    %32 = vector.load %arg1[%c0_39, %c3, %c0_40, %c0_41] : memref<1x4x3x64xf32, #tpu.memory_space<vmem>>, vector<1x1x3x64xf32>
    %33 = vector.shape_cast %32 : vector<1x1x3x64xf32> to vector<3x64xf32>
    %34 = arith.truncf %33 : vector<3x64xf32> to vector<3x64xbf16>
    %c48_42 = arith.constant 48 : index
    %c0_43 = arith.constant 0 : index
    %35 = vector.load %arg6[%c48_42, %c0_43] : memref<64x384xbf16, #tpu.memory_space<vmem>>, vector<3x64xbf16>
    tpu.vector_store %arg6[%c48_42, %c0_43], %34 {strides = array<i32>} : memref<64x384xbf16, #tpu.memory_space<vmem>>, vector<3x64xbf16>,
    %c49_44 = arith.constant 49 : index
    %c64_45 = arith.constant 64 : index
    %36 = vector.load %arg6[%c49_44, %c64_45] : memref<64x384xbf16, #tpu.memory_space<vmem>>, vector<3x64xbf16>
    tpu.vector_store %arg6[%c49_44, %c64_45], %34 {strides = array<i32>} : memref<64x384xbf16, #tpu.memory_space<vmem>>, vector<3x64xbf16>,
    %c50_46 = arith.constant 50 : index
    %c128_47 = arith.constant 128 : index
    %37 = vector.load %arg6[%c50_46, %c128_47] : memref<64x384xbf16, #tpu.memory_space<vmem>>, vector<3x64xbf16>
    tpu.vector_store %arg6[%c50_46, %c128_47], %34 {strides = array<i32>} : memref<64x384xbf16, #tpu.memory_space<vmem>>, vector<3x64xbf16>,
    %c0_48 = arith.constant 0 : index
    %c0_49 = arith.constant 0 : index
    %38 = vector.load %arg6[%c0_48, %c0_49] : memref<64x384xbf16, #tpu.memory_space<vmem>>, vector<64x384xbf16>
    %c0_50 = arith.constant 0 : index
    %c0_51 = arith.constant 0 : index
    %39 = vector.load %arg2[%c0_50, %c0_51] : memref<384x128xbf16, #tpu.memory_space<vmem>>, vector<384x128xbf16>
    %cst_52 = arith.constant dense<0.000000e+00> : vector<64x128xf32>
    %40 = tpu.matmul %38, %39, %cst_52 {dimension_numbers = #tpu.dot_dimension_numbers<[1], [0], [0], [1], [0, 0, 1, 1], [], []>} : vector<64x384xbf16>, vector<384x128xbf16>, vector<64x128xf32> -> vector<64x128xf32>
    %c0_53 = arith.constant 0 : index
    %c0_54 = arith.constant 0 : index
    %41 = vector.load %arg3[%c0_53, %c0_54] : memref<1x128xf32, #tpu.memory_space<vmem>>, vector<1x128xf32>
    %42 = vector.broadcast %41 : vector<1x128xf32> to vector<64x128xf32>
    %43 = arith.mulf %40, %42 : vector<64x128xf32>
    %c0_55 = arith.constant 0 : index
    %c0_56 = arith.constant 0 : index
    %44 = vector.load %arg4[%c0_55, %c0_56] : memref<1x128xf32, #tpu.memory_space<vmem>>, vector<1x128xf32>
    %45 = vector.broadcast %44 : vector<1x128xf32> to vector<64x128xf32>
    %46 = arith.addf %43, %45 : vector<64x128xf32>
    %cst_57 = arith.constant 0.000000e+00 : f32
    %47 = vector.broadcast %cst_57 : f32 to vector<64x128xf32>
    %48 = arith.cmpf ogt, %46, %47 : vector<64x128xf32>
    %49 = math.exp %46 : vector<64x128xf32>
    %cst_58 = arith.constant 1.000000e+00 : f32
    %50 = vector.broadcast %cst_58 : f32 to vector<64x128xf32>
    %51 = arith.subf %49, %50 : vector<64x128xf32>
    %52 = arith.select %48, %46, %51 : vector<64x128xi1>, vector<64x128xf32>
    %53 = arith.truncf %52 : vector<64x128xf32> to vector<64x128xbf16>
    %c0_59 = arith.constant 0 : index
    %c0_60 = arith.constant 0 : index
    %c0_61 = arith.constant 0 : index
    %54 = vector.load %arg5[%c0_59, %c0_60, %c0_61] : memref<1x64x128xbf16, #tpu.memory_space<vmem>>, vector<1x64x128xbf16>
    %55 = vector.shape_cast %54 : vector<1x64x128xbf16> to vector<64x128xbf16>
    %56 = vector.shape_cast %53 : vector<64x128xbf16> to vector<1x64x128xbf16>
    tpu.vector_store %arg5[%c0_59, %c0_60, %c0_61], %56 {strides = array<i32>} : memref<1x64x128xbf16, #tpu.memory_space<vmem>>, vector<1x64x128xbf16>,
    return
  }
  func.func @transform_0(%arg0: i32) -> (i32, i32, i32, i32) {
    %c0_i32 = arith.constant 0 : i32
    %c0_i32_0 = arith.constant 0 : i32
    %c0_i32_1 = arith.constant 0 : i32
    %c0_i32_2 = arith.constant 0 : i32
    return %arg0, %c0_i32, %c0_i32_0, %c0_i32_1 : i32, i32, i32, i32
  }
  func.func @transform_1(%arg0: i32) -> (i32, i32) {
    %c0_i32 = arith.constant 0 : i32
    %c0_i32_0 = arith.constant 0 : i32
    %c0_i32_1 = arith.constant 0 : i32
    return %c0_i32, %c0_i32_0 : i32, i32
  }
  func.func @transform_2(%arg0: i32) -> (i32, i32) {
    %c0_i32 = arith.constant 0 : i32
    %c0_i32_0 = arith.constant 0 : i32
    %c0_i32_1 = arith.constant 0 : i32
    return %c0_i32, %c0_i32_0 : i32, i32
  }
  func.func @transform_3(%arg0: i32) -> (i32, i32) {
    %c0_i32 = arith.constant 0 : i32
    %c0_i32_0 = arith.constant 0 : i32
    %c0_i32_1 = arith.constant 0 : i32
    return %c0_i32, %c0_i32_0 : i32, i32
  }
  func.func @transform_4(%arg0: i32) -> (i32, i32, i32) {
    %c0_i32 = arith.constant 0 : i32
    %c0_i32_0 = arith.constant 0 : i32
    %c0_i32_1 = arith.constant 0 : i32
    return %arg0, %c0_i32, %c0_i32_0 : i32, i32, i32
  }
}

module attributes {stable_mosaic.version = 11 : i64} {
  func.func @kernel(%arg0: i32, %arg1: memref<1x4x7x64xbf16, #tpu.memory_space<vmem>>, %arg2: memref<1x4x7x64xf32, #tpu.memory_space<vmem>>, %arg3: memref<768x64xbf16, #tpu.memory_space<vmem>>, %arg4: memref<1x64xf32, #tpu.memory_space<vmem>>, %arg5: memref<1x64xf32, #tpu.memory_space<vmem>>, %arg6: memref<1x64x64xbf16, #tpu.memory_space<vmem>>, %arg7: memref<64x768xbf16, #tpu.memory_space<vmem>>) attributes {dimension_semantics = [#tpu.dimension_semantics<parallel>], iteration_bounds = array<i64: 2>, scalar_prefetch = 0 : i64, scratch_operands = 1 : i64, tpu.core_type = #tpu.core_type<tc>, window_params = [{transform_indices = @transform_0, window_bounds = array<i64: 1, 4, 7, 64>}, {transform_indices = @transform_1, window_bounds = array<i64: 1, 4, 7, 64>}, {pipeline_mode = #tpu.pipeline_mode<synchronous>, transform_indices = @transform_2, window_bounds = array<i64: 768, 64>}, {pipeline_mode = #tpu.pipeline_mode<synchronous>, transform_indices = @transform_3, window_bounds = array<i64: 1, 64>}, {pipeline_mode = #tpu.pipeline_mode<synchronous>, transform_indices = @transform_4, window_bounds = array<i64: 1, 64>}, {transform_indices = @transform_5, window_bounds = array<i64: 1, 64, 64>}]} {
    %cst = arith.constant 0.000000e+00 : bf16
    %0 = vector.broadcast %cst : bf16 to vector<9x768xbf16>
    %c0 = arith.constant 0 : index
    %c0_0 = arith.constant 0 : index
    %1 = vector.load %arg7[%c0, %c0_0] : memref<64x768xbf16, #tpu.memory_space<vmem>>, vector<9x768xbf16>
    tpu.vector_store %arg7[%c0, %c0_0], %0 {strides = array<i32>} : memref<64x768xbf16, #tpu.memory_space<vmem>>, vector<9x768xbf16>,
    %c16 = arith.constant 16 : index
    %c0_1 = arith.constant 0 : index
    %2 = vector.load %arg7[%c16, %c0_1] : memref<64x768xbf16, #tpu.memory_space<vmem>>, vector<9x768xbf16>
    tpu.vector_store %arg7[%c16, %c0_1], %0 {strides = array<i32>} : memref<64x768xbf16, #tpu.memory_space<vmem>>, vector<9x768xbf16>,
    %c32 = arith.constant 32 : index
    %c0_2 = arith.constant 0 : index
    %3 = vector.load %arg7[%c32, %c0_2] : memref<64x768xbf16, #tpu.memory_space<vmem>>, vector<9x768xbf16>
    tpu.vector_store %arg7[%c32, %c0_2], %0 {strides = array<i32>} : memref<64x768xbf16, #tpu.memory_space<vmem>>, vector<9x768xbf16>,
    %c48 = arith.constant 48 : index
    %c0_3 = arith.constant 0 : index
    %4 = vector.load %arg7[%c48, %c0_3] : memref<64x768xbf16, #tpu.memory_space<vmem>>, vector<9x768xbf16>
    tpu.vector_store %arg7[%c48, %c0_3], %0 {strides = array<i32>} : memref<64x768xbf16, #tpu.memory_space<vmem>>, vector<9x768xbf16>,
    %c0_4 = arith.constant 0 : index
    %c0_5 = arith.constant 0 : index
    %c0_6 = arith.constant 0 : index
    %c0_7 = arith.constant 0 : index
    %5 = vector.load %arg1[%c0_4, %c0_5, %c0_6, %c0_7] : memref<1x4x7x64xbf16, #tpu.memory_space<vmem>>, vector<1x1x7x64xbf16>
    %6 = vector.shape_cast %5 : vector<1x1x7x64xbf16> to vector<7x64xbf16>
    %c0_8 = arith.constant 0 : index
    %c0_9 = arith.constant 0 : index
    %c0_10 = arith.constant 0 : index
    %c0_11 = arith.constant 0 : index
    %7 = vector.load %arg2[%c0_8, %c0_9, %c0_10, %c0_11] : memref<1x4x7x64xf32, #tpu.memory_space<vmem>>, vector<1x1x7x64xf32>
    %8 = vector.shape_cast %7 : vector<1x1x7x64xf32> to vector<7x64xf32>
    %9 = arith.truncf %8 : vector<7x64xf32> to vector<7x64xbf16>
    %c0_12 = arith.constant 0 : index
    %c0_13 = arith.constant 0 : index
    %10 = vector.load %arg7[%c0_12, %c0_13] : memref<64x768xbf16, #tpu.memory_space<vmem>>, vector<7x64xbf16>
    tpu.vector_store %arg7[%c0_12, %c0_13], %6 {strides = array<i32>} : memref<64x768xbf16, #tpu.memory_space<vmem>>, vector<7x64xbf16>,
    %c0_14 = arith.constant 0 : index
    %c64 = arith.constant 64 : index
    %11 = vector.load %arg7[%c0_14, %c64] : memref<64x768xbf16, #tpu.memory_space<vmem>>, vector<7x64xbf16>
    tpu.vector_store %arg7[%c0_14, %c64], %9 {strides = array<i32>} : memref<64x768xbf16, #tpu.memory_space<vmem>>, vector<7x64xbf16>,
    %c1 = arith.constant 1 : index
    %c128 = arith.constant 128 : index
    %12 = vector.load %arg7[%c1, %c128] : memref<64x768xbf16, #tpu.memory_space<vmem>>, vector<7x64xbf16>
    tpu.vector_store %arg7[%c1, %c128], %6 {strides = array<i32>} : memref<64x768xbf16, #tpu.memory_space<vmem>>, vector<7x64xbf16>,
    %c1_15 = arith.constant 1 : index
    %c192 = arith.constant 192 : index
    %13 = vector.load %arg7[%c1_15, %c192] : memref<64x768xbf16, #tpu.memory_space<vmem>>, vector<7x64xbf16>
    tpu.vector_store %arg7[%c1_15, %c192], %9 {strides = array<i32>} : memref<64x768xbf16, #tpu.memory_space<vmem>>, vector<7x64xbf16>,
    %c2 = arith.constant 2 : index
    %c256 = arith.constant 256 : index
    %14 = vector.load %arg7[%c2, %c256] : memref<64x768xbf16, #tpu.memory_space<vmem>>, vector<7x64xbf16>
    tpu.vector_store %arg7[%c2, %c256], %6 {strides = array<i32>} : memref<64x768xbf16, #tpu.memory_space<vmem>>, vector<7x64xbf16>,
    %c2_16 = arith.constant 2 : index
    %c320 = arith.constant 320 : index
    %15 = vector.load %arg7[%c2_16, %c320] : memref<64x768xbf16, #tpu.memory_space<vmem>>, vector<7x64xbf16>
    tpu.vector_store %arg7[%c2_16, %c320], %9 {strides = array<i32>} : memref<64x768xbf16, #tpu.memory_space<vmem>>, vector<7x64xbf16>,
    %c16_17 = arith.constant 16 : index
    %c384 = arith.constant 384 : index
    %16 = vector.load %arg7[%c16_17, %c384] : memref<64x768xbf16, #tpu.memory_space<vmem>>, vector<7x64xbf16>
    tpu.vector_store %arg7[%c16_17, %c384], %6 {strides = array<i32>} : memref<64x768xbf16, #tpu.memory_space<vmem>>, vector<7x64xbf16>,
    %c16_18 = arith.constant 16 : index
    %c448 = arith.constant 448 : index
    %17 = vector.load %arg7[%c16_18, %c448] : memref<64x768xbf16, #tpu.memory_space<vmem>>, vector<7x64xbf16>
    tpu.vector_store %arg7[%c16_18, %c448], %9 {strides = array<i32>} : memref<64x768xbf16, #tpu.memory_space<vmem>>, vector<7x64xbf16>,
    %c17 = arith.constant 17 : index
    %c512 = arith.constant 512 : index
    %18 = vector.load %arg7[%c17, %c512] : memref<64x768xbf16, #tpu.memory_space<vmem>>, vector<7x64xbf16>
    tpu.vector_store %arg7[%c17, %c512], %6 {strides = array<i32>} : memref<64x768xbf16, #tpu.memory_space<vmem>>, vector<7x64xbf16>,
    %c17_19 = arith.constant 17 : index
    %c576 = arith.constant 576 : index
    %19 = vector.load %arg7[%c17_19, %c576] : memref<64x768xbf16, #tpu.memory_space<vmem>>, vector<7x64xbf16>
    tpu.vector_store %arg7[%c17_19, %c576], %9 {strides = array<i32>} : memref<64x768xbf16, #tpu.memory_space<vmem>>, vector<7x64xbf16>,
    %c18 = arith.constant 18 : index
    %c640 = arith.constant 640 : index
    %20 = vector.load %arg7[%c18, %c640] : memref<64x768xbf16, #tpu.memory_space<vmem>>, vector<7x64xbf16>
    tpu.vector_store %arg7[%c18, %c640], %6 {strides = array<i32>} : memref<64x768xbf16, #tpu.memory_space<vmem>>, vector<7x64xbf16>,
    %c18_20 = arith.constant 18 : index
    %c704 = arith.constant 704 : index
    %21 = vector.load %arg7[%c18_20, %c704] : memref<64x768xbf16, #tpu.memory_space<vmem>>, vector<7x64xbf16>
    tpu.vector_store %arg7[%c18_20, %c704], %9 {strides = array<i32>} : memref<64x768xbf16, #tpu.memory_space<vmem>>, vector<7x64xbf16>,
    %c0_21 = arith.constant 0 : index
    %c1_22 = arith.constant 1 : index
    %c0_23 = arith.constant 0 : index
    %c0_24 = arith.constant 0 : index
    %22 = vector.load %arg1[%c0_21, %c1_22, %c0_23, %c0_24] : memref<1x4x7x64xbf16, #tpu.memory_space<vmem>>, vector<1x1x7x64xbf16>
    %23 = vector.shape_cast %22 : vector<1x1x7x64xbf16> to vector<7x64xbf16>
    %c0_25 = arith.constant 0 : index
    %c1_26 = arith.constant 1 : index
    %c0_27 = arith.constant 0 : index
    %c0_28 = arith.constant 0 : index
    %24 = vector.load %arg2[%c0_25, %c1_26, %c0_27, %c0_28] : memref<1x4x7x64xf32, #tpu.memory_space<vmem>>, vector<1x1x7x64xf32>
    %25 = vector.shape_cast %24 : vector<1x1x7x64xf32> to vector<7x64xf32>
    %26 = arith.truncf %25 : vector<7x64xf32> to vector<7x64xbf16>
    %c16_29 = arith.constant 16 : index
    %c0_30 = arith.constant 0 : index
    %27 = vector.load %arg7[%c16_29, %c0_30] : memref<64x768xbf16, #tpu.memory_space<vmem>>, vector<7x64xbf16>
    tpu.vector_store %arg7[%c16_29, %c0_30], %23 {strides = array<i32>} : memref<64x768xbf16, #tpu.memory_space<vmem>>, vector<7x64xbf16>,
    %c16_31 = arith.constant 16 : index
    %c64_32 = arith.constant 64 : index
    %28 = vector.load %arg7[%c16_31, %c64_32] : memref<64x768xbf16, #tpu.memory_space<vmem>>, vector<7x64xbf16>
    tpu.vector_store %arg7[%c16_31, %c64_32], %26 {strides = array<i32>} : memref<64x768xbf16, #tpu.memory_space<vmem>>, vector<7x64xbf16>,
    %c17_33 = arith.constant 17 : index
    %c128_34 = arith.constant 128 : index
    %29 = vector.load %arg7[%c17_33, %c128_34] : memref<64x768xbf16, #tpu.memory_space<vmem>>, vector<7x64xbf16>
    tpu.vector_store %arg7[%c17_33, %c128_34], %23 {strides = array<i32>} : memref<64x768xbf16, #tpu.memory_space<vmem>>, vector<7x64xbf16>,
    %c17_35 = arith.constant 17 : index
    %c192_36 = arith.constant 192 : index
    %30 = vector.load %arg7[%c17_35, %c192_36] : memref<64x768xbf16, #tpu.memory_space<vmem>>, vector<7x64xbf16>
    tpu.vector_store %arg7[%c17_35, %c192_36], %26 {strides = array<i32>} : memref<64x768xbf16, #tpu.memory_space<vmem>>, vector<7x64xbf16>,
    %c18_37 = arith.constant 18 : index
    %c256_38 = arith.constant 256 : index
    %31 = vector.load %arg7[%c18_37, %c256_38] : memref<64x768xbf16, #tpu.memory_space<vmem>>, vector<7x64xbf16>
    tpu.vector_store %arg7[%c18_37, %c256_38], %23 {strides = array<i32>} : memref<64x768xbf16, #tpu.memory_space<vmem>>, vector<7x64xbf16>,
    %c18_39 = arith.constant 18 : index
    %c320_40 = arith.constant 320 : index
    %32 = vector.load %arg7[%c18_39, %c320_40] : memref<64x768xbf16, #tpu.memory_space<vmem>>, vector<7x64xbf16>
    tpu.vector_store %arg7[%c18_39, %c320_40], %26 {strides = array<i32>} : memref<64x768xbf16, #tpu.memory_space<vmem>>, vector<7x64xbf16>,
    %c32_41 = arith.constant 32 : index
    %c384_42 = arith.constant 384 : index
    %33 = vector.load %arg7[%c32_41, %c384_42] : memref<64x768xbf16, #tpu.memory_space<vmem>>, vector<7x64xbf16>
    tpu.vector_store %arg7[%c32_41, %c384_42], %23 {strides = array<i32>} : memref<64x768xbf16, #tpu.memory_space<vmem>>, vector<7x64xbf16>,
    %c32_43 = arith.constant 32 : index
    %c448_44 = arith.constant 448 : index
    %34 = vector.load %arg7[%c32_43, %c448_44] : memref<64x768xbf16, #tpu.memory_space<vmem>>, vector<7x64xbf16>
    tpu.vector_store %arg7[%c32_43, %c448_44], %26 {strides = array<i32>} : memref<64x768xbf16, #tpu.memory_space<vmem>>, vector<7x64xbf16>,
    %c33 = arith.constant 33 : index
    %c512_45 = arith.constant 512 : index
    %35 = vector.load %arg7[%c33, %c512_45] : memref<64x768xbf16, #tpu.memory_space<vmem>>, vector<7x64xbf16>
    tpu.vector_store %arg7[%c33, %c512_45], %23 {strides = array<i32>} : memref<64x768xbf16, #tpu.memory_space<vmem>>, vector<7x64xbf16>,
    %c33_46 = arith.constant 33 : index
    %c576_47 = arith.constant 576 : index
    %36 = vector.load %arg7[%c33_46, %c576_47] : memref<64x768xbf16, #tpu.memory_space<vmem>>, vector<7x64xbf16>
    tpu.vector_store %arg7[%c33_46, %c576_47], %26 {strides = array<i32>} : memref<64x768xbf16, #tpu.memory_space<vmem>>, vector<7x64xbf16>,
    %c34 = arith.constant 34 : index
    %c640_48 = arith.constant 640 : index
    %37 = vector.load %arg7[%c34, %c640_48] : memref<64x768xbf16, #tpu.memory_space<vmem>>, vector<7x64xbf16>
    tpu.vector_store %arg7[%c34, %c640_48], %23 {strides = array<i32>} : memref<64x768xbf16, #tpu.memory_space<vmem>>, vector<7x64xbf16>,
    %c34_49 = arith.constant 34 : index
    %c704_50 = arith.constant 704 : index
    %38 = vector.load %arg7[%c34_49, %c704_50] : memref<64x768xbf16, #tpu.memory_space<vmem>>, vector<7x64xbf16>
    tpu.vector_store %arg7[%c34_49, %c704_50], %26 {strides = array<i32>} : memref<64x768xbf16, #tpu.memory_space<vmem>>, vector<7x64xbf16>,
    %c0_51 = arith.constant 0 : index
    %c2_52 = arith.constant 2 : index
    %c0_53 = arith.constant 0 : index
    %c0_54 = arith.constant 0 : index
    %39 = vector.load %arg1[%c0_51, %c2_52, %c0_53, %c0_54] : memref<1x4x7x64xbf16, #tpu.memory_space<vmem>>, vector<1x1x7x64xbf16>
    %40 = vector.shape_cast %39 : vector<1x1x7x64xbf16> to vector<7x64xbf16>
    %c0_55 = arith.constant 0 : index
    %c2_56 = arith.constant 2 : index
    %c0_57 = arith.constant 0 : index
    %c0_58 = arith.constant 0 : index
    %41 = vector.load %arg2[%c0_55, %c2_56, %c0_57, %c0_58] : memref<1x4x7x64xf32, #tpu.memory_space<vmem>>, vector<1x1x7x64xf32>
    %42 = vector.shape_cast %41 : vector<1x1x7x64xf32> to vector<7x64xf32>
    %43 = arith.truncf %42 : vector<7x64xf32> to vector<7x64xbf16>
    %c32_59 = arith.constant 32 : index
    %c0_60 = arith.constant 0 : index
    %44 = vector.load %arg7[%c32_59, %c0_60] : memref<64x768xbf16, #tpu.memory_space<vmem>>, vector<7x64xbf16>
    tpu.vector_store %arg7[%c32_59, %c0_60], %40 {strides = array<i32>} : memref<64x768xbf16, #tpu.memory_space<vmem>>, vector<7x64xbf16>,
    %c32_61 = arith.constant 32 : index
    %c64_62 = arith.constant 64 : index
    %45 = vector.load %arg7[%c32_61, %c64_62] : memref<64x768xbf16, #tpu.memory_space<vmem>>, vector<7x64xbf16>
    tpu.vector_store %arg7[%c32_61, %c64_62], %43 {strides = array<i32>} : memref<64x768xbf16, #tpu.memory_space<vmem>>, vector<7x64xbf16>,
    %c33_63 = arith.constant 33 : index
    %c128_64 = arith.constant 128 : index
    %46 = vector.load %arg7[%c33_63, %c128_64] : memref<64x768xbf16, #tpu.memory_space<vmem>>, vector<7x64xbf16>
    tpu.vector_store %arg7[%c33_63, %c128_64], %40 {strides = array<i32>} : memref<64x768xbf16, #tpu.memory_space<vmem>>, vector<7x64xbf16>,
    %c33_65 = arith.constant 33 : index
    %c192_66 = arith.constant 192 : index
    %47 = vector.load %arg7[%c33_65, %c192_66] : memref<64x768xbf16, #tpu.memory_space<vmem>>, vector<7x64xbf16>
    tpu.vector_store %arg7[%c33_65, %c192_66], %43 {strides = array<i32>} : memref<64x768xbf16, #tpu.memory_space<vmem>>, vector<7x64xbf16>,
    %c34_67 = arith.constant 34 : index
    %c256_68 = arith.constant 256 : index
    %48 = vector.load %arg7[%c34_67, %c256_68] : memref<64x768xbf16, #tpu.memory_space<vmem>>, vector<7x64xbf16>
    tpu.vector_store %arg7[%c34_67, %c256_68], %40 {strides = array<i32>} : memref<64x768xbf16, #tpu.memory_space<vmem>>, vector<7x64xbf16>,
    %c34_69 = arith.constant 34 : index
    %c320_70 = arith.constant 320 : index
    %49 = vector.load %arg7[%c34_69, %c320_70] : memref<64x768xbf16, #tpu.memory_space<vmem>>, vector<7x64xbf16>
    tpu.vector_store %arg7[%c34_69, %c320_70], %43 {strides = array<i32>} : memref<64x768xbf16, #tpu.memory_space<vmem>>, vector<7x64xbf16>,
    %c48_71 = arith.constant 48 : index
    %c384_72 = arith.constant 384 : index
    %50 = vector.load %arg7[%c48_71, %c384_72] : memref<64x768xbf16, #tpu.memory_space<vmem>>, vector<7x64xbf16>
    tpu.vector_store %arg7[%c48_71, %c384_72], %40 {strides = array<i32>} : memref<64x768xbf16, #tpu.memory_space<vmem>>, vector<7x64xbf16>,
    %c48_73 = arith.constant 48 : index
    %c448_74 = arith.constant 448 : index
    %51 = vector.load %arg7[%c48_73, %c448_74] : memref<64x768xbf16, #tpu.memory_space<vmem>>, vector<7x64xbf16>
    tpu.vector_store %arg7[%c48_73, %c448_74], %43 {strides = array<i32>} : memref<64x768xbf16, #tpu.memory_space<vmem>>, vector<7x64xbf16>,
    %c49 = arith.constant 49 : index
    %c512_75 = arith.constant 512 : index
    %52 = vector.load %arg7[%c49, %c512_75] : memref<64x768xbf16, #tpu.memory_space<vmem>>, vector<7x64xbf16>
    tpu.vector_store %arg7[%c49, %c512_75], %40 {strides = array<i32>} : memref<64x768xbf16, #tpu.memory_space<vmem>>, vector<7x64xbf16>,
    %c49_76 = arith.constant 49 : index
    %c576_77 = arith.constant 576 : index
    %53 = vector.load %arg7[%c49_76, %c576_77] : memref<64x768xbf16, #tpu.memory_space<vmem>>, vector<7x64xbf16>
    tpu.vector_store %arg7[%c49_76, %c576_77], %43 {strides = array<i32>} : memref<64x768xbf16, #tpu.memory_space<vmem>>, vector<7x64xbf16>,
    %c50 = arith.constant 50 : index
    %c640_78 = arith.constant 640 : index
    %54 = vector.load %arg7[%c50, %c640_78] : memref<64x768xbf16, #tpu.memory_space<vmem>>, vector<7x64xbf16>
    tpu.vector_store %arg7[%c50, %c640_78], %40 {strides = array<i32>} : memref<64x768xbf16, #tpu.memory_space<vmem>>, vector<7x64xbf16>,
    %c50_79 = arith.constant 50 : index
    %c704_80 = arith.constant 704 : index
    %55 = vector.load %arg7[%c50_79, %c704_80] : memref<64x768xbf16, #tpu.memory_space<vmem>>, vector<7x64xbf16>
    tpu.vector_store %arg7[%c50_79, %c704_80], %43 {strides = array<i32>} : memref<64x768xbf16, #tpu.memory_space<vmem>>, vector<7x64xbf16>,
    %c0_81 = arith.constant 0 : index
    %c3 = arith.constant 3 : index
    %c0_82 = arith.constant 0 : index
    %c0_83 = arith.constant 0 : index
    %56 = vector.load %arg1[%c0_81, %c3, %c0_82, %c0_83] : memref<1x4x7x64xbf16, #tpu.memory_space<vmem>>, vector<1x1x7x64xbf16>
    %57 = vector.shape_cast %56 : vector<1x1x7x64xbf16> to vector<7x64xbf16>
    %c0_84 = arith.constant 0 : index
    %c3_85 = arith.constant 3 : index
    %c0_86 = arith.constant 0 : index
    %c0_87 = arith.constant 0 : index
    %58 = vector.load %arg2[%c0_84, %c3_85, %c0_86, %c0_87] : memref<1x4x7x64xf32, #tpu.memory_space<vmem>>, vector<1x1x7x64xf32>
    %59 = vector.shape_cast %58 : vector<1x1x7x64xf32> to vector<7x64xf32>
    %60 = arith.truncf %59 : vector<7x64xf32> to vector<7x64xbf16>
    %c48_88 = arith.constant 48 : index
    %c0_89 = arith.constant 0 : index
    %61 = vector.load %arg7[%c48_88, %c0_89] : memref<64x768xbf16, #tpu.memory_space<vmem>>, vector<7x64xbf16>
    tpu.vector_store %arg7[%c48_88, %c0_89], %57 {strides = array<i32>} : memref<64x768xbf16, #tpu.memory_space<vmem>>, vector<7x64xbf16>,
    %c48_90 = arith.constant 48 : index
    %c64_91 = arith.constant 64 : index
    %62 = vector.load %arg7[%c48_90, %c64_91] : memref<64x768xbf16, #tpu.memory_space<vmem>>, vector<7x64xbf16>
    tpu.vector_store %arg7[%c48_90, %c64_91], %60 {strides = array<i32>} : memref<64x768xbf16, #tpu.memory_space<vmem>>, vector<7x64xbf16>,
    %c49_92 = arith.constant 49 : index
    %c128_93 = arith.constant 128 : index
    %63 = vector.load %arg7[%c49_92, %c128_93] : memref<64x768xbf16, #tpu.memory_space<vmem>>, vector<7x64xbf16>
    tpu.vector_store %arg7[%c49_92, %c128_93], %57 {strides = array<i32>} : memref<64x768xbf16, #tpu.memory_space<vmem>>, vector<7x64xbf16>,
    %c49_94 = arith.constant 49 : index
    %c192_95 = arith.constant 192 : index
    %64 = vector.load %arg7[%c49_94, %c192_95] : memref<64x768xbf16, #tpu.memory_space<vmem>>, vector<7x64xbf16>
    tpu.vector_store %arg7[%c49_94, %c192_95], %60 {strides = array<i32>} : memref<64x768xbf16, #tpu.memory_space<vmem>>, vector<7x64xbf16>,
    %c50_96 = arith.constant 50 : index
    %c256_97 = arith.constant 256 : index
    %65 = vector.load %arg7[%c50_96, %c256_97] : memref<64x768xbf16, #tpu.memory_space<vmem>>, vector<7x64xbf16>
    tpu.vector_store %arg7[%c50_96, %c256_97], %57 {strides = array<i32>} : memref<64x768xbf16, #tpu.memory_space<vmem>>, vector<7x64xbf16>,
    %c50_98 = arith.constant 50 : index
    %c320_99 = arith.constant 320 : index
    %66 = vector.load %arg7[%c50_98, %c320_99] : memref<64x768xbf16, #tpu.memory_space<vmem>>, vector<7x64xbf16>
    tpu.vector_store %arg7[%c50_98, %c320_99], %60 {strides = array<i32>} : memref<64x768xbf16, #tpu.memory_space<vmem>>, vector<7x64xbf16>,
    %c0_100 = arith.constant 0 : index
    %c0_101 = arith.constant 0 : index
    %67 = vector.load %arg7[%c0_100, %c0_101] : memref<64x768xbf16, #tpu.memory_space<vmem>>, vector<64x768xbf16>
    %c0_102 = arith.constant 0 : index
    %c0_103 = arith.constant 0 : index
    %68 = vector.load %arg3[%c0_102, %c0_103] : memref<768x64xbf16, #tpu.memory_space<vmem>>, vector<768x64xbf16>
    %cst_104 = arith.constant dense<0.000000e+00> : vector<64x64xf32>
    %69 = tpu.matmul %67, %68, %cst_104 {dimension_numbers = #tpu.dot_dimension_numbers<[1], [0], [0], [1], [0, 0, 1, 1], [], []>} : vector<64x768xbf16>, vector<768x64xbf16>, vector<64x64xf32> -> vector<64x64xf32>
    %c0_105 = arith.constant 0 : index
    %c0_106 = arith.constant 0 : index
    %70 = vector.load %arg4[%c0_105, %c0_106] : memref<1x64xf32, #tpu.memory_space<vmem>>, vector<1x64xf32>
    %71 = vector.broadcast %70 : vector<1x64xf32> to vector<64x64xf32>
    %72 = arith.mulf %69, %71 : vector<64x64xf32>
    %c0_107 = arith.constant 0 : index
    %c0_108 = arith.constant 0 : index
    %73 = vector.load %arg5[%c0_107, %c0_108] : memref<1x64xf32, #tpu.memory_space<vmem>>, vector<1x64xf32>
    %74 = vector.broadcast %73 : vector<1x64xf32> to vector<64x64xf32>
    %75 = arith.addf %72, %74 : vector<64x64xf32>
    %cst_109 = arith.constant 0.000000e+00 : f32
    %76 = vector.broadcast %cst_109 : f32 to vector<64x64xf32>
    %77 = arith.cmpf ogt, %75, %76 : vector<64x64xf32>
    %78 = math.exp %75 : vector<64x64xf32>
    %cst_110 = arith.constant 1.000000e+00 : f32
    %79 = vector.broadcast %cst_110 : f32 to vector<64x64xf32>
    %80 = arith.subf %78, %79 : vector<64x64xf32>
    %81 = arith.select %77, %75, %80 : vector<64x64xi1>, vector<64x64xf32>
    %82 = arith.truncf %81 : vector<64x64xf32> to vector<64x64xbf16>
    %c0_111 = arith.constant 0 : index
    %c0_112 = arith.constant 0 : index
    %c0_113 = arith.constant 0 : index
    %83 = vector.load %arg6[%c0_111, %c0_112, %c0_113] : memref<1x64x64xbf16, #tpu.memory_space<vmem>>, vector<1x64x64xbf16>
    %84 = vector.shape_cast %83 : vector<1x64x64xbf16> to vector<64x64xbf16>
    %85 = vector.shape_cast %82 : vector<64x64xbf16> to vector<1x64x64xbf16>
    tpu.vector_store %arg6[%c0_111, %c0_112, %c0_113], %85 {strides = array<i32>} : memref<1x64x64xbf16, #tpu.memory_space<vmem>>, vector<1x64x64xbf16>,
    return
  }
  func.func @transform_0(%arg0: i32) -> (i32, i32, i32, i32) {
    %c0_i32 = arith.constant 0 : i32
    %c0_i32_0 = arith.constant 0 : i32
    %c0_i32_1 = arith.constant 0 : i32
    %c0_i32_2 = arith.constant 0 : i32
    return %arg0, %c0_i32, %c0_i32_0, %c0_i32_1 : i32, i32, i32, i32
  }
  func.func @transform_1(%arg0: i32) -> (i32, i32, i32, i32) {
    %c0_i32 = arith.constant 0 : i32
    %c0_i32_0 = arith.constant 0 : i32
    %c0_i32_1 = arith.constant 0 : i32
    %c0_i32_2 = arith.constant 0 : i32
    return %arg0, %c0_i32, %c0_i32_0, %c0_i32_1 : i32, i32, i32, i32
  }
  func.func @transform_2(%arg0: i32) -> (i32, i32) {
    %c0_i32 = arith.constant 0 : i32
    %c0_i32_0 = arith.constant 0 : i32
    %c0_i32_1 = arith.constant 0 : i32
    return %c0_i32, %c0_i32_0 : i32, i32
  }
  func.func @transform_3(%arg0: i32) -> (i32, i32) {
    %c0_i32 = arith.constant 0 : i32
    %c0_i32_0 = arith.constant 0 : i32
    %c0_i32_1 = arith.constant 0 : i32
    return %c0_i32, %c0_i32_0 : i32, i32
  }
  func.func @transform_4(%arg0: i32) -> (i32, i32) {
    %c0_i32 = arith.constant 0 : i32
    %c0_i32_0 = arith.constant 0 : i32
    %c0_i32_1 = arith.constant 0 : i32
    return %c0_i32, %c0_i32_0 : i32, i32
  }
  func.func @transform_5(%arg0: i32) -> (i32, i32, i32) {
    %c0_i32 = arith.constant 0 : i32
    %c0_i32_0 = arith.constant 0 : i32
    %c0_i32_1 = arith.constant 0 : i32
    return %arg0, %c0_i32, %c0_i32_0 : i32, i32, i32
  }
}

module attributes {stable_mosaic.version = 11 : i64} {
  func.func @kernel(%arg0: i32, %arg1: memref<1x4x15x32xbf16, #tpu.memory_space<vmem>>, %arg2: memref<1x4x15x32xf32, #tpu.memory_space<vmem>>, %arg3: memref<384x64xbf16, #tpu.memory_space<vmem>>, %arg4: memref<1x64xf32, #tpu.memory_space<vmem>>, %arg5: memref<1x64xf32, #tpu.memory_space<vmem>>, %arg6: memref<1x128x64xbf16, #tpu.memory_space<vmem>>, %arg7: memref<128x384xbf16, #tpu.memory_space<vmem>>) attributes {dimension_semantics = [#tpu.dimension_semantics<parallel>], iteration_bounds = array<i64: 2>, scalar_prefetch = 0 : i64, scratch_operands = 1 : i64, tpu.core_type = #tpu.core_type<tc>, window_params = [{transform_indices = @transform_0, window_bounds = array<i64: 1, 4, 15, 32>}, {transform_indices = @transform_1, window_bounds = array<i64: 1, 4, 15, 32>}, {pipeline_mode = #tpu.pipeline_mode<synchronous>, transform_indices = @transform_2, window_bounds = array<i64: 384, 64>}, {pipeline_mode = #tpu.pipeline_mode<synchronous>, transform_indices = @transform_3, window_bounds = array<i64: 1, 64>}, {pipeline_mode = #tpu.pipeline_mode<synchronous>, transform_indices = @transform_4, window_bounds = array<i64: 1, 64>}, {transform_indices = @transform_5, window_bounds = array<i64: 1, 128, 64>}]} {
    %cst = arith.constant 0.000000e+00 : bf16
    %0 = vector.broadcast %cst : bf16 to vector<17x384xbf16>
    %c0 = arith.constant 0 : index
    %c0_0 = arith.constant 0 : index
    %1 = vector.load %arg7[%c0, %c0_0] : memref<128x384xbf16, #tpu.memory_space<vmem>>, vector<17x384xbf16>
    tpu.vector_store %arg7[%c0, %c0_0], %0 {strides = array<i32>} : memref<128x384xbf16, #tpu.memory_space<vmem>>, vector<17x384xbf16>,
    %c32 = arith.constant 32 : index
    %c0_1 = arith.constant 0 : index
    %2 = vector.load %arg7[%c32, %c0_1] : memref<128x384xbf16, #tpu.memory_space<vmem>>, vector<17x384xbf16>
    tpu.vector_store %arg7[%c32, %c0_1], %0 {strides = array<i32>} : memref<128x384xbf16, #tpu.memory_space<vmem>>, vector<17x384xbf16>,
    %c64 = arith.constant 64 : index
    %c0_2 = arith.constant 0 : index
    %3 = vector.load %arg7[%c64, %c0_2] : memref<128x384xbf16, #tpu.memory_space<vmem>>, vector<17x384xbf16>
    tpu.vector_store %arg7[%c64, %c0_2], %0 {strides = array<i32>} : memref<128x384xbf16, #tpu.memory_space<vmem>>, vector<17x384xbf16>,
    %c96 = arith.constant 96 : index
    %c0_3 = arith.constant 0 : index
    %4 = vector.load %arg7[%c96, %c0_3] : memref<128x384xbf16, #tpu.memory_space<vmem>>, vector<17x384xbf16>
    tpu.vector_store %arg7[%c96, %c0_3], %0 {strides = array<i32>} : memref<128x384xbf16, #tpu.memory_space<vmem>>, vector<17x384xbf16>,
    %c0_4 = arith.constant 0 : index
    %c0_5 = arith.constant 0 : index
    %c0_6 = arith.constant 0 : index
    %c0_7 = arith.constant 0 : index
    %5 = vector.load %arg1[%c0_4, %c0_5, %c0_6, %c0_7] : memref<1x4x15x32xbf16, #tpu.memory_space<vmem>>, vector<1x1x15x32xbf16>
    %6 = vector.shape_cast %5 : vector<1x1x15x32xbf16> to vector<15x32xbf16>
    %c0_8 = arith.constant 0 : index
    %c0_9 = arith.constant 0 : index
    %c0_10 = arith.constant 0 : index
    %c0_11 = arith.constant 0 : index
    %7 = vector.load %arg2[%c0_8, %c0_9, %c0_10, %c0_11] : memref<1x4x15x32xf32, #tpu.memory_space<vmem>>, vector<1x1x15x32xf32>
    %8 = vector.shape_cast %7 : vector<1x1x15x32xf32> to vector<15x32xf32>
    %9 = arith.truncf %8 : vector<15x32xf32> to vector<15x32xbf16>
    %c0_12 = arith.constant 0 : index
    %c0_13 = arith.constant 0 : index
    %10 = vector.load %arg7[%c0_12, %c0_13] : memref<128x384xbf16, #tpu.memory_space<vmem>>, vector<15x32xbf16>
    tpu.vector_store %arg7[%c0_12, %c0_13], %6 {strides = array<i32>} : memref<128x384xbf16, #tpu.memory_space<vmem>>, vector<15x32xbf16>,
    %c0_14 = arith.constant 0 : index
    %c32_15 = arith.constant 32 : index
    %11 = vector.load %arg7[%c0_14, %c32_15] : memref<128x384xbf16, #tpu.memory_space<vmem>>, vector<15x32xbf16>
    tpu.vector_store %arg7[%c0_14, %c32_15], %9 {strides = array<i32>} : memref<128x384xbf16, #tpu.memory_space<vmem>>, vector<15x32xbf16>,
    %c1 = arith.constant 1 : index
    %c64_16 = arith.constant 64 : index
    %12 = vector.load %arg7[%c1, %c64_16] : memref<128x384xbf16, #tpu.memory_space<vmem>>, vector<15x32xbf16>
    tpu.vector_store %arg7[%c1, %c64_16], %6 {strides = array<i32>} : memref<128x384xbf16, #tpu.memory_space<vmem>>, vector<15x32xbf16>,
    %c1_17 = arith.constant 1 : index
    %c96_18 = arith.constant 96 : index
    %13 = vector.load %arg7[%c1_17, %c96_18] : memref<128x384xbf16, #tpu.memory_space<vmem>>, vector<15x32xbf16>
    tpu.vector_store %arg7[%c1_17, %c96_18], %9 {strides = array<i32>} : memref<128x384xbf16, #tpu.memory_space<vmem>>, vector<15x32xbf16>,
    %c2 = arith.constant 2 : index
    %c128 = arith.constant 128 : index
    %14 = vector.load %arg7[%c2, %c128] : memref<128x384xbf16, #tpu.memory_space<vmem>>, vector<15x32xbf16>
    tpu.vector_store %arg7[%c2, %c128], %6 {strides = array<i32>} : memref<128x384xbf16, #tpu.memory_space<vmem>>, vector<15x32xbf16>,
    %c2_19 = arith.constant 2 : index
    %c160 = arith.constant 160 : index
    %15 = vector.load %arg7[%c2_19, %c160] : memref<128x384xbf16, #tpu.memory_space<vmem>>, vector<15x32xbf16>
    tpu.vector_store %arg7[%c2_19, %c160], %9 {strides = array<i32>} : memref<128x384xbf16, #tpu.memory_space<vmem>>, vector<15x32xbf16>,
    %c32_20 = arith.constant 32 : index
    %c192 = arith.constant 192 : index
    %16 = vector.load %arg7[%c32_20, %c192] : memref<128x384xbf16, #tpu.memory_space<vmem>>, vector<15x32xbf16>
    tpu.vector_store %arg7[%c32_20, %c192], %6 {strides = array<i32>} : memref<128x384xbf16, #tpu.memory_space<vmem>>, vector<15x32xbf16>,
    %c32_21 = arith.constant 32 : index
    %c224 = arith.constant 224 : index
    %17 = vector.load %arg7[%c32_21, %c224] : memref<128x384xbf16, #tpu.memory_space<vmem>>, vector<15x32xbf16>
    tpu.vector_store %arg7[%c32_21, %c224], %9 {strides = array<i32>} : memref<128x384xbf16, #tpu.memory_space<vmem>>, vector<15x32xbf16>,
    %c33 = arith.constant 33 : index
    %c256 = arith.constant 256 : index
    %18 = vector.load %arg7[%c33, %c256] : memref<128x384xbf16, #tpu.memory_space<vmem>>, vector<15x32xbf16>
    tpu.vector_store %arg7[%c33, %c256], %6 {strides = array<i32>} : memref<128x384xbf16, #tpu.memory_space<vmem>>, vector<15x32xbf16>,
    %c33_22 = arith.constant 33 : index
    %c288 = arith.constant 288 : index
    %19 = vector.load %arg7[%c33_22, %c288] : memref<128x384xbf16, #tpu.memory_space<vmem>>, vector<15x32xbf16>
    tpu.vector_store %arg7[%c33_22, %c288], %9 {strides = array<i32>} : memref<128x384xbf16, #tpu.memory_space<vmem>>, vector<15x32xbf16>,
    %c34 = arith.constant 34 : index
    %c320 = arith.constant 320 : index
    %20 = vector.load %arg7[%c34, %c320] : memref<128x384xbf16, #tpu.memory_space<vmem>>, vector<15x32xbf16>
    tpu.vector_store %arg7[%c34, %c320], %6 {strides = array<i32>} : memref<128x384xbf16, #tpu.memory_space<vmem>>, vector<15x32xbf16>,
    %c34_23 = arith.constant 34 : index
    %c352 = arith.constant 352 : index
    %21 = vector.load %arg7[%c34_23, %c352] : memref<128x384xbf16, #tpu.memory_space<vmem>>, vector<15x32xbf16>
    tpu.vector_store %arg7[%c34_23, %c352], %9 {strides = array<i32>} : memref<128x384xbf16, #tpu.memory_space<vmem>>, vector<15x32xbf16>,
    %c0_24 = arith.constant 0 : index
    %c1_25 = arith.constant 1 : index
    %c0_26 = arith.constant 0 : index
    %c0_27 = arith.constant 0 : index
    %22 = vector.load %arg1[%c0_24, %c1_25, %c0_26, %c0_27] : memref<1x4x15x32xbf16, #tpu.memory_space<vmem>>, vector<1x1x15x32xbf16>
    %23 = vector.shape_cast %22 : vector<1x1x15x32xbf16> to vector<15x32xbf16>
    %c0_28 = arith.constant 0 : index
    %c1_29 = arith.constant 1 : index
    %c0_30 = arith.constant 0 : index
    %c0_31 = arith.constant 0 : index
    %24 = vector.load %arg2[%c0_28, %c1_29, %c0_30, %c0_31] : memref<1x4x15x32xf32, #tpu.memory_space<vmem>>, vector<1x1x15x32xf32>
    %25 = vector.shape_cast %24 : vector<1x1x15x32xf32> to vector<15x32xf32>
    %26 = arith.truncf %25 : vector<15x32xf32> to vector<15x32xbf16>
    %c32_32 = arith.constant 32 : index
    %c0_33 = arith.constant 0 : index
    %27 = vector.load %arg7[%c32_32, %c0_33] : memref<128x384xbf16, #tpu.memory_space<vmem>>, vector<15x32xbf16>
    tpu.vector_store %arg7[%c32_32, %c0_33], %23 {strides = array<i32>} : memref<128x384xbf16, #tpu.memory_space<vmem>>, vector<15x32xbf16>,
    %c32_34 = arith.constant 32 : index
    %c32_35 = arith.constant 32 : index
    %28 = vector.load %arg7[%c32_34, %c32_35] : memref<128x384xbf16, #tpu.memory_space<vmem>>, vector<15x32xbf16>
    tpu.vector_store %arg7[%c32_34, %c32_35], %26 {strides = array<i32>} : memref<128x384xbf16, #tpu.memory_space<vmem>>, vector<15x32xbf16>,
    %c33_36 = arith.constant 33 : index
    %c64_37 = arith.constant 64 : index
    %29 = vector.load %arg7[%c33_36, %c64_37] : memref<128x384xbf16, #tpu.memory_space<vmem>>, vector<15x32xbf16>
    tpu.vector_store %arg7[%c33_36, %c64_37], %23 {strides = array<i32>} : memref<128x384xbf16, #tpu.memory_space<vmem>>, vector<15x32xbf16>,
    %c33_38 = arith.constant 33 : index
    %c96_39 = arith.constant 96 : index
    %30 = vector.load %arg7[%c33_38, %c96_39] : memref<128x384xbf16, #tpu.memory_space<vmem>>, vector<15x32xbf16>
    tpu.vector_store %arg7[%c33_38, %c96_39], %26 {strides = array<i32>} : memref<128x384xbf16, #tpu.memory_space<vmem>>, vector<15x32xbf16>,
    %c34_40 = arith.constant 34 : index
    %c128_41 = arith.constant 128 : index
    %31 = vector.load %arg7[%c34_40, %c128_41] : memref<128x384xbf16, #tpu.memory_space<vmem>>, vector<15x32xbf16>
    tpu.vector_store %arg7[%c34_40, %c128_41], %23 {strides = array<i32>} : memref<128x384xbf16, #tpu.memory_space<vmem>>, vector<15x32xbf16>,
    %c34_42 = arith.constant 34 : index
    %c160_43 = arith.constant 160 : index
    %32 = vector.load %arg7[%c34_42, %c160_43] : memref<128x384xbf16, #tpu.memory_space<vmem>>, vector<15x32xbf16>
    tpu.vector_store %arg7[%c34_42, %c160_43], %26 {strides = array<i32>} : memref<128x384xbf16, #tpu.memory_space<vmem>>, vector<15x32xbf16>,
    %c64_44 = arith.constant 64 : index
    %c192_45 = arith.constant 192 : index
    %33 = vector.load %arg7[%c64_44, %c192_45] : memref<128x384xbf16, #tpu.memory_space<vmem>>, vector<15x32xbf16>
    tpu.vector_store %arg7[%c64_44, %c192_45], %23 {strides = array<i32>} : memref<128x384xbf16, #tpu.memory_space<vmem>>, vector<15x32xbf16>,
    %c64_46 = arith.constant 64 : index
    %c224_47 = arith.constant 224 : index
    %34 = vector.load %arg7[%c64_46, %c224_47] : memref<128x384xbf16, #tpu.memory_space<vmem>>, vector<15x32xbf16>
    tpu.vector_store %arg7[%c64_46, %c224_47], %26 {strides = array<i32>} : memref<128x384xbf16, #tpu.memory_space<vmem>>, vector<15x32xbf16>,
    %c65 = arith.constant 65 : index
    %c256_48 = arith.constant 256 : index
    %35 = vector.load %arg7[%c65, %c256_48] : memref<128x384xbf16, #tpu.memory_space<vmem>>, vector<15x32xbf16>
    tpu.vector_store %arg7[%c65, %c256_48], %23 {strides = array<i32>} : memref<128x384xbf16, #tpu.memory_space<vmem>>, vector<15x32xbf16>,
    %c65_49 = arith.constant 65 : index
    %c288_50 = arith.constant 288 : index
    %36 = vector.load %arg7[%c65_49, %c288_50] : memref<128x384xbf16, #tpu.memory_space<vmem>>, vector<15x32xbf16>
    tpu.vector_store %arg7[%c65_49, %c288_50], %26 {strides = array<i32>} : memref<128x384xbf16, #tpu.memory_space<vmem>>, vector<15x32xbf16>,
    %c66 = arith.constant 66 : index
    %c320_51 = arith.constant 320 : index
    %37 = vector.load %arg7[%c66, %c320_51] : memref<128x384xbf16, #tpu.memory_space<vmem>>, vector<15x32xbf16>
    tpu.vector_store %arg7[%c66, %c320_51], %23 {strides = array<i32>} : memref<128x384xbf16, #tpu.memory_space<vmem>>, vector<15x32xbf16>,
    %c66_52 = arith.constant 66 : index
    %c352_53 = arith.constant 352 : index
    %38 = vector.load %arg7[%c66_52, %c352_53] : memref<128x384xbf16, #tpu.memory_space<vmem>>, vector<15x32xbf16>
    tpu.vector_store %arg7[%c66_52, %c352_53], %26 {strides = array<i32>} : memref<128x384xbf16, #tpu.memory_space<vmem>>, vector<15x32xbf16>,
    %c0_54 = arith.constant 0 : index
    %c2_55 = arith.constant 2 : index
    %c0_56 = arith.constant 0 : index
    %c0_57 = arith.constant 0 : index
    %39 = vector.load %arg1[%c0_54, %c2_55, %c0_56, %c0_57] : memref<1x4x15x32xbf16, #tpu.memory_space<vmem>>, vector<1x1x15x32xbf16>
    %40 = vector.shape_cast %39 : vector<1x1x15x32xbf16> to vector<15x32xbf16>
    %c0_58 = arith.constant 0 : index
    %c2_59 = arith.constant 2 : index
    %c0_60 = arith.constant 0 : index
    %c0_61 = arith.constant 0 : index
    %41 = vector.load %arg2[%c0_58, %c2_59, %c0_60, %c0_61] : memref<1x4x15x32xf32, #tpu.memory_space<vmem>>, vector<1x1x15x32xf32>
    %42 = vector.shape_cast %41 : vector<1x1x15x32xf32> to vector<15x32xf32>
    %43 = arith.truncf %42 : vector<15x32xf32> to vector<15x32xbf16>
    %c64_62 = arith.constant 64 : index
    %c0_63 = arith.constant 0 : index
    %44 = vector.load %arg7[%c64_62, %c0_63] : memref<128x384xbf16, #tpu.memory_space<vmem>>, vector<15x32xbf16>
    tpu.vector_store %arg7[%c64_62, %c0_63], %40 {strides = array<i32>} : memref<128x384xbf16, #tpu.memory_space<vmem>>, vector<15x32xbf16>,
    %c64_64 = arith.constant 64 : index
    %c32_65 = arith.constant 32 : index
    %45 = vector.load %arg7[%c64_64, %c32_65] : memref<128x384xbf16, #tpu.memory_space<vmem>>, vector<15x32xbf16>
    tpu.vector_store %arg7[%c64_64, %c32_65], %43 {strides = array<i32>} : memref<128x384xbf16, #tpu.memory_space<vmem>>, vector<15x32xbf16>,
    %c65_66 = arith.constant 65 : index
    %c64_67 = arith.constant 64 : index
    %46 = vector.load %arg7[%c65_66, %c64_67] : memref<128x384xbf16, #tpu.memory_space<vmem>>, vector<15x32xbf16>
    tpu.vector_store %arg7[%c65_66, %c64_67], %40 {strides = array<i32>} : memref<128x384xbf16, #tpu.memory_space<vmem>>, vector<15x32xbf16>,
    %c65_68 = arith.constant 65 : index
    %c96_69 = arith.constant 96 : index
    %47 = vector.load %arg7[%c65_68, %c96_69] : memref<128x384xbf16, #tpu.memory_space<vmem>>, vector<15x32xbf16>
    tpu.vector_store %arg7[%c65_68, %c96_69], %43 {strides = array<i32>} : memref<128x384xbf16, #tpu.memory_space<vmem>>, vector<15x32xbf16>,
    %c66_70 = arith.constant 66 : index
    %c128_71 = arith.constant 128 : index
    %48 = vector.load %arg7[%c66_70, %c128_71] : memref<128x384xbf16, #tpu.memory_space<vmem>>, vector<15x32xbf16>
    tpu.vector_store %arg7[%c66_70, %c128_71], %40 {strides = array<i32>} : memref<128x384xbf16, #tpu.memory_space<vmem>>, vector<15x32xbf16>,
    %c66_72 = arith.constant 66 : index
    %c160_73 = arith.constant 160 : index
    %49 = vector.load %arg7[%c66_72, %c160_73] : memref<128x384xbf16, #tpu.memory_space<vmem>>, vector<15x32xbf16>
    tpu.vector_store %arg7[%c66_72, %c160_73], %43 {strides = array<i32>} : memref<128x384xbf16, #tpu.memory_space<vmem>>, vector<15x32xbf16>,
    %c96_74 = arith.constant 96 : index
    %c192_75 = arith.constant 192 : index
    %50 = vector.load %arg7[%c96_74, %c192_75] : memref<128x384xbf16, #tpu.memory_space<vmem>>, vector<15x32xbf16>
    tpu.vector_store %arg7[%c96_74, %c192_75], %40 {strides = array<i32>} : memref<128x384xbf16, #tpu.memory_space<vmem>>, vector<15x32xbf16>,
    %c96_76 = arith.constant 96 : index
    %c224_77 = arith.constant 224 : index
    %51 = vector.load %arg7[%c96_76, %c224_77] : memref<128x384xbf16, #tpu.memory_space<vmem>>, vector<15x32xbf16>
    tpu.vector_store %arg7[%c96_76, %c224_77], %43 {strides = array<i32>} : memref<128x384xbf16, #tpu.memory_space<vmem>>, vector<15x32xbf16>,
    %c97 = arith.constant 97 : index
    %c256_78 = arith.constant 256 : index
    %52 = vector.load %arg7[%c97, %c256_78] : memref<128x384xbf16, #tpu.memory_space<vmem>>, vector<15x32xbf16>
    tpu.vector_store %arg7[%c97, %c256_78], %40 {strides = array<i32>} : memref<128x384xbf16, #tpu.memory_space<vmem>>, vector<15x32xbf16>,
    %c97_79 = arith.constant 97 : index
    %c288_80 = arith.constant 288 : index
    %53 = vector.load %arg7[%c97_79, %c288_80] : memref<128x384xbf16, #tpu.memory_space<vmem>>, vector<15x32xbf16>
    tpu.vector_store %arg7[%c97_79, %c288_80], %43 {strides = array<i32>} : memref<128x384xbf16, #tpu.memory_space<vmem>>, vector<15x32xbf16>,
    %c98 = arith.constant 98 : index
    %c320_81 = arith.constant 320 : index
    %54 = vector.load %arg7[%c98, %c320_81] : memref<128x384xbf16, #tpu.memory_space<vmem>>, vector<15x32xbf16>
    tpu.vector_store %arg7[%c98, %c320_81], %40 {strides = array<i32>} : memref<128x384xbf16, #tpu.memory_space<vmem>>, vector<15x32xbf16>,
    %c98_82 = arith.constant 98 : index
    %c352_83 = arith.constant 352 : index
    %55 = vector.load %arg7[%c98_82, %c352_83] : memref<128x384xbf16, #tpu.memory_space<vmem>>, vector<15x32xbf16>
    tpu.vector_store %arg7[%c98_82, %c352_83], %43 {strides = array<i32>} : memref<128x384xbf16, #tpu.memory_space<vmem>>, vector<15x32xbf16>,
    %c0_84 = arith.constant 0 : index
    %c3 = arith.constant 3 : index
    %c0_85 = arith.constant 0 : index
    %c0_86 = arith.constant 0 : index
    %56 = vector.load %arg1[%c0_84, %c3, %c0_85, %c0_86] : memref<1x4x15x32xbf16, #tpu.memory_space<vmem>>, vector<1x1x15x32xbf16>
    %57 = vector.shape_cast %56 : vector<1x1x15x32xbf16> to vector<15x32xbf16>
    %c0_87 = arith.constant 0 : index
    %c3_88 = arith.constant 3 : index
    %c0_89 = arith.constant 0 : index
    %c0_90 = arith.constant 0 : index
    %58 = vector.load %arg2[%c0_87, %c3_88, %c0_89, %c0_90] : memref<1x4x15x32xf32, #tpu.memory_space<vmem>>, vector<1x1x15x32xf32>
    %59 = vector.shape_cast %58 : vector<1x1x15x32xf32> to vector<15x32xf32>
    %60 = arith.truncf %59 : vector<15x32xf32> to vector<15x32xbf16>
    %c96_91 = arith.constant 96 : index
    %c0_92 = arith.constant 0 : index
    %61 = vector.load %arg7[%c96_91, %c0_92] : memref<128x384xbf16, #tpu.memory_space<vmem>>, vector<15x32xbf16>
    tpu.vector_store %arg7[%c96_91, %c0_92], %57 {strides = array<i32>} : memref<128x384xbf16, #tpu.memory_space<vmem>>, vector<15x32xbf16>,
    %c96_93 = arith.constant 96 : index
    %c32_94 = arith.constant 32 : index
    %62 = vector.load %arg7[%c96_93, %c32_94] : memref<128x384xbf16, #tpu.memory_space<vmem>>, vector<15x32xbf16>
    tpu.vector_store %arg7[%c96_93, %c32_94], %60 {strides = array<i32>} : memref<128x384xbf16, #tpu.memory_space<vmem>>, vector<15x32xbf16>,
    %c97_95 = arith.constant 97 : index
    %c64_96 = arith.constant 64 : index
    %63 = vector.load %arg7[%c97_95, %c64_96] : memref<128x384xbf16, #tpu.memory_space<vmem>>, vector<15x32xbf16>
    tpu.vector_store %arg7[%c97_95, %c64_96], %57 {strides = array<i32>} : memref<128x384xbf16, #tpu.memory_space<vmem>>, vector<15x32xbf16>,
    %c97_97 = arith.constant 97 : index
    %c96_98 = arith.constant 96 : index
    %64 = vector.load %arg7[%c97_97, %c96_98] : memref<128x384xbf16, #tpu.memory_space<vmem>>, vector<15x32xbf16>
    tpu.vector_store %arg7[%c97_97, %c96_98], %60 {strides = array<i32>} : memref<128x384xbf16, #tpu.memory_space<vmem>>, vector<15x32xbf16>,
    %c98_99 = arith.constant 98 : index
    %c128_100 = arith.constant 128 : index
    %65 = vector.load %arg7[%c98_99, %c128_100] : memref<128x384xbf16, #tpu.memory_space<vmem>>, vector<15x32xbf16>
    tpu.vector_store %arg7[%c98_99, %c128_100], %57 {strides = array<i32>} : memref<128x384xbf16, #tpu.memory_space<vmem>>, vector<15x32xbf16>,
    %c98_101 = arith.constant 98 : index
    %c160_102 = arith.constant 160 : index
    %66 = vector.load %arg7[%c98_101, %c160_102] : memref<128x384xbf16, #tpu.memory_space<vmem>>, vector<15x32xbf16>
    tpu.vector_store %arg7[%c98_101, %c160_102], %60 {strides = array<i32>} : memref<128x384xbf16, #tpu.memory_space<vmem>>, vector<15x32xbf16>,
    %c0_103 = arith.constant 0 : index
    %c0_104 = arith.constant 0 : index
    %67 = vector.load %arg7[%c0_103, %c0_104] : memref<128x384xbf16, #tpu.memory_space<vmem>>, vector<128x384xbf16>
    %c0_105 = arith.constant 0 : index
    %c0_106 = arith.constant 0 : index
    %68 = vector.load %arg3[%c0_105, %c0_106] : memref<384x64xbf16, #tpu.memory_space<vmem>>, vector<384x64xbf16>
    %cst_107 = arith.constant dense<0.000000e+00> : vector<128x64xf32>
    %69 = tpu.matmul %67, %68, %cst_107 {dimension_numbers = #tpu.dot_dimension_numbers<[1], [0], [0], [1], [0, 0, 1, 1], [], []>} : vector<128x384xbf16>, vector<384x64xbf16>, vector<128x64xf32> -> vector<128x64xf32>
    %c0_108 = arith.constant 0 : index
    %c0_109 = arith.constant 0 : index
    %70 = vector.load %arg4[%c0_108, %c0_109] : memref<1x64xf32, #tpu.memory_space<vmem>>, vector<1x64xf32>
    %71 = vector.broadcast %70 : vector<1x64xf32> to vector<128x64xf32>
    %72 = arith.mulf %69, %71 : vector<128x64xf32>
    %c0_110 = arith.constant 0 : index
    %c0_111 = arith.constant 0 : index
    %73 = vector.load %arg5[%c0_110, %c0_111] : memref<1x64xf32, #tpu.memory_space<vmem>>, vector<1x64xf32>
    %74 = vector.broadcast %73 : vector<1x64xf32> to vector<128x64xf32>
    %75 = arith.addf %72, %74 : vector<128x64xf32>
    %cst_112 = arith.constant 0.000000e+00 : f32
    %76 = vector.broadcast %cst_112 : f32 to vector<128x64xf32>
    %77 = arith.cmpf ogt, %75, %76 : vector<128x64xf32>
    %78 = math.exp %75 : vector<128x64xf32>
    %cst_113 = arith.constant 1.000000e+00 : f32
    %79 = vector.broadcast %cst_113 : f32 to vector<128x64xf32>
    %80 = arith.subf %78, %79 : vector<128x64xf32>
    %81 = arith.select %77, %75, %80 : vector<128x64xi1>, vector<128x64xf32>
    %82 = arith.truncf %81 : vector<128x64xf32> to vector<128x64xbf16>
    %c0_114 = arith.constant 0 : index
    %c0_115 = arith.constant 0 : index
    %c0_116 = arith.constant 0 : index
    %83 = vector.load %arg6[%c0_114, %c0_115, %c0_116] : memref<1x128x64xbf16, #tpu.memory_space<vmem>>, vector<1x128x64xbf16>
    %84 = vector.shape_cast %83 : vector<1x128x64xbf16> to vector<128x64xbf16>
    %85 = vector.shape_cast %82 : vector<128x64xbf16> to vector<1x128x64xbf16>
    tpu.vector_store %arg6[%c0_114, %c0_115, %c0_116], %85 {strides = array<i32>} : memref<1x128x64xbf16, #tpu.memory_space<vmem>>, vector<1x128x64xbf16>,
    return
  }
  func.func @transform_0(%arg0: i32) -> (i32, i32, i32, i32) {
    %c0_i32 = arith.constant 0 : i32
    %c0_i32_0 = arith.constant 0 : i32
    %c0_i32_1 = arith.constant 0 : i32
    %c0_i32_2 = arith.constant 0 : i32
    return %arg0, %c0_i32, %c0_i32_0, %c0_i32_1 : i32, i32, i32, i32
  }
  func.func @transform_1(%arg0: i32) -> (i32, i32, i32, i32) {
    %c0_i32 = arith.constant 0 : i32
    %c0_i32_0 = arith.constant 0 : i32
    %c0_i32_1 = arith.constant 0 : i32
    %c0_i32_2 = arith.constant 0 : i32
    return %arg0, %c0_i32, %c0_i32_0, %c0_i32_1 : i32, i32, i32, i32
  }
  func.func @transform_2(%arg0: i32) -> (i32, i32) {
    %c0_i32 = arith.constant 0 : i32
    %c0_i32_0 = arith.constant 0 : i32
    %c0_i32_1 = arith.constant 0 : i32
    return %c0_i32, %c0_i32_0 : i32, i32
  }
  func.func @transform_3(%arg0: i32) -> (i32, i32) {
    %c0_i32 = arith.constant 0 : i32
    %c0_i32_0 = arith.constant 0 : i32
    %c0_i32_1 = arith.constant 0 : i32
    return %c0_i32, %c0_i32_0 : i32, i32
  }
  func.func @transform_4(%arg0: i32) -> (i32, i32) {
    %c0_i32 = arith.constant 0 : i32
    %c0_i32_0 = arith.constant 0 : i32
    %c0_i32_1 = arith.constant 0 : i32
    return %c0_i32, %c0_i32_0 : i32, i32
  }
  func.func @transform_5(%arg0: i32) -> (i32, i32, i32) {
    %c0_i32 = arith.constant 0 : i32
    %c0_i32_0 = arith.constant 0 : i32
    %c0_i32_1 = arith.constant 0 : i32
    return %arg0, %c0_i32, %c0_i32_0 : i32, i32, i32
  }
}

module attributes {stable_mosaic.version = 11 : i64} {
  func.func @kernel(%arg0: i32, %arg1: memref<1x4x31x32xbf16, #tpu.memory_space<vmem>>, %arg2: memref<1x4x31x32xf32, #tpu.memory_space<vmem>>, %arg3: memref<384x32xbf16, #tpu.memory_space<vmem>>, %arg4: memref<1x32xf32, #tpu.memory_space<vmem>>, %arg5: memref<1x32xf32, #tpu.memory_space<vmem>>, %arg6: memref<1x192x32xbf16, #tpu.memory_space<vmem>>, %arg7: memref<192x384xbf16, #tpu.memory_space<vmem>>) attributes {dimension_semantics = [#tpu.dimension_semantics<parallel>], iteration_bounds = array<i64: 2>, scalar_prefetch = 0 : i64, scratch_operands = 1 : i64, tpu.core_type = #tpu.core_type<tc>, window_params = [{transform_indices = @transform_0, window_bounds = array<i64: 1, 4, 31, 32>}, {transform_indices = @transform_1, window_bounds = array<i64: 1, 4, 31, 32>}, {pipeline_mode = #tpu.pipeline_mode<synchronous>, transform_indices = @transform_2, window_bounds = array<i64: 384, 32>}, {pipeline_mode = #tpu.pipeline_mode<synchronous>, transform_indices = @transform_3, window_bounds = array<i64: 1, 32>}, {pipeline_mode = #tpu.pipeline_mode<synchronous>, transform_indices = @transform_4, window_bounds = array<i64: 1, 32>}, {transform_indices = @transform_5, window_bounds = array<i64: 1, 192, 32>}]} {
    %cst = arith.constant 0.000000e+00 : bf16
    %0 = vector.broadcast %cst : bf16 to vector<33x384xbf16>
    %c0 = arith.constant 0 : index
    %c0_0 = arith.constant 0 : index
    %1 = vector.load %arg7[%c0, %c0_0] : memref<192x384xbf16, #tpu.memory_space<vmem>>, vector<33x384xbf16>
    tpu.vector_store %arg7[%c0, %c0_0], %0 {strides = array<i32>} : memref<192x384xbf16, #tpu.memory_space<vmem>>, vector<33x384xbf16>,
    %c48 = arith.constant 48 : index
    %c0_1 = arith.constant 0 : index
    %2 = vector.load %arg7[%c48, %c0_1] : memref<192x384xbf16, #tpu.memory_space<vmem>>, vector<33x384xbf16>
    tpu.vector_store %arg7[%c48, %c0_1], %0 {strides = array<i32>} : memref<192x384xbf16, #tpu.memory_space<vmem>>, vector<33x384xbf16>,
    %c96 = arith.constant 96 : index
    %c0_2 = arith.constant 0 : index
    %3 = vector.load %arg7[%c96, %c0_2] : memref<192x384xbf16, #tpu.memory_space<vmem>>, vector<33x384xbf16>
    tpu.vector_store %arg7[%c96, %c0_2], %0 {strides = array<i32>} : memref<192x384xbf16, #tpu.memory_space<vmem>>, vector<33x384xbf16>,
    %c144 = arith.constant 144 : index
    %c0_3 = arith.constant 0 : index
    %4 = vector.load %arg7[%c144, %c0_3] : memref<192x384xbf16, #tpu.memory_space<vmem>>, vector<33x384xbf16>
    tpu.vector_store %arg7[%c144, %c0_3], %0 {strides = array<i32>} : memref<192x384xbf16, #tpu.memory_space<vmem>>, vector<33x384xbf16>,
    %c0_4 = arith.constant 0 : index
    %c0_5 = arith.constant 0 : index
    %c0_6 = arith.constant 0 : index
    %c0_7 = arith.constant 0 : index
    %5 = vector.load %arg1[%c0_4, %c0_5, %c0_6, %c0_7] : memref<1x4x31x32xbf16, #tpu.memory_space<vmem>>, vector<1x1x31x32xbf16>
    %6 = vector.shape_cast %5 : vector<1x1x31x32xbf16> to vector<31x32xbf16>
    %c0_8 = arith.constant 0 : index
    %c0_9 = arith.constant 0 : index
    %c0_10 = arith.constant 0 : index
    %c0_11 = arith.constant 0 : index
    %7 = vector.load %arg2[%c0_8, %c0_9, %c0_10, %c0_11] : memref<1x4x31x32xf32, #tpu.memory_space<vmem>>, vector<1x1x31x32xf32>
    %8 = vector.shape_cast %7 : vector<1x1x31x32xf32> to vector<31x32xf32>
    %9 = arith.truncf %8 : vector<31x32xf32> to vector<31x32xbf16>
    %c0_12 = arith.constant 0 : index
    %c0_13 = arith.constant 0 : index
    %10 = vector.load %arg7[%c0_12, %c0_13] : memref<192x384xbf16, #tpu.memory_space<vmem>>, vector<31x32xbf16>
    tpu.vector_store %arg7[%c0_12, %c0_13], %6 {strides = array<i32>} : memref<192x384xbf16, #tpu.memory_space<vmem>>, vector<31x32xbf16>,
    %c0_14 = arith.constant 0 : index
    %c32 = arith.constant 32 : index
    %11 = vector.load %arg7[%c0_14, %c32] : memref<192x384xbf16, #tpu.memory_space<vmem>>, vector<31x32xbf16>
    tpu.vector_store %arg7[%c0_14, %c32], %9 {strides = array<i32>} : memref<192x384xbf16, #tpu.memory_space<vmem>>, vector<31x32xbf16>,
    %c1 = arith.constant 1 : index
    %c64 = arith.constant 64 : index
    %12 = vector.load %arg7[%c1, %c64] : memref<192x384xbf16, #tpu.memory_space<vmem>>, vector<31x32xbf16>
    tpu.vector_store %arg7[%c1, %c64], %6 {strides = array<i32>} : memref<192x384xbf16, #tpu.memory_space<vmem>>, vector<31x32xbf16>,
    %c1_15 = arith.constant 1 : index
    %c96_16 = arith.constant 96 : index
    %13 = vector.load %arg7[%c1_15, %c96_16] : memref<192x384xbf16, #tpu.memory_space<vmem>>, vector<31x32xbf16>
    tpu.vector_store %arg7[%c1_15, %c96_16], %9 {strides = array<i32>} : memref<192x384xbf16, #tpu.memory_space<vmem>>, vector<31x32xbf16>,
    %c2 = arith.constant 2 : index
    %c128 = arith.constant 128 : index
    %14 = vector.load %arg7[%c2, %c128] : memref<192x384xbf16, #tpu.memory_space<vmem>>, vector<31x32xbf16>
    tpu.vector_store %arg7[%c2, %c128], %6 {strides = array<i32>} : memref<192x384xbf16, #tpu.memory_space<vmem>>, vector<31x32xbf16>,
    %c2_17 = arith.constant 2 : index
    %c160 = arith.constant 160 : index
    %15 = vector.load %arg7[%c2_17, %c160] : memref<192x384xbf16, #tpu.memory_space<vmem>>, vector<31x32xbf16>
    tpu.vector_store %arg7[%c2_17, %c160], %9 {strides = array<i32>} : memref<192x384xbf16, #tpu.memory_space<vmem>>, vector<31x32xbf16>,
    %c48_18 = arith.constant 48 : index
    %c192 = arith.constant 192 : index
    %16 = vector.load %arg7[%c48_18, %c192] : memref<192x384xbf16, #tpu.memory_space<vmem>>, vector<31x32xbf16>
    tpu.vector_store %arg7[%c48_18, %c192], %6 {strides = array<i32>} : memref<192x384xbf16, #tpu.memory_space<vmem>>, vector<31x32xbf16>,
    %c48_19 = arith.constant 48 : index
    %c224 = arith.constant 224 : index
    %17 = vector.load %arg7[%c48_19, %c224] : memref<192x384xbf16, #tpu.memory_space<vmem>>, vector<31x32xbf16>
    tpu.vector_store %arg7[%c48_19, %c224], %9 {strides = array<i32>} : memref<192x384xbf16, #tpu.memory_space<vmem>>, vector<31x32xbf16>,
    %c49 = arith.constant 49 : index
    %c256 = arith.constant 256 : index
    %18 = vector.load %arg7[%c49, %c256] : memref<192x384xbf16, #tpu.memory_space<vmem>>, vector<31x32xbf16>
    tpu.vector_store %arg7[%c49, %c256], %6 {strides = array<i32>} : memref<192x384xbf16, #tpu.memory_space<vmem>>, vector<31x32xbf16>,
    %c49_20 = arith.constant 49 : index
    %c288 = arith.constant 288 : index
    %19 = vector.load %arg7[%c49_20, %c288] : memref<192x384xbf16, #tpu.memory_space<vmem>>, vector<31x32xbf16>
    tpu.vector_store %arg7[%c49_20, %c288], %9 {strides = array<i32>} : memref<192x384xbf16, #tpu.memory_space<vmem>>, vector<31x32xbf16>,
    %c50 = arith.constant 50 : index
    %c320 = arith.constant 320 : index
    %20 = vector.load %arg7[%c50, %c320] : memref<192x384xbf16, #tpu.memory_space<vmem>>, vector<31x32xbf16>
    tpu.vector_store %arg7[%c50, %c320], %6 {strides = array<i32>} : memref<192x384xbf16, #tpu.memory_space<vmem>>, vector<31x32xbf16>,
    %c50_21 = arith.constant 50 : index
    %c352 = arith.constant 352 : index
    %21 = vector.load %arg7[%c50_21, %c352] : memref<192x384xbf16, #tpu.memory_space<vmem>>, vector<31x32xbf16>
    tpu.vector_store %arg7[%c50_21, %c352], %9 {strides = array<i32>} : memref<192x384xbf16, #tpu.memory_space<vmem>>, vector<31x32xbf16>,
    %c0_22 = arith.constant 0 : index
    %c1_23 = arith.constant 1 : index
    %c0_24 = arith.constant 0 : index
    %c0_25 = arith.constant 0 : index
    %22 = vector.load %arg1[%c0_22, %c1_23, %c0_24, %c0_25] : memref<1x4x31x32xbf16, #tpu.memory_space<vmem>>, vector<1x1x31x32xbf16>
    %23 = vector.shape_cast %22 : vector<1x1x31x32xbf16> to vector<31x32xbf16>
    %c0_26 = arith.constant 0 : index
    %c1_27 = arith.constant 1 : index
    %c0_28 = arith.constant 0 : index
    %c0_29 = arith.constant 0 : index
    %24 = vector.load %arg2[%c0_26, %c1_27, %c0_28, %c0_29] : memref<1x4x31x32xf32, #tpu.memory_space<vmem>>, vector<1x1x31x32xf32>
    %25 = vector.shape_cast %24 : vector<1x1x31x32xf32> to vector<31x32xf32>
    %26 = arith.truncf %25 : vector<31x32xf32> to vector<31x32xbf16>
    %c48_30 = arith.constant 48 : index
    %c0_31 = arith.constant 0 : index
    %27 = vector.load %arg7[%c48_30, %c0_31] : memref<192x384xbf16, #tpu.memory_space<vmem>>, vector<31x32xbf16>
    tpu.vector_store %arg7[%c48_30, %c0_31], %23 {strides = array<i32>} : memref<192x384xbf16, #tpu.memory_space<vmem>>, vector<31x32xbf16>,
    %c48_32 = arith.constant 48 : index
    %c32_33 = arith.constant 32 : index
    %28 = vector.load %arg7[%c48_32, %c32_33] : memref<192x384xbf16, #tpu.memory_space<vmem>>, vector<31x32xbf16>
    tpu.vector_store %arg7[%c48_32, %c32_33], %26 {strides = array<i32>} : memref<192x384xbf16, #tpu.memory_space<vmem>>, vector<31x32xbf16>,
    %c49_34 = arith.constant 49 : index
    %c64_35 = arith.constant 64 : index
    %29 = vector.load %arg7[%c49_34, %c64_35] : memref<192x384xbf16, #tpu.memory_space<vmem>>, vector<31x32xbf16>
    tpu.vector_store %arg7[%c49_34, %c64_35], %23 {strides = array<i32>} : memref<192x384xbf16, #tpu.memory_space<vmem>>, vector<31x32xbf16>,
    %c49_36 = arith.constant 49 : index
    %c96_37 = arith.constant 96 : index
    %30 = vector.load %arg7[%c49_36, %c96_37] : memref<192x384xbf16, #tpu.memory_space<vmem>>, vector<31x32xbf16>
    tpu.vector_store %arg7[%c49_36, %c96_37], %26 {strides = array<i32>} : memref<192x384xbf16, #tpu.memory_space<vmem>>, vector<31x32xbf16>,
    %c50_38 = arith.constant 50 : index
    %c128_39 = arith.constant 128 : index
    %31 = vector.load %arg7[%c50_38, %c128_39] : memref<192x384xbf16, #tpu.memory_space<vmem>>, vector<31x32xbf16>
    tpu.vector_store %arg7[%c50_38, %c128_39], %23 {strides = array<i32>} : memref<192x384xbf16, #tpu.memory_space<vmem>>, vector<31x32xbf16>,
    %c50_40 = arith.constant 50 : index
    %c160_41 = arith.constant 160 : index
    %32 = vector.load %arg7[%c50_40, %c160_41] : memref<192x384xbf16, #tpu.memory_space<vmem>>, vector<31x32xbf16>
    tpu.vector_store %arg7[%c50_40, %c160_41], %26 {strides = array<i32>} : memref<192x384xbf16, #tpu.memory_space<vmem>>, vector<31x32xbf16>,
    %c96_42 = arith.constant 96 : index
    %c192_43 = arith.constant 192 : index
    %33 = vector.load %arg7[%c96_42, %c192_43] : memref<192x384xbf16, #tpu.memory_space<vmem>>, vector<31x32xbf16>
    tpu.vector_store %arg7[%c96_42, %c192_43], %23 {strides = array<i32>} : memref<192x384xbf16, #tpu.memory_space<vmem>>, vector<31x32xbf16>,
    %c96_44 = arith.constant 96 : index
    %c224_45 = arith.constant 224 : index
    %34 = vector.load %arg7[%c96_44, %c224_45] : memref<192x384xbf16, #tpu.memory_space<vmem>>, vector<31x32xbf16>
    tpu.vector_store %arg7[%c96_44, %c224_45], %26 {strides = array<i32>} : memref<192x384xbf16, #tpu.memory_space<vmem>>, vector<31x32xbf16>,
    %c97 = arith.constant 97 : index
    %c256_46 = arith.constant 256 : index
    %35 = vector.load %arg7[%c97, %c256_46] : memref<192x384xbf16, #tpu.memory_space<vmem>>, vector<31x32xbf16>
    tpu.vector_store %arg7[%c97, %c256_46], %23 {strides = array<i32>} : memref<192x384xbf16, #tpu.memory_space<vmem>>, vector<31x32xbf16>,
    %c97_47 = arith.constant 97 : index
    %c288_48 = arith.constant 288 : index
    %36 = vector.load %arg7[%c97_47, %c288_48] : memref<192x384xbf16, #tpu.memory_space<vmem>>, vector<31x32xbf16>
    tpu.vector_store %arg7[%c97_47, %c288_48], %26 {strides = array<i32>} : memref<192x384xbf16, #tpu.memory_space<vmem>>, vector<31x32xbf16>,
    %c98 = arith.constant 98 : index
    %c320_49 = arith.constant 320 : index
    %37 = vector.load %arg7[%c98, %c320_49] : memref<192x384xbf16, #tpu.memory_space<vmem>>, vector<31x32xbf16>
    tpu.vector_store %arg7[%c98, %c320_49], %23 {strides = array<i32>} : memref<192x384xbf16, #tpu.memory_space<vmem>>, vector<31x32xbf16>,
    %c98_50 = arith.constant 98 : index
    %c352_51 = arith.constant 352 : index
    %38 = vector.load %arg7[%c98_50, %c352_51] : memref<192x384xbf16, #tpu.memory_space<vmem>>, vector<31x32xbf16>
    tpu.vector_store %arg7[%c98_50, %c352_51], %26 {strides = array<i32>} : memref<192x384xbf16, #tpu.memory_space<vmem>>, vector<31x32xbf16>,
    %c0_52 = arith.constant 0 : index
    %c2_53 = arith.constant 2 : index
    %c0_54 = arith.constant 0 : index
    %c0_55 = arith.constant 0 : index
    %39 = vector.load %arg1[%c0_52, %c2_53, %c0_54, %c0_55] : memref<1x4x31x32xbf16, #tpu.memory_space<vmem>>, vector<1x1x31x32xbf16>
    %40 = vector.shape_cast %39 : vector<1x1x31x32xbf16> to vector<31x32xbf16>
    %c0_56 = arith.constant 0 : index
    %c2_57 = arith.constant 2 : index
    %c0_58 = arith.constant 0 : index
    %c0_59 = arith.constant 0 : index
    %41 = vector.load %arg2[%c0_56, %c2_57, %c0_58, %c0_59] : memref<1x4x31x32xf32, #tpu.memory_space<vmem>>, vector<1x1x31x32xf32>
    %42 = vector.shape_cast %41 : vector<1x1x31x32xf32> to vector<31x32xf32>
    %43 = arith.truncf %42 : vector<31x32xf32> to vector<31x32xbf16>
    %c96_60 = arith.constant 96 : index
    %c0_61 = arith.constant 0 : index
    %44 = vector.load %arg7[%c96_60, %c0_61] : memref<192x384xbf16, #tpu.memory_space<vmem>>, vector<31x32xbf16>
    tpu.vector_store %arg7[%c96_60, %c0_61], %40 {strides = array<i32>} : memref<192x384xbf16, #tpu.memory_space<vmem>>, vector<31x32xbf16>,
    %c96_62 = arith.constant 96 : index
    %c32_63 = arith.constant 32 : index
    %45 = vector.load %arg7[%c96_62, %c32_63] : memref<192x384xbf16, #tpu.memory_space<vmem>>, vector<31x32xbf16>
    tpu.vector_store %arg7[%c96_62, %c32_63], %43 {strides = array<i32>} : memref<192x384xbf16, #tpu.memory_space<vmem>>, vector<31x32xbf16>,
    %c97_64 = arith.constant 97 : index
    %c64_65 = arith.constant 64 : index
    %46 = vector.load %arg7[%c97_64, %c64_65] : memref<192x384xbf16, #tpu.memory_space<vmem>>, vector<31x32xbf16>
    tpu.vector_store %arg7[%c97_64, %c64_65], %40 {strides = array<i32>} : memref<192x384xbf16, #tpu.memory_space<vmem>>, vector<31x32xbf16>,
    %c97_66 = arith.constant 97 : index
    %c96_67 = arith.constant 96 : index
    %47 = vector.load %arg7[%c97_66, %c96_67] : memref<192x384xbf16, #tpu.memory_space<vmem>>, vector<31x32xbf16>
    tpu.vector_store %arg7[%c97_66, %c96_67], %43 {strides = array<i32>} : memref<192x384xbf16, #tpu.memory_space<vmem>>, vector<31x32xbf16>,
    %c98_68 = arith.constant 98 : index
    %c128_69 = arith.constant 128 : index
    %48 = vector.load %arg7[%c98_68, %c128_69] : memref<192x384xbf16, #tpu.memory_space<vmem>>, vector<31x32xbf16>
    tpu.vector_store %arg7[%c98_68, %c128_69], %40 {strides = array<i32>} : memref<192x384xbf16, #tpu.memory_space<vmem>>, vector<31x32xbf16>,
    %c98_70 = arith.constant 98 : index
    %c160_71 = arith.constant 160 : index
    %49 = vector.load %arg7[%c98_70, %c160_71] : memref<192x384xbf16, #tpu.memory_space<vmem>>, vector<31x32xbf16>
    tpu.vector_store %arg7[%c98_70, %c160_71], %43 {strides = array<i32>} : memref<192x384xbf16, #tpu.memory_space<vmem>>, vector<31x32xbf16>,
    %c144_72 = arith.constant 144 : index
    %c192_73 = arith.constant 192 : index
    %50 = vector.load %arg7[%c144_72, %c192_73] : memref<192x384xbf16, #tpu.memory_space<vmem>>, vector<31x32xbf16>
    tpu.vector_store %arg7[%c144_72, %c192_73], %40 {strides = array<i32>} : memref<192x384xbf16, #tpu.memory_space<vmem>>, vector<31x32xbf16>,
    %c144_74 = arith.constant 144 : index
    %c224_75 = arith.constant 224 : index
    %51 = vector.load %arg7[%c144_74, %c224_75] : memref<192x384xbf16, #tpu.memory_space<vmem>>, vector<31x32xbf16>
    tpu.vector_store %arg7[%c144_74, %c224_75], %43 {strides = array<i32>} : memref<192x384xbf16, #tpu.memory_space<vmem>>, vector<31x32xbf16>,
    %c145 = arith.constant 145 : index
    %c256_76 = arith.constant 256 : index
    %52 = vector.load %arg7[%c145, %c256_76] : memref<192x384xbf16, #tpu.memory_space<vmem>>, vector<31x32xbf16>
    tpu.vector_store %arg7[%c145, %c256_76], %40 {strides = array<i32>} : memref<192x384xbf16, #tpu.memory_space<vmem>>, vector<31x32xbf16>,
    %c145_77 = arith.constant 145 : index
    %c288_78 = arith.constant 288 : index
    %53 = vector.load %arg7[%c145_77, %c288_78] : memref<192x384xbf16, #tpu.memory_space<vmem>>, vector<31x32xbf16>
    tpu.vector_store %arg7[%c145_77, %c288_78], %43 {strides = array<i32>} : memref<192x384xbf16, #tpu.memory_space<vmem>>, vector<31x32xbf16>,
    %c146 = arith.constant 146 : index
    %c320_79 = arith.constant 320 : index
    %54 = vector.load %arg7[%c146, %c320_79] : memref<192x384xbf16, #tpu.memory_space<vmem>>, vector<31x32xbf16>
    tpu.vector_store %arg7[%c146, %c320_79], %40 {strides = array<i32>} : memref<192x384xbf16, #tpu.memory_space<vmem>>, vector<31x32xbf16>,
    %c146_80 = arith.constant 146 : index
    %c352_81 = arith.constant 352 : index
    %55 = vector.load %arg7[%c146_80, %c352_81] : memref<192x384xbf16, #tpu.memory_space<vmem>>, vector<31x32xbf16>
    tpu.vector_store %arg7[%c146_80, %c352_81], %43 {strides = array<i32>} : memref<192x384xbf16, #tpu.memory_space<vmem>>, vector<31x32xbf16>,
    %c0_82 = arith.constant 0 : index
    %c3 = arith.constant 3 : index
    %c0_83 = arith.constant 0 : index
    %c0_84 = arith.constant 0 : index
    %56 = vector.load %arg1[%c0_82, %c3, %c0_83, %c0_84] : memref<1x4x31x32xbf16, #tpu.memory_space<vmem>>, vector<1x1x31x32xbf16>
    %57 = vector.shape_cast %56 : vector<1x1x31x32xbf16> to vector<31x32xbf16>
    %c0_85 = arith.constant 0 : index
    %c3_86 = arith.constant 3 : index
    %c0_87 = arith.constant 0 : index
    %c0_88 = arith.constant 0 : index
    %58 = vector.load %arg2[%c0_85, %c3_86, %c0_87, %c0_88] : memref<1x4x31x32xf32, #tpu.memory_space<vmem>>, vector<1x1x31x32xf32>
    %59 = vector.shape_cast %58 : vector<1x1x31x32xf32> to vector<31x32xf32>
    %60 = arith.truncf %59 : vector<31x32xf32> to vector<31x32xbf16>
    %c144_89 = arith.constant 144 : index
    %c0_90 = arith.constant 0 : index
    %61 = vector.load %arg7[%c144_89, %c0_90] : memref<192x384xbf16, #tpu.memory_space<vmem>>, vector<31x32xbf16>
    tpu.vector_store %arg7[%c144_89, %c0_90], %57 {strides = array<i32>} : memref<192x384xbf16, #tpu.memory_space<vmem>>, vector<31x32xbf16>,
    %c144_91 = arith.constant 144 : index
    %c32_92 = arith.constant 32 : index
    %62 = vector.load %arg7[%c144_91, %c32_92] : memref<192x384xbf16, #tpu.memory_space<vmem>>, vector<31x32xbf16>
    tpu.vector_store %arg7[%c144_91, %c32_92], %60 {strides = array<i32>} : memref<192x384xbf16, #tpu.memory_space<vmem>>, vector<31x32xbf16>,
    %c145_93 = arith.constant 145 : index
    %c64_94 = arith.constant 64 : index
    %63 = vector.load %arg7[%c145_93, %c64_94] : memref<192x384xbf16, #tpu.memory_space<vmem>>, vector<31x32xbf16>
    tpu.vector_store %arg7[%c145_93, %c64_94], %57 {strides = array<i32>} : memref<192x384xbf16, #tpu.memory_space<vmem>>, vector<31x32xbf16>,
    %c145_95 = arith.constant 145 : index
    %c96_96 = arith.constant 96 : index
    %64 = vector.load %arg7[%c145_95, %c96_96] : memref<192x384xbf16, #tpu.memory_space<vmem>>, vector<31x32xbf16>
    tpu.vector_store %arg7[%c145_95, %c96_96], %60 {strides = array<i32>} : memref<192x384xbf16, #tpu.memory_space<vmem>>, vector<31x32xbf16>,
    %c146_97 = arith.constant 146 : index
    %c128_98 = arith.constant 128 : index
    %65 = vector.load %arg7[%c146_97, %c128_98] : memref<192x384xbf16, #tpu.memory_space<vmem>>, vector<31x32xbf16>
    tpu.vector_store %arg7[%c146_97, %c128_98], %57 {strides = array<i32>} : memref<192x384xbf16, #tpu.memory_space<vmem>>, vector<31x32xbf16>,
    %c146_99 = arith.constant 146 : index
    %c160_100 = arith.constant 160 : index
    %66 = vector.load %arg7[%c146_99, %c160_100] : memref<192x384xbf16, #tpu.memory_space<vmem>>, vector<31x32xbf16>
    tpu.vector_store %arg7[%c146_99, %c160_100], %60 {strides = array<i32>} : memref<192x384xbf16, #tpu.memory_space<vmem>>, vector<31x32xbf16>,
    %c0_101 = arith.constant 0 : index
    %c0_102 = arith.constant 0 : index
    %67 = vector.load %arg7[%c0_101, %c0_102] : memref<192x384xbf16, #tpu.memory_space<vmem>>, vector<192x384xbf16>
    %c0_103 = arith.constant 0 : index
    %c0_104 = arith.constant 0 : index
    %68 = vector.load %arg3[%c0_103, %c0_104] : memref<384x32xbf16, #tpu.memory_space<vmem>>, vector<384x32xbf16>
    %cst_105 = arith.constant dense<0.000000e+00> : vector<192x32xf32>
    %69 = tpu.matmul %67, %68, %cst_105 {dimension_numbers = #tpu.dot_dimension_numbers<[1], [0], [0], [1], [0, 0, 1, 1], [], []>} : vector<192x384xbf16>, vector<384x32xbf16>, vector<192x32xf32> -> vector<192x32xf32>
    %c0_106 = arith.constant 0 : index
    %c0_107 = arith.constant 0 : index
    %70 = vector.load %arg4[%c0_106, %c0_107] : memref<1x32xf32, #tpu.memory_space<vmem>>, vector<1x32xf32>
    %71 = vector.broadcast %70 : vector<1x32xf32> to vector<192x32xf32>
    %72 = arith.mulf %69, %71 : vector<192x32xf32>
    %c0_108 = arith.constant 0 : index
    %c0_109 = arith.constant 0 : index
    %73 = vector.load %arg5[%c0_108, %c0_109] : memref<1x32xf32, #tpu.memory_space<vmem>>, vector<1x32xf32>
    %74 = vector.broadcast %73 : vector<1x32xf32> to vector<192x32xf32>
    %75 = arith.addf %72, %74 : vector<192x32xf32>
    %cst_110 = arith.constant 0.000000e+00 : f32
    %76 = vector.broadcast %cst_110 : f32 to vector<192x32xf32>
    %77 = arith.cmpf ogt, %75, %76 : vector<192x32xf32>
    %78 = math.exp %75 : vector<192x32xf32>
    %cst_111 = arith.constant 1.000000e+00 : f32
    %79 = vector.broadcast %cst_111 : f32 to vector<192x32xf32>
    %80 = arith.subf %78, %79 : vector<192x32xf32>
    %81 = arith.select %77, %75, %80 : vector<192x32xi1>, vector<192x32xf32>
    %82 = arith.truncf %81 : vector<192x32xf32> to vector<192x32xbf16>
    %c0_112 = arith.constant 0 : index
    %c0_113 = arith.constant 0 : index
    %c0_114 = arith.constant 0 : index
    %83 = vector.load %arg6[%c0_112, %c0_113, %c0_114] : memref<1x192x32xbf16, #tpu.memory_space<vmem>>, vector<1x192x32xbf16>
    %84 = vector.shape_cast %83 : vector<1x192x32xbf16> to vector<192x32xbf16>
    %85 = vector.shape_cast %82 : vector<192x32xbf16> to vector<1x192x32xbf16>
    tpu.vector_store %arg6[%c0_112, %c0_113, %c0_114], %85 {strides = array<i32>} : memref<1x192x32xbf16, #tpu.memory_space<vmem>>, vector<1x192x32xbf16>,
    return
  }
  func.func @transform_0(%arg0: i32) -> (i32, i32, i32, i32) {
    %c0_i32 = arith.constant 0 : i32
    %c0_i32_0 = arith.constant 0 : i32
    %c0_i32_1 = arith.constant 0 : i32
    %c0_i32_2 = arith.constant 0 : i32
    return %arg0, %c0_i32, %c0_i32_0, %c0_i32_1 : i32, i32, i32, i32
  }
  func.func @transform_1(%arg0: i32) -> (i32, i32, i32, i32) {
    %c0_i32 = arith.constant 0 : i32
    %c0_i32_0 = arith.constant 0 : i32
    %c0_i32_1 = arith.constant 0 : i32
    %c0_i32_2 = arith.constant 0 : i32
    return %arg0, %c0_i32, %c0_i32_0, %c0_i32_1 : i32, i32, i32, i32
  }
  func.func @transform_2(%arg0: i32) -> (i32, i32) {
    %c0_i32 = arith.constant 0 : i32
    %c0_i32_0 = arith.constant 0 : i32
    %c0_i32_1 = arith.constant 0 : i32
    return %c0_i32, %c0_i32_0 : i32, i32
  }
  func.func @transform_3(%arg0: i32) -> (i32, i32) {
    %c0_i32 = arith.constant 0 : i32
    %c0_i32_0 = arith.constant 0 : i32
    %c0_i32_1 = arith.constant 0 : i32
    return %c0_i32, %c0_i32_0 : i32, i32
  }
  func.func @transform_4(%arg0: i32) -> (i32, i32) {
    %c0_i32 = arith.constant 0 : i32
    %c0_i32_0 = arith.constant 0 : i32
    %c0_i32_1 = arith.constant 0 : i32
    return %c0_i32, %c0_i32_0 : i32, i32
  }
  func.func @transform_5(%arg0: i32) -> (i32, i32, i32) {
    %c0_i32 = arith.constant 0 : i32
    %c0_i32_0 = arith.constant 0 : i32
    %c0_i32_1 = arith.constant 0 : i32
    return %arg0, %c0_i32, %c0_i32_0 : i32, i32, i32
  }
}

module attributes {stable_mosaic.version = 11 : i64} {
  func.func @kernel(%arg0: i32, %arg1: memref<1x4x63x16xbf16, #tpu.memory_space<vmem>>, %arg2: memref<1x4x63x16xf32, #tpu.memory_space<vmem>>, %arg3: memref<192x32xbf16, #tpu.memory_space<vmem>>, %arg4: memref<1x32xf32, #tpu.memory_space<vmem>>, %arg5: memref<1x32xf32, #tpu.memory_space<vmem>>, %arg6: memref<1x320x32xbf16, #tpu.memory_space<vmem>>, %arg7: memref<320x192xbf16, #tpu.memory_space<vmem>>) attributes {dimension_semantics = [#tpu.dimension_semantics<parallel>], iteration_bounds = array<i64: 2>, scalar_prefetch = 0 : i64, scratch_operands = 1 : i64, tpu.core_type = #tpu.core_type<tc>, window_params = [{transform_indices = @transform_0, window_bounds = array<i64: 1, 4, 63, 16>}, {transform_indices = @transform_1, window_bounds = array<i64: 1, 4, 63, 16>}, {pipeline_mode = #tpu.pipeline_mode<synchronous>, transform_indices = @transform_2, window_bounds = array<i64: 192, 32>}, {pipeline_mode = #tpu.pipeline_mode<synchronous>, transform_indices = @transform_3, window_bounds = array<i64: 1, 32>}, {pipeline_mode = #tpu.pipeline_mode<synchronous>, transform_indices = @transform_4, window_bounds = array<i64: 1, 32>}, {transform_indices = @transform_5, window_bounds = array<i64: 1, 320, 32>}]} {
    %cst = arith.constant 0.000000e+00 : bf16
    %0 = vector.broadcast %cst : bf16 to vector<65x192xbf16>
    %c0 = arith.constant 0 : index
    %c0_0 = arith.constant 0 : index
    %1 = vector.load %arg7[%c0, %c0_0] : memref<320x192xbf16, #tpu.memory_space<vmem>>, vector<65x192xbf16>
    tpu.vector_store %arg7[%c0, %c0_0], %0 {strides = array<i32>} : memref<320x192xbf16, #tpu.memory_space<vmem>>, vector<65x192xbf16>,
    %c80 = arith.constant 80 : index
    %c0_1 = arith.constant 0 : index
    %2 = vector.load %arg7[%c80, %c0_1] : memref<320x192xbf16, #tpu.memory_space<vmem>>, vector<65x192xbf16>
    tpu.vector_store %arg7[%c80, %c0_1], %0 {strides = array<i32>} : memref<320x192xbf16, #tpu.memory_space<vmem>>, vector<65x192xbf16>,
    %c160 = arith.constant 160 : index
    %c0_2 = arith.constant 0 : index
    %3 = vector.load %arg7[%c160, %c0_2] : memref<320x192xbf16, #tpu.memory_space<vmem>>, vector<65x192xbf16>
    tpu.vector_store %arg7[%c160, %c0_2], %0 {strides = array<i32>} : memref<320x192xbf16, #tpu.memory_space<vmem>>, vector<65x192xbf16>,
    %c240 = arith.constant 240 : index
    %c0_3 = arith.constant 0 : index
    %4 = vector.load %arg7[%c240, %c0_3] : memref<320x192xbf16, #tpu.memory_space<vmem>>, vector<65x192xbf16>
    tpu.vector_store %arg7[%c240, %c0_3], %0 {strides = array<i32>} : memref<320x192xbf16, #tpu.memory_space<vmem>>, vector<65x192xbf16>,
    %c0_4 = arith.constant 0 : index
    %c0_5 = arith.constant 0 : index
    %c0_6 = arith.constant 0 : index
    %c0_7 = arith.constant 0 : index
    %5 = vector.load %arg1[%c0_4, %c0_5, %c0_6, %c0_7] : memref<1x4x63x16xbf16, #tpu.memory_space<vmem>>, vector<1x1x63x16xbf16>
    %6 = vector.shape_cast %5 : vector<1x1x63x16xbf16> to vector<63x16xbf16>
    %c0_8 = arith.constant 0 : index
    %c0_9 = arith.constant 0 : index
    %c0_10 = arith.constant 0 : index
    %c0_11 = arith.constant 0 : index
    %7 = vector.load %arg2[%c0_8, %c0_9, %c0_10, %c0_11] : memref<1x4x63x16xf32, #tpu.memory_space<vmem>>, vector<1x1x63x16xf32>
    %8 = vector.shape_cast %7 : vector<1x1x63x16xf32> to vector<63x16xf32>
    %9 = arith.truncf %8 : vector<63x16xf32> to vector<63x16xbf16>
    %c0_12 = arith.constant 0 : index
    %c0_13 = arith.constant 0 : index
    %10 = vector.load %arg7[%c0_12, %c0_13] : memref<320x192xbf16, #tpu.memory_space<vmem>>, vector<63x16xbf16>
    tpu.vector_store %arg7[%c0_12, %c0_13], %6 {strides = array<i32>} : memref<320x192xbf16, #tpu.memory_space<vmem>>, vector<63x16xbf16>,
    %c0_14 = arith.constant 0 : index
    %c16 = arith.constant 16 : index
    %11 = vector.load %arg7[%c0_14, %c16] : memref<320x192xbf16, #tpu.memory_space<vmem>>, vector<63x16xbf16>
    tpu.vector_store %arg7[%c0_14, %c16], %9 {strides = array<i32>} : memref<320x192xbf16, #tpu.memory_space<vmem>>, vector<63x16xbf16>,
    %c1 = arith.constant 1 : index
    %c32 = arith.constant 32 : index
    %12 = vector.load %arg7[%c1, %c32] : memref<320x192xbf16, #tpu.memory_space<vmem>>, vector<63x16xbf16>
    tpu.vector_store %arg7[%c1, %c32], %6 {strides = array<i32>} : memref<320x192xbf16, #tpu.memory_space<vmem>>, vector<63x16xbf16>,
    %c1_15 = arith.constant 1 : index
    %c48 = arith.constant 48 : index
    %13 = vector.load %arg7[%c1_15, %c48] : memref<320x192xbf16, #tpu.memory_space<vmem>>, vector<63x16xbf16>
    tpu.vector_store %arg7[%c1_15, %c48], %9 {strides = array<i32>} : memref<320x192xbf16, #tpu.memory_space<vmem>>, vector<63x16xbf16>,
    %c2 = arith.constant 2 : index
    %c64 = arith.constant 64 : index
    %14 = vector.load %arg7[%c2, %c64] : memref<320x192xbf16, #tpu.memory_space<vmem>>, vector<63x16xbf16>
    tpu.vector_store %arg7[%c2, %c64], %6 {strides = array<i32>} : memref<320x192xbf16, #tpu.memory_space<vmem>>, vector<63x16xbf16>,
    %c2_16 = arith.constant 2 : index
    %c80_17 = arith.constant 80 : index
    %15 = vector.load %arg7[%c2_16, %c80_17] : memref<320x192xbf16, #tpu.memory_space<vmem>>, vector<63x16xbf16>
    tpu.vector_store %arg7[%c2_16, %c80_17], %9 {strides = array<i32>} : memref<320x192xbf16, #tpu.memory_space<vmem>>, vector<63x16xbf16>,
    %c80_18 = arith.constant 80 : index
    %c96 = arith.constant 96 : index
    %16 = vector.load %arg7[%c80_18, %c96] : memref<320x192xbf16, #tpu.memory_space<vmem>>, vector<63x16xbf16>
    tpu.vector_store %arg7[%c80_18, %c96], %6 {strides = array<i32>} : memref<320x192xbf16, #tpu.memory_space<vmem>>, vector<63x16xbf16>,
    %c80_19 = arith.constant 80 : index
    %c112 = arith.constant 112 : index
    %17 = vector.load %arg7[%c80_19, %c112] : memref<320x192xbf16, #tpu.memory_space<vmem>>, vector<63x16xbf16>
    tpu.vector_store %arg7[%c80_19, %c112], %9 {strides = array<i32>} : memref<320x192xbf16, #tpu.memory_space<vmem>>, vector<63x16xbf16>,
    %c81 = arith.constant 81 : index
    %c128 = arith.constant 128 : index
    %18 = vector.load %arg7[%c81, %c128] : memref<320x192xbf16, #tpu.memory_space<vmem>>, vector<63x16xbf16>
    tpu.vector_store %arg7[%c81, %c128], %6 {strides = array<i32>} : memref<320x192xbf16, #tpu.memory_space<vmem>>, vector<63x16xbf16>,
    %c81_20 = arith.constant 81 : index
    %c144 = arith.constant 144 : index
    %19 = vector.load %arg7[%c81_20, %c144] : memref<320x192xbf16, #tpu.memory_space<vmem>>, vector<63x16xbf16>
    tpu.vector_store %arg7[%c81_20, %c144], %9 {strides = array<i32>} : memref<320x192xbf16, #tpu.memory_space<vmem>>, vector<63x16xbf16>,
    %c82 = arith.constant 82 : index
    %c160_21 = arith.constant 160 : index
    %20 = vector.load %arg7[%c82, %c160_21] : memref<320x192xbf16, #tpu.memory_space<vmem>>, vector<63x16xbf16>
    tpu.vector_store %arg7[%c82, %c160_21], %6 {strides = array<i32>} : memref<320x192xbf16, #tpu.memory_space<vmem>>, vector<63x16xbf16>,
    %c82_22 = arith.constant 82 : index
    %c176 = arith.constant 176 : index
    %21 = vector.load %arg7[%c82_22, %c176] : memref<320x192xbf16, #tpu.memory_space<vmem>>, vector<63x16xbf16>
    tpu.vector_store %arg7[%c82_22, %c176], %9 {strides = array<i32>} : memref<320x192xbf16, #tpu.memory_space<vmem>>, vector<63x16xbf16>,
    %c0_23 = arith.constant 0 : index
    %c1_24 = arith.constant 1 : index
    %c0_25 = arith.constant 0 : index
    %c0_26 = arith.constant 0 : index
    %22 = vector.load %arg1[%c0_23, %c1_24, %c0_25, %c0_26] : memref<1x4x63x16xbf16, #tpu.memory_space<vmem>>, vector<1x1x63x16xbf16>
    %23 = vector.shape_cast %22 : vector<1x1x63x16xbf16> to vector<63x16xbf16>
    %c0_27 = arith.constant 0 : index
    %c1_28 = arith.constant 1 : index
    %c0_29 = arith.constant 0 : index
    %c0_30 = arith.constant 0 : index
    %24 = vector.load %arg2[%c0_27, %c1_28, %c0_29, %c0_30] : memref<1x4x63x16xf32, #tpu.memory_space<vmem>>, vector<1x1x63x16xf32>
    %25 = vector.shape_cast %24 : vector<1x1x63x16xf32> to vector<63x16xf32>
    %26 = arith.truncf %25 : vector<63x16xf32> to vector<63x16xbf16>
    %c80_31 = arith.constant 80 : index
    %c0_32 = arith.constant 0 : index
    %27 = vector.load %arg7[%c80_31, %c0_32] : memref<320x192xbf16, #tpu.memory_space<vmem>>, vector<63x16xbf16>
    tpu.vector_store %arg7[%c80_31, %c0_32], %23 {strides = array<i32>} : memref<320x192xbf16, #tpu.memory_space<vmem>>, vector<63x16xbf16>,
    %c80_33 = arith.constant 80 : index
    %c16_34 = arith.constant 16 : index
    %28 = vector.load %arg7[%c80_33, %c16_34] : memref<320x192xbf16, #tpu.memory_space<vmem>>, vector<63x16xbf16>
    tpu.vector_store %arg7[%c80_33, %c16_34], %26 {strides = array<i32>} : memref<320x192xbf16, #tpu.memory_space<vmem>>, vector<63x16xbf16>,
    %c81_35 = arith.constant 81 : index
    %c32_36 = arith.constant 32 : index
    %29 = vector.load %arg7[%c81_35, %c32_36] : memref<320x192xbf16, #tpu.memory_space<vmem>>, vector<63x16xbf16>
    tpu.vector_store %arg7[%c81_35, %c32_36], %23 {strides = array<i32>} : memref<320x192xbf16, #tpu.memory_space<vmem>>, vector<63x16xbf16>,
    %c81_37 = arith.constant 81 : index
    %c48_38 = arith.constant 48 : index
    %30 = vector.load %arg7[%c81_37, %c48_38] : memref<320x192xbf16, #tpu.memory_space<vmem>>, vector<63x16xbf16>
    tpu.vector_store %arg7[%c81_37, %c48_38], %26 {strides = array<i32>} : memref<320x192xbf16, #tpu.memory_space<vmem>>, vector<63x16xbf16>,
    %c82_39 = arith.constant 82 : index
    %c64_40 = arith.constant 64 : index
    %31 = vector.load %arg7[%c82_39, %c64_40] : memref<320x192xbf16, #tpu.memory_space<vmem>>, vector<63x16xbf16>
    tpu.vector_store %arg7[%c82_39, %c64_40], %23 {strides = array<i32>} : memref<320x192xbf16, #tpu.memory_space<vmem>>, vector<63x16xbf16>,
    %c82_41 = arith.constant 82 : index
    %c80_42 = arith.constant 80 : index
    %32 = vector.load %arg7[%c82_41, %c80_42] : memref<320x192xbf16, #tpu.memory_space<vmem>>, vector<63x16xbf16>
    tpu.vector_store %arg7[%c82_41, %c80_42], %26 {strides = array<i32>} : memref<320x192xbf16, #tpu.memory_space<vmem>>, vector<63x16xbf16>,
    %c160_43 = arith.constant 160 : index
    %c96_44 = arith.constant 96 : index
    %33 = vector.load %arg7[%c160_43, %c96_44] : memref<320x192xbf16, #tpu.memory_space<vmem>>, vector<63x16xbf16>
    tpu.vector_store %arg7[%c160_43, %c96_44], %23 {strides = array<i32>} : memref<320x192xbf16, #tpu.memory_space<vmem>>, vector<63x16xbf16>,
    %c160_45 = arith.constant 160 : index
    %c112_46 = arith.constant 112 : index
    %34 = vector.load %arg7[%c160_45, %c112_46] : memref<320x192xbf16, #tpu.memory_space<vmem>>, vector<63x16xbf16>
    tpu.vector_store %arg7[%c160_45, %c112_46], %26 {strides = array<i32>} : memref<320x192xbf16, #tpu.memory_space<vmem>>, vector<63x16xbf16>,
    %c161 = arith.constant 161 : index
    %c128_47 = arith.constant 128 : index
    %35 = vector.load %arg7[%c161, %c128_47] : memref<320x192xbf16, #tpu.memory_space<vmem>>, vector<63x16xbf16>
    tpu.vector_store %arg7[%c161, %c128_47], %23 {strides = array<i32>} : memref<320x192xbf16, #tpu.memory_space<vmem>>, vector<63x16xbf16>,
    %c161_48 = arith.constant 161 : index
    %c144_49 = arith.constant 144 : index
    %36 = vector.load %arg7[%c161_48, %c144_49] : memref<320x192xbf16, #tpu.memory_space<vmem>>, vector<63x16xbf16>
    tpu.vector_store %arg7[%c161_48, %c144_49], %26 {strides = array<i32>} : memref<320x192xbf16, #tpu.memory_space<vmem>>, vector<63x16xbf16>,
    %c162 = arith.constant 162 : index
    %c160_50 = arith.constant 160 : index
    %37 = vector.load %arg7[%c162, %c160_50] : memref<320x192xbf16, #tpu.memory_space<vmem>>, vector<63x16xbf16>
    tpu.vector_store %arg7[%c162, %c160_50], %23 {strides = array<i32>} : memref<320x192xbf16, #tpu.memory_space<vmem>>, vector<63x16xbf16>,
    %c162_51 = arith.constant 162 : index
    %c176_52 = arith.constant 176 : index
    %38 = vector.load %arg7[%c162_51, %c176_52] : memref<320x192xbf16, #tpu.memory_space<vmem>>, vector<63x16xbf16>
    tpu.vector_store %arg7[%c162_51, %c176_52], %26 {strides = array<i32>} : memref<320x192xbf16, #tpu.memory_space<vmem>>, vector<63x16xbf16>,
    %c0_53 = arith.constant 0 : index
    %c2_54 = arith.constant 2 : index
    %c0_55 = arith.constant 0 : index
    %c0_56 = arith.constant 0 : index
    %39 = vector.load %arg1[%c0_53, %c2_54, %c0_55, %c0_56] : memref<1x4x63x16xbf16, #tpu.memory_space<vmem>>, vector<1x1x63x16xbf16>
    %40 = vector.shape_cast %39 : vector<1x1x63x16xbf16> to vector<63x16xbf16>
    %c0_57 = arith.constant 0 : index
    %c2_58 = arith.constant 2 : index
    %c0_59 = arith.constant 0 : index
    %c0_60 = arith.constant 0 : index
    %41 = vector.load %arg2[%c0_57, %c2_58, %c0_59, %c0_60] : memref<1x4x63x16xf32, #tpu.memory_space<vmem>>, vector<1x1x63x16xf32>
    %42 = vector.shape_cast %41 : vector<1x1x63x16xf32> to vector<63x16xf32>
    %43 = arith.truncf %42 : vector<63x16xf32> to vector<63x16xbf16>
    %c160_61 = arith.constant 160 : index
    %c0_62 = arith.constant 0 : index
    %44 = vector.load %arg7[%c160_61, %c0_62] : memref<320x192xbf16, #tpu.memory_space<vmem>>, vector<63x16xbf16>
    tpu.vector_store %arg7[%c160_61, %c0_62], %40 {strides = array<i32>} : memref<320x192xbf16, #tpu.memory_space<vmem>>, vector<63x16xbf16>,
    %c160_63 = arith.constant 160 : index
    %c16_64 = arith.constant 16 : index
    %45 = vector.load %arg7[%c160_63, %c16_64] : memref<320x192xbf16, #tpu.memory_space<vmem>>, vector<63x16xbf16>
    tpu.vector_store %arg7[%c160_63, %c16_64], %43 {strides = array<i32>} : memref<320x192xbf16, #tpu.memory_space<vmem>>, vector<63x16xbf16>,
    %c161_65 = arith.constant 161 : index
    %c32_66 = arith.constant 32 : index
    %46 = vector.load %arg7[%c161_65, %c32_66] : memref<320x192xbf16, #tpu.memory_space<vmem>>, vector<63x16xbf16>
    tpu.vector_store %arg7[%c161_65, %c32_66], %40 {strides = array<i32>} : memref<320x192xbf16, #tpu.memory_space<vmem>>, vector<63x16xbf16>,
    %c161_67 = arith.constant 161 : index
    %c48_68 = arith.constant 48 : index
    %47 = vector.load %arg7[%c161_67, %c48_68] : memref<320x192xbf16, #tpu.memory_space<vmem>>, vector<63x16xbf16>
    tpu.vector_store %arg7[%c161_67, %c48_68], %43 {strides = array<i32>} : memref<320x192xbf16, #tpu.memory_space<vmem>>, vector<63x16xbf16>,
    %c162_69 = arith.constant 162 : index
    %c64_70 = arith.constant 64 : index
    %48 = vector.load %arg7[%c162_69, %c64_70] : memref<320x192xbf16, #tpu.memory_space<vmem>>, vector<63x16xbf16>
    tpu.vector_store %arg7[%c162_69, %c64_70], %40 {strides = array<i32>} : memref<320x192xbf16, #tpu.memory_space<vmem>>, vector<63x16xbf16>,
    %c162_71 = arith.constant 162 : index
    %c80_72 = arith.constant 80 : index
    %49 = vector.load %arg7[%c162_71, %c80_72] : memref<320x192xbf16, #tpu.memory_space<vmem>>, vector<63x16xbf16>
    tpu.vector_store %arg7[%c162_71, %c80_72], %43 {strides = array<i32>} : memref<320x192xbf16, #tpu.memory_space<vmem>>, vector<63x16xbf16>,
    %c240_73 = arith.constant 240 : index
    %c96_74 = arith.constant 96 : index
    %50 = vector.load %arg7[%c240_73, %c96_74] : memref<320x192xbf16, #tpu.memory_space<vmem>>, vector<63x16xbf16>
    tpu.vector_store %arg7[%c240_73, %c96_74], %40 {strides = array<i32>} : memref<320x192xbf16, #tpu.memory_space<vmem>>, vector<63x16xbf16>,
    %c240_75 = arith.constant 240 : index
    %c112_76 = arith.constant 112 : index
    %51 = vector.load %arg7[%c240_75, %c112_76] : memref<320x192xbf16, #tpu.memory_space<vmem>>, vector<63x16xbf16>
    tpu.vector_store %arg7[%c240_75, %c112_76], %43 {strides = array<i32>} : memref<320x192xbf16, #tpu.memory_space<vmem>>, vector<63x16xbf16>,
    %c241 = arith.constant 241 : index
    %c128_77 = arith.constant 128 : index
    %52 = vector.load %arg7[%c241, %c128_77] : memref<320x192xbf16, #tpu.memory_space<vmem>>, vector<63x16xbf16>
    tpu.vector_store %arg7[%c241, %c128_77], %40 {strides = array<i32>} : memref<320x192xbf16, #tpu.memory_space<vmem>>, vector<63x16xbf16>,
    %c241_78 = arith.constant 241 : index
    %c144_79 = arith.constant 144 : index
    %53 = vector.load %arg7[%c241_78, %c144_79] : memref<320x192xbf16, #tpu.memory_space<vmem>>, vector<63x16xbf16>
    tpu.vector_store %arg7[%c241_78, %c144_79], %43 {strides = array<i32>} : memref<320x192xbf16, #tpu.memory_space<vmem>>, vector<63x16xbf16>,
    %c242 = arith.constant 242 : index
    %c160_80 = arith.constant 160 : index
    %54 = vector.load %arg7[%c242, %c160_80] : memref<320x192xbf16, #tpu.memory_space<vmem>>, vector<63x16xbf16>
    tpu.vector_store %arg7[%c242, %c160_80], %40 {strides = array<i32>} : memref<320x192xbf16, #tpu.memory_space<vmem>>, vector<63x16xbf16>,
    %c242_81 = arith.constant 242 : index
    %c176_82 = arith.constant 176 : index
    %55 = vector.load %arg7[%c242_81, %c176_82] : memref<320x192xbf16, #tpu.memory_space<vmem>>, vector<63x16xbf16>
    tpu.vector_store %arg7[%c242_81, %c176_82], %43 {strides = array<i32>} : memref<320x192xbf16, #tpu.memory_space<vmem>>, vector<63x16xbf16>,
    %c0_83 = arith.constant 0 : index
    %c3 = arith.constant 3 : index
    %c0_84 = arith.constant 0 : index
    %c0_85 = arith.constant 0 : index
    %56 = vector.load %arg1[%c0_83, %c3, %c0_84, %c0_85] : memref<1x4x63x16xbf16, #tpu.memory_space<vmem>>, vector<1x1x63x16xbf16>
    %57 = vector.shape_cast %56 : vector<1x1x63x16xbf16> to vector<63x16xbf16>
    %c0_86 = arith.constant 0 : index
    %c3_87 = arith.constant 3 : index
    %c0_88 = arith.constant 0 : index
    %c0_89 = arith.constant 0 : index
    %58 = vector.load %arg2[%c0_86, %c3_87, %c0_88, %c0_89] : memref<1x4x63x16xf32, #tpu.memory_space<vmem>>, vector<1x1x63x16xf32>
    %59 = vector.shape_cast %58 : vector<1x1x63x16xf32> to vector<63x16xf32>
    %60 = arith.truncf %59 : vector<63x16xf32> to vector<63x16xbf16>
    %c240_90 = arith.constant 240 : index
    %c0_91 = arith.constant 0 : index
    %61 = vector.load %arg7[%c240_90, %c0_91] : memref<320x192xbf16, #tpu.memory_space<vmem>>, vector<63x16xbf16>
    tpu.vector_store %arg7[%c240_90, %c0_91], %57 {strides = array<i32>} : memref<320x192xbf16, #tpu.memory_space<vmem>>, vector<63x16xbf16>,
    %c240_92 = arith.constant 240 : index
    %c16_93 = arith.constant 16 : index
    %62 = vector.load %arg7[%c240_92, %c16_93] : memref<320x192xbf16, #tpu.memory_space<vmem>>, vector<63x16xbf16>
    tpu.vector_store %arg7[%c240_92, %c16_93], %60 {strides = array<i32>} : memref<320x192xbf16, #tpu.memory_space<vmem>>, vector<63x16xbf16>,
    %c241_94 = arith.constant 241 : index
    %c32_95 = arith.constant 32 : index
    %63 = vector.load %arg7[%c241_94, %c32_95] : memref<320x192xbf16, #tpu.memory_space<vmem>>, vector<63x16xbf16>
    tpu.vector_store %arg7[%c241_94, %c32_95], %57 {strides = array<i32>} : memref<320x192xbf16, #tpu.memory_space<vmem>>, vector<63x16xbf16>,
    %c241_96 = arith.constant 241 : index
    %c48_97 = arith.constant 48 : index
    %64 = vector.load %arg7[%c241_96, %c48_97] : memref<320x192xbf16, #tpu.memory_space<vmem>>, vector<63x16xbf16>
    tpu.vector_store %arg7[%c241_96, %c48_97], %60 {strides = array<i32>} : memref<320x192xbf16, #tpu.memory_space<vmem>>, vector<63x16xbf16>,
    %c242_98 = arith.constant 242 : index
    %c64_99 = arith.constant 64 : index
    %65 = vector.load %arg7[%c242_98, %c64_99] : memref<320x192xbf16, #tpu.memory_space<vmem>>, vector<63x16xbf16>
    tpu.vector_store %arg7[%c242_98, %c64_99], %57 {strides = array<i32>} : memref<320x192xbf16, #tpu.memory_space<vmem>>, vector<63x16xbf16>,
    %c242_100 = arith.constant 242 : index
    %c80_101 = arith.constant 80 : index
    %66 = vector.load %arg7[%c242_100, %c80_101] : memref<320x192xbf16, #tpu.memory_space<vmem>>, vector<63x16xbf16>
    tpu.vector_store %arg7[%c242_100, %c80_101], %60 {strides = array<i32>} : memref<320x192xbf16, #tpu.memory_space<vmem>>, vector<63x16xbf16>,
    %c0_102 = arith.constant 0 : index
    %c0_103 = arith.constant 0 : index
    %67 = vector.load %arg7[%c0_102, %c0_103] : memref<320x192xbf16, #tpu.memory_space<vmem>>, vector<320x192xbf16>
    %c0_104 = arith.constant 0 : index
    %c0_105 = arith.constant 0 : index
    %68 = vector.load %arg3[%c0_104, %c0_105] : memref<192x32xbf16, #tpu.memory_space<vmem>>, vector<192x32xbf16>
    %cst_106 = arith.constant dense<0.000000e+00> : vector<320x32xf32>
    %69 = tpu.matmul %67, %68, %cst_106 {dimension_numbers = #tpu.dot_dimension_numbers<[1], [0], [0], [1], [0, 0, 1, 1], [], []>} : vector<320x192xbf16>, vector<192x32xbf16>, vector<320x32xf32> -> vector<320x32xf32>
    %c0_107 = arith.constant 0 : index
    %c0_108 = arith.constant 0 : index
    %70 = vector.load %arg4[%c0_107, %c0_108] : memref<1x32xf32, #tpu.memory_space<vmem>>, vector<1x32xf32>
    %71 = vector.broadcast %70 : vector<1x32xf32> to vector<320x32xf32>
    %72 = arith.mulf %69, %71 : vector<320x32xf32>
    %c0_109 = arith.constant 0 : index
    %c0_110 = arith.constant 0 : index
    %73 = vector.load %arg5[%c0_109, %c0_110] : memref<1x32xf32, #tpu.memory_space<vmem>>, vector<1x32xf32>
    %74 = vector.broadcast %73 : vector<1x32xf32> to vector<320x32xf32>
    %75 = arith.addf %72, %74 : vector<320x32xf32>
    %cst_111 = arith.constant 0.000000e+00 : f32
    %76 = vector.broadcast %cst_111 : f32 to vector<320x32xf32>
    %77 = arith.cmpf ogt, %75, %76 : vector<320x32xf32>
    %78 = math.exp %75 : vector<320x32xf32>
    %cst_112 = arith.constant 1.000000e+00 : f32
    %79 = vector.broadcast %cst_112 : f32 to vector<320x32xf32>
    %80 = arith.subf %78, %79 : vector<320x32xf32>
    %81 = arith.select %77, %75, %80 : vector<320x32xi1>, vector<320x32xf32>
    %82 = arith.truncf %81 : vector<320x32xf32> to vector<320x32xbf16>
    %c0_113 = arith.constant 0 : index
    %c0_114 = arith.constant 0 : index
    %c0_115 = arith.constant 0 : index
    %83 = vector.load %arg6[%c0_113, %c0_114, %c0_115] : memref<1x320x32xbf16, #tpu.memory_space<vmem>>, vector<1x320x32xbf16>
    %84 = vector.shape_cast %83 : vector<1x320x32xbf16> to vector<320x32xbf16>
    %85 = vector.shape_cast %82 : vector<320x32xbf16> to vector<1x320x32xbf16>
    tpu.vector_store %arg6[%c0_113, %c0_114, %c0_115], %85 {strides = array<i32>} : memref<1x320x32xbf16, #tpu.memory_space<vmem>>, vector<1x320x32xbf16>,
    return
  }
  func.func @transform_0(%arg0: i32) -> (i32, i32, i32, i32) {
    %c0_i32 = arith.constant 0 : i32
    %c0_i32_0 = arith.constant 0 : i32
    %c0_i32_1 = arith.constant 0 : i32
    %c0_i32_2 = arith.constant 0 : i32
    return %arg0, %c0_i32, %c0_i32_0, %c0_i32_1 : i32, i32, i32, i32
  }
  func.func @transform_1(%arg0: i32) -> (i32, i32, i32, i32) {
    %c0_i32 = arith.constant 0 : i32
    %c0_i32_0 = arith.constant 0 : i32
    %c0_i32_1 = arith.constant 0 : i32
    %c0_i32_2 = arith.constant 0 : i32
    return %arg0, %c0_i32, %c0_i32_0, %c0_i32_1 : i32, i32, i32, i32
  }
  func.func @transform_2(%arg0: i32) -> (i32, i32) {
    %c0_i32 = arith.constant 0 : i32
    %c0_i32_0 = arith.constant 0 : i32
    %c0_i32_1 = arith.constant 0 : i32
    return %c0_i32, %c0_i32_0 : i32, i32
  }
  func.func @transform_3(%arg0: i32) -> (i32, i32) {
    %c0_i32 = arith.constant 0 : i32
    %c0_i32_0 = arith.constant 0 : i32
    %c0_i32_1 = arith.constant 0 : i32
    return %c0_i32, %c0_i32_0 : i32, i32
  }
  func.func @transform_4(%arg0: i32) -> (i32, i32) {
    %c0_i32 = arith.constant 0 : i32
    %c0_i32_0 = arith.constant 0 : i32
    %c0_i32_1 = arith.constant 0 : i32
    return %c0_i32, %c0_i32_0 : i32, i32
  }
  func.func @transform_5(%arg0: i32) -> (i32, i32, i32) {
    %c0_i32 = arith.constant 0 : i32
    %c0_i32_0 = arith.constant 0 : i32
    %c0_i32_1 = arith.constant 0 : i32
    return %arg0, %c0_i32, %c0_i32_0 : i32, i32, i32
  }
}

</mosaic_0001>

<bundles_post_ra>
// kernel: adecoder_forward.5
= control target key start
LH: loop header
LB: loop body
LE: loop exit
PB: predicated region body
PF: predicated region fallthrough
CT: control target
= control target key end

     0   :  { %s1144_s15 = smov 0   ;;  %s1434_s0 = inlined_call_operand.vmem [shape: f32[2,4,3,64], index: 0, kind: input, shape index: {}]   ;;  %s1435_s1 = inlined_call_operand.vmem [shape: bf16[384,128], index: 1, kind: input, shape index: {}]   ;;  %s1436_s2 = inlined_call_operand.vmem [shape: f32[1,128], index: 2, kind: input, shape index: {}]   ;;  %s1437_s3 = inlined_call_operand.vmem [shape: f32[1,128], index: 3, kind: input, shape index: {}]   ;;  %s1438_s4 = inlined_call_operand.vmem [shape: bf16[2,64,128], index: 4, kind: output, shape index: {}]  }
   0x1 LB: > { %s896_s16 = sadd.s32 4294967295, %s1116_s15   ;;  %p900_p0 = scmp.ge.s32.totalorder %s1116_s15, 1  ;;  %s1116_s15 = sphi %s1144_s15, %s14_s15  }
   0x2   : > { %p162_p1 = scmp.lt.s32.totalorder %s1116_s15, 3 }
   0x4   : > { %p163_p2 = pnand %p900_p0, %p162_p1 }
   0x5   : > { %p188_p3 = scmp.lt.s32.totalorder (!%p163_p2), %s896_s16, 1  ;;  %vm199_vm0 = vcmask (!%p163_p2), 1042432   ;;  %vm200_vm1 = vsmask.f32 (!%p163_p2), 2304  ;;  %v205_v1 = vld [vmem:[#allocation2 + $0x8] sm:$0x7] (!%p163_p2) }
   0x6   : > { %166 = sbr.rel (%p163_p2) target bundleno = 415 (0x19f), region = 36  ;;  %vm1153_vm2 = vmand (!%p163_p2), %vm199_vm0, %vm200_vm1  ;;  %v1070_v3 = vld [vmem:[%s1435_s1 + $0x40] sm:$0xff] (!%p163_p2)   ;;  %v1072_v5 = vld [vmem:[%s1435_s1 + $0x48] sm:$0xff] (!%p163_p2)   ;;  %vm265_vm3 = vcmask (!%p163_p2), 518145   ;;  %s1118_s5 = smov (!%p163_p2), 64   ;;  %vm240_vm5 = vcmask (!%p163_p2), 517120  }
   0x7   : > { %v206_v2 = vsel (!%p163_p2), %vm1153_vm2, 0, %v205_v1  ;;  %v1071_v4 = vld [vmem:[%s1435_s1] sm:$0xff] (!%p163_p2)   ;;  %985 = vmatprep.subr.bf16.mxu0 (!%p163_p2), %v1070_v3  ;;  %v1073_v6 = vld [vmem:[%s1435_s1 + $0x8] sm:$0xff] (!%p163_p2)   ;;  %v1074_v15 = vld [vmem:[%s1435_s1 + $0x50] sm:$0xff] (!%p163_p2)   ;;  %vm241_vm6 = vsmask.f32 (!%p163_p2), 1280 }
   0x8   : > { %207 = vst [vmem:[#allocation2 + $0x8] sm:$0x7] (!%p163_p2), %v206_v2  ;;  %986 = vmatpush3.bf16.msra.mxu0 (!%p163_p2), %v1071_v4  ;;  %vm1198_vm4 = vmand (!%p163_p2), %vm265_vm3, %vm200_vm1  ;;  %v1075_v21 = vld [vmem:[%s1435_s1 + $0x80] sm:$0xff] (!%p163_p2)   ;;  %v1076_v25 = vld [vmem:[%s1435_s1 + $0x10] sm:$0xff] (!%p163_p2)   ;;  %vm257_vm8 = vsmask.f32 (!%p163_p2), 7938 }
   0x9   : > { %987 = vmatprep.subr.bf16.mxu0 (!%p163_p2), %v1072_v5  ;;  %1037 = vmatprep.subr.bf16.mxu1 (!%p163_p2), %v1075_v21  ;;  %v1077_v32 = vld [vmem:[%s1435_s1 + $0x58] sm:$0xff] (!%p163_p2)   ;;  %v1078_v36 = vld [vmem:[%s1435_s1 + $0x88] sm:$0xff] (!%p163_p2)   ;;  %v202_v40 = vld [vmem:[#allocation2] sm:$0x7] (!%p163_p2)  ;;  %vm256_vm10 = vcmask (!%p163_p2), 1041920   ;;  %vm285_vm13 = vcmask (!%p163_p2), 1042945  }
   0xa   : > { %1038 = vmatpush3.bf16.msra.mxu1 (!%p163_p2), %v1075_v21  ;;  %v1079_v39 = vld [vmem:[%s1435_s1 + $0x18] sm:$0xff] (!%p163_p2)   ;;  %v1080_v41 = vld [vmem:[%s1435_s1 + $0x60] sm:$0xff] (!%p163_p2)   ;;  %v203_v42 = vsel (!%p163_p2), %vm1153_vm2, 0, %v202_v40  ;;  %v1081_v43 = vld [vmem:[%s1435_s1 + $0x90] sm:$0xff] (!%p163_p2)  }
   0xb   : > { %1039 = vmatprep.subr.bf16.mxu1 (!%p163_p2), %v1078_v36  ;;  %204 = vst [vmem:[#allocation2] sm:$0x7] (!%p163_p2), %v203_v42  ;;  %v211_v44 = vld [vmem:[#allocation2 + $0x18] sm:$0x7] (!%p163_p2)  ;;  %v214_v45 = vld [vmem:[#allocation2 + $0x20] sm:$0x7] (!%p163_p2)  ;;  %vm1266_vm7 = vmand (!%p163_p2), %vm240_vm5, %vm241_vm6 }
   0xc   : > { %988 = vmatpush3.bf16.msra.mxu0 (!%p163_p2), %v1073_v6  ;;  %v220_v46 = vld [vmem:[#allocation2 + $0x30] sm:$0x7] (!%p163_p2)  ;;  %v212_v48 = vsel (!%p163_p2), %vm1153_vm2, 0, %v211_v44  ;;  %v215_v49 = vsel (!%p163_p2), %vm1153_vm2, 0, %v214_v45  ;;  %v229_v51 = vld [vmem:[#allocation2 + $0x48] sm:$0x7] (!%p163_p2)  ;;  %vm1311_vm9 = vmand (!%p163_p2), %vm240_vm5, %vm257_vm8 }
   0xd   : > { %s1454_s16 = smov (!%p188_p3, %s896_s16), 1  ;;  %989 = vmatprep.subr.bf16.mxu0 %v1074_v15  ;;  %v221_v50 = vsel %vm1153_vm2, 0, %v220_v46  ;;  %v1082_v52 = vld [vmem:[%s1435_s1 + $0x20] sm:$0xff]   ;;  %213 = vst [vmem:[#allocation2 + $0x18] sm:$0x7] %v212_v48  ;;  %v230_v53 = vsel %vm1153_vm2, 0, %v229_v51  ;;  %vm1350_vm11 = vmand %vm256_vm10, %vm241_vm6 }
   0xe   : > { %s952_s21 = sshll.u32 %s1454_s16, 4  ;;  %1040 = vmatpush3.bf16.msra.mxu1 %v1078_v36  ;;  %216 = vst [vmem:[#allocation2 + $0x20] sm:$0x7] %v215_v49  ;;  %222 = vst [vmem:[#allocation2 + $0x30] sm:$0x7] %v221_v50  ;;  %v1083_v54 = vld [vmem:[%s1435_s1 + $0x68] sm:$0xff]  }
   0xf   : > { %s192_s26 = scalar_lea.vmem %s1434_s0, %s952_s21  ;;  %v267_v23 = vld [vmem:[#allocation2 + $0x8] sm:$0x6]  ;;  %1041 = vmatprep.subr.bf16.mxu1 %v1081_v43  ;;  %231 = vst [vmem:[#allocation2 + $0x48] sm:$0x7] %v230_v53  ;;  %v223_v56 = vld [vmem:[#allocation2 + $0x38] sm:$0x7]  ;;  %vm1359_vm12 = vmand %vm256_vm10, %vm257_vm8 }
  0x10   : > { %v238_v7 = vld [vmem:[%s192_s26] sm:$0x7]  ;;  %v905_v8 = vld [vmem:[%s192_s26 + $0x4] sm:$0x7]  ;;  %v906_v9 = vld [vmem:[%s192_s26 + $0x8] sm:$0x7]  ;;  %990 = vmatpush3.bf16.msra.mxu0 %v1076_v25 }
  0x11   : > { %v1177_v10 = vpack.c.bf16 %v238_v7, %v238_v7  ;;  %v1179_v11 = vpack.c.bf16 %v905_v8, %v905_v8  ;;  %v1181_v12 = vpack.c.bf16 %v906_v9, %v906_v9  ;;  %v907_v13 = vld [vmem:[%s192_s26 + $0xc] sm:$0x7]  ;;  %991 = vmatprep.subr.bf16.mxu0 %v1077_v32  ;;  %v224_v59 = vsel %vm1153_vm2, 0, %v223_v56  ;;  %v217_v60 = vld [vmem:[#allocation2 + $0x28] sm:$0x7]  ;;  %v1084_v62 = vld [vmem:[%s1435_s1 + $0x98] sm:$0xff]  }
  0x12   : > { %v1183_v14 = vpack.c.bf16 %v907_v13, %v907_v13  ;;  %1042 = vmatpush3.bf16.msra.mxu1 %v1081_v43  ;;  %225 = vst [vmem:[#allocation2 + $0x38] sm:$0x7] %v224_v59  ;;  %v243_v61 = vld [vmem:[#allocation2] sm:$0x3]  ;;  %v218_v63 = vsel %vm1153_vm2, 0, %v217_v60  ;;  %v1085_v2 = vld [vmem:[%s1435_s1 + $0x28] sm:$0xff]   ;;  %vm1380_vm14 = vmand %vm285_vm13, %vm200_vm1 }
  0x13   : > { %270 = vrot.lane.b32.xlu0 %v1177_v10, %s1118_s5  ;;  %315 = vrot.lane.b32.xlu1 %v1179_v11, %s1118_s5  ;;  %v247_v16 = vshrl.u32 %v1177_v10, 16  ;;  %v250_v17 = vshll.u32 %v1177_v10, 16  ;;  %v297_v18 = vshrl.u32 %v1179_v11, 16  ;;  %v300_v19 = vshll.u32 %v1179_v11, 16  ;;  %219 = vst [vmem:[#allocation2 + $0x28] sm:$0x7] %v218_v63 }
  0x14   : > { %v263_v22 = vrot.slane %v1177_v10, 7  ;;  %v338_v24 = vshrl.u32 %v1181_v12, 16  ;;  %v341_v28 = vshll.u32 %v1181_v12, 16  ;;  %v379_v29 = vshrl.u32 %v1183_v14, 16  ;;  %992 = vmatpush3.bf16.msra.mxu0 %v1079_v39  ;;  %v226_v3 = vld [vmem:[#allocation2 + $0x40] sm:$0x7]  ;;  %1043 = vmatprep.subr.bf16.mxu1 %v1084_v62 }
  0x15   : > { %v249_v26 = vrot.slane %v247_v16, 7  ;;  %v299_v27 = vrot.slane %v297_v18, 7  ;;  %v382_v35 = vshll.u32 %v1183_v14, 16  ;;  %993 = vmatprep.subr.bf16.mxu0 %v1080_v41  ;;  %v310_v55 = vrot.slane %v1179_v11, 7  ;;  %v235_v5 = vld [vmem:[#allocation2 + $0x58] sm:$0x7] }
  0x16   : > { %v268_v30 = vsel %vm1198_vm4, %v263_v22, %v267_v23  ;;  %v340_v31 = vrot.slane %v338_v24, 7  ;;  %v381_v38 = vrot.slane %v379_v29, 7  ;;  %v351_v57 = vrot.slane %v1181_v12, 7  ;;  %v293_v6 = vld [vmem:[#allocation2 + $0x18] sm:$0x3]  ;;  %1044 = vmatpush3.bf16.msra.mxu1 %v1084_v62  ;;  %v1086_v16 = vld [vmem:[%s1435_s1 + $0x70] sm:$0xff]  }
  0x17   : > { %v1219_v33 = vor.u32 %v250_v17, %v249_v26  ;;  %v1221_v34 = vor.u32 %v300_v19, %v299_v27  ;;  %269 = vst [vmem:[#allocation2 + $0x8] sm:$0x6] %v268_v30  ;;  %v244_v1 = vsel %vm1266_vm7, %v1177_v10, %v243_v61  ;;  %v227_v4 = vsel %vm1153_vm2, 0, %v226_v3  ;;  %v334_v7 = vld [vmem:[#allocation2 + $0x30] sm:$0x3]  ;;  %v1087_v18 = vld [vmem:[%s1435_s1 + $0xa0] sm:$0xff]  }
  0x18   : > { %v1231_v37 = vor.u32 %v341_v28, %v340_v31  ;;  %v384_v47 = vor.u32 %v382_v35, %v381_v38  ;;  %994 = vmatpush3.bf16.msra.mxu0 %v1082_v52  ;;  %245 = vst [vmem:[#allocation2] sm:$0x3] %v244_v1  ;;  %228 = vst [vmem:[#allocation2 + $0x40] sm:$0x7] %v227_v4  ;;  %v294_v8 = vsel %vm1266_vm7, %v1179_v11, %v293_v6  ;;  %v375_v10 = vld [vmem:[#allocation2 + $0x48] sm:$0x3] }
  0x19   : > { %253 = vrot.lane.b32.xlu0 %v1219_v33, %s1118_s5  ;;  %303 = vrot.lane.b32.xlu1 %v1221_v34, %s1118_s5  ;;  %v335_v9 = vsel %vm1266_vm7, %v1181_v12, %v334_v7  ;;  %v236_v13 = vsel %vm1153_vm2, 0, %v235_v5  ;;  %295 = vst [vmem:[#allocation2 + $0x18] sm:$0x3] %v294_v8  ;;  %v376_v15 = vsel %vm1266_vm7, %v1183_v14, %v375_v10  ;;  %v1088_v19 = vld [vmem:[%s1435_s1 + $0x30] sm:$0xff]   ;;  %v1089_v24 = vld [vmem:[%s1435_s1 + $0x78] sm:$0xff]   ;;  %v392_v4 = vrot.slane %v1183_v14, 7 }
  0x1a   : > { %995 = vmatprep.subr.bf16.mxu0 %v1083_v54  ;;  %336 = vst [vmem:[#allocation2 + $0x30] sm:$0x3] %v335_v9  ;;  %237 = vst [vmem:[#allocation2 + $0x58] sm:$0x7] %v236_v13  ;;  %v232_v21 = vld [vmem:[#allocation2 + $0x50] sm:$0x7]  ;;  %1045 = vmatprep.subr.bf16.mxu1 %v1087_v18 }
  0x1b   : > { %377 = vst [vmem:[#allocation2 + $0x48] sm:$0x3] %v376_v15  ;;  %v233_v23 = vsel %vm1153_vm2, 0, %v232_v21  ;;  %1046 = vmatpush3.bf16.msra.mxu1 %v1087_v18  ;;  %v1090_v27 = vld [vmem:[%s1435_s1 + $0xa8] sm:$0xff]   ;;  %v1091_v29 = vld [vmem:[%s1435_s1 + $0x38] sm:$0xff]   ;;  %s953_s26 = sshll.u32 %s1454_s16, 5 }
  0x1c   : > { %996 = vmatpush3.bf16.msra.mxu0 %v1085_v2  ;;  %234 = vst [vmem:[#allocation2 + $0x50] sm:$0x7] %v233_v23  ;;  %1047 = vmatprep.subr.bf16.mxu1 %v1090_v27  ;;  %v208_v35 = vld [vmem:[#allocation2 + $0x10] sm:$0x7]  ;;  %v274_v39 = vld [vmem:[#allocation2 + $0x20] sm:$0x3]  ;;  %s1424_s29 = scalar_lea.vmem %s1438_s4, %s953_s26 }
  0x1d   : > { %356 = vrot.lane.b32.xlu0 %v1181_v12, %s1118_s5  ;;  %344 = vrot.lane.b32.xlu1 %v1231_v37, %s1118_s5  ;;  %v209_v36 = vsel %vm1153_vm2, 0, %v208_v35  ;;  %v318_v40 = vld [vmem:[#allocation2 + $0x38] sm:$0x3] }
  0x1e   : > { %997 = vmatprep.subr.bf16.mxu0 %v1086_v16  ;;  %v398_v31 = vld [vmem:[#allocation2 + $0x8] sm:$0xff]  ;;  %210 = vst [vmem:[#allocation2 + $0x10] sm:$0x7] %v209_v36 }
  0x1f   : > { %v322_v26 = vld [vmem:[#allocation2 + $0x40] sm:$0x3]  ;;  %1048 = vmatpush3.bf16.msra.mxu1 %v1090_v27  ;;  %633 = vmatprep.mubr.bf16.mxu0 %v398_v31 }
  0x20   : > { %998 = vmatpush3.bf16.msra.mxu0 %v1088_v19  ;;  %v323_v28 = vsel %vm1311_vm9, %v1221_v34, %v322_v26  ;;  %v1093_v34 = vld [vmem:[%s1435_s1 + $0xb8] sm:$0xff]   ;;  %v259_v45 = vld [vmem:[#allocation2] sm:$0x3] }
  0x21   : > { %282 = vrot.lane.b32.xlu0 %v263_v22, %s1118_s5  ;;  %385 = vrot.lane.b32.xlu1 %v384_v47, %s1118_s5  ;;  %v279_v22 = vld [vmem:[#allocation2 + $0x28] sm:$0x3]  ;;  %324 = vst [vmem:[#allocation2 + $0x40] sm:$0x3] %v323_v28  ;;  %v363_v30 = vld [vmem:[#allocation2 + $0x58] sm:$0x3] }
  0x22   : > { %v280_v25 = vsel %vm1311_vm9, %v1219_v33, %v279_v22  ;;  %999 = vmatprep.subr.bf16.mxu0 %v1089_v24  ;;  %v364_v32 = vsel %vm1311_vm9, %v1231_v37, %v363_v30  ;;  %v1092_v33 = vld [vmem:[%s1435_s1 + $0xb0] sm:$0xff]   ;;  %v306_v46 = vld [vmem:[#allocation2 + $0x18] sm:$0x3] }
  0x23   : > { %281 = vst [vmem:[#allocation2 + $0x28] sm:$0x3] %v280_v25  ;;  %365 = vst [vmem:[#allocation2 + $0x58] sm:$0x3] %v364_v32  ;;  %1049 = vmatprep.subr.bf16.mxu1 %v1092_v33  ;;  %v359_v51 = vld [vmem:[#allocation2 + $0x50] sm:$0x3] }
  0x24   : > { %1000 = vmatpush3.bf16.msra.mxu0 %v1091_v29  ;;  %1050 = vmatpush3.bf16.msra.mxu1 %v1092_v33  ;;  %v347_v52 = vld [vmem:[#allocation2 + $0x30] sm:$0x3]  ;;  %v1398_v33 = vld [vmem:[%s1436_s2] ss:$0 sm:$0xff] }
  0x25   : > { %325 = vrot.lane.b32.xlu0 %v310_v55, %s1118_s5  ;;  %366 = vrot.lane.b32.xlu1 %v351_v57, %s1118_s5  ;;  %v399_v37 = vld [vmem:[#allocation2 + $0x10] sm:$0xff] }
  0x26   : > { %1051 = vmatprep.subr.bf16.mxu1 %v1093_v34  ;;  %1053 = vmatprep.mubr.bf16.mxu1 %v399_v37 }
  0x28   : > { %1052 = vmatpush3.bf16.msra.mxu1 %v1093_v34  ;;  %v328_v5 = vld [vmem:[#allocation2 + $0x40] sm:$0x6] }
  0x2a   : > { %v287_v12 = vld [vmem:[#allocation2 + $0x28] sm:$0x6]  ;;  %v369_v6 = vld [vmem:[#allocation2 + $0x58] sm:$0x6] }
  0x85   : > { %v271_v41 = vpop.permute.xlu0 %270  ;;  %v316_v42 = vpop.permute.xlu1 %315 }
  0x86   : > { %v275_v0 = vsel %vm1350_vm11, %v271_v41, %v274_v39  ;;  %v319_v43 = vsel %vm1350_vm11, %v316_v42, %v318_v40  ;;  %v1403_v39 = vld [vmem:[%s1437_s3] ss:$0 sm:$0xff] }
  0x87   : > { %276 = vst [vmem:[#allocation2 + $0x20] sm:$0x3] %v275_v0  ;;  %320 = vst [vmem:[#allocation2 + $0x38] sm:$0x3] %v319_v43 }
  0x8b   : > { %v254_v47 = vpop.permute.xlu0 %253  ;;  %v304_v48 = vpop.permute.xlu1 %303 }
  0x8c   : > { %v260_v49 = vsel %vm1359_vm12, %v254_v47, %v259_v45  ;;  %v307_v50 = vsel %vm1359_vm12, %v304_v48, %v306_v46 }
  0x8d   : > { %261 = vst [vmem:[#allocation2] sm:$0x3] %v260_v49  ;;  %308 = vst [vmem:[#allocation2 + $0x18] sm:$0x3] %v307_v50 }
  0x8e   : > { %v312_v53 = vld [vmem:[#allocation2 + $0x20] sm:$0x6]  ;;  %v353_v54 = vld [vmem:[#allocation2 + $0x38] sm:$0x6] }
  0x8f   : > { %v313_v56 = vsel %vm1198_vm4, %v310_v55, %v312_v53  ;;  %v354_v58 = vsel %vm1198_vm4, %v351_v57, %v353_v54  ;;  %v357_v59 = vpop.permute.xlu0 %356  ;;  %v345_v60 = vpop.permute.xlu1 %344  ;;  %v388_v55 = vld [vmem:[#allocation2 + $0x48] sm:$0x3] }
  0x90   : > { %314 = vst [vmem:[#allocation2 + $0x20] sm:$0x6] %v313_v56  ;;  %355 = vst [vmem:[#allocation2 + $0x38] sm:$0x6] %v354_v58  ;;  %v360_v61 = vsel %vm1350_vm11, %v357_v59, %v359_v51  ;;  %v348_v62 = vsel %vm1359_vm12, %v345_v60, %v347_v52 }
  0x91   : > { %361 = vst [vmem:[#allocation2 + $0x50] sm:$0x3] %v360_v61  ;;  %349 = vst [vmem:[#allocation2 + $0x30] sm:$0x3] %v348_v62 }
  0x93   : > { %v283_v57 = vpop.permute.xlu0 %282  ;;  %v386_v63 = vpop.permute.xlu1 %385 }
  0x94   : > { %v288_v1 = vsel %vm1380_vm14, %v283_v57, %v287_v12  ;;  %v397_v2 = vld [vmem:[#allocation2] sm:$0xff]  ;;  %v389_v3 = vsel %vm1359_vm12, %v386_v63, %v388_v55  ;;  %v400_v14 = vld [vmem:[#allocation2 + $0x18] sm:$0xff] }
  0x95   : > { %289 = vst [vmem:[#allocation2 + $0x28] sm:$0x6] %v288_v1  ;;  %634 = vmatmul.mubr.bf16.vlgmr.msra.gmra.mrb[0].mxu0 %v397_v2  ;;  %390 = vst [vmem:[#allocation2 + $0x48] sm:$0x3] %v389_v3 }
  0x97   : > { %v401_v7 = vld [vmem:[#allocation2 + $0x20] sm:$0xff]  ;;  %v326_v8 = vpop.permute.xlu0 %325  ;;  %v367_v9 = vpop.permute.xlu1 %366  ;;  %v404_v18 = vld [vmem:[#allocation2 + $0x38] sm:$0xff] }
  0x98   : > { %v394_v10 = vld [vmem:[#allocation2 + $0x50] sm:$0x6]  ;;  %641 = vmatprep.mubr.bf16.mxu0 %v401_v7  ;;  %v329_v13 = vsel %vm1380_vm14, %v326_v8, %v328_v5  ;;  %v370_v15 = vsel %vm1380_vm14, %v367_v9, %v369_v6 }
  0x99   : > { %v395_v16 = vsel %vm1198_vm4, %v392_v4, %v394_v10  ;;  %330 = vst [vmem:[#allocation2 + $0x40] sm:$0x6] %v329_v13  ;;  %371 = vst [vmem:[#allocation2 + $0x58] sm:$0x6] %v370_v15  ;;  %v403_v21 = vld [vmem:[#allocation2 + $0x30] sm:$0xff] }
  0x9a   : > { %396 = vst [vmem:[#allocation2 + $0x50] sm:$0x6] %v395_v16 }
  0x9c   : > { %v402_v17 = vld [vmem:[#allocation2 + $0x28] sm:$0xff] }
  0x9d   : > { %642 = vmatmul.mubr.bf16.gmra.mrb[4].mxu0 %v400_v14  ;;  %1054 = vmatmul.mubr.bf16.vlgmr.msra.gmra.mrb[0].mxu1 %v402_v17  ;;  %v406_v24 = vld [vmem:[#allocation2 + $0x48] sm:$0xff] }
  0x9e   : > { %649 = vmatprep.mubr.bf16.mxu0 %v404_v18 }
  0xa0   : > { %v405_v19 = vld [vmem:[#allocation2 + $0x40] sm:$0xff]  ;;  %v408_v22 = vld [vmem:[#allocation2 + $0x58] sm:$0xff] }
  0xa1   : > { %1057 = vmatprep.mubr.bf16.mxu1 %v405_v19  ;;  %v407_v23 = vld [vmem:[#allocation2 + $0x50] sm:$0xff] }
  0xa5   : > { %650 = vmatmul.mubr.bf16.gmra.mrb[8].mxu0 %v403_v21  ;;  %1058 = vmatmul.mubr.bf16.gmra.mrb[4].mxu1 %v408_v22 }
  0xa6   : > { %657 = vmatprep.mubr.bf16.mxu0 %v407_v23 }
  0xad   : > { %658 = vmatmul.mubr.bf16.gmra.mrb[12].mxu0 %v406_v24 }
 0x168   : > { %v1001_v20 = vpop.f32.mrb[0].mxu0 }
 0x169   : > { %v1002_v25 = vpop.f32.mrb[1].mxu0 }
 0x16a   : > { %v1003_v26 = vadd.f32 %v1002_v25, %v1001_v20  ;;  %v1004_v27 = vpop.f32.mrb[2].mxu0 }
 0x16b   : > { %v1005_v28 = vpop.f32.mrb[3].mxu0 }
 0x16c   : > { %v1006_v29 = vadd.f32 %v1005_v28, %v1004_v27 }
 0x170   : > { %v1007_v30 = vpop.f32.mrb[4].mxu0  ;;  %v1055_v31 = vpop.f32.mrb[0].mxu1 }
 0x171   : > { %v1008_v32 = vpop.f32.mrb[5].mxu0  ;;  %v700_v34 = vpop.f32.mrb[1].mxu1 }
 0x172   : > { %v1009_v35 = vadd.f32 %v1008_v32, %v1007_v30  ;;  %v701_v36 = vadd.f32 %v1003_v26, %v700_v34  ;;  %v1010_v37 = vpop.f32.mrb[6].mxu0  ;;  %v1056_v38 = vpop.f32.mrb[2].mxu1 }
 0x173   : > { %v1011_v40 = vpop.f32.mrb[7].mxu0  ;;  %v703_v41 = vpop.f32.mrb[3].mxu1 }
 0x174   : > { %v709_v42 = vadd.f32 %v1055_v31, %v1009_v35  ;;  %v738_v0 = vmul.f32 %v1398_v33, %v701_v36  ;;  %v1012_v43 = vadd.f32 %v1011_v40, %v1010_v37  ;;  %v704_v44 = vadd.f32 %v1006_v29, %v703_v41 }
 0x176   : > { %v740_v45 = vmul.f32 %v1398_v33, %v709_v42  ;;  %v753_v46 = vadd.f32 %v1403_v39, %v738_v0  ;;  %v712_v47 = vadd.f32 %v1056_v38, %v1012_v43  ;;  %v739_v48 = vmul.f32 %v1398_v33, %v704_v44 }
 0x178   : > { %v755_v49 = vadd.f32 %v1403_v39, %v740_v45  ;;  %v769_v50 = vmul.f32 1.442695, %v753_v46  ;;  %v741_v51 = vmul.f32 %v1398_v33, %v712_v47  ;;  %v1013_v52 = vpop.f32.mrb[8].mxu0  ;;  %v1059_v53 = vpop.f32.mrb[4].mxu1  ;;  %v754_v54 = vadd.f32 %v1403_v39, %v739_v48 }
 0x179   : > { %v1014_v56 = vpop.f32.mrb[9].mxu0  ;;  %v716_v58 = vpop.f32.mrb[5].mxu1  ;;  %vm761_vm15 = vcmp.gt.f32.partialorder %v753_v46, 0.0 }
 0x17a   : > { %v773_v59 = vmul.f32 1.442695, %v755_v49  ;;  %1094 = vpow2.f32 %v769_v50  ;;  %v756_v60 = vadd.f32 %v1403_v39, %v741_v51  ;;  %v1016_v61 = vpop.f32.mrb[10].mxu0  ;;  %v1060_v62 = vpop.f32.mrb[6].mxu1  ;;  %v771_v11 = vmul.f32 1.442695, %v754_v54 }
 0x17b   : > { %v1015_v12 = vadd.f32 %v1014_v56, %v1013_v52  ;;  %v1017_v55 = vpop.f32.mrb[11].mxu0  ;;  %v719_v57 = vpop.f32.mrb[7].mxu1  ;;  %vm763_vm0 = vcmp.gt.f32.partialorder %v755_v49, 0.0  ;;  %vm762_vm2 = vcmp.gt.f32.partialorder %v754_v54, 0.0 }
 0x17c   : > { %1096 = vpow2.f32 %v773_v59  ;;  %v775_v63 = vmul.f32 1.442695, %v756_v60  ;;  %v1018_v1 = vadd.f32 %v1017_v55, %v1016_v61  ;;  %vm764_vm1 = vcmp.gt.f32.partialorder %v756_v60, 0.0 }
 0x17d   : > { %1098 = vpow2.f32 %v771_v11  ;;  %v717_v2 = vadd.f32 %v1015_v12, %v716_v58 }
 0x17e   : > { %1100 = vpow2.f32 %v775_v63  ;;  %v720_v3 = vadd.f32 %v1018_v1, %v719_v57 }
 0x17f   : > { %v742_v4 = vmul.f32 %v1398_v33, %v717_v2 }
 0x180   : > { %v743_v5 = vmul.f32 %v1398_v33, %v720_v3  ;;  %v1019_v6 = vpop.f32.mrb[12].mxu0 }
 0x181   : > { %v757_v7 = vadd.f32 %v1403_v39, %v742_v4  ;;  %v1020_v8 = vpop.f32.mrb[13].mxu0 }
 0x182   : > { %v758_v9 = vadd.f32 %v1403_v39, %v743_v5  ;;  %v1021_v10 = vadd.f32 %v1020_v8, %v1019_v6  ;;  %v1022_v13 = vpop.f32.mrb[14].mxu0 }
 0x183   : > { %v777_v15 = vmul.f32 1.442695, %v757_v7  ;;  %v1023_v16 = vpop.f32.mrb[15].mxu0  ;;  %vm765_vm3 = vcmp.gt.f32.partialorder %v757_v7, 0.0 }
 0x184   : > { %v1095_v14 = vpop.eup %1094  ;;  %v779_v17 = vmul.f32 1.442695, %v758_v9  ;;  %v725_v18 = vadd.f32 %v1059_v53, %v1021_v10  ;;  %v1024_v19 = vadd.f32 %v1023_v16, %v1022_v13  ;;  %vm766_vm4 = vcmp.gt.f32.partialorder %v758_v9, 0.0 }
 0x185   : > { %1102 = vpow2.f32 %v777_v15  ;;  %v934_v22 = vadd.f32 -1.0, %v1095_v14 }
 0x186   : > { %v1097_v21 = vpop.eup %1096  ;;  %1104 = vpow2.f32 %v779_v17  ;;  %v744_v23 = vmul.f32 %v1398_v33, %v725_v18  ;;  %v728_v24 = vadd.f32 %v1060_v62, %v1024_v19 }
 0x187   : > { %v1099_v20 = vpop.eup %1098  ;;  %v936_v25 = vadd.f32 -1.0, %v1097_v21  ;;  %v793_v31 = vsel %vm761_vm15, %v753_v46, %v934_v22 }
 0x188   : > { %v1101_v26 = vpop.eup %1100  ;;  %v935_v27 = vadd.f32 -1.0, %v1099_v20  ;;  %v759_v28 = vadd.f32 %v1403_v39, %v744_v23  ;;  %v745_v29 = vmul.f32 %v1398_v33, %v728_v24 }
 0x189   : > { %v937_v30 = vadd.f32 -1.0, %v1101_v26  ;;  %v795_v36 = vsel %vm763_vm0, %v755_v49, %v936_v25 }
 0x18a   : > { %v794_v32 = vsel %vm762_vm2, %v754_v54, %v935_v27  ;;  %v781_v34 = vmul.f32 1.442695, %v759_v28  ;;  %v760_v35 = vadd.f32 %v1403_v39, %v745_v29  ;;  %vm767_vm5 = vcmp.gt.f32.partialorder %v759_v28, 0.0 }
 0x18b   : > { %v796_v37 = vsel %vm764_vm1, %v756_v60, %v937_v30  ;;  %v965_v38 = vpack.c.bf16 %v794_v32, %v793_v31 }
 0x18c   : > { %v970_v33 = vpack.c.bf16 %v796_v37, %v795_v36  ;;  %1106 = vpow2.f32 %v781_v34  ;;  %v783_v40 = vmul.f32 1.442695, %v760_v35  ;;  %vm768_vm6 = vcmp.gt.f32.partialorder %v760_v35, 0.0 }
 0x18d   : > { %966 = vst [vmem:[%s1424_s29] sm:$0xff] %v965_v38  }
 0x18e   : > { %982 = vst [vmem:[%s1424_s29 + $0x8] sm:$0xff] %v970_v33   ;;  %1108 = vpow2.f32 %v783_v40 }
 0x18f   : > { %v1103_v41 = vpop.eup %1102 }
 0x190   : > { %v1105_v42 = vpop.eup %1104  ;;  %v938_v0 = vadd.f32 -1.0, %v1103_v41 }
 0x191   : > { %v939_v43 = vadd.f32 -1.0, %v1105_v42 }
 0x192   : > { %v797_v44 = vsel %vm765_vm3, %v757_v7, %v938_v0 }
 0x193   : > { %v798_v45 = vsel %vm766_vm4, %v758_v9, %v939_v43 }
 0x194   : > { %v975_v39 = vpack.c.bf16 %v798_v45, %v797_v44 }
 0x196   : > { %v1107_v46 = vpop.eup %1106  ;;  %983 = vst [vmem:[%s1424_s29 + $0x10] sm:$0xff] %v975_v39  }
 0x197   : > { %v940_v47 = vadd.f32 -1.0, %v1107_v46 }
 0x198   : > { %v1109_v48 = vpop.eup %1108 }
 0x199   : > { %v941_v49 = vadd.f32 -1.0, %v1109_v48  ;;  %v799_v50 = vsel %vm767_vm5, %v759_v28, %v940_v47 }
 0x19b   : > { %v800_v51 = vsel %vm768_vm6, %v760_v35, %v941_v49 }
 0x19c   : > { %v980_v52 = vpack.c.bf16 %v800_v51, %v799_v50 }
 0x19e   : > { %984 = vst [vmem:[%s1424_s29 + $0x18] sm:$0xff] %v980_v52  }
 0x19f PF: > { %s14_s15 = sadd.s32 1, %s1116_s15  }
 0x1a0   : > { %p11_p4 = scmp.ge.s32.totalorder %s14_s15, 4  }
 0x1a2   :  { %13 = sbr.rel (!%p11_p4) target bundleno = 1 (0x1), region = 69 }

// kernel: adecoder_forward.6
= control target key start
LH: loop header
LB: loop body
LE: loop exit
PB: predicated region body
PF: predicated region fallthrough
CT: control target
= control target key end

     0   :  { %s1734_s18 = smov 0   ;;  %s2185_s0 = inlined_call_operand.vmem [shape: bf16[2,4,7,64], index: 0, kind: input, shape index: {}]   ;;  %s2186_s1 = inlined_call_operand.vmem [shape: f32[2,4,7,64], index: 1, kind: input, shape index: {}]   ;;  %s2187_s2 = inlined_call_operand.vmem [shape: bf16[768,64], index: 2, kind: input, shape index: {}]   ;;  %s2188_s3 = inlined_call_operand.vmem [shape: f32[1,64], index: 3, kind: input, shape index: {}]   ;;  %s2189_s4 = inlined_call_operand.vmem [shape: f32[1,64], index: 4, kind: input, shape index: {}]   ;;  %s2190_s5 = inlined_call_operand.vmem [shape: bf16[2,64,64], index: 5, kind: output, shape index: {}]  }
   0x1 LB: > { %s1382_s19 = sadd.s32 4294967295, %s1701_s18   ;;  %p1386_p0 = scmp.ge.s32.totalorder %s1701_s18, 1  ;;  %s1701_s18 = sphi %s1734_s18, %s15_s18  }
   0x2   : > { %p197_p1 = scmp.lt.s32.totalorder %s1701_s18, 3 }
   0x4   : > { %p198_p2 = pnand %p1386_p0, %p197_p1 }
   0x5   : > { %p230_p3 = scmp.lt.s32.totalorder (!%p198_p2), %s1382_s19, 1  ;;  %v1631_v0 = vld [vmem:[%s2187_s2 + $0xc0] sm:$0xff] (!%p198_p2)   ;;  %v1635_v4 = vld [vmem:[%s2187_s2 + $0xc8] sm:$0xff] (!%p198_p2)   ;;  %s1703_s13 = smov (!%p198_p2), 64   ;;  %v1639_v24 = vld [vmem:[%s2187_s2 + $0xd0] sm:$0xff] (!%p198_p2)   ;;  %vm246_vm0 = vcmask (!%p198_p2), 1044480  }
   0x6   : > { %201 = sbr.rel (%p198_p2) target bundleno = 435 (0x1b3), region = 40  ;;  %v1632_v1 = vld [vmem:[%s2187_s2 + $0x80] sm:$0xff] (!%p198_p2)   ;;  %1522 = vmatprep.subr.bf16.mxu1 (!%p198_p2), %v1631_v0  ;;  %v1636_v11 = vld [vmem:[%s2187_s2 + $0x88] sm:$0xff] (!%p198_p2)   ;;  %v1640_v27 = vld [vmem:[%s2187_s2 + $0x90] sm:$0xff] (!%p198_p2)   ;;  %vm247_vm1 = vsmask.f32 (!%p198_p2), 4352 }
   0x7   : > { %v1633_v2 = vld [vmem:[%s2187_s2 + $0x40] sm:$0xff] (!%p198_p2)   ;;  %1523 = vmatpush3.bf16.msra.mxu1 (!%p198_p2), %v1632_v1  ;;  %v1637_v15 = vld [vmem:[%s2187_s2 + $0x48] sm:$0xff] (!%p198_p2)   ;;  %v1641_v29 = vld [vmem:[%s2187_s2 + $0x50] sm:$0xff] (!%p198_p2)   ;;  %vm371_vm3 = vcmask (!%p198_p2), 520193   ;;  %vm350_vm4 = vsmask.f32 (!%p198_p2), 7938 }
   0x8   : > { %v1634_v3 = vld [vmem:[%s2187_s2] sm:$0xff] (!%p198_p2)   ;;  %1482 = vmatprep.subr.bf16.mxu0 (!%p198_p2), %v1633_v2  ;;  %1524 = vmatprep.subr.bf16.mxu1 (!%p198_p2), %v1635_v4  ;;  %v1638_v20 = vld [vmem:[%s2187_s2 + $0x8] sm:$0xff] (!%p198_p2)   ;;  %v1642_v31 = vld [vmem:[%s2187_s2 + $0x10] sm:$0xff] (!%p198_p2)   ;;  %vm324_vm6 = vcmask (!%p198_p2), 519168   ;;  %vm325_vm7 = vsmask.f32 (!%p198_p2), 3328 }
   0x9   : > { %1483 = vmatpush3.bf16.msra.mxu0 (!%p198_p2), %v1634_v3  ;;  %v1643_v34 = vld [vmem:[%s2187_s2 + $0xd8] sm:$0xff] (!%p198_p2)   ;;  %v1647_v42 = vld [vmem:[%s2187_s2 + $0xe0] sm:$0xff] (!%p198_p2)   ;;  %v1651_v50 = vld [vmem:[%s2187_s2 + $0xe8] sm:$0xff] (!%p198_p2)   ;;  %vm380_vm10 = vcmask (!%p198_p2), 1044993   ;;  %vm334_vm12 = vcmask (!%p198_p2), 1043968  }
   0xa   : > { %1484 = vmatprep.subr.bf16.mxu0 (!%p198_p2), %v1637_v15  ;;  %v1644_v36 = vld [vmem:[%s2187_s2 + $0x98] sm:$0xff] (!%p198_p2)   ;;  %v1648_v44 = vld [vmem:[%s2187_s2 + $0xa0] sm:$0xff] (!%p198_p2)   ;;  %v1652_v52 = vld [vmem:[%s2187_s2 + $0xa8] sm:$0xff] (!%p198_p2)  }
   0xb   : > { %1525 = vmatpush3.bf16.msra.mxu1 (!%p198_p2), %v1636_v11  ;;  %v1645_v38 = vld [vmem:[%s2187_s2 + $0x58] sm:$0xff] (!%p198_p2)   ;;  %v1649_v46 = vld [vmem:[%s2187_s2 + $0x60] sm:$0xff] (!%p198_p2)   ;;  %v255_v54 = vld [vmem:[#allocation2 + $0x10] sm:$0x1f] (!%p198_p2) }
   0xc   : > { %1526 = vmatprep.subr.bf16.mxu1 (!%p198_p2), %v1639_v24  ;;  %v1646_v40 = vld [vmem:[%s2187_s2 + $0x18] sm:$0xff] (!%p198_p2)   ;;  %v1650_v48 = vld [vmem:[%s2187_s2 + $0x20] sm:$0xff] (!%p198_p2)   ;;  %vm1859_vm2 = vmand (!%p198_p2), %vm246_vm0, %vm247_vm1 }
   0xd   : > { %s2206_s19 = smov (!%p230_p3, %s1382_s19), 1  ;;  %1485 = vmatpush3.bf16.msra.mxu0 %v1638_v20  ;;  %v282_v55 = vld [vmem:[#allocation2 + $0x58] sm:$0x1f]  ;;  %v252_v58 = vld [vmem:[#allocation2 + $0x8] sm:$0x1f]  ;;  %v256_v60 = vsel %vm1859_vm2, 0, %v255_v54  ;;  %vm1880_vm5 = vmand %vm371_vm3, %vm247_vm1 }
   0xe   : > { %s1472_s26 = sshll.u32 %s2206_s19, 5  ;;  %s1471_s14 = sshll.u32 %s2206_s19, 4  ;;  %1486 = vmatprep.subr.bf16.mxu0 %v1641_v29  ;;  %v279_v59 = vld [vmem:[#allocation2 + $0x50] sm:$0x1f]  ;;  %v283_v61 = vsel %vm1859_vm2, 0, %v282_v55  ;;  %v253_v62 = vsel %vm1859_vm2, 0, %v252_v58  ;;  %vm1899_vm8 = vmand %vm324_vm6, %vm350_vm4 }
   0xf   : > { %s239_s8 = scalar_lea.vmem %s2186_s1, %s1472_s26  ;;  %s1786_s23 = scalar_lea.vmem %s2185_s0, %s1471_s14  ;;  %1527 = vmatpush3.bf16.msra.mxu1 %v1640_v27  ;;  %v280_v63 = vsel %vm1859_vm2, 0, %v279_v59  ;;  %257 = vst [vmem:[#allocation2 + $0x10] sm:$0x1f] %v256_v60  ;;  %284 = vst [vmem:[#allocation2 + $0x58] sm:$0x1f] %v283_v61  ;;  %v1653_v2 = vld [vmem:[%s2187_s2 + $0x68] sm:$0xff]  }
  0x10   : > { %v322_v5 = vld [vmem:[%s239_s8] sm:$0x7f]  ;;  %v1395_v6 = vld [vmem:[%s239_s8 + $0x8] sm:$0x7f]  ;;  %v1398_v9 = vld [vmem:[%s239_s8 + $0x10] sm:$0x7f]  ;;  %1528 = vmatprep.subr.bf16.mxu1 %v1643_v34  ;;  %s2164_s22 = scalar_lea.vmem %s2190_s5, %s1472_s26 }
  0x11   : > { %v323_v7 = vpack.c.bf16 %v322_v5, %v322_v5  ;;  %v407_v8 = vpack.c.bf16 %v1395_v6, %v1395_v6  ;;  %v1401_v10 = vld [vmem:[%s239_s8 + $0x18] sm:$0x7f]  ;;  %v1771_v18 = vpack.c.bf16 %v1398_v9, %v1398_v9  ;;  %v1802_v32 = vld [vmem:[%s1786_s23] sm:$0xf]  ;;  %1487 = vmatpush3.bf16.msra.mxu0 %v1642_v31  ;;  %v1821_v41 = vld [vmem:[%s1786_s23 + $0x4] sm:$0xf] }
  0x12   : > { %v1778_v22 = vpack.c.bf16 %v1401_v10, %v1401_v10  ;;  %1488 = vmatprep.subr.bf16.mxu0 %v1645_v38  ;;  %v1828_v43 = vcombine.low %v1802_v32, %v1802_v32  ;;  %v1848_v51 = vcombine.low %v1821_v41, %v1821_v41  ;;  %254 = vst [vmem:[#allocation2 + $0x8] sm:$0x1f] %v253_v62  ;;  %281 = vst [vmem:[#allocation2 + $0x50] sm:$0x1f] %v280_v63  ;;  %v1654_v5 = vld [vmem:[%s2187_s2 + $0x28] sm:$0xff]   ;;  %v1656_v9 = vld [vmem:[%s2187_s2 + $0xb0] sm:$0xff]  }
  0x13   : > { %v376_v12 = vrot.slane %v323_v7, 7  ;;  %v356_v13 = vshrl.u32 %v323_v7, 16  ;;  %v359_v14 = vshll.u32 %v323_v7, 16  ;;  %v433_v16 = vshrl.u32 %v407_v8, 16  ;;  %1529 = vmatpush3.bf16.msra.mxu1 %v1644_v36  ;;  %v270_v10 = vld [vmem:[#allocation2 + $0x38] sm:$0x1f]  ;;  %vm1911_vm9 = vmand %vm324_vm6, %vm325_vm7 }
  0x14   : > { %v436_v17 = vshll.u32 %v407_v8, 16  ;;  %v505_v26 = vshrl.u32 %v1771_v18, 16  ;;  %v450_v28 = vrot.slane %v407_v8, 7  ;;  %v577_v30 = vshrl.u32 %v1778_v22, 16  ;;  %1530 = vmatprep.subr.bf16.mxu1 %v1647_v42  ;;  %v1657_v29 = vld [vmem:[%s2187_s2 + $0x70] sm:$0xff]   ;;  %v1659_v34 = vld [vmem:[%s2187_s2 + $0xf8] sm:$0xff]   ;;  %vm2041_vm11 = vmand %vm380_vm10, %vm247_vm1 }
  0x15   : > { %377 = vrot.lane.b32.xlu1 %v376_v12, %s1703_s13  ;;  %v358_v19 = vrot.slane %v356_v13, 7  ;;  %v435_v21 = vrot.slane %v433_v16, 7  ;;  %v508_v33 = vshll.u32 %v1771_v18, 16  ;;  %v580_v37 = vshll.u32 %v1778_v22, 16  ;;  %1489 = vmatpush3.bf16.msra.mxu0 %v1646_v40  ;;  %v249_v16 = vld [vmem:[#allocation2] sm:$0x1f]  ;;  %vm2051_vm13 = vmand %vm334_vm12, %vm350_vm4 }
  0x16   : > { %v507_v35 = vrot.slane %v505_v26, 7  ;;  %v579_v39 = vrot.slane %v577_v30, 7  ;;  %v522_v49 = vrot.slane %v1771_v18, 7  ;;  %1490 = vmatprep.subr.bf16.mxu0 %v1649_v46  ;;  %v343_v53 = vshrl.u32 %v1828_v43, 16  ;;  %v1658_v31 = vld [vmem:[%s2187_s2 + $0x30] sm:$0xff]   ;;  %v1660_v36 = vld [vmem:[%s2187_s2 + $0xb8] sm:$0xff]   ;;  %vm2065_vm14 = vmand %vm334_vm12, %vm325_vm7 }
  0x17   : > { %v361_v23 = vor.u32 %v359_v14, %v358_v19  ;;  %v438_v25 = vor.u32 %v436_v17, %v435_v21  ;;  %1531 = vmatpush3.bf16.msra.mxu1 %v1648_v44  ;;  %v594_v56 = vrot.slane %v1778_v22, 7  ;;  %v346_v1 = vshll.u32 %v1828_v43, 16  ;;  %v297_v14 = vld [vmem:[#allocation2 + $0x80] sm:$0x1f]  ;;  %v276_v19 = vld [vmem:[#allocation2 + $0x48] sm:$0x1f] }
  0x18   : > { %v510_v45 = vor.u32 %v508_v33, %v507_v35  ;;  %v582_v47 = vor.u32 %v580_v37, %v579_v39  ;;  %1532 = vmatprep.subr.bf16.mxu1 %v1651_v50  ;;  %v345_v0 = vrot.slane %v343_v53, 7  ;;  %v422_v3 = vshrl.u32 %v1848_v51, 16  ;;  %v373_v21 = vld [vmem:[#allocation2 + $0x10] sm:$0x1e]  ;;  %v1935_v35 = vld [vmem:[%s1786_s23 + $0x8] sm:$0xf] }
  0x19   : > { %362 = vrot.lane.b32.xlu0 %v361_v23, %s1703_s13  ;;  %439 = vrot.lane.b32.xlu1 %v438_v25, %s1703_s13  ;;  %v369_v6 = vrot.slane %v1828_v43, 7  ;;  %v425_v11 = vshll.u32 %v1848_v51, 16  ;;  %v271_v13 = vsel %vm1859_vm2, 0, %v270_v10  ;;  %v298_v17 = vsel %vm1859_vm2, 0, %v297_v14  ;;  %v352_v23 = vld [vmem:[#allocation2 + $0x8] sm:$0xf] }
  0x1a   : > { %1491 = vmatpush3.bf16.msra.mxu0 %v1650_v48  ;;  %v424_v15 = vrot.slane %v422_v3, 7  ;;  %272 = vst [vmem:[#allocation2 + $0x38] sm:$0x1f] %v271_v13  ;;  %299 = vst [vmem:[#allocation2 + $0x80] sm:$0x1f] %v298_v17  ;;  %v1662_v54 = vld [vmem:[%s2187_s2 + $0x38] sm:$0xff]   ;;  %v1963_v55 = vcombine.low %v1935_v35, %v1935_v35 }
  0x1b   : > { %1533 = vmatpush3.bf16.msra.mxu1 %v1652_v52  ;;  %1492 = vmatprep.subr.bf16.mxu0 %v1653_v2  ;;  %v374_v24 = vsel %vm1880_vm5, %v369_v6, %v373_v21  ;;  %v391_v26 = vld [vmem:[#allocation2 + $0x50] sm:$0xf]  ;;  %v273_v37 = vld [vmem:[#allocation2 + $0x40] sm:$0x1f]  ;;  %v300_v38 = vld [vmem:[#allocation2 + $0x88] sm:$0x1f] }
  0x1c   : > { %375 = vst [vmem:[#allocation2 + $0x10] sm:$0x1e] %v374_v24  ;;  %v427_v33 = vor.u32 %v425_v11, %v424_v15  ;;  %v267_v39 = vld [vmem:[#allocation2 + $0x30] sm:$0x1f]  ;;  %v274_v42 = vsel %vm1859_vm2, 0, %v273_v37  ;;  %v301_v43 = vsel %vm1859_vm2, 0, %v300_v38 }
  0x1d   : > { %331 = vrot.lane.b32.xlu0 %v323_v7, %s1703_s13  ;;  %451 = vrot.lane.b32.xlu1 %v450_v28, %s1703_s13  ;;  %v1655_v7 = vld [vmem:[%s2187_s2 + $0xf0] sm:$0xff]   ;;  %v277_v28 = vsel %vm1859_vm2, 0, %v276_v19  ;;  %v268_v44 = vsel %vm1859_vm2, 0, %v267_v39  ;;  %275 = vst [vmem:[#allocation2 + $0x40] sm:$0x1f] %v274_v42  ;;  %v445_v58 = vrot.slane %v1848_v51, 7 }
  0x1e   : > { %1493 = vmatpush3.bf16.msra.mxu0 %v1654_v5  ;;  %1534 = vmatprep.subr.bf16.mxu1 %v1655_v7  ;;  %278 = vst [vmem:[#allocation2 + $0x48] sm:$0x1f] %v277_v28  ;;  %302 = vst [vmem:[#allocation2 + $0x88] sm:$0x1f] %v301_v43  ;;  %v258_v59 = vld [vmem:[#allocation2 + $0x18] sm:$0x1f] }
  0x1f   : > { %1535 = vmatpush3.bf16.msra.mxu1 %v1656_v9  ;;  %1494 = vmatprep.subr.bf16.mxu0 %v1657_v29  ;;  %269 = vst [vmem:[#allocation2 + $0x30] sm:$0x1f] %v268_v44  ;;  %v1967_v60 = vld [vmem:[%s1786_s23 + $0xc] sm:$0xf]  ;;  %v259_v62 = vsel %vm1859_vm2, 0, %v258_v59  ;;  %v1663_v63 = vld [vmem:[%s2187_s2 + $0x140] sm:$0xff]  }
  0x20   : > { %1536 = vmatprep.subr.bf16.mxu1 %v1659_v34  ;;  %260 = vst [vmem:[#allocation2 + $0x18] sm:$0x1f] %v259_v62  ;;  %v494_v51 = vshrl.u32 %v1963_v55, 16  ;;  %v1989_v9 = vcombine.low %v1967_v60, %v1967_v60  ;;  %v497_v11 = vshll.u32 %v1963_v55, 16  ;;  %v312_v19 = vld [vmem:[#allocation2 + $0xa8] sm:$0x1f] }
  0x21   : > { %412 = vrot.lane.b32.xlu0 %v407_v8, %s1703_s13  ;;  %484 = vrot.lane.b32.xlu1 %v1771_v18, %s1703_s13  ;;  %v348_v8 = vor.u32 %v346_v1, %v345_v0  ;;  %v250_v18 = vsel %vm1859_vm2, 0, %v249_v16  ;;  %v429_v40 = vld [vmem:[#allocation2 + $0x38] sm:$0xf]  ;;  %v463_v46 = vld [vmem:[#allocation2 + $0x80] sm:$0xf]  ;;  %v313_v21 = vsel %vm1859_vm2, 0, %v312_v19 }
  0x22   : > { %251 = vst [vmem:[#allocation2] sm:$0x1f] %v250_v18  ;;  %1495 = vmatpush3.bf16.msra.mxu0 %v1658_v31  ;;  %v464_v50 = vsel %vm1899_vm8, %v427_v33, %v463_v46  ;;  %v288_v0 = vld [vmem:[#allocation2 + $0x68] sm:$0x1f]  ;;  %v496_v15 = vrot.slane %v494_v51, 7 }
  0x23   : > { %v353_v27 = vsel %vm1899_vm8, %v348_v8, %v352_v23  ;;  %v392_v30 = vsel %vm1899_vm8, %v348_v8, %v391_v26  ;;  %1537 = vmatpush3.bf16.msra.mxu1 %v1660_v36  ;;  %465 = vst [vmem:[#allocation2 + $0x80] sm:$0xf] %v464_v50  ;;  %v289_v7 = vsel %vm1859_vm2, 0, %v288_v0  ;;  %v315_v8 = vld [vmem:[#allocation2 + $0xb0] sm:$0x1f]  ;;  %v569_v36 = vshll.u32 %v1989_v9, 16 }
  0x24   : > { %354 = vst [vmem:[#allocation2 + $0x8] sm:$0xf] %v353_v27  ;;  %393 = vst [vmem:[#allocation2 + $0x50] sm:$0xf] %v392_v30  ;;  %1602 = vmatprep.subr.bf16.mxu1 %v1663_v63  ;;  %v447_v1 = vld [vmem:[#allocation2 + $0x40] sm:$0x1e]  ;;  %v499_v24 = vor.u32 %v497_v11, %v496_v15 }
  0x25   : > { %511 = vrot.lane.b32.xlu0 %v510_v45, %s1703_s13  ;;  %583 = vrot.lane.b32.xlu1 %v582_v47, %s1703_s13  ;;  %v1661_v45 = vld [vmem:[%s2187_s2 + $0x78] sm:$0xff]   ;;  %v430_v47 = vsel %vm1899_vm8, %v427_v33, %v429_v40  ;;  %v469_v2 = vld [vmem:[#allocation2 + $0x88] sm:$0x1e]  ;;  %290 = vst [vmem:[#allocation2 + $0x68] sm:$0x1f] %v289_v7  ;;  %v316_v14 = vsel %vm1859_vm2, 0, %v315_v8 }
  0x26   : > { %431 = vst [vmem:[#allocation2 + $0x38] sm:$0xf] %v430_v47  ;;  %1496 = vmatprep.subr.bf16.mxu0 %v1661_v45  ;;  %v408_v3 = vld [vmem:[#allocation2 + $0x30] sm:$0xf]  ;;  %v470_v5 = vsel %vm1880_vm5, %v445_v58, %v469_v2  ;;  %317 = vst [vmem:[#allocation2 + $0xb0] sm:$0x1f] %v316_v14 }
  0x27   : > { %1497 = vmatpush3.bf16.msra.mxu0 %v1662_v54  ;;  %471 = vst [vmem:[#allocation2 + $0x88] sm:$0x1e] %v470_v5  ;;  %v285_v16 = vld [vmem:[#allocation2 + $0x60] sm:$0x1f]  ;;  %v604_v17 = vld [vmem:[#allocation2 + $0x18] sm:$0xff]  ;;  %v517_v27 = vrot.slane %v1963_v55, 7 }
  0x28   : > { %1562 = vmatprep.subr.bf16.mxu0 %v1663_v63  ;;  %v286_v18 = vsel %vm1859_vm2, 0, %v285_v16  ;;  %1106 = vmatprep.mubr.bf16.mxu1 %v604_v17  ;;  %v318_v23 = vld [vmem:[#allocation2 + $0xb8] sm:$0x1f]  ;;  %314 = vst [vmem:[#allocation2 + $0xa8] sm:$0x1f] %v313_v21  ;;  %v1665_v21 = vld [vmem:[%s2187_s2 + $0x148] sm:$0xff]  }
  0x29   : > { %523 = vrot.lane.b32.xlu0 %v522_v49, %s1703_s13  ;;  %595 = vrot.lane.b32.xlu1 %v594_v56, %s1703_s13  ;;  %v327_v48 = vld [vmem:[#allocation2] sm:$0xf]  ;;  %v294_v49 = vld [vmem:[#allocation2 + $0x78] sm:$0x1f]  ;;  %v385_v56 = vld [vmem:[#allocation2 + $0x48] sm:$0xf] }
  0x2a   : > { %v328_v52 = vsel %vm1911_vm9, %v1802_v32, %v327_v48  ;;  %v295_v53 = vsel %vm1859_vm2, 0, %v294_v49  ;;  %v386_v61 = vsel %vm1911_vm9, %v1802_v32, %v385_v56  ;;  %v448_v32 = vsel %vm1880_vm5, %v445_v58, %v447_v1  ;;  %287 = vst [vmem:[#allocation2 + $0x60] sm:$0x1f] %v286_v18  ;;  %v306_v29 = vld [vmem:[#allocation2 + $0x98] sm:$0x1f]  ;;  %v1664_v18 = vld [vmem:[%s2187_s2 + $0x100] sm:$0xff]  }
  0x2b   : > { %329 = vst [vmem:[#allocation2] sm:$0xf] %v328_v52  ;;  %296 = vst [vmem:[#allocation2 + $0x78] sm:$0x1f] %v295_v53  ;;  %v319_v26 = vsel %vm1859_vm2, 0, %v318_v23  ;;  %v307_v33 = vsel %vm1859_vm2, 0, %v306_v29 }
  0x2c   : > { %387 = vst [vmem:[#allocation2 + $0x48] sm:$0xf] %v386_v61  ;;  %449 = vst [vmem:[#allocation2 + $0x40] sm:$0x1e] %v448_v32  ;;  %v501_v28 = vld [vmem:[#allocation2 + $0x68] sm:$0xf] }
  0x2d   : > { %556 = vrot.lane.b32.xlu0 %v1778_v22, %s1703_s13  ;;  %v397_v22 = vld [vmem:[#allocation2 + $0x58] sm:$0x1e]  ;;  %320 = vst [vmem:[#allocation2 + $0xb8] sm:$0x1f] %v319_v26  ;;  %v535_v30 = vld [vmem:[#allocation2 + $0xb0] sm:$0xf]  ;;  %v502_v31 = vsel %vm1899_vm8, %v499_v24, %v501_v28 }
  0x2e   : > { %v398_v25 = vsel %vm1880_vm5, %v369_v6, %v397_v22  ;;  %v409_v6 = vsel %vm1911_vm9, %v1821_v41, %v408_v3  ;;  %v291_v22 = vld [vmem:[#allocation2 + $0x70] sm:$0x1f]  ;;  %503 = vst [vmem:[#allocation2 + $0x68] sm:$0xf] %v502_v31  ;;  %v536_v37 = vsel %vm1899_vm8, %v499_v24, %v535_v30  ;;  %308 = vst [vmem:[#allocation2 + $0x98] sm:$0x1f] %v307_v33 }
  0x2f   : > { %399 = vst [vmem:[#allocation2 + $0x58] sm:$0x1e] %v398_v25  ;;  %410 = vst [vmem:[#allocation2 + $0x30] sm:$0xf] %v409_v6  ;;  %v292_v25 = vsel %vm1859_vm2, 0, %v291_v22  ;;  %v1666_v29 = vld [vmem:[%s2187_s2 + $0x108] sm:$0xff]  }
  0x30   : > { %293 = vst [vmem:[#allocation2 + $0x70] sm:$0x1f] %v292_v25  ;;  %537 = vst [vmem:[#allocation2 + $0xb0] sm:$0xf] %v536_v37  ;;  %v309_v39 = vld [vmem:[#allocation2 + $0xa0] sm:$0x1f] }
  0x31   : > { %v480_v38 = vld [vmem:[#allocation2 + $0x60] sm:$0xf]  ;;  %v529_v40 = vld [vmem:[#allocation2 + $0xa8] sm:$0xf]  ;;  %v310_v43 = vsel %vm1859_vm2, 0, %v309_v39 }
  0x32   : > { %v457_v10 = vld [vmem:[#allocation2 + $0x78] sm:$0xf]  ;;  %v481_v42 = vsel %vm1911_vm9, %v1935_v35, %v480_v38  ;;  %v530_v44 = vsel %vm1911_vm9, %v1935_v35, %v529_v40  ;;  %311 = vst [vmem:[#allocation2 + $0xa0] sm:$0x1f] %v310_v43  ;;  %v303_v50 = vld [vmem:[#allocation2 + $0x90] sm:$0x1f] }
  0x33   : > { %v458_v13 = vsel %vm1911_vm9, %v1821_v41, %v457_v10  ;;  %v566_v41 = vshrl.u32 %v1989_v9, 16  ;;  %482 = vst [vmem:[#allocation2 + $0x60] sm:$0xf] %v481_v42  ;;  %531 = vst [vmem:[#allocation2 + $0xa8] sm:$0xf] %v530_v44  ;;  %v304_v52 = vsel %vm1859_vm2, 0, %v303_v50 }
  0x34   : > { %459 = vst [vmem:[#allocation2 + $0x78] sm:$0xf] %v458_v13  ;;  %v541_v46 = vld [vmem:[#allocation2 + $0xb8] sm:$0x1e]  ;;  %v589_v35 = vrot.slane %v1989_v9, 7 }
  0x35   : > { %v568_v34 = vrot.slane %v566_v41, 7  ;;  %v542_v48 = vsel %vm1880_vm5, %v517_v27, %v541_v46  ;;  %v573_v53 = vld [vmem:[#allocation2 + $0x98] sm:$0xf]  ;;  %305 = vst [vmem:[#allocation2 + $0x90] sm:$0x1f] %v304_v52 }
  0x36   : > { %543 = vst [vmem:[#allocation2 + $0xb8] sm:$0x1e] %v542_v48  ;;  %v264_v59 = vld [vmem:[#allocation2 + $0x28] sm:$0x1f]  ;;  %v261_v61 = vld [vmem:[#allocation2 + $0x20] sm:$0x1f] }
  0x37   : > { %v519_v45 = vld [vmem:[#allocation2 + $0x70] sm:$0x1e]  ;;  %v571_v49 = vor.u32 %v569_v36, %v568_v34  ;;  %v265_v63 = vsel %vm1859_vm2, 0, %v264_v59  ;;  %v262_v12 = vsel %vm1859_vm2, 0, %v261_v61  ;;  %v400_v51 = vld [vmem:[#allocation2 + $0x58] sm:$0x1e] }
  0x38   : > { %v520_v47 = vsel %vm1880_vm5, %v517_v27, %v519_v45  ;;  %266 = vst [vmem:[#allocation2 + $0x28] sm:$0x1f] %v265_v63  ;;  %263 = vst [vmem:[#allocation2 + $0x20] sm:$0x1f] %v262_v12  ;;  %v382_v0 = vld [vmem:[#allocation2 + $0x10] sm:$0x1e] }
  0x39   : > { %521 = vst [vmem:[#allocation2 + $0x70] sm:$0x1e] %v520_v47  ;;  %v574_v54 = vsel %vm1899_vm8, %v571_v49, %v573_v53  ;;  %v591_v55 = vld [vmem:[#allocation2 + $0xa0] sm:$0x1e]  ;;  %v366_v2 = vld [vmem:[#allocation2 + $0x8] sm:$0xf] }
  0x3a   : > { %575 = vst [vmem:[#allocation2 + $0x98] sm:$0xf] %v574_v54  ;;  %v592_v56 = vsel %vm1880_vm5, %v589_v35, %v591_v55  ;;  %v394_v3 = vld [vmem:[#allocation2 + $0x50] sm:$0xf]  ;;  %v442_v32 = vld [vmem:[#allocation2 + $0x38] sm:$0xf] }
  0x3b   : > { %593 = vst [vmem:[#allocation2 + $0xa0] sm:$0x1e] %v592_v56  ;;  %v466_v5 = vld [vmem:[#allocation2 + $0x80] sm:$0xf]  ;;  %v388_v15 = vld [vmem:[#allocation2 + $0x48] sm:$0xf] }
  0x3c   : > { %v552_v58 = vld [vmem:[#allocation2 + $0x90] sm:$0xf]  ;;  %v336_v14 = vld [vmem:[#allocation2] sm:$0xf]  ;;  %v472_v17 = vld [vmem:[#allocation2 + $0x88] sm:$0x1e] }
  0x3d   : > { %v553_v62 = vsel %vm1911_vm9, %v1967_v60, %v552_v58  ;;  %v454_v16 = vld [vmem:[#allocation2 + $0x40] sm:$0x1e]  ;;  %v415_v27 = vld [vmem:[#allocation2 + $0x30] sm:$0xf]  ;;  %v460_v28 = vld [vmem:[#allocation2 + $0x78] sm:$0xf] }
  0x3e   : > { %554 = vst [vmem:[#allocation2 + $0x90] sm:$0xf] %v553_v62  ;;  %v487_v30 = vld [vmem:[#allocation2 + $0x60] sm:$0xf]  ;;  %v532_v31 = vld [vmem:[#allocation2 + $0xa8] sm:$0xf] }
  0x3f   : > { %v1667_v34 = vld [vmem:[%s2187_s2 + $0x150] sm:$0xff]   ;;  %v514_v40 = vld [vmem:[#allocation2 + $0x68] sm:$0xf]  ;;  %v1669_v54 = vld [vmem:[%s2187_s2 + $0x158] sm:$0xff]  }
  0x40   : > { %v538_v42 = vld [vmem:[#allocation2 + $0xb0] sm:$0xf]  ;;  %v544_v56 = vld [vmem:[#allocation2 + $0xb8] sm:$0x1e] }
  0x41   : > { %v586_v45 = vld [vmem:[#allocation2 + $0x98] sm:$0xf]  ;;  %v1668_v48 = vld [vmem:[%s2187_s2 + $0x110] sm:$0xff]  }
  0x42   : > { %v526_v55 = vld [vmem:[#allocation2 + $0x70] sm:$0x1e]  ;;  %v598_v61 = vld [vmem:[#allocation2 + $0xa0] sm:$0x1e] }
  0x45   : > { %v559_v1 = vld [vmem:[#allocation2 + $0x90] sm:$0xf] }
  0x87   : > { %v378_v20 = vpop.permute.xlu1 %377 }
  0x88   : > { %v383_v60 = vsel %vm2041_vm11, %v378_v20, %v382_v0  ;;  %v401_v57 = vsel %vm2041_vm11, %v378_v20, %v400_v51  ;;  %v1670_v51 = vld [vmem:[%s2187_s2 + $0x118] sm:$0xff]  }
  0x89   : > { %384 = vst [vmem:[#allocation2 + $0x10] sm:$0x1e] %v383_v60  ;;  %402 = vst [vmem:[#allocation2 + $0x58] sm:$0x1e] %v401_v57  ;;  %v1671_v57 = vld [vmem:[%s2187_s2 + $0x160] sm:$0xff]  }
  0x8b   : > { %v363_v6 = vpop.permute.xlu0 %362  ;;  %v440_v9 = vpop.permute.xlu1 %439 }
  0x8c   : > { %v367_v7 = vsel %vm2051_vm13, %v363_v6, %v366_v2  ;;  %v395_v8 = vsel %vm2051_vm13, %v363_v6, %v394_v3  ;;  %v443_v10 = vsel %vm2051_vm13, %v440_v9, %v442_v32  ;;  %v467_v11 = vsel %vm2051_vm13, %v440_v9, %v466_v5  ;;  %v1672_v5 = vld [vmem:[%s2187_s2 + $0x120] sm:$0xff]   ;;  %v1673_v6 = vld [vmem:[%s2187_s2 + $0x168] sm:$0xff]  }
  0x8d   : > { %368 = vst [vmem:[#allocation2 + $0x8] sm:$0xf] %v367_v7  ;;  %396 = vst [vmem:[#allocation2 + $0x50] sm:$0xf] %v395_v8  ;;  %v1674_v9 = vld [vmem:[%s2187_s2 + $0x128] sm:$0xff]  }
  0x8e   : > { %444 = vst [vmem:[#allocation2 + $0x38] sm:$0xf] %v443_v10  ;;  %468 = vst [vmem:[#allocation2 + $0x80] sm:$0xf] %v467_v11  ;;  %v1675_v10 = vld [vmem:[%s2187_s2 + $0x170] sm:$0xff]  }
  0x8f   : > { %v332_v19 = vpop.permute.xlu0 %331  ;;  %v452_v41 = vpop.permute.xlu1 %451 }
  0x90   : > { %v337_v22 = vsel %vm2065_vm14, %v332_v19, %v336_v14  ;;  %v389_v23 = vsel %vm2065_vm14, %v332_v19, %v388_v15  ;;  %v603_v24 = vld [vmem:[#allocation2 + $0x10] sm:$0xff]  ;;  %v455_v25 = vsel %vm2041_vm11, %v452_v41, %v454_v16  ;;  %v473_v26 = vsel %vm2041_vm11, %v452_v41, %v472_v17  ;;  %v1677_v15 = vld [vmem:[%s2187_s2 + $0x178] sm:$0xff]   ;;  %v605_v41 = vld [vmem:[#allocation2 + $0x20] sm:$0xff] }
  0x91   : > { %338 = vst [vmem:[#allocation2] sm:$0xf] %v337_v22  ;;  %390 = vst [vmem:[#allocation2 + $0x48] sm:$0xf] %v389_v23  ;;  %1107 = vmatmul.mubr.bf16.vlgmr.msra.gmra.mrb[0].mxu1 %v603_v24  ;;  %v1676_v14 = vld [vmem:[%s2187_s2 + $0x130] sm:$0xff]   ;;  %v1678_v17 = vld [vmem:[%s2187_s2 + $0x138] sm:$0xff]  }
  0x92   : > { %456 = vst [vmem:[#allocation2 + $0x40] sm:$0x1e] %v455_v25  ;;  %474 = vst [vmem:[#allocation2 + $0x88] sm:$0x1e] %v473_v26  ;;  %1610 = vmatpush3.bf16.msra.mxu1 %v1664_v18  ;;  %v612_v24 = vld [vmem:[#allocation2 + $0x58] sm:$0xff] }
  0x93   : > { %v413_v33 = vpop.permute.xlu0 %412  ;;  %1603 = vmatprep.subr.bf16.mxu1 %v1665_v21  ;;  %v485_v39 = vpop.permute.xlu1 %484 }
  0x94   : > { %v416_v36 = vsel %vm2065_vm14, %v413_v33, %v415_v27  ;;  %v461_v37 = vsel %vm2065_vm14, %v413_v33, %v460_v28  ;;  %v602_v38 = vld [vmem:[#allocation2 + $0x8] sm:$0xff]  ;;  %v488_v43 = vsel %vm2065_vm14, %v485_v39, %v487_v30  ;;  %v533_v44 = vsel %vm2065_vm14, %v485_v39, %v532_v31  ;;  %v611_v26 = vld [vmem:[#allocation2 + $0x50] sm:$0xff] }
  0x95   : > { %417 = vst [vmem:[#allocation2 + $0x30] sm:$0xf] %v416_v36  ;;  %462 = vst [vmem:[#allocation2 + $0x78] sm:$0xf] %v461_v37  ;;  %1041 = vmatprep.mubr.bf16.mxu0 %v602_v38  ;;  %v608_v47 = vld [vmem:[#allocation2 + $0x38] sm:$0xff]  ;;  %v617_v22 = vld [vmem:[#allocation2 + $0x80] sm:$0xff] }
  0x96   : > { %1611 = vmatpush3.bf16.msra.mxu1 %v1666_v29  ;;  %489 = vst [vmem:[#allocation2 + $0x60] sm:$0xf] %v488_v43  ;;  %534 = vst [vmem:[#allocation2 + $0xa8] sm:$0xf] %v533_v44 }
  0x97   : > { %v512_v46 = vpop.permute.xlu0 %511  ;;  %1604 = vmatprep.subr.bf16.mxu1 %v1667_v34  ;;  %v584_v35 = vpop.permute.xlu1 %583 }
  0x98   : > { %v515_v49 = vsel %vm2051_vm13, %v512_v46, %v514_v40  ;;  %v539_v50 = vsel %vm2051_vm13, %v512_v46, %v538_v42  ;;  %v601_v52 = vld [vmem:[#allocation2] sm:$0xff]  ;;  %v610_v53 = vld [vmem:[#allocation2 + $0x48] sm:$0xff]  ;;  %v587_v59 = vsel %vm2051_vm13, %v584_v35, %v586_v45 }
  0x99   : > { %516 = vst [vmem:[#allocation2 + $0x68] sm:$0xf] %v515_v49  ;;  %540 = vst [vmem:[#allocation2 + $0xb0] sm:$0xf] %v539_v50  ;;  %1042 = vmatmul.mubr.bf16.vlgmr.msra.gmra.mrb[0].mxu0 %v601_v52  ;;  %1114 = vmatprep.mubr.bf16.mxu1 %v610_v53  ;;  %v609_v58 = vld [vmem:[#allocation2 + $0x40] sm:$0xff] }
  0x9a   : > { %1563 = vmatpush3.bf16.msra.mxu0 %v1664_v18  ;;  %1049 = vmatprep.mubr.bf16.mxu0 %v608_v47  ;;  %588 = vst [vmem:[#allocation2 + $0x98] sm:$0xf] %v587_v59  ;;  %v618_v18 = vld [vmem:[#allocation2 + $0x88] sm:$0xff] }
  0x9b   : > { %v524_v62 = vpop.permute.xlu0 %523  ;;  %1564 = vmatprep.subr.bf16.mxu0 %v1665_v21  ;;  %1115 = vmatmul.mubr.bf16.gmra.mrb[4].mxu1 %v609_v58  ;;  %v596_v20 = vpop.permute.xlu1 %595  ;;  %v606_v21 = vld [vmem:[#allocation2 + $0x28] sm:$0xff] }
  0x9c   : > { %v527_v63 = vsel %vm2041_vm11, %v524_v62, %v526_v55  ;;  %v545_v12 = vsel %vm2041_vm11, %v524_v62, %v544_v56  ;;  %1612 = vmatpush3.bf16.msra.mxu1 %v1668_v48  ;;  %v616_v0 = vld [vmem:[#allocation2 + $0x78] sm:$0xff]  ;;  %v599_v60 = vsel %vm2041_vm11, %v596_v20, %v598_v61  ;;  %v607_v2 = vld [vmem:[#allocation2 + $0x30] sm:$0xff] }
  0x9d   : > { %528 = vst [vmem:[#allocation2 + $0x70] sm:$0x1e] %v527_v63  ;;  %546 = vst [vmem:[#allocation2 + $0xb8] sm:$0x1e] %v545_v12  ;;  %1122 = vmatprep.mubr.bf16.mxu1 %v616_v0  ;;  %1605 = vmatprep.subr.bf16.mxu1 %v1669_v54  ;;  %v622_v7 = vld [vmem:[#allocation2 + $0xa8] sm:$0xff]  ;;  %v613_v11 = vld [vmem:[#allocation2 + $0x60] sm:$0xff] }
  0x9e   : > { %1565 = vmatpush3.bf16.msra.mxu0 %v1666_v29  ;;  %600 = vst [vmem:[#allocation2 + $0xa0] sm:$0x1e] %v599_v60 }
  0x9f   : > { %1566 = vmatprep.subr.bf16.mxu0 %v1667_v34  ;;  %v557_v3 = vpop.permute.xlu0 %556 }
  0xa0   : > { %1613 = vmatpush3.bf16.msra.mxu1 %v1670_v51  ;;  %v614_v32 = vld [vmem:[#allocation2 + $0x68] sm:$0xff]  ;;  %v560_v4 = vsel %vm2065_vm14, %v557_v3, %v559_v1  ;;  %v623_v25 = vld [vmem:[#allocation2 + $0xb0] sm:$0xff] }
  0xa1   : > { %1050 = vmatmul.mubr.bf16.gmra.mrb[4].mxu0 %v607_v2  ;;  %1606 = vmatprep.subr.bf16.mxu1 %v1671_v57  ;;  %561 = vst [vmem:[#allocation2 + $0x90] sm:$0xf] %v560_v4  ;;  %v620_v13 = vld [vmem:[#allocation2 + $0x98] sm:$0xff] }
  0xa2   : > { %1567 = vmatpush3.bf16.msra.mxu0 %v1668_v48  ;;  %1057 = vmatprep.mubr.bf16.mxu0 %v614_v32 }
  0xa3   : > { %1568 = vmatprep.subr.bf16.mxu0 %v1669_v54 }
  0xa4   : > { %v615_v8 = vld [vmem:[#allocation2 + $0x70] sm:$0xff]  ;;  %1614 = vmatpush3.bf16.msra.mxu1 %v1672_v5  ;;  %v624_v23 = vld [vmem:[#allocation2 + $0xb8] sm:$0xff] }
  0xa5   : > { %1123 = vmatmul.mubr.bf16.gmra.mrb[8].mxu1 %v615_v8  ;;  %1607 = vmatprep.subr.bf16.mxu1 %v1673_v6  ;;  %v621_v16 = vld [vmem:[#allocation2 + $0xa0] sm:$0xff] }
  0xa6   : > { %1569 = vmatpush3.bf16.msra.mxu0 %v1670_v51  ;;  %1130 = vmatprep.mubr.bf16.mxu1 %v622_v7 }
  0xa7   : > { %1570 = vmatprep.subr.bf16.mxu0 %v1671_v57 }
  0xa8   : > { %1615 = vmatpush3.bf16.msra.mxu1 %v1674_v9  ;;  %v619_v19 = vld [vmem:[#allocation2 + $0x90] sm:$0xff] }
  0xa9   : > { %1058 = vmatmul.mubr.bf16.gmra.mrb[8].mxu0 %v613_v11  ;;  %1608 = vmatprep.subr.bf16.mxu1 %v1675_v10 }
  0xaa   : > { %1571 = vmatpush3.bf16.msra.mxu0 %v1672_v5  ;;  %1065 = vmatprep.mubr.bf16.mxu0 %v620_v13 }
  0xab   : > { %1572 = vmatprep.subr.bf16.mxu0 %v1673_v6 }
  0xac   : > { %1616 = vmatpush3.bf16.msra.mxu1 %v1676_v14 }
  0xad   : > { %1131 = vmatmul.mubr.bf16.gmra.mrb[12].mxu1 %v621_v16  ;;  %1609 = vmatprep.subr.bf16.mxu1 %v1677_v15 }
  0xae   : > { %1573 = vmatpush3.bf16.msra.mxu0 %v1674_v9  ;;  %1187 = vmatprep.mubr.bf16.mxu1 %v618_v18 }
  0xaf   : > { %1574 = vmatprep.subr.bf16.mxu0 %v1675_v10 }
  0xb0   : > { %1617 = vmatpush3.bf16.msra.mxu1 %v1678_v17 }
  0xb1   : > { %1066 = vmatmul.mubr.bf16.gmra.mrb[12].mxu0 %v619_v19 }
  0xb2   : > { %1575 = vmatpush3.bf16.msra.mxu0 %v1676_v14  ;;  %1171 = vmatprep.mubr.bf16.mxu0 %v606_v21 }
  0xb3   : > { %1576 = vmatprep.subr.bf16.mxu0 %v1677_v15 }
  0xb5   : > { %1188 = vmatmul.mubr.bf16.vlgmr.msra.gmra.mrb[16].mxu1 %v617_v22 }
  0xb6   : > { %1577 = vmatpush3.bf16.msra.mxu0 %v1678_v17  ;;  %1195 = vmatprep.mubr.bf16.mxu1 %v624_v23 }
  0xb9   : > { %1172 = vmatmul.mubr.bf16.vlgmr.msra.gmra.mrb[16].mxu0 %v605_v41  ;;  %v1451_v41 = vld [vmem:[%s2188_s3] ss:$0 sm:$0xff] }
  0xba   : > { %1179 = vmatprep.mubr.bf16.mxu0 %v612_v24 }
  0xbd   : > { %1196 = vmatmul.mubr.bf16.gmra.mrb[20].mxu1 %v623_v25 }
  0xc1   : > { %1180 = vmatmul.mubr.bf16.gmra.mrb[20].mxu0 %v611_v26 }
 0x164   : > { %v1538_v27 = vpop.f32.mrb[0].mxu1 }
 0x165   : > { %v1539_v28 = vpop.f32.mrb[1].mxu1 }
 0x166   : > { %v1540_v29 = vadd.f32 %v1539_v28, %v1538_v27  ;;  %v1541_v30 = vpop.f32.mrb[2].mxu1  ;;  %v1452_v28 = vld [vmem:[%s2189_s4] ss:$0 sm:$0xff] }
 0x167   : > { %v1542_v31 = vpop.f32.mrb[3].mxu1 }
 0x168   : > { %v1543_v33 = vadd.f32 %v1542_v31, %v1541_v30 }
 0x16c   : > { %v1498_v34 = vpop.f32.mrb[0].mxu0 }
 0x16d   : > { %v1499_v36 = vpop.f32.mrb[1].mxu0 }
 0x16e   : > { %v1500_v37 = vadd.f32 %v1499_v36, %v1498_v34  ;;  %v1501_v38 = vpop.f32.mrb[2].mxu0  ;;  %v1544_v39 = vpop.f32.mrb[4].mxu1 }
 0x16f   : > { %v1502_v40 = vpop.f32.mrb[3].mxu0  ;;  %v1545_v42 = vpop.f32.mrb[5].mxu1 }
 0x170   : > { %v1109_v43 = vadd.f32 %v1540_v29, %v1500_v37  ;;  %v1503_v44 = vadd.f32 %v1502_v40, %v1501_v38  ;;  %v1546_v45 = vadd.f32 %v1545_v42, %v1544_v39  ;;  %v1547_v46 = vpop.f32.mrb[6].mxu1 }
 0x171   : > { %v1548_v47 = vpop.f32.mrb[7].mxu1 }
 0x172   : > { %v2144_v48 = vadd.f32 %v1543_v33, %v1503_v44  ;;  %v1549_v49 = vadd.f32 %v1548_v47, %v1547_v46 }
 0x174   : > { %v1504_v50 = vpop.f32.mrb[4].mxu0 }
 0x175   : > { %v1505_v52 = vpop.f32.mrb[5].mxu0 }
 0x176   : > { %v1506_v53 = vadd.f32 %v1505_v52, %v1504_v50  ;;  %v1507_v35 = vpop.f32.mrb[6].mxu0 }
 0x177   : > { %v1508_v54 = vpop.f32.mrb[7].mxu0 }
 0x178   : > { %v2146_v55 = vadd.f32 %v1546_v45, %v1506_v53  ;;  %v1509_v56 = vadd.f32 %v1508_v54, %v1507_v35  ;;  %v1550_v58 = vpop.f32.mrb[8].mxu1 }
 0x179   : > { %v1551_v59 = vpop.f32.mrb[9].mxu1 }
 0x17a   : > { %v2148_v61 = vadd.f32 %v1549_v49, %v1509_v56  ;;  %v1552_v62 = vadd.f32 %v1551_v59, %v1550_v58  ;;  %v1553_v63 = vpop.f32.mrb[10].mxu1 }
 0x17b   : > { %v1554_v12 = vpop.f32.mrb[11].mxu1 }
 0x17c   : > { %v1510_v0 = vpop.f32.mrb[8].mxu0  ;;  %v1555_v51 = vadd.f32 %v1554_v12, %v1553_v63 }
 0x17d   : > { %v1511_v20 = vpop.f32.mrb[9].mxu0 }
 0x17e   : > { %v1512_v60 = vadd.f32 %v1511_v20, %v1510_v0  ;;  %v1513_v57 = vpop.f32.mrb[10].mxu0 }
 0x17f   : > { %v1514_v1 = vpop.f32.mrb[11].mxu0 }
 0x180   : > { %v1125_v2 = vadd.f32 %v1552_v62, %v1512_v60  ;;  %v1515_v3 = vadd.f32 %v1514_v1, %v1513_v57  ;;  %v1556_v32 = vpop.f32.mrb[12].mxu1 }
 0x181   : > { %v1557_v5 = vpop.f32.mrb[13].mxu1 }
 0x182   : > { %v1128_v4 = vadd.f32 %v1555_v51, %v1515_v3  ;;  %v1558_v6 = vadd.f32 %v1557_v5, %v1556_v32  ;;  %v1559_v7 = vpop.f32.mrb[14].mxu1 }
 0x183   : > { %v1560_v8 = vpop.f32.mrb[15].mxu1 }
 0x184   : > { %v1516_v9 = vpop.f32.mrb[12].mxu0  ;;  %v1561_v10 = vadd.f32 %v1560_v8, %v1559_v7 }
 0x185   : > { %v1517_v11 = vpop.f32.mrb[13].mxu0 }
 0x186   : > { %v1518_v13 = vadd.f32 %v1517_v11, %v1516_v9  ;;  %v1519_v14 = vpop.f32.mrb[14].mxu0 }
 0x187   : > { %v1520_v15 = vpop.f32.mrb[15].mxu0 }
 0x188   : > { %v1133_v16 = vadd.f32 %v1558_v6, %v1518_v13  ;;  %v1521_v17 = vadd.f32 %v1520_v15, %v1519_v14  ;;  %v1590_v18 = vpop.f32.mrb[16].mxu1 }
 0x189   : > { %v1591_v19 = vpop.f32.mrb[17].mxu1 }
 0x18a   : > { %v1136_v21 = vadd.f32 %v1561_v10, %v1521_v17  ;;  %v1592_v22 = vadd.f32 %v1591_v19, %v1590_v18  ;;  %v1593_v23 = vpop.f32.mrb[18].mxu1 }
 0x18b   : > { %v1594_v24 = vpop.f32.mrb[19].mxu1 }
 0x18c   : > { %v1190_v25 = vadd.f32 %v1592_v22, %v1125_v2  ;;  %v1595_v26 = vadd.f32 %v1594_v24, %v1593_v23  ;;  %v1578_v27 = vpop.f32.mrb[16].mxu0 }
 0x18d   : > { %v1579_v29 = vpop.f32.mrb[17].mxu0 }
 0x18e   : > { %v1215_v30 = vmul.f32 %v1451_v41, %v1190_v25  ;;  %v1193_v31 = vadd.f32 %v1595_v26, %v1128_v4  ;;  %v1580_v33 = vadd.f32 %v1579_v29, %v1578_v27  ;;  %v1581_v34 = vpop.f32.mrb[18].mxu0 }
 0x18f   : > { %v1582_v36 = vpop.f32.mrb[19].mxu0 }
 0x190   : > { %v1230_v37 = vadd.f32 %v1452_v28, %v1215_v30  ;;  %v1216_v38 = vmul.f32 %v1451_v41, %v1193_v31  ;;  %v1174_v39 = vadd.f32 %v1580_v33, %v1109_v43  ;;  %v1583_v40 = vadd.f32 %v1582_v36, %v1581_v34  ;;  %v1596_v42 = vpop.f32.mrb[20].mxu1 }
 0x191   : > { %v1597_v44 = vpop.f32.mrb[21].mxu1 }
 0x192   : > { %v1250_v45 = vmul.f32 1.442695, %v1230_v37  ;;  %v1231_v46 = vadd.f32 %v1452_v28, %v1216_v38  ;;  %v1211_v47 = vmul.f32 %v1451_v41, %v1174_v39  ;;  %v1599_v49 = vpop.f32.mrb[22].mxu1  ;;  %v1177_v50 = vadd.f32 %v1583_v40, %v2144_v48 }
 0x193   : > { %v1598_v52 = vadd.f32 %v1597_v44, %v1596_v42  ;;  %v1600_v53 = vpop.f32.mrb[23].mxu1  ;;  %vm1238_vm15 = vcmp.gt.f32.partialorder %v1230_v37, 0.0 }
 0x194   : > { %1679 = vpow2.f32 %v1250_v45  ;;  %v1252_v35 = vmul.f32 1.442695, %v1231_v46  ;;  %v1226_v54 = vadd.f32 %v1452_v28, %v1211_v47  ;;  %v1584_v56 = vpop.f32.mrb[20].mxu0  ;;  %v1212_v58 = vmul.f32 %v1451_v41, %v1177_v50 }
 0x195   : > { %v1198_v59 = vadd.f32 %v1598_v52, %v1133_v16  ;;  %v1601_v62 = vadd.f32 %v1600_v53, %v1599_v49  ;;  %v1585_v63 = vpop.f32.mrb[21].mxu0  ;;  %vm1239_vm0 = vcmp.gt.f32.partialorder %v1231_v46, 0.0 }
 0x196   : > { %1681 = vpow2.f32 %v1252_v35  ;;  %v1242_v43 = vmul.f32 1.442695, %v1226_v54  ;;  %v1586_v12 = vadd.f32 %v1585_v63, %v1584_v56  ;;  %v1587_v0 = vpop.f32.mrb[22].mxu0  ;;  %v1227_v51 = vadd.f32 %v1452_v28, %v1212_v58 }
 0x197   : > { %v1217_v20 = vmul.f32 %v1451_v41, %v1198_v59  ;;  %v1201_v60 = vadd.f32 %v1601_v62, %v1136_v21  ;;  %v1588_v57 = vpop.f32.mrb[23].mxu0  ;;  %vm1234_vm1 = vcmp.gt.f32.partialorder %v1226_v54, 0.0 }
 0x198   : > { %1683 = vpow2.f32 %v1242_v43  ;;  %v1182_v48 = vadd.f32 %v1586_v12, %v2146_v55  ;;  %v1589_v1 = vadd.f32 %v1588_v57, %v1587_v0  ;;  %v1244_v2 = vmul.f32 1.442695, %v1227_v51 }
 0x199   : > { %v1232_v3 = vadd.f32 %v1452_v28, %v1217_v20  ;;  %v1218_v32 = vmul.f32 %v1451_v41, %v1201_v60  ;;  %vm1235_vm2 = vcmp.gt.f32.partialorder %v1227_v51, 0.0 }
 0x19a   : > { %v1213_v5 = vmul.f32 %v1451_v41, %v1182_v48  ;;  %v1185_v4 = vadd.f32 %v1589_v1, %v2148_v61  ;;  %1685 = vpow2.f32 %v1244_v2 }
 0x19b   : > { %v1254_v6 = vmul.f32 1.442695, %v1232_v3  ;;  %v1233_v7 = vadd.f32 %v1452_v28, %v1218_v32  ;;  %vm1240_vm3 = vcmp.gt.f32.partialorder %v1232_v3, 0.0 }
 0x19c   : > { %v1228_v8 = vadd.f32 %v1452_v28, %v1213_v5  ;;  %v1214_v9 = vmul.f32 %v1451_v41, %v1185_v4 }
 0x19d   : > { %1687 = vpow2.f32 %v1254_v6  ;;  %v1256_v10 = vmul.f32 1.442695, %v1233_v7  ;;  %vm1241_vm4 = vcmp.gt.f32.partialorder %v1233_v7, 0.0 }
 0x19e   : > { %v1680_v11 = vpop.eup %1679  ;;  %v1246_v13 = vmul.f32 1.442695, %v1228_v8  ;;  %v1229_v14 = vadd.f32 %v1452_v28, %v1214_v9  ;;  %vm1236_vm5 = vcmp.gt.f32.partialorder %v1228_v8, 0.0 }
 0x19f   : > { %v1457_v15 = vadd.f32 -1.0, %v1680_v11  ;;  %1689 = vpow2.f32 %v1256_v10 }
 0x1a0   : > { %v1682_v55 = vpop.eup %1681  ;;  %1691 = vpow2.f32 %v1246_v13  ;;  %v1248_v16 = vmul.f32 1.442695, %v1229_v14  ;;  %vm1237_vm7 = vcmp.gt.f32.partialorder %v1229_v14, 0.0 }
 0x1a1   : > { %v1270_v61 = vsel %vm1238_vm15, %v1230_v37, %v1457_v15  ;;  %v1458_v17 = vadd.f32 -1.0, %v1682_v55 }
 0x1a2   : > { %v1684_v18 = vpop.eup %1683  ;;  %v1478_v19 = vpack.c.bf16 %v1270_v61, %v1270_v61  ;;  %1693 = vpow2.f32 %v1248_v16 }
 0x1a3   : > { %v1271_v21 = vsel %vm1239_vm0, %v1231_v46, %v1458_v17  ;;  %v1453_v22 = vadd.f32 -1.0, %v1684_v18 }
 0x1a4   : > { %1311 = vst.msk [vmem:[%s2164_s22 + $0x10] sm:$0xf] %vm324_vm6, %v1478_v19  ;;  %v1479_v23 = vpack.c.bf16 %v1271_v21, %v1271_v21  ;;  %v1686_v41 = vpop.eup %1685 }
 0x1a5   : > { %v1266_v24 = vsel %vm1234_vm1, %v1226_v54, %v1453_v22  ;;  %v1454_v26 = vadd.f32 -1.0, %v1686_v41 }
 0x1a6   : > { %1312 = vst.msk [vmem:[%s2164_s22 + $0x14] sm:$0xf] %vm324_vm6, %v1479_v23  ;;  %v1474_v25 = vpack.c.bf16 %v1266_v24, %v1266_v24 }
 0x1a7   : > { %v1688_v27 = vpop.eup %1687  ;;  %v1267_v28 = vsel %vm1235_vm2, %v1227_v51, %v1454_v26 }
 0x1a8   : > { %1307 = vst.msk [vmem:[%s2164_s22] sm:$0xf] %vm324_vm6, %v1474_v25  ;;  %v1459_v29 = vadd.f32 -1.0, %v1688_v27  ;;  %v1475_v31 = vpack.c.bf16 %v1267_v28, %v1267_v28 }
 0x1a9   : > { %v1690_v30 = vpop.eup %1689 }
 0x1aa   : > { %v1692_v33 = vpop.eup %1691  ;;  %v1272_v34 = vsel %vm1240_vm3, %v1232_v3, %v1459_v29  ;;  %v1460_v36 = vadd.f32 -1.0, %v1690_v30  ;;  %1308 = vst.msk [vmem:[%s2164_s22 + $0x4] sm:$0xf] %vm324_vm6, %v1475_v31 }
 0x1ab   : > { %v1480_v37 = vpack.c.bf16 %v1272_v34, %v1272_v34  ;;  %v1455_v38 = vadd.f32 -1.0, %v1692_v33 }
 0x1ac   : > { %v1694_v39 = vpop.eup %1693  ;;  %v1273_v40 = vsel %vm1241_vm4, %v1233_v7, %v1460_v36 }
 0x1ad   : > { %1313 = vst.msk [vmem:[%s2164_s22 + $0x18] sm:$0xf] %vm324_vm6, %v1480_v37  ;;  %v1481_v42 = vpack.c.bf16 %v1273_v40, %v1273_v40  ;;  %v1268_v44 = vsel %vm1236_vm5, %v1228_v8, %v1455_v38  ;;  %v1456_v45 = vadd.f32 -1.0, %v1694_v39 }
 0x1ae   : > { %v1476_v46 = vpack.c.bf16 %v1268_v44, %v1268_v44 }
 0x1af   : > { %1314 = vst.msk [vmem:[%s2164_s22 + $0x1c] sm:$0xf] %vm324_vm6, %v1481_v42  ;;  %v1269_v47 = vsel %vm1237_vm7, %v1229_v14, %v1456_v45 }
 0x1b0   : > { %1309 = vst.msk [vmem:[%s2164_s22 + $0x8] sm:$0xf] %vm324_vm6, %v1476_v46  ;;  %v1477_v49 = vpack.c.bf16 %v1269_v47, %v1269_v47 }
 0x1b2   : > { %1310 = vst.msk [vmem:[%s2164_s22 + $0xc] sm:$0xf] %vm324_vm6, %v1477_v49 }
 0x1b3 PF: > { %s15_s18 = sadd.s32 1, %s1701_s18  }
 0x1b4   : > { %p12_p4 = scmp.ge.s32.totalorder %s15_s18, 4  }
 0x1b6   :  { %14 = sbr.rel (!%p12_p4) target bundleno = 1 (0x1), region = 79 }

// kernel: adecoder_forward.7
= control target key start
LH: loop header
LB: loop body
LE: loop exit
PB: predicated region body
PF: predicated region fallthrough
CT: control target
= control target key end

     0   :  { %s1697_s18 = smov 0   ;;  %s2266_s0 = inlined_call_operand.vmem [shape: bf16[2,4,15,32], index: 0, kind: input, shape index: {}]   ;;  %s2267_s1 = inlined_call_operand.vmem [shape: f32[2,4,15,32], index: 1, kind: input, shape index: {}]   ;;  %s2268_s2 = inlined_call_operand.vmem [shape: bf16[384,64], index: 2, kind: input, shape index: {}]   ;;  %s2269_s3 = inlined_call_operand.vmem [shape: f32[1,64], index: 3, kind: input, shape index: {}]   ;;  %s2270_s4 = inlined_call_operand.vmem [shape: f32[1,64], index: 4, kind: input, shape index: {}]   ;;  %s2271_s5 = inlined_call_operand.vmem [shape: bf16[2,128,64], index: 5, kind: output, shape index: {}]  }
   0x1 LB: > { %s1365_s19 = sadd.s32 4294967295, %s1661_s18   ;;  %p1369_p0 = scmp.ge.s32.totalorder %s1661_s18, 1  ;;  %s1661_s18 = sphi %s1697_s18, %s15_s18  }
   0x2   : > { %p197_p1 = scmp.lt.s32.totalorder %s1661_s18, 3 }
   0x4   : > { %p198_p2 = pnand %p1369_p0, %p197_p1 }
   0x5   : > { %p230_p3 = scmp.lt.s32.totalorder (!%p198_p2), %s1365_s19, 1  ;;  %vm249_vm0 = vcmask (!%p198_p2), 1040384   ;;  %vm250_vm1 = vsmask.f32 (!%p198_p2), 256  ;;  %v255_v1 = vld [vmem:[#allocation2 + $0x20] sm:$0x1] (!%p198_p2) }
   0x6   : > { %201 = sbr.rel (%p198_p2) target bundleno = 452 (0x1c4), region = 40  ;;  %vm1706_vm2 = vmand (!%p198_p2), %vm249_vm0, %vm250_vm1  ;;  %v267_v2 = vld [vmem:[#allocation2 + $0x50] sm:$0x1] (!%p198_p2)  ;;  %v279_v5 = vld [vmem:[#allocation2 + $0x80] sm:$0x1] (!%p198_p2)  ;;  %v1663_v13 = vmov (!%p198_p2), 0  }
   0x7   : > { %v256_v3 = vsel (!%p198_p2), %vm1706_vm2, 0, %v255_v1  ;;  %v268_v4 = vsel (!%p198_p2), %vm1706_vm2, 0, %v267_v2  ;;  %v1599_v6 = vld [vmem:[%s2268_s2 + $0x40] sm:$0xff] (!%p198_p2)   ;;  %v280_v7 = vsel (!%p198_p2), %vm1706_vm2, 0, %v279_v5  ;;  %247 = vst [vmem:[#allocation2 + $0x8] sm:$0xff] (!%p198_p2), %v1663_v13  ;;  %1567 = vmatprep.mubr.bf16.mxu1 (!%p198_p2), %v1663_v13  ;;  %s1664_s9 = smov (!%p198_p2), 32  }
   0x8   : > { %257 = vst [vmem:[#allocation2 + $0x20] sm:$0x1] (!%p198_p2), %v256_v3  ;;  %269 = vst [vmem:[#allocation2 + $0x50] sm:$0x1] (!%p198_p2), %v268_v4  ;;  %v1600_v8 = vld [vmem:[%s2268_s2] sm:$0xff] (!%p198_p2)   ;;  %1471 = vmatprep.subr.bf16.mxu0 (!%p198_p2), %v1599_v6  ;;  %vm358_vm3 = vcmask (!%p198_p2), 253952  }
   0x9   : > { %281 = vst [vmem:[#allocation2 + $0x80] sm:$0x1] (!%p198_p2), %v280_v7  ;;  %1472 = vmatpush3.bf16.msra.mxu0 (!%p198_p2), %v1600_v8  ;;  %v1601_v9 = vld [vmem:[%s2268_s2 + $0x80] sm:$0xff] (!%p198_p2)   ;;  %vm1767_vm4 = vmand (!%p198_p2), %vm358_vm3, %vm250_vm1  ;;  %v1602_v31 = vld [vmem:[%s2268_s2 + $0x48] sm:$0xff] (!%p198_p2)   ;;  %s1665_s12 = smov (!%p198_p2), 96   ;;  %s1666_s15 = smov (!%p198_p2), 64  }
   0xa   : > { %1551 = vmatprep.subr.bf16.mxu1 (!%p198_p2), %v1601_v9  ;;  %v1603_v34 = vld [vmem:[%s2268_s2 + $0x8] sm:$0xff] (!%p198_p2)   ;;  %1473 = vmatprep.subr.bf16.mxu0 (!%p198_p2), %v1602_v31  ;;  %v1605_v42 = vld [vmem:[%s2268_s2 + $0x50] sm:$0xff] (!%p198_p2)   ;;  %vm356_vm5 = vcmask (!%p198_p2), 261121   ;;  %v1608_v57 = vld [vmem:[%s2268_s2 + $0x58] sm:$0xff] (!%p198_p2)   ;;  %vm308_vm6 = vcmask (!%p198_p2), 261120   ;;  %vm318_vm9 = vcmask (!%p198_p2), 523520  }
   0xb   : > { %1552 = vmatpush3.bf16.msra.mxu1 (!%p198_p2), %v1601_v9  ;;  %v1604_v39 = vld [vmem:[%s2268_s2 + $0x88] sm:$0xff] (!%p198_p2)   ;;  %v1606_v45 = vld [vmem:[%s2268_s2 + $0x10] sm:$0xff] (!%p198_p2)   ;;  %v1609_v59 = vld [vmem:[%s2268_s2 + $0x18] sm:$0xff] (!%p198_p2)   ;;  %vm309_vm7 = vsmask.f32 (!%p198_p2), 7424  ;;  %vm333_vm10 = vcmask (!%p198_p2), 785920  }
   0xc   : > { %1553 = vmatprep.subr.bf16.mxu1 (!%p198_p2), %v1604_v39  ;;  %v1607_v49 = vld [vmem:[%s2268_s2 + $0x90] sm:$0xff] (!%p198_p2)   ;;  %v1610_v61 = vld [vmem:[%s2268_s2 + $0x98] sm:$0xff] (!%p198_p2)   ;;  %v1611_v1 = vld [vmem:[%s2268_s2 + $0x60] sm:$0xff] (!%p198_p2)   ;;  %vm334_vm11 = vsmask.f32 (!%p198_p2), 7938  ;;  %vm349_vm12 = vcmask (!%p198_p2), 1048320  }
   0xd   : > { %s2301_s19 = smov (!%p230_p3, %s1365_s19), 1  ;;  %1474 = vmatpush3.bf16.msra.mxu0 %v1603_v34  ;;  %v1612_v3 = vld [vmem:[%s2268_s2 + $0x20] sm:$0xff]   ;;  %v1614_v9 = vld [vmem:[%s2268_s2 + $0x68] sm:$0xff]   ;;  %vm1979_vm8 = vmand %vm308_vm6, %vm309_vm7  ;;  %vm369_vm15 = vcmask 516352   ;;  %vm2272_vm3 = vcmask 523521  }
   0xe   : > { %s1453_s24 = sshll.u32 %s2301_s19, 6  ;;  %s1452_s25 = sshll.u32 %s2301_s19, 5  ;;  %1475 = vmatprep.subr.bf16.mxu0 %v1605_v42  ;;  %v1613_v7 = vld [vmem:[%s2268_s2 + $0xa0] sm:$0xff]   ;;  %v282_v42 = vld [vmem:[#allocation2 + $0x88] sm:$0x1]  ;;  %vm1985_vm13 = vmand %vm318_vm9, %vm309_vm7 }
   0xf   : > { %s1731_s28 = scalar_lea.vmem %s2267_s1, %s1453_s24  ;;  %s1741_s8 = scalar_lea.vmem %s2266_s0, %s1452_s25  ;;  %v360_v33 = vld [vmem:[#allocation2 + $0x20] sm:$0x1]  ;;  %v472_v38 = vld [vmem:[#allocation2 + $0x50] sm:$0x1]  ;;  %1554 = vmatpush3.bf16.msra.mxu1 %v1604_v39  ;;  %vm1994_vm14 = vmand %vm333_vm10, %vm334_vm11 }
  0x10   : > { %v299_v10 = vld [vmem:[%s1731_s28] sm:$0xff]  ;;  %v300_v11 = vld [vmem:[%s1731_s28 + $0x8] sm:$0x7f]  ;;  %v1379_v12 = vld [vmem:[%s1731_s28 + $0x10] sm:$0xff]  ;;  %1555 = vmatprep.subr.bf16.mxu1 %v1607_v49 }
  0x11   : > { %v1744_v14 = vpack.c.bf16 %v300_v11, %v299_v10  ;;  %v1380_v15 = vld [vmem:[%s1731_s28 + $0x18] sm:$0x7f]  ;;  %v1750_v17 = vld [vmem:[%s1741_s8] sm:$0xff]   ;;  %v1757_v20 = vld [vmem:[%s1741_s8 + $0x8] sm:$0xff]   ;;  %1476 = vmatpush3.bf16.msra.mxu0 %v1606_v45 }
  0x12   : > { %v1747_v16 = vpack.c.bf16 %v1380_v15, %v1379_v12  ;;  %v324_v21 = vshrl.u32 %v1750_v17, 16  ;;  %v327_v22 = vshll.u32 %v1750_v17, 16  ;;  %v444_v25 = vshrl.u32 %v1757_v20, 16  ;;  %v1775_v30 = vld [vmem:[%s1741_s8 + $0x10] sm:$0xff]   ;;  %v571_v41 = vld [vmem:[#allocation2 + $0x80] sm:$0x1]  ;;  %1477 = vmatprep.subr.bf16.mxu0 %v1608_v57  ;;  %vm2000_vm0 = vmand %vm349_vm12, %vm334_vm11 }
  0x13   : > { %315 = vrot.lane.b32.xlu0 %v1744_v14, %s1664_s9  ;;  %v340_v18 = vshrl.u32 %v1744_v14, 16  ;;  %v343_v19 = vshll.u32 %v1744_v14, 16  ;;  %v363_v29 = vrot.slane %v1744_v14, 7  ;;  %v447_v36 = vshll.u32 %v1757_v20, 16  ;;  %v1384_v51 = vld [vmem:[%s1731_s28 + $0x20] sm:$0xff]  ;;  %1556 = vmatpush3.bf16.msra.mxu1 %v1607_v49  ;;  %v1389_v4 = vld [vmem:[%s1731_s28 + $0x30] sm:$0xff] }
  0x14   : > { %437 = vrot.lane.b32.xlu1 %v1747_v16, %s1664_s9  ;;  %v326_v24 = vrot.slane %v324_v21, 7  ;;  %v457_v32 = vshrl.u32 %v1747_v16, 16  ;;  %v446_v35 = vrot.slane %v444_v25, 7  ;;  %v1790_v37 = vrot.slane %v1750_v17, 7  ;;  %v1385_v53 = vld [vmem:[%s1731_s28 + $0x28] sm:$0x7f]  ;;  %1557 = vmatprep.subr.bf16.mxu1 %v1610_v61 }
  0x15   : > { %v342_v23 = vrot.slane %v340_v18, 7  ;;  %v1796_v40 = vrot.slane %v1757_v20, 7  ;;  %v1805_v44 = vrot.slane %v1775_v30, 7  ;;  %v460_v47 = vshll.u32 %v1747_v16, 16  ;;  %1478 = vmatpush3.bf16.msra.mxu0 %v1609_v59  ;;  %v1390_v5 = vld [vmem:[%s1731_s28 + $0x38] sm:$0x7f]  ;;  %s2163_s28 = scalar_lea.vmem %s2271_s5, %s1453_s24 }
  0x16   : > { %v1771_v28 = vor.u32 %v327_v22, %v326_v24  ;;  %v361_v43 = vsel %vm1767_vm4, %v1790_v37, %v360_v33  ;;  %v459_v46 = vrot.slane %v457_v32, 7  ;;  %v1822_v50 = vor.u32 %v447_v36, %v446_v35  ;;  %357 = vst.msk [vmem:[#allocation2 + $0x8] sm:$0xfe] %vm356_vm5, %v1790_v37  ;;  %1479 = vmatprep.subr.bf16.mxu0 %v1611_v1  ;;  %v1879_v10 = vld [vmem:[%s1741_s8 + $0x18] sm:$0xff]   ;;  %v1615_v11 = vld [vmem:[%s2268_s2 + $0x28] sm:$0xff]   ;;  %v1617_v15 = vld [vmem:[%s2268_s2 + $0x70] sm:$0xff]  }
  0x17   : > { %v1764_v26 = vor.u32 %v343_v19, %v342_v23  ;;  %362 = vst [vmem:[#allocation2 + $0x20] sm:$0x1] %v361_v43  ;;  %v473_v48 = vsel %vm1767_vm4, %v1796_v40, %v472_v38  ;;  %v572_v52 = vsel %vm1767_vm4, %v1805_v44, %v571_v41  ;;  %v1835_v55 = vpack.c.bf16 %v1385_v53, %v1384_v51  ;;  %v1616_v12 = vld [vmem:[%s2268_s2 + $0xa8] sm:$0xff]   ;;  %v1618_v19 = vld [vmem:[%s2268_s2 + $0x30] sm:$0xff]   ;;  %v1620_v23 = vld [vmem:[%s2268_s2 + $0x78] sm:$0xff]  }
  0x18   : > { %330 = vrot.lane.b32.xlu0 %v1771_v28, %s1666_s15  ;;  %474 = vst [vmem:[#allocation2 + $0x50] sm:$0x1] %v473_v48  ;;  %573 = vst [vmem:[#allocation2 + $0x80] sm:$0x1] %v572_v52  ;;  %v1831_v54 = vor.u32 %v460_v47, %v459_v46  ;;  %v543_v56 = vshrl.u32 %v1775_v30, 16  ;;  %v475_v60 = vrot.slane %v1747_v16, 7  ;;  %1558 = vmatpush3.bf16.msra.mxu1 %v1610_v61 }
  0x19   : > { %346 = vrot.lane.b32.xlu1 %v1764_v26, %s1665_s12  ;;  %v556_v58 = vshrl.u32 %v1835_v55, 16  ;;  %v546_v63 = vshll.u32 %v1775_v30, 16  ;;  %v559_v6 = vshll.u32 %v1835_v55, 16  ;;  %1480 = vmatpush3.bf16.msra.mxu0 %v1612_v3  ;;  %v1896_v18 = vpack.c.bf16 %v1390_v5, %v1389_v4  ;;  %v1619_v21 = vld [vmem:[%s2268_s2 + $0xb0] sm:$0xff]   ;;  %v1621_v25 = vld [vmem:[%s2268_s2 + $0x38] sm:$0xff]  }
  0x1a   : > { %v545_v62 = vrot.slane %v543_v56, 7  ;;  %1559 = vmatprep.subr.bf16.mxu1 %v1613_v7  ;;  %1481 = vmatprep.subr.bf16.mxu0 %v1614_v9  ;;  %v642_v22 = vshrl.u32 %v1879_v10, 16  ;;  %v574_v24 = vrot.slane %v1835_v55, 7  ;;  %v645_v31 = vshll.u32 %v1879_v10, 16  ;;  %v1622_v32 = vld [vmem:[%s2268_s2 + $0xb8] sm:$0xff]  }
  0x1b   : > { %v558_v2 = vrot.slane %v556_v58, 7  ;;  %v258_v33 = vld [vmem:[#allocation2 + $0x28] sm:$0x1]  ;;  %v252_v36 = vld [vmem:[#allocation2 + $0x18] sm:$0x1]  ;;  %v655_v52 = vshrl.u32 %v1896_v18, 16 }
  0x1c   : > { %364 = vrot.lane.b32.xlu0 %v363_v29, %s1664_s9  ;;  %v1873_v8 = vor.u32 %v546_v63, %v545_v62  ;;  %1560 = vmatpush3.bf16.msra.mxu1 %v1613_v7  ;;  %v644_v34 = vrot.slane %v642_v22, 7  ;;  %v259_v35 = vsel %vm1706_vm2, 0, %v258_v33  ;;  %v270_v38 = vld [vmem:[#allocation2 + $0x58] sm:$0x1]  ;;  %v253_v39 = vsel %vm1706_vm2, 0, %v252_v36 }
  0x1d   : > { %374 = vrot.lane.b32.xlu1 %v1750_v17, %s1666_s15  ;;  %v1889_v13 = vor.u32 %v559_v6, %v558_v2  ;;  %1482 = vmatpush3.bf16.msra.mxu0 %v1615_v11  ;;  %260 = vst [vmem:[#allocation2 + $0x28] sm:$0x1] %v259_v35  ;;  %v271_v41 = vsel %vm1706_vm2, 0, %v270_v38  ;;  %v264_v43 = vld [vmem:[#allocation2 + $0x48] sm:$0x1]  ;;  %v667_v58 = vrot.slane %v1879_v10, 7 }
  0x1e   : > { %1561 = vmatprep.subr.bf16.mxu1 %v1616_v12  ;;  %1483 = vmatprep.subr.bf16.mxu0 %v1617_v15  ;;  %254 = vst [vmem:[#allocation2 + $0x18] sm:$0x1] %v253_v39  ;;  %272 = vst [vmem:[#allocation2 + $0x58] sm:$0x1] %v271_v41  ;;  %v265_v45 = vsel %vm1706_vm2, 0, %v264_v43  ;;  %v647_v56 = vor.u32 %v645_v31, %v644_v34  ;;  %v657_v59 = vrot.slane %v655_v52, 7 }
  0x1f   : > { %v291_v46 = vld [vmem:[#allocation2 + $0xb0] sm:$0x1]  ;;  %v294_v47 = vld [vmem:[#allocation2 + $0xb8] sm:$0x1]  ;;  %266 = vst [vmem:[#allocation2 + $0x48] sm:$0x1] %v265_v45 }
  0x20   : > { %450 = vrot.lane.b32.xlu0 %v1822_v50, %s1666_s15  ;;  %1562 = vmatpush3.bf16.msra.mxu1 %v1616_v12  ;;  %v292_v48 = vsel %vm1706_vm2, 0, %v291_v46  ;;  %v295_v49 = vsel %vm1706_vm2, 0, %v294_v47  ;;  %v276_v51 = vld [vmem:[#allocation2 + $0x78] sm:$0x1]  ;;  %v658_v61 = vshll.u32 %v1896_v18, 16  ;;  %v673_v1 = vrot.slane %v1896_v18, 7 }
  0x21   : > { %381 = vrot.lane.b32.xlu1 %v1744_v14, %s1665_s12  ;;  %1563 = vmatprep.subr.bf16.mxu1 %v1619_v21  ;;  %293 = vst [vmem:[#allocation2 + $0xb0] sm:$0x1] %v292_v48  ;;  %296 = vst [vmem:[#allocation2 + $0xb8] sm:$0x1] %v295_v49  ;;  %v277_v53 = vsel %vm1706_vm2, 0, %v276_v51 }
  0x22   : > { %1484 = vmatpush3.bf16.msra.mxu0 %v1618_v19  ;;  %278 = vst [vmem:[#allocation2 + $0x78] sm:$0x1] %v277_v53  ;;  %v660_v63 = vor.u32 %v658_v61, %v657_v59  ;;  %v288_v2 = vld [vmem:[#allocation2 + $0xa8] sm:$0x1]  ;;  %v371_v9 = vld [vmem:[#allocation2 + $0x20] sm:$0x1] }
  0x23   : > { %1485 = vmatprep.subr.bf16.mxu0 %v1620_v23  ;;  %v289_v27 = vsel %vm1706_vm2, 0, %v288_v2  ;;  %v480_v36 = vld [vmem:[#allocation2 + $0x50] sm:$0x1] }
  0x24   : > { %536 = vrot.lane.b32.xlu0 %v1835_v55, %s1664_s9  ;;  %1564 = vmatpush3.bf16.msra.mxu1 %v1619_v21  ;;  %v686_v57 = vld [vmem:[#allocation2 + $0x28] sm:$0xff]  ;;  %290 = vst [vmem:[#allocation2 + $0xa8] sm:$0x1] %v289_v27  ;;  %v434_v21 = vsel %vm1979_vm8, %v1757_v20, 0 }
  0x25   : > { %463 = vrot.lane.b32.xlu1 %v1831_v54, %s1665_s12  ;;  %1565 = vmatprep.subr.bf16.mxu1 %v1622_v32 }
  0x26   : > { %1486 = vmatpush3.bf16.msra.mxu0 %v1621_v25 }
  0x28   : > { %476 = vrot.lane.b32.xlu0 %v475_v60, %s1664_s9  ;;  %1566 = vmatpush3.bf16.msra.mxu1 %v1622_v32 }
  0x29   : > { %483 = vrot.lane.b32.xlu1 %v1757_v20, %s1666_s15 }
  0x2b   : > { %1568 = vmatmul.mubr.bf16.vlgmr.msra.gmra.mrb[0].mxu1 %v686_v57  ;;  %v579_v57 = vld [vmem:[#allocation2 + $0x80] sm:$0x1] }
  0x2c   : > { %549 = vrot.lane.b32.xlu0 %v1873_v8, %s1666_s15 }
  0x2d   : > { %489 = vrot.lane.b32.xlu1 %v1747_v16, %s1665_s12 }
  0x30   : > { %635 = vrot.lane.b32.xlu0 %v1896_v18, %s1664_s9 }
  0x31   : > { %562 = vrot.lane.b32.xlu1 %v1889_v13, %s1665_s12 }
  0x34   : > { %575 = vrot.lane.b32.xlu0 %v574_v24, %s1664_s9 }
  0x35   : > { %400 = vrot.lane.b32.xlu1 %v1790_v37, %s1666_s15  ;;  %v283_v37 = vsel %vm1706_vm2, 0, %v282_v42  ;;  %vm2009_vm2 = vmand %vm369_vm15, %vm250_vm1  ;;  %v533_v42 = vsel %vm1979_vm8, %v1775_v30, 0 }
  0x36   : > { %284 = vst [vmem:[#allocation2 + $0x88] sm:$0x1] %v283_v37  ;;  %vm2028_vm15 = vmand %vm349_vm12, %vm309_vm7  ;;  %v684_v37 = vld [vmem:[#allocation2 + $0x18] sm:$0xff] }
  0x37   : > { %vm2070_vm12 = vmand %vm308_vm6, %vm334_vm11  ;;  %vm403_vm6 = vcmask 785921  }
  0x38   : > { %582 = vrot.lane.b32.xlu0 %v1775_v30, %s1666_s15  ;;  %v497_v0 = vsel %vm2070_vm12, %v1822_v50, 0 }
  0x39   : > { %393 = vrot.lane.b32.xlu1 %v1764_v26, %s1664_s9  ;;  %v670_v26 = vld [vmem:[#allocation2 + $0xb0] sm:$0x1] }
  0x3a   : > { %v671_v62 = vsel %vm1767_vm4, %v667_v58, %v670_v26  ;;  %vm2017_vm4 = vmand %vm333_vm10, %vm309_vm7  ;;  %vm405_vm7 = vcmask 778752  }
  0x3b   : > { %672 = vst [vmem:[#allocation2 + $0xb0] sm:$0x1] %v671_v62  ;;  %vm2064_vm10 = vmand %vm405_vm7, %vm250_vm1 }
  0x3c   : > { %648 = vrot.lane.b32.xlu0 %v647_v56, %s1666_s15  ;;  %v407_v56 = vld [vmem:[#allocation2 + $0x58] sm:$0x1]  ;;  %vm2081_vm7 = vmand %vm318_vm9, %vm334_vm11  ;;  %vm415_vm9 = vcmask 1041152   ;;  %vm413_vm11 = vcmask 1048321  }
  0x3d   : > { %505 = vrot.lane.b32.xlu1 %v1796_v40, %s1666_s15 }
  0x40   : > { %410 = vrot.lane.b32.xlu0 %v363_v29, %s1665_s12 }
  0x41   : > { %588 = vrot.lane.b32.xlu1 %v1835_v55, %s1665_s12 }
  0x44   : > { %499 = vrot.lane.b32.xlu0 %v1831_v54, %s1664_s9  ;;  %v312_v54 = vsel %vm1979_vm8, %v1750_v17, 0 }
  0x45   : > { %661 = vrot.lane.b32.xlu1 %v660_v63, %s1665_s12 }
  0x48   : > { %674 = vrot.lane.b32.xlu0 %v673_v1, %s1664_s9  ;;  %v391_v1 = vsel %vm2070_vm12, %v1771_v28, 0 }
  0x49   : > { %604 = vrot.lane.b32.xlu1 %v1805_v44, %s1666_s15 }
  0x4c   : > { %512 = vrot.lane.b32.xlu0 %v475_v60, %s1665_s12 }
  0x4d   : > { %598 = vrot.lane.b32.xlu1 %v1889_v13, %s1664_s9 }
  0x50   : > { %611 = vrot.lane.b32.xlu0 %v574_v24, %s1665_s12 }
  0x85   : > { %v316_v14 = vpop.permute.xlu0 %315 }
  0x86   : > { %v438_v29 = vpop.permute.xlu1 %437  ;;  %v321_v4 = vsel %vm1985_vm13, %v316_v14, %v312_v54  ;;  %v509_v54 = vld [vmem:[#allocation2 + $0x88] sm:$0x1] }
  0x87   : > { %v441_v25 = vsel %vm1985_vm13, %v438_v29, %v434_v21 }
  0x8a   : > { %v331_v5 = vpop.permute.xlu0 %330 }
  0x8b   : > { %v347_v3 = vpop.permute.xlu1 %346  ;;  %v337_v17 = vsel %vm1994_vm14, %v331_v5, %v321_v4  ;;  %v690_v4 = vld [vmem:[#allocation2 + $0x48] sm:$0xff] }
  0x8c   : > { %v352_v7 = vsel %vm2000_vm0, %v347_v3, %v337_v17 }
  0x8e   : > { %v365_v13 = vpop.permute.xlu0 %364 }
  0x8f   : > { %v375_v12 = vpop.permute.xlu1 %374  ;;  %368 = vst.msk [vmem:[#allocation2 + $0x8] sm:$0xfe] %vm2272_vm3, %v365_v13  ;;  %v372_v15 = vsel %vm2009_vm2, %v365_v13, %v371_v9 }
  0x90   : > { %v379_v18 = vsel %vm2017_vm4, %v375_v12, 0  ;;  %373 = vst [vmem:[#allocation2 + $0x20] sm:$0x1] %v372_v15  ;;  %v632_v12 = vsel %vm1979_vm8, %v1879_v10, 0  ;;  %vm1281_vm8 = vcmask 519168  }
  0x92   : > { %v451_v23 = vpop.permute.xlu0 %450 }
  0x93   : > { %v382_v22 = vpop.permute.xlu1 %381  ;;  %v454_v31 = vsel %vm1994_vm14, %v451_v23, %v441_v25 }
  0x94   : > { %v386_v24 = vsel %vm2028_vm15, %v382_v22, %v379_v18 }
  0x95   : > { %387 = vst [vmem:[#allocation2 + $0x38] sm:$0xff] %v386_v24 }
  0x96   : > { %471 = vst.msk [vmem:[#allocation2 + $0x38] sm:$0xfe] %vm356_vm5, %v1796_v40  ;;  %v537_v33 = vpop.permute.xlu0 %536  ;;  %v682_v34 = vld [vmem:[#allocation2 + $0x8] sm:$0xff] }
  0x97   : > { %v464_v32 = vpop.permute.xlu1 %463  ;;  %929 = vmatprep.mubr.bf16.mxu0 %v682_v34  ;;  %v685_v35 = vld [vmem:[#allocation2 + $0x20] sm:$0xff]  ;;  %v540_v47 = vsel %vm1985_vm13, %v537_v33, %v533_v42  ;;  %v596_v34 = vsel %vm2070_vm12, %v1873_v8, 0 }
  0x98   : > { %v467_v20 = vsel %vm2000_vm0, %v464_v32, %v454_v31  ;;  %930 = vmatmul.mubr.bf16.vlgmr.msra.gmra.mrb[0].mxu0 %v352_v7  ;;  %v608_v31 = vld [vmem:[#allocation2 + $0xb8] sm:$0x1]  ;;  %v678_v32 = vld [vmem:[#allocation2 + $0xb0] sm:$0x1] }
  0x99   : > { %937 = vmatprep.mubr.bf16.mxu0 %v685_v35 }
  0x9a   : > { %v477_v39 = vpop.permute.xlu0 %476 }
  0x9b   : > { %v484_v38 = vpop.permute.xlu1 %483  ;;  %479 = vst.msk [vmem:[#allocation2 + $0x38] sm:$0xfe] %vm2272_vm3, %v477_v39  ;;  %v481_v40 = vsel %vm2009_vm2, %v477_v39, %v480_v36  ;;  %v696_v36 = vld [vmem:[#allocation2 + $0x78] sm:$0xff] }
  0x9c   : > { %v487_v41 = vsel %vm2017_vm4, %v484_v38, 0  ;;  %482 = vst [vmem:[#allocation2 + $0x50] sm:$0x1] %v481_v40 }
  0x9e   : > { %v550_v45 = vpop.permute.xlu0 %549 }
  0x9f   : > { %v490_v43 = vpop.permute.xlu1 %489  ;;  %v553_v48 = vsel %vm1994_vm14, %v550_v45, %v540_v47 }
  0xa0   : > { %v493_v46 = vsel %vm2028_vm15, %v490_v43, %v487_v41  ;;  %938 = vmatmul.mubr.bf16.gmra.mrb[4].mxu0 %v684_v37 }
  0xa1   : > { %494 = vst [vmem:[#allocation2 + $0x68] sm:$0xff] %v493_v46 }
  0xa2   : > { %570 = vst.msk [vmem:[#allocation2 + $0x68] sm:$0xfe] %vm356_vm5, %v1805_v44  ;;  %v636_v30 = vpop.permute.xlu0 %635  ;;  %v688_v52 = vld [vmem:[#allocation2 + $0x38] sm:$0xff] }
  0xa3   : > { %v563_v49 = vpop.permute.xlu1 %562  ;;  %945 = vmatprep.mubr.bf16.mxu0 %v688_v52  ;;  %v691_v2 = vld [vmem:[#allocation2 + $0x50] sm:$0xff]  ;;  %v639_v23 = vsel %vm1985_vm13, %v636_v30, %v632_v12 }
  0xa4   : > { %v566_v51 = vsel %vm2000_vm0, %v563_v49, %v553_v48  ;;  %v702_v49 = vld [vmem:[#allocation2 + $0xa8] sm:$0xff] }
  0xa6   : > { %v576_v61 = vpop.permute.xlu0 %575 }
  0xa7   : > { %v401_v59 = vpop.permute.xlu1 %400  ;;  %578 = vst.msk [vmem:[#allocation2 + $0x68] sm:$0xfe] %vm2272_vm3, %v576_v61  ;;  %v580_v62 = vsel %vm2009_vm2, %v576_v61, %v579_v57  ;;  %vm2094_vm3 = vmand %vm415_vm9, %vm250_vm1  ;;  %vm2299_vm1 = vcmask 523521  }
  0xa8   : > { %v408_v26 = vsel %vm2064_vm10, %v401_v59, %v407_v56  ;;  %581 = vst [vmem:[#allocation2 + $0x80] sm:$0x1] %v580_v62  ;;  %946 = vmatmul.mubr.bf16.gmra.mrb[8].mxu0 %v467_v20 }
  0xa9   : > { %409 = vst [vmem:[#allocation2 + $0x58] sm:$0x1] %v408_v26  ;;  %953 = vmatprep.mubr.bf16.mxu0 %v691_v2  ;;  %v2143_v26 = vld [vmem:[%s2269_s3] ss:$0 sm:$0xff] }
  0xaa   : > { %v583_v14 = vpop.permute.xlu0 %582 }
  0xab   : > { %v394_v27 = vpop.permute.xlu1 %393  ;;  %v586_v13 = vsel %vm2017_vm4, %v583_v14, 0 }
  0xac   : > { %v398_v29 = vsel %vm2081_vm7, %v394_v27, %v391_v1  ;;  %v2148_v1 = vld [vmem:[%s2270_s4] ss:$0 sm:$0xff] }
  0xad   : > { %399 = vst [vmem:[#allocation2 + $0x40] sm:$0xff] %v398_v29 }
  0xae   : > { %404 = vst.msk [vmem:[#allocation2 + $0x40] sm:$0xfe] %vm403_vm6, %v401_v59  ;;  %v649_v5 = vpop.permute.xlu0 %648  ;;  %v694_v9 = vld [vmem:[#allocation2 + $0x68] sm:$0xff] }
  0xaf   : > { %v506_v3 = vpop.permute.xlu1 %505  ;;  %v652_v11 = vsel %vm1994_vm14, %v649_v5, %v639_v23  ;;  %v697_v50 = vld [vmem:[#allocation2 + $0x80] sm:$0xff] }
  0xb0   : > { %v510_v28 = vsel %vm2064_vm10, %v506_v3, %v509_v54  ;;  %v417_v7 = vld [vmem:[#allocation2 + $0x58] sm:$0x1]  ;;  %954 = vmatmul.mubr.bf16.gmra.mrb[12].mxu0 %v690_v4 }
  0xb1   : > { %511 = vst [vmem:[#allocation2 + $0x88] sm:$0x1] %v510_v28  ;;  %961 = vmatprep.mubr.bf16.mxu0 %v694_v9 }
  0xb2   : > { %v411_v18 = vpop.permute.xlu0 %410 }
  0xb3   : > { %v589_v15 = vpop.permute.xlu1 %588  ;;  %414 = vst.msk [vmem:[#allocation2 + $0x40] sm:$0xfe] %vm413_vm11, %v411_v18  ;;  %v418_v22 = vsel %vm2094_vm3, %v411_v18, %v417_v7 }
  0xb4   : > { %v592_v21 = vsel %vm2028_vm15, %v589_v15, %v586_v13  ;;  %419 = vst [vmem:[#allocation2 + $0x58] sm:$0x1] %v418_v22 }
  0xb5   : > { %593 = vst [vmem:[#allocation2 + $0x98] sm:$0xff] %v592_v21 }
  0xb6   : > { %669 = vst.msk [vmem:[#allocation2 + $0x98] sm:$0xfe] %vm356_vm5, %v667_v58  ;;  %v500_v24 = vpop.permute.xlu0 %499 }
  0xb7   : > { %v662_v19 = vpop.permute.xlu1 %661  ;;  %v503_v16 = vsel %vm2081_vm7, %v500_v24, %v497_v0 }
  0xb8   : > { %v665_v25 = vsel %vm2000_vm0, %v662_v19, %v652_v11  ;;  %504 = vst [vmem:[#allocation2 + $0x70] sm:$0xff] %v503_v16  ;;  %962 = vmatmul.mubr.bf16.gmra.mrb[16].mxu0 %v566_v51  ;;  %v516_v38 = vld [vmem:[#allocation2 + $0x88] sm:$0x1] }
  0xb9   : > { %508 = vst.msk [vmem:[#allocation2 + $0x70] sm:$0xfe] %vm403_vm6, %v506_v3  ;;  %969 = vmatprep.mubr.bf16.mxu0 %v697_v50 }
  0xba   : > { %v675_v58 = vpop.permute.xlu0 %674  ;;  %v689_v55 = vld [vmem:[#allocation2 + $0x40] sm:$0xff] }
  0xbb   : > { %v605_v10 = vpop.permute.xlu1 %604  ;;  %677 = vst.msk [vmem:[#allocation2 + $0x98] sm:$0xfe] %vm2299_vm1, %v675_v58  ;;  %v679_v60 = vsel %vm2009_vm2, %v675_v58, %v678_v32  ;;  %1571 = vmatprep.mubr.bf16.mxu1 %v689_v55  ;;  %v692_v20 = vld [vmem:[#allocation2 + $0x58] sm:$0xff] }
  0xbc   : > { %v609_v33 = vsel %vm2064_vm10, %v605_v10, %v608_v31  ;;  %680 = vst [vmem:[#allocation2 + $0xb0] sm:$0x1] %v679_v60  ;;  %1572 = vmatmul.mubr.bf16.gmra.mrb[4].mxu1 %v692_v20 }
  0xbd   : > { %610 = vst [vmem:[#allocation2 + $0xb8] sm:$0x1] %v609_v33 }
  0xbe   : > { %v513_v39 = vpop.permute.xlu0 %512 }
  0xbf   : > { %v599_v35 = vpop.permute.xlu1 %598  ;;  %515 = vst.msk [vmem:[#allocation2 + $0x70] sm:$0xfe] %vm413_vm11, %v513_v39  ;;  %v517_v6 = vsel %vm2094_vm3, %v513_v39, %v516_v38 }
  0xc0   : > { %v602_v40 = vsel %vm2081_vm7, %v599_v35, %v596_v34  ;;  %518 = vst [vmem:[#allocation2 + $0x88] sm:$0x1] %v517_v6  ;;  %970 = vmatmul.mubr.bf16.gmra.mrb[20].mxu0 %v696_v36 }
  0xc1   : > { %603 = vst [vmem:[#allocation2 + $0xa0] sm:$0xff] %v602_v40 }
  0xc2   : > { %607 = vst.msk [vmem:[#allocation2 + $0xa0] sm:$0xfe] %vm403_vm6, %v605_v10  ;;  %v612_v41 = vpop.permute.xlu0 %611  ;;  %v700_v42 = vld [vmem:[#allocation2 + $0x98] sm:$0xff] }
  0xc3   : > { %614 = vst.msk [vmem:[#allocation2 + $0xa0] sm:$0xfe] %vm413_vm11, %v612_v41  ;;  %977 = vmatprep.mubr.bf16.mxu0 %v700_v42  ;;  %v703_v46 = vld [vmem:[#allocation2 + $0xb0] sm:$0xff] }
  0xc4   : > { %v615_v8 = vld [vmem:[#allocation2 + $0xb8] sm:$0x1] }
  0xc5   : > { %v616_v43 = vsel %vm2094_vm3, %v612_v41, %v615_v8 }
  0xc6   : > { %617 = vst [vmem:[#allocation2 + $0xb8] sm:$0x1] %v616_v43  ;;  %v695_v37 = vld [vmem:[#allocation2 + $0x70] sm:$0xff] }
  0xc7   : > { %1575 = vmatprep.mubr.bf16.mxu1 %v695_v37  ;;  %v698_v45 = vld [vmem:[#allocation2 + $0x88] sm:$0xff] }
  0xc8   : > { %1576 = vmatmul.mubr.bf16.gmra.mrb[8].mxu1 %v698_v45  ;;  %978 = vmatmul.mubr.bf16.gmra.mrb[24].mxu0 %v665_v25 }
  0xc9   : > { %985 = vmatprep.mubr.bf16.mxu0 %v703_v46 }
  0xca   : > { %v701_v47 = vld [vmem:[#allocation2 + $0xa0] sm:$0xff] }
  0xcb   : > { %1579 = vmatprep.mubr.bf16.mxu1 %v701_v47 }
  0xcd   : > { %v704_v48 = vld [vmem:[#allocation2 + $0xb8] sm:$0xff] }
  0xd0   : > { %1580 = vmatmul.mubr.bf16.gmra.mrb[12].mxu1 %v704_v48  ;;  %986 = vmatmul.mubr.bf16.gmra.mrb[28].mxu0 %v702_v49 }
  0xfe   : > { %v1569_v30 = vpop.f32.mrb[0].mxu1 }
  0xff   : > { %v1028_v51 = vpop.f32.mrb[1].mxu1 }
 0x100   : > { %v1570_v52 = vpop.f32.mrb[2].mxu1 }
 0x101   : > { %v1031_v53 = vpop.f32.mrb[3].mxu1 }
 0x16b   : > { %v1487_v56 = vpop.f32.mrb[0].mxu0 }
 0x16c   : > { %v1488_v57 = vpop.f32.mrb[1].mxu0 }
 0x16d   : > { %v1489_v44 = vadd.f32 %v1488_v57, %v1487_v56  ;;  %v1490_v59 = vpop.f32.mrb[2].mxu0 }
 0x16e   : > { %v1491_v61 = vpop.f32.mrb[3].mxu0 }
 0x16f   : > { %v1492_v62 = vadd.f32 %v1491_v61, %v1490_v59  ;;  %v1029_v63 = vadd.f32 %v1489_v44, %v1028_v51 }
 0x171   : > { %v1098_v2 = vmul.f32 %v2143_v26, %v1029_v63  ;;  %v1032_v27 = vadd.f32 %v1492_v62, %v1031_v53 }
 0x173   : > { %v1121_v14 = vadd.f32 %v2148_v1, %v1098_v2  ;;  %v1099_v29 = vmul.f32 %v2143_v26, %v1032_v27  ;;  %v1493_v54 = vpop.f32.mrb[4].mxu0 }
 0x174   : > { %v1494_v3 = vpop.f32.mrb[5].mxu0 }
 0x175   : > { %v1153_v4 = vmul.f32 1.442695, %v1121_v14  ;;  %v1122_v5 = vadd.f32 %v2148_v1, %v1099_v29  ;;  %v1495_v28 = vadd.f32 %v1494_v3, %v1493_v54  ;;  %v1496_v17 = vpop.f32.mrb[6].mxu0  ;;  %vm1137_vm5 = vcmp.gt.f32.partialorder %v1121_v14, 0.0 }
 0x176   : > { %v1497_v7 = vpop.f32.mrb[7].mxu0 }
 0x177   : > { %1623 = vpow2.f32 %v1153_v4  ;;  %v1155_v9 = vmul.f32 1.442695, %v1122_v5  ;;  %v1037_v12 = vadd.f32 %v1569_v30, %v1495_v28  ;;  %v1498_v13 = vadd.f32 %v1497_v7, %v1496_v17 }
 0x178   : > { %vm1138_vm13 = vcmp.gt.f32.partialorder %v1122_v5, 0.0 }
 0x179   : > { %1625 = vpow2.f32 %v1155_v9  ;;  %v1100_v15 = vmul.f32 %v2143_v26, %v1037_v12  ;;  %v1040_v18 = vadd.f32 %v1570_v52, %v1498_v13 }
 0x17b   : > { %v1123_v21 = vadd.f32 %v2148_v1, %v1100_v15  ;;  %v1499_v22 = vpop.f32.mrb[8].mxu0  ;;  %v1101_v23 = vmul.f32 %v2143_v26, %v1040_v18 }
 0x17c   : > { %v1500_v0 = vpop.f32.mrb[9].mxu0 }
 0x17d   : > { %v1157_v11 = vmul.f32 1.442695, %v1123_v21  ;;  %v1501_v19 = vadd.f32 %v1500_v0, %v1499_v22  ;;  %v1502_v24 = vpop.f32.mrb[10].mxu0  ;;  %v1124_v25 = vadd.f32 %v2148_v1, %v1101_v23  ;;  %vm1139_vm14 = vcmp.gt.f32.partialorder %v1123_v21, 0.0 }
 0x17e   : > { %v1503_v16 = vpop.f32.mrb[11].mxu0 }
 0x17f   : > { %1627 = vpow2.f32 %v1157_v11  ;;  %v1504_v31 = vadd.f32 %v1503_v16, %v1502_v24  ;;  %v1159_v32 = vmul.f32 1.442695, %v1124_v25  ;;  %vm1140_vm0 = vcmp.gt.f32.partialorder %v1124_v25, 0.0 }
 0x181   : > { %v1624_v50 = vpop.eup %1623  ;;  %1629 = vpow2.f32 %v1159_v32 }
 0x182   : > { %v1418_v10 = vadd.f32 -1.0, %v1624_v50 }
 0x183   : > { %v1626_v58 = vpop.eup %1625  ;;  %v1505_v55 = vpop.f32.mrb[12].mxu0 }
 0x184   : > { %v1201_v33 = vsel %vm1137_vm5, %v1121_v14, %v1418_v10  ;;  %v1419_v60 = vadd.f32 -1.0, %v1626_v58  ;;  %v1506_v20 = vpop.f32.mrb[13].mxu0 }
 0x185   : > { %v1455_v34 = vpack.c.bf16 %v1201_v33, %v1201_v33  ;;  %v1507_v35 = vadd.f32 %v1506_v20, %v1505_v55  ;;  %v1508_v36 = vpop.f32.mrb[14].mxu0 }
 0x186   : > { %v1202_v38 = vsel %vm1138_vm13, %v1122_v5, %v1419_v60  ;;  %v1509_v39 = vpop.f32.mrb[15].mxu0 }
 0x187   : > { %1282 = vst.msk [vmem:[%s2163_s28] sm:$0xf] %vm1281_vm8, %v1455_v34  ;;  %v1456_v40 = vpack.c.bf16 %v1202_v38, %v1202_v38  ;;  %v1510_v6 = vadd.f32 %v1509_v39, %v1508_v36 }
 0x189   : > { %v1628_v8 = vpop.eup %1627  ;;  %1283 = vst.msk [vmem:[%s2163_s28 + $0x4] sm:$0xf] %vm1281_vm8, %v1456_v40 }
 0x18a   : > { %v1420_v41 = vadd.f32 -1.0, %v1628_v8 }
 0x18b   : > { %v1511_v42 = vpop.f32.mrb[16].mxu0  ;;  %v1630_v43 = vpop.eup %1629 }
 0x18c   : > { %v1203_v37 = vsel %vm1139_vm14, %v1123_v21, %v1420_v41  ;;  %v1512_v45 = vpop.f32.mrb[17].mxu0  ;;  %v1421_v47 = vadd.f32 -1.0, %v1630_v43 }
 0x18d   : > { %v1457_v46 = vpack.c.bf16 %v1203_v37, %v1203_v37  ;;  %v1513_v48 = vadd.f32 %v1512_v45, %v1511_v42  ;;  %v1514_v49 = vpop.f32.mrb[18].mxu0 }
 0x18e   : > { %v1515_v30 = vpop.f32.mrb[19].mxu0  ;;  %v1204_v51 = vsel %vm1140_vm0, %v1124_v25, %v1421_v47 }
 0x18f   : > { %1284 = vst.msk [vmem:[%s2163_s28 + $0x8] sm:$0xf] %vm1281_vm8, %v1457_v46  ;;  %v1573_v52 = vpop.f32.mrb[4].mxu1  ;;  %v1516_v53 = vadd.f32 %v1515_v30, %v1514_v49  ;;  %v1458_v56 = vpack.c.bf16 %v1204_v51, %v1204_v51 }
 0x190   : > { %v1053_v57 = vadd.f32 %v1573_v52, %v1507_v35  ;;  %v1044_v44 = vpop.f32.mrb[5].mxu1 }
 0x191   : > { %v1045_v59 = vadd.f32 %v1501_v19, %v1044_v44  ;;  %v1574_v61 = vpop.f32.mrb[6].mxu1  ;;  %1285 = vst.msk [vmem:[%s2163_s28 + $0xc] sm:$0xf] %vm1281_vm8, %v1458_v56 }
 0x192   : > { %v1104_v62 = vmul.f32 %v2143_v26, %v1053_v57  ;;  %v1056_v63 = vadd.f32 %v1574_v61, %v1510_v6  ;;  %v1047_v2 = vpop.f32.mrb[7].mxu1 }
 0x193   : > { %v1102_v27 = vmul.f32 %v2143_v26, %v1045_v59  ;;  %v1048_v14 = vadd.f32 %v1504_v31, %v1047_v2  ;;  %v1517_v29 = vpop.f32.mrb[20].mxu0 }
 0x194   : > { %v1127_v54 = vadd.f32 %v2148_v1, %v1104_v62  ;;  %v1105_v3 = vmul.f32 %v2143_v26, %v1056_v63  ;;  %v1518_v4 = vpop.f32.mrb[21].mxu0 }
 0x195   : > { %v2178_v5 = vadd.f32 %v2148_v1, %v1102_v27  ;;  %v1103_v28 = vmul.f32 %v2143_v26, %v1048_v14  ;;  %v1519_v17 = vadd.f32 %v1518_v4, %v1517_v29  ;;  %v1520_v7 = vpop.f32.mrb[22].mxu0 }
 0x196   : > { %v1165_v9 = vmul.f32 1.442695, %v1127_v54  ;;  %v2182_v12 = vadd.f32 %v2148_v1, %v1105_v3  ;;  %v1521_v13 = vpop.f32.mrb[23].mxu0  ;;  %vm1143_vm2 = vcmp.gt.f32.partialorder %v1127_v54, 0.0 }
 0x197   : > { %v1161_v15 = vmul.f32 1.442695, %v2178_v5  ;;  %v2186_v18 = vadd.f32 %v2148_v1, %v1103_v28  ;;  %v1522_v21 = vadd.f32 %v1521_v13, %v1520_v7  ;;  %vm1141_vm3 = vcmp.gt.f32.partialorder %v2178_v5, 0.0 }
 0x198   : > { %1631 = vpow2.f32 %v1165_v9  ;;  %v1167_v22 = vmul.f32 1.442695, %v2182_v12  ;;  %vm1144_vm4 = vcmp.gt.f32.partialorder %v2182_v12, 0.0 }
 0x199   : > { %1633 = vpow2.f32 %v1161_v15  ;;  %v1163_v23 = vmul.f32 1.442695, %v2186_v18  ;;  %vm1142_vm15 = vcmp.gt.f32.partialorder %v2186_v18, 0.0 }
 0x19a   : > { %1635 = vpow2.f32 %v1167_v22 }
 0x19b   : > { %1637 = vpow2.f32 %v1163_v23  ;;  %v1577_v0 = vpop.f32.mrb[8].mxu1  ;;  %v1523_v11 = vpop.f32.mrb[24].mxu0 }
 0x19c   : > { %v1069_v19 = vadd.f32 %v1577_v0, %v1519_v17  ;;  %v1060_v24 = vpop.f32.mrb[9].mxu1  ;;  %v1524_v25 = vpop.f32.mrb[25].mxu0 }
 0x19d   : > { %v1061_v16 = vadd.f32 %v1513_v48, %v1060_v24  ;;  %v1578_v31 = vpop.f32.mrb[10].mxu1  ;;  %v1525_v32 = vadd.f32 %v1524_v25, %v1523_v11  ;;  %v1526_v50 = vpop.f32.mrb[26].mxu0 }
 0x19e   : > { %v1108_v10 = vmul.f32 %v2143_v26, %v1069_v19  ;;  %v1072_v58 = vadd.f32 %v1578_v31, %v1522_v21  ;;  %v1063_v55 = vpop.f32.mrb[11].mxu1  ;;  %v1527_v33 = vpop.f32.mrb[27].mxu0 }
 0x19f   : > { %v1106_v60 = vmul.f32 %v2143_v26, %v1061_v16  ;;  %v1064_v20 = vadd.f32 %v1516_v53, %v1063_v55  ;;  %v1528_v34 = vadd.f32 %v1527_v33, %v1526_v50 }
 0x1a0   : > { %v2193_v35 = vadd.f32 %v2148_v1, %v1108_v10  ;;  %v1109_v36 = vmul.f32 %v2143_v26, %v1072_v58 }
 0x1a1   : > { %v2197_v38 = vadd.f32 %v2148_v1, %v1106_v60  ;;  %v1107_v39 = vmul.f32 %v2143_v26, %v1064_v20 }
 0x1a2   : > { %v1632_v40 = vpop.eup %1631  ;;  %v1173_v6 = vmul.f32 1.442695, %v2193_v35  ;;  %v2202_v8 = vadd.f32 %v2148_v1, %v1109_v36  ;;  %vm1147_vm10 = vcmp.gt.f32.partialorder %v2193_v35, 0.0 }
 0x1a3   : > { %v1634_v41 = vpop.eup %1633  ;;  %v1424_v42 = vadd.f32 -1.0, %v1632_v40  ;;  %v1169_v43 = vmul.f32 1.442695, %v2197_v38  ;;  %v2207_v37 = vadd.f32 %v2148_v1, %v1107_v39  ;;  %v1581_v45 = vpop.f32.mrb[12].mxu1  ;;  %vm1145_vm12 = vcmp.gt.f32.partialorder %v2197_v38, 0.0 }
 0x1a4   : > { %v1529_v46 = vpop.f32.mrb[28].mxu0  ;;  %v1636_v47 = vpop.eup %1635  ;;  %v1422_v48 = vadd.f32 -1.0, %v1634_v41  ;;  %1639 = vpow2.f32 %v1173_v6  ;;  %v1175_v49 = vmul.f32 1.442695, %v2202_v8  ;;  %vm1148_vm7 = vcmp.gt.f32.partialorder %v2202_v8, 0.0 }
 0x1a5   : > { %v1076_v30 = vpop.f32.mrb[13].mxu1  ;;  %v1530_v51 = vpop.f32.mrb[29].mxu0  ;;  %v1207_v53 = vsel %vm1143_vm2, %v1127_v54, %v1424_v42  ;;  %v1425_v56 = vadd.f32 -1.0, %v1636_v47  ;;  %1641 = vpow2.f32 %v1169_v43  ;;  %v1171_v29 = vmul.f32 1.442695, %v2207_v37 }
 0x1a6   : > { %v1638_v52 = vpop.eup %1637  ;;  %v1582_v57 = vpop.f32.mrb[14].mxu1  ;;  %v1461_v59 = vpack.c.bf16 %v1207_v53, %v1207_v53  ;;  %v1205_v61 = vsel %vm1141_vm3, %v2178_v5, %v1422_v48  ;;  %1643 = vpow2.f32 %v1175_v49  ;;  %v1077_v54 = vadd.f32 %v1525_v32, %v1076_v30 }
 0x1a7   : > { %v1532_v44 = vpop.f32.mrb[30].mxu0  ;;  %v1423_v62 = vadd.f32 -1.0, %v1638_v52  ;;  %v1079_v63 = vpop.f32.mrb[15].mxu1  ;;  %v1459_v27 = vpack.c.bf16 %v1205_v61, %v1205_v61  ;;  %v1208_v14 = vsel %vm1144_vm4, %v2182_v12, %v1425_v56  ;;  %v1531_v28 = vadd.f32 %v1530_v51, %v1529_v46 }
 0x1a8   : > { %v1533_v2 = vpop.f32.mrb[31].mxu0  ;;  %1288 = vst.msk [vmem:[%s2163_s28 + $0x18] sm:$0xf] %vm1281_vm8, %v1461_v59  ;;  %v1462_v3 = vpack.c.bf16 %v1208_v14, %v1208_v14  ;;  %v1080_v5 = vadd.f32 %v1528_v34, %v1079_v63  ;;  %1645 = vpow2.f32 %v1171_v29  ;;  %v1110_v7 = vmul.f32 %v2143_v26, %v1077_v54 }
 0x1a9   : > { %v1206_v4 = vsel %vm1142_vm15, %v2186_v18, %v1423_v62  ;;  %1286 = vst.msk [vmem:[%s2163_s28 + $0x10] sm:$0xf] %vm1281_vm8, %v1459_v27  ;;  %v1534_v9 = vadd.f32 %v1533_v2, %v1532_v44  ;;  %v1085_v13 = vadd.f32 %v1581_v45, %v1531_v28  ;;  %vm1146_vm6 = vcmp.gt.f32.partialorder %v2207_v37, 0.0 }
 0x1aa   : > { %v1460_v17 = vpack.c.bf16 %v1206_v4, %v1206_v4  ;;  %1289 = vst.msk [vmem:[%s2163_s28 + $0x1c] sm:$0xf] %vm1281_vm8, %v1462_v3  ;;  %v1111_v12 = vmul.f32 %v2143_v26, %v1080_v5  ;;  %v1133_v15 = vadd.f32 %v2148_v1, %v1110_v7 }
 0x1ab   : > { %v1088_v21 = vadd.f32 %v1582_v57, %v1534_v9  ;;  %v1112_v22 = vmul.f32 %v2143_v26, %v1085_v13 }
 0x1ac   : > { %1287 = vst.msk [vmem:[%s2163_s28 + $0x14] sm:$0xf] %vm1281_vm8, %v1460_v17  ;;  %v1134_v18 = vadd.f32 %v2148_v1, %v1111_v12  ;;  %v1177_v23 = vmul.f32 1.442695, %v1133_v15  ;;  %vm1149_vm9 = vcmp.gt.f32.partialorder %v1133_v15, 0.0 }
 0x1ad   : > { %v1113_v0 = vmul.f32 %v2143_v26, %v1088_v21  ;;  %v1135_v24 = vadd.f32 %v2148_v1, %v1112_v22 }
 0x1ae   : > { %v1640_v11 = vpop.eup %1639  ;;  %v1179_v19 = vmul.f32 1.442695, %v1134_v18  ;;  %1647 = vpow2.f32 %v1177_v23  ;;  %vm1150_vm11 = vcmp.gt.f32.partialorder %v1134_v18, 0.0 }
 0x1af   : > { %v1642_v25 = vpop.eup %1641  ;;  %v1428_v16 = vadd.f32 -1.0, %v1640_v11  ;;  %v1136_v31 = vadd.f32 %v2148_v1, %v1113_v0  ;;  %v1181_v10 = vmul.f32 1.442695, %v1135_v24  ;;  %vm1151_vm1 = vcmp.gt.f32.partialorder %v1135_v24, 0.0 }
 0x1b0   : > { %v1644_v32 = vpop.eup %1643  ;;  %v1426_v50 = vadd.f32 -1.0, %v1642_v25  ;;  %1649 = vpow2.f32 %v1179_v19 }
 0x1b1   : > { %v1211_v58 = vsel %vm1147_vm10, %v2193_v35, %v1428_v16  ;;  %v1429_v26 = vadd.f32 -1.0, %v1644_v32  ;;  %v1183_v55 = vmul.f32 1.442695, %v1136_v31  ;;  %1651 = vpow2.f32 %v1181_v10 }
 0x1b2   : > { %v1465_v33 = vpack.c.bf16 %v1211_v58, %v1211_v58  ;;  %v1209_v60 = vsel %vm1145_vm12, %v2197_v38, %v1426_v50  ;;  %v1646_v1 = vpop.eup %1645  ;;  %vm1152_vm5 = vcmp.gt.f32.partialorder %v1136_v31, 0.0 }
 0x1b3   : > { %v1463_v20 = vpack.c.bf16 %v1209_v60, %v1209_v60  ;;  %v1212_v34 = vsel %vm1148_vm7, %v2202_v8, %v1429_v26  ;;  %1653 = vpow2.f32 %v1183_v55  ;;  %v1427_v36 = vadd.f32 -1.0, %v1646_v1 }
 0x1b4   : > { %1292 = vst.msk [vmem:[%s2163_s28 + $0x28] sm:$0xf] %vm1281_vm8, %v1465_v33  ;;  %v1466_v35 = vpack.c.bf16 %v1212_v34, %v1212_v34 }
 0x1b5   : > { %1290 = vst.msk [vmem:[%s2163_s28 + $0x20] sm:$0xf] %vm1281_vm8, %v1463_v20  ;;  %v1210_v38 = vsel %vm1146_vm6, %v2207_v37, %v1427_v36 }
 0x1b6   : > { %1293 = vst.msk [vmem:[%s2163_s28 + $0x2c] sm:$0xf] %vm1281_vm8, %v1466_v35  ;;  %v1464_v39 = vpack.c.bf16 %v1210_v38, %v1210_v38 }
 0x1b8   : > { %v1648_v40 = vpop.eup %1647  ;;  %1291 = vst.msk [vmem:[%s2163_s28 + $0x24] sm:$0xf] %vm1281_vm8, %v1464_v39 }
 0x1b9   : > { %v1430_v8 = vadd.f32 -1.0, %v1648_v40 }
 0x1ba   : > { %v1650_v6 = vpop.eup %1649 }
 0x1bb   : > { %v1431_v41 = vadd.f32 -1.0, %v1650_v6  ;;  %v1652_v42 = vpop.eup %1651  ;;  %v1213_v43 = vsel %vm1149_vm9, %v1133_v15, %v1430_v8 }
 0x1bc   : > { %v1467_v46 = vpack.c.bf16 %v1213_v43, %v1213_v43  ;;  %v1432_v48 = vadd.f32 -1.0, %v1652_v42 }
 0x1bd   : > { %v1654_v45 = vpop.eup %1653  ;;  %v1214_v47 = vsel %vm1150_vm11, %v1134_v18, %v1431_v41 }
 0x1be   : > { %v1468_v37 = vpack.c.bf16 %v1214_v47, %v1214_v47  ;;  %v1433_v49 = vadd.f32 -1.0, %v1654_v45  ;;  %1294 = vst.msk [vmem:[%s2163_s28 + $0x30] sm:$0xf] %vm1281_vm8, %v1467_v46  ;;  %v1215_v30 = vsel %vm1151_vm1, %v1135_v24, %v1432_v48 }
 0x1bf   : > { %v1469_v51 = vpack.c.bf16 %v1215_v30, %v1215_v30 }
 0x1c0   : > { %1295 = vst.msk [vmem:[%s2163_s28 + $0x34] sm:$0xf] %vm1281_vm8, %v1468_v37  ;;  %v1216_v52 = vsel %vm1152_vm5, %v1136_v31, %v1433_v49 }
 0x1c1   : > { %v1470_v53 = vpack.c.bf16 %v1216_v52, %v1216_v52  ;;  %1296 = vst.msk [vmem:[%s2163_s28 + $0x38] sm:$0xf] %vm1281_vm8, %v1469_v51 }
 0x1c3   : > { %1297 = vst.msk [vmem:[%s2163_s28 + $0x3c] sm:$0xf] %vm1281_vm8, %v1470_v53 }
 0x1c4 PF: > { %s15_s18 = sadd.s32 1, %s1661_s18  }
 0x1c5   : > { %p12_p4 = scmp.ge.s32.totalorder %s15_s18, 4  }
 0x1c7   :  { %14 = sbr.rel (!%p12_p4) target bundleno = 1 (0x1), region = 79 }

// kernel: adecoder_forward.8
= control target key start
LH: loop header
LB: loop body
LE: loop exit
PB: predicated region body
PF: predicated region fallthrough
CT: control target
= control target key end

     0   :  { %s2285_s18 = smov 0   ;;  %s3150_s0 = inlined_call_operand.vmem [shape: bf16[2,4,31,32], index: 0, kind: input, shape index: {}]   ;;  %s3151_s1 = inlined_call_operand.vmem [shape: f32[2,4,31,32], index: 1, kind: input, shape index: {}]   ;;  %s3152_s2 = inlined_call_operand.vmem [shape: bf16[384,32], index: 2, kind: input, shape index: {}]   ;;  %s3153_s3 = inlined_call_operand.vmem [shape: f32[1,32], index: 3, kind: input, shape index: {}]   ;;  %s3154_s4 = inlined_call_operand.vmem [shape: f32[1,32], index: 4, kind: input, shape index: {}]   ;;  %s3155_s5 = inlined_call_operand.vmem [shape: bf16[2,192,32], index: 5, kind: output, shape index: {}]  }
   0x1 LB: > { %s1857_s19 = sadd.s32 4294967295, %s2249_s18   ;;  %p1861_p0 = scmp.ge.s32.totalorder %s2249_s18, 1  ;;  %s2249_s18 = sphi %s2285_s18, %s15_s18  }
   0x2   : > { %p197_p1 = scmp.lt.s32.totalorder %s2249_s18, 3 }
   0x4   : > { %p198_p2 = pnand %p1861_p0, %p197_p1 }
   0x5   : > { %p2293_p3 = scmp.lt.s32.totalorder (!%p198_p2), %s1857_s19, 1  ;;  %vm3157_vm0 = vcmask (!%p198_p2), 1040384   ;;  %vm3158_vm1 = vsmask.f32 (!%p198_p2), 256  ;;  %v2251_v1 = vmov (!%p198_p2), 0   ;;  %v2169_v6 = vld [vmem:[%s3152_s2 + $0x40] sm:$0xff] (!%p198_p2)  }
   0x6   : > { %201 = sbr.rel (%p198_p2) target bundleno = 524 (0x20c), region = 40  ;;  %vm2299_vm2 = vmand (!%p198_p2), %vm3157_vm0, %vm3158_vm1  ;;  %246 = vst [vmem:[#allocation2] sm:$0xff] (!%p198_p2), %v2251_v1  ;;  %2125 = vmatprep.mubr.bf16.mxu1 (!%p198_p2), %v2251_v1  ;;  %v258_v2 = vld [vmem:[#allocation2 + $0x38] sm:$0x1] (!%p198_p2)  ;;  %v273_v3 = vld [vmem:[#allocation2 + $0x80] sm:$0x1] (!%p198_p2)  ;;  %2001 = vmatprep.subr.bf16.mxu0 (!%p198_p2), %v2169_v6 }
   0x7   : > { %247 = vst [vmem:[#allocation2 + $0x8] sm:$0xff] (!%p198_p2), %v2251_v1  ;;  %248 = vst [vmem:[#allocation2 + $0x10] sm:$0xff] (!%p198_p2), %v2251_v1  ;;  %v259_v4 = vsel (!%p198_p2), %vm2299_vm2, 0, %v258_v2  ;;  %v274_v5 = vsel (!%p198_p2), %vm2299_vm2, 0, %v273_v3  ;;  %v2170_v7 = vld [vmem:[%s3152_s2] sm:$0xff] (!%p198_p2)   ;;  %vm3161_vm3 = vcmask (!%p198_p2), 261120  }
   0x8   : > { %250 = vst [vmem:[#allocation2 + $0x20] sm:$0xff] (!%p198_p2), %v2251_v1  ;;  %264 = vst [vmem:[#allocation2 + $0x48] sm:$0xff] (!%p198_p2), %v2251_v1  ;;  %v2171_v8 = vld [vmem:[%s3152_s2 + $0x80] sm:$0xff] (!%p198_p2)   ;;  %2002 = vmatpush3.bf16.msra.mxu0 (!%p198_p2), %v2170_v7  ;;  %s2252_s10 = smov (!%p198_p2), 32   ;;  %vm376_vm4 = vsmask.f32 (!%p198_p2), 7938 }
   0x9   : > { %265 = vst [vmem:[#allocation2 + $0x50] sm:$0xff] (!%p198_p2), %v2251_v1  ;;  %269 = vst [vmem:[#allocation2 + $0x70] sm:$0xff] (!%p198_p2), %v2251_v1  ;;  %2109 = vmatprep.subr.bf16.mxu1 (!%p198_p2), %v2171_v8  ;;  %s2253_s11 = smov (!%p198_p2), 64   ;;  %vm420_vm6 = vcmask (!%p198_p2), 253952   ;;  %s2254_s12 = smov (!%p198_p2), 96   ;;  %v2172_v59 = vld [vmem:[%s3152_s2 + $0x48] sm:$0xff] (!%p198_p2)  }
   0xa   : > { %279 = vst [vmem:[#allocation2 + $0x90] sm:$0xff] (!%p198_p2), %v2251_v1  ;;  %280 = vst [vmem:[#allocation2 + $0x98] sm:$0xff] (!%p198_p2), %v2251_v1  ;;  %2110 = vmatpush3.bf16.msra.mxu1 (!%p198_p2), %v2171_v8  ;;  %v2173_v62 = vld [vmem:[%s3152_s2 + $0x8] sm:$0xff] (!%p198_p2)   ;;  %vm3160_vm7 = vcmask (!%p198_p2), 261121   ;;  %2003 = vmatprep.subr.bf16.mxu0 (!%p198_p2), %v2172_v59  ;;  %vm334_vm9 = vsmask.f32 (!%p198_p2), 7424 }
   0xb   : > { %284 = vst [vmem:[#allocation2 + $0xb8] sm:$0xff] (!%p198_p2), %v2251_v1  ;;  %294 = vst [vmem:[#allocation2 + $0xd8] sm:$0xff] (!%p198_p2), %v2251_v1  ;;  %vm3156_vm10 = vcmask (!%p198_p2), 523520   ;;  %vm3159_vm12 = vcmask (!%p198_p2), 523521   ;;  %vm375_vm14 = vcmask (!%p198_p2), 785920   ;;  %vm404_vm15 = vcmask (!%p198_p2), 1048320  }
   0xc   : > { %295 = vst [vmem:[#allocation2 + $0xe0] sm:$0xff] (!%p198_p2), %v2251_v1  ;;  %299 = vst [vmem:[#allocation2 + $0x100] sm:$0xff] (!%p198_p2), %v2251_v1  ;;  %2004 = vmatpush3.bf16.msra.mxu0 (!%p198_p2), %v2173_v62 }
   0xd   : > { %s3207_s19 = smov (!%p2293_p3, %s1857_s19), 1  ;;  %260 = vst [vmem:[#allocation2 + $0x38] sm:$0x1] %v259_v4  ;;  %275 = vst [vmem:[#allocation2 + $0x80] sm:$0x1] %v274_v5 }
   0xe   : > { %s1976_s21 = sshll.u32 %s3207_s19, 7  ;;  %s1975_s29 = sshll.u32 %s3207_s19, 6  ;;  %vm2392_vm5 = vmand %vm3161_vm3, %vm376_vm4 }
   0xf   : > { %s2335_s28 = scalar_lea.vmem %s3151_s1, %s1976_s21  ;;  %s2347_s9 = scalar_lea.vmem %s3150_s0, %s1975_s29  ;;  %vm2464_vm8 = vmand %vm420_vm6, %vm3158_vm1 }
  0x10   : > { %v1873_v9 = vld [vmem:[%s2335_s28 + $0x20] sm:$0xff]  ;;  %v1874_v10 = vld [vmem:[%s2335_s28 + $0x28] sm:$0xff]  ;;  %v315_v14 = vld [vmem:[%s2335_s28 + $0x10] sm:$0xff] }
  0x11   : > { %v313_v11 = vld [vmem:[%s2335_s28] sm:$0xff]  ;;  %v2349_v12 = vpack.c.bf16 %v1874_v10, %v1873_v9  ;;  %v314_v13 = vld [vmem:[%s2335_s28 + $0x8] sm:$0xff]  ;;  %v316_v15 = vld [vmem:[%s2335_s28 + $0x18] sm:$0x7f] }
  0x12   : > { %v2354_v16 = vpack.c.bf16 %v314_v13, %v313_v11  ;;  %v2356_v17 = vpack.c.bf16 %v316_v15, %v315_v14  ;;  %v2359_v18 = vld [vmem:[%s2347_s9] sm:$0xff]   ;;  %v2364_v19 = vld [vmem:[%s2347_s9 + $0x8] sm:$0xff]   ;;  %v2383_v29 = vld [vmem:[%s2347_s9 + $0x10] sm:$0xff]  }
  0x13   : > { %549 = vrot.lane.b32.xlu1 %v2349_v12, %s2252_s10  ;;  %v355_v22 = vshrl.u32 %v2359_v18, 16  ;;  %v358_v23 = vshll.u32 %v2359_v18, 16  ;;  %332 = vst.msk [vmem:[#allocation2] sm:$0xff] %vm3161_vm3, %v2359_v18  ;;  %v362_v25 = vshrl.u32 %v2364_v19, 16  ;;  %v365_v26 = vshll.u32 %v2364_v19, 16  ;;  %v2386_v30 = vld [vmem:[%s2347_s9 + $0x18] sm:$0xff]   ;;  %vm2770_vm11 = vmand %vm3161_vm3, %vm334_vm9 }
  0x14   : > { %341 = vrot.lane.b32.xlu0 %v2354_v16, %s2252_s10  ;;  %v2369_v20 = vrot.slane %v2354_v16, 7  ;;  %v2372_v21 = vrot.slane %v2356_v17, 7  ;;  %v384_v24 = vshrl.u32 %v2354_v16, 16  ;;  %v391_v28 = vshrl.u32 %v2356_v17, 16  ;;  %543 = vst.msk [vmem:[#allocation2 + $0x48] sm:$0xff] %vm3161_vm3, %v2383_v29  ;;  %v2416_v45 = vld [vmem:[%s2347_s9 + $0x20] sm:$0xff]   ;;  %vm2783_vm13 = vmand %vm3156_vm10, %vm334_vm9 }
  0x15   : > { %v357_v27 = vrot.slane %v355_v22, 7  ;;  %v387_v33 = vshll.u32 %v2354_v16, 16  ;;  %v364_v34 = vrot.slane %v362_v25, 7  ;;  %v560_v37 = vshrl.u32 %v2383_v29, 16  ;;  %725 = vst.msk [vmem:[#allocation2 + $0x90] sm:$0xff] %vm3161_vm3, %v2416_v45  ;;  %v2432_v54 = vld [vmem:[%s2347_s9 + $0x28] sm:$0xff]   ;;  %vm2802_vm6 = vmand %vm375_vm14, %vm376_vm4 }
  0x16   : > { %v386_v32 = vrot.slane %v384_v24, 7  ;;  %v2402_v35 = vsel %vm3157_vm0, %v2369_v20, %v2372_v21  ;;  %v563_v38 = vshll.u32 %v2383_v29, 16  ;;  %v393_v40 = vrot.slane %v391_v28, 7  ;;  %v2435_v55 = vld [vmem:[%s2347_s9 + $0x30] sm:$0xff]   ;;  %v422_v61 = vld [vmem:[#allocation2 + $0x38] sm:$0x1] }
  0x17   : > { %428 = vrot.lane.b32.xlu1 %v2369_v20, %s2252_s10  ;;  %v2404_v36 = vor.u32 %v358_v23, %v357_v27  ;;  %v367_v39 = vor.u32 %v365_v26, %v364_v34  ;;  %v394_v41 = vshll.u32 %v2356_v17, 16  ;;  %v562_v43 = vrot.slane %v560_v37, 7  ;;  %907 = vst.msk [vmem:[#allocation2 + $0xd8] sm:$0xff] %vm3161_vm3, %v2435_v55  ;;  %v2174_v10 = vld [vmem:[%s3152_s2 + $0x88] sm:$0xff]   ;;  %v1875_v13 = vld [vmem:[%s2335_s28 + $0x30] sm:$0xff] }
  0x18   : > { %343 = vrot.lane.b32.xlu0 %v2356_v17, %s2252_s10  ;;  %v567_v44 = vshrl.u32 %v2386_v30, 16  ;;  %v2420_v46 = vor.u32 %v387_v33, %v386_v32  ;;  %v570_v48 = vshll.u32 %v2386_v30, 16  ;;  %v742_v52 = vshrl.u32 %v2416_v45, 16  ;;  %v1876_v14 = vld [vmem:[%s2335_s28 + $0x38] sm:$0x7f]  ;;  %2111 = vmatprep.subr.bf16.mxu1 %v2174_v10  ;;  %v2175_v25 = vld [vmem:[%s3152_s2 + $0x50] sm:$0xff]  }
  0x19   : > { %v471_v42 = vsel %vm2392_vm5, %v2404_v36, 0  ;;  %v368_v47 = vsel %vm3158_vm1, %v357_v27, %v367_v39  ;;  %v565_v49 = vor.u32 %v563_v38, %v562_v43  ;;  %v396_v51 = vor.u32 %v394_v41, %v393_v40  ;;  %v617_v24 = vld [vmem:[#allocation2 + $0x80] sm:$0x1]  ;;  %2112 = vmatpush3.bf16.msra.mxu1 %v2174_v10  ;;  %2005 = vmatprep.subr.bf16.mxu0 %v2175_v25  ;;  %v2176_v37 = vld [vmem:[%s3152_s2 + $0x10] sm:$0xff]   ;;  %v2179_v41 = vld [vmem:[%s3152_s2 + $0x58] sm:$0xff]  }
  0x1a   : > { %473 = vst.msk [vmem:[#allocation2 + $0x70] sm:$0xff] %vm3161_vm3, %v368_v47  ;;  %v569_v50 = vrot.slane %v567_v44, 7  ;;  %v745_v53 = vshll.u32 %v2416_v45, 16  ;;  %v744_v58 = vrot.slane %v742_v52, 7  ;;  %v749_v3 = vshrl.u32 %v2432_v54, 16  ;;  %2006 = vmatpush3.bf16.msra.mxu0 %v2176_v37  ;;  %v2178_v38 = vld [vmem:[%s3152_s2 + $0x90] sm:$0xff]  }
  0x1b   : > { %430 = vrot.lane.b32.xlu1 %v2402_v35, %s2252_s10  ;;  %v660_v56 = vsel %vm2392_vm5, %v565_v49, 0  ;;  %v2454_v63 = vsel %vm3158_vm1, %v386_v32, %v396_v51  ;;  %v752_v4 = vshll.u32 %v2432_v54, 16  ;;  %v2469_v6 = vrot.slane %v2364_v19, 7  ;;  %2113 = vmatprep.subr.bf16.mxu1 %v2178_v38  ;;  %v1884_v51 = vld [vmem:[%s2335_s28 + $0x48] sm:$0xff]  ;;  %v255_v25 = vld [vmem:[#allocation2 + $0x30] sm:$0x1] }
  0x1c   : > { %369 = vrot.lane.b32.xlu0 %v2404_v36, %s2253_s11  ;;  %v572_v57 = vor.u32 %v570_v48, %v569_v50  ;;  %661 = vst [vmem:[#allocation2 + $0xa0] sm:$0xff] %v660_v56  ;;  %v2458_v2 = vor.u32 %v745_v53, %v744_v58  ;;  %v2472_v7 = vrot.slane %v2359_v18, 7  ;;  %v751_v9 = vrot.slane %v749_v3, 7  ;;  %2007 = vmatprep.subr.bf16.mxu0 %v2179_v41  ;;  %v2182_v48 = vld [vmem:[%s3152_s2 + $0x60] sm:$0xff]   ;;  %v2187_v3 = vld [vmem:[%s3152_s2 + $0xa8] sm:$0xff]  }
  0x1d   : > { %v585_v11 = vshrl.u32 %v2349_v12, 16  ;;  %v423_v15 = vsel %vm2464_vm8, %v2469_v6, %v422_v61  ;;  %v2503_v26 = vrot.slane %v2386_v30, 7  ;;  %v588_v27 = vshll.u32 %v2349_v12, 16  ;;  %2114 = vmatpush3.bf16.msra.mxu1 %v2178_v38  ;;  %v1883_v50 = vld [vmem:[%s2335_s28 + $0x40] sm:$0xff] }
  0x1e   : > { %v2448_v60 = vsel %vm3158_vm1, %v562_v43, %v572_v57  ;;  %v842_v8 = vsel %vm2392_vm5, %v2458_v2, 0  ;;  %418 = vst.msk [vmem:[#allocation2 + $0x8] sm:$0xfe] %vm3160_vm7, %v2472_v7  ;;  %v754_v22 = vor.u32 %v752_v4, %v751_v9  ;;  %424 = vst [vmem:[#allocation2 + $0x38] sm:$0x1] %v423_v15  ;;  %v2495_v23 = vsel %vm3157_vm0, %v2472_v7, %v2469_v6  ;;  %v2180_v43 = vld [vmem:[%s3152_s2 + $0x18] sm:$0xff]  }
  0x1f   : > { %398 = vrot.lane.b32.xlu1 %v2420_v46, %s2254_s12  ;;  %662 = vst.msk [vmem:[#allocation2 + $0xb8] sm:$0xff] %vm3161_vm3, %v2448_v60  ;;  %843 = vst [vmem:[#allocation2 + $0xe8] sm:$0xff] %v842_v8  ;;  %v2508_v28 = vpack.c.bf16 %v1876_v14, %v1875_v13  ;;  %v587_v33 = vrot.slane %v585_v11, 7  ;;  %v618_v34 = vsel %vm2464_vm8, %v2503_v26, %v617_v24  ;;  %v2528_v39 = vrot.slane %v2349_v12, 7  ;;  %v2184_v56 = vld [vmem:[%s3152_s2 + $0xa0] sm:$0xff]   ;;  %v2185_v57 = vld [vmem:[%s3152_s2 + $0x68] sm:$0xff]  }
  0x20   : > { %371 = vrot.lane.b32.xlu0 %v368_v47, %s2253_s11  ;;  %419 = vst.msk [vmem:[#allocation2 + $0x20] sm:$0xff] %vm3161_vm3, %v2495_v23  ;;  %v2511_v32 = vsel %vm3158_vm1, %v744_v58, %v754_v22  ;;  %619 = vst [vmem:[#allocation2 + $0x80] sm:$0x1] %v618_v34  ;;  %v288_v47 = vld [vmem:[#allocation2 + $0xc8] sm:$0x1]  ;;  %2008 = vmatpush3.bf16.msra.mxu0 %v2180_v43  ;;  %v2572_v59 = vpack.c.bf16 %v1884_v51, %v1883_v50  ;;  %v2581_v4 = vrot.slane %v2432_v54, 7 }
  0x21   : > { %844 = vst.msk [vmem:[#allocation2 + $0x100] sm:$0xff] %vm3161_vm3, %v2511_v32  ;;  %v592_v40 = vshrl.u32 %v2508_v28, 16  ;;  %v2539_v44 = vor.u32 %v588_v27, %v587_v33  ;;  %v595_v53 = vshll.u32 %v2508_v28, 16  ;;  %2009 = vmatprep.subr.bf16.mxu0 %v2182_v48  ;;  %v2186_v58 = vld [vmem:[%s3152_s2 + $0x28] sm:$0xff]   ;;  %v2575_v62 = vrot.slane %v2508_v28, 7  ;;  %v2188_v8 = vld [vmem:[%s3152_s2 + $0x70] sm:$0xff]  }
  0x22   : > { %v2190_v11 = vld [vmem:[%s3152_s2 + $0xb0] sm:$0xff]   ;;  %v2192_v15 = vld [vmem:[%s3152_s2 + $0x38] sm:$0xff]   ;;  %v767_v24 = vshrl.u32 %v2572_v59, 16  ;;  %v770_v38 = vshll.u32 %v2572_v59, 16  ;;  %vm494_vm5 = vcmask 785921  }
  0x23   : > { %432 = vrot.lane.b32.xlu1 %v2372_v21, %s2252_s10  ;;  %v594_v52 = vrot.slane %v592_v40, 7  ;;  %v2608_v14 = vsel %vm3157_vm0, %v2528_v39, %v2575_v62  ;;  %v2193_v22 = vld [vmem:[%s3152_s2 + $0xb8] sm:$0xff]   ;;  %v276_v40 = vld [vmem:[#allocation2 + $0x88] sm:$0x1]  ;;  %v1885_v48 = vld [vmem:[%s2335_s28 + $0x50] sm:$0xff] }
  0x24   : > { %400 = vrot.lane.b32.xlu0 %v2454_v63, %s2254_s12  ;;  %v270_v27 = vld [vmem:[#allocation2 + $0x78] sm:$0x1]  ;;  %v769_v37 = vrot.slane %v767_v24, 7  ;;  %v277_v41 = vsel %vm2299_vm2, 0, %v276_v40 }
  0x25   : > { %v597_v61 = vor.u32 %v595_v53, %v594_v52  ;;  %v271_v34 = vsel %vm2299_vm2, 0, %v270_v27  ;;  %278 = vst [vmem:[#allocation2 + $0x88] sm:$0x1] %v277_v41  ;;  %v1896_v24 = vld [vmem:[%s2335_s28 + $0x78] sm:$0x7f] }
  0x26   : > { %272 = vst [vmem:[#allocation2 + $0x78] sm:$0x1] %v271_v34  ;;  %v2634_v43 = vor.u32 %v770_v38, %v769_v37 }
  0x27   : > { %447 = vrot.lane.b32.xlu1 %v2364_v19, %s2253_s11  ;;  %v2600_v13 = vsel %vm3158_vm1, %v587_v33, %v597_v61  ;;  %v256_v33 = vsel %vm2299_vm2, 0, %v255_v25 }
  0x28   : > { %574 = vrot.lane.b32.xlu0 %v565_v49, %s2253_s11  ;;  %v289_v49 = vsel %vm2299_vm2, 0, %v288_v47  ;;  %257 = vst [vmem:[#allocation2 + $0x30] sm:$0x1] %v256_v33  ;;  %v1894_v47 = vld [vmem:[%s2335_s28 + $0x68] sm:$0xff] }
  0x29   : > { %290 = vst [vmem:[#allocation2 + $0xc8] sm:$0x1] %v289_v49  ;;  %v1886_v49 = vld [vmem:[%s2335_s28 + $0x58] sm:$0x7f] }
  0x2a   : > { %v2654_v50 = vpack.c.bf16 %v1886_v49, %v1885_v48 }
  0x2b   : > { %456 = vrot.lane.b32.xlu1 %v2354_v16, %s2254_s12  ;;  %v2181_v16 = vld [vmem:[%s3152_s2 + $0x98] sm:$0xff]  }
  0x2c   : > { %445 = vrot.lane.b32.xlu0 %v2359_v18, %s2253_s11  ;;  %v2183_v18 = vld [vmem:[%s3152_s2 + $0x20] sm:$0xff]   ;;  %2115 = vmatprep.subr.bf16.mxu1 %v2181_v16  ;;  %v2664_v51 = vrot.slane %v2654_v50, 7  ;;  %v777_v52 = vshll.u32 %v2654_v50, 16 }
  0x2d   : > { %2116 = vmatpush3.bf16.msra.mxu1 %v2181_v16  ;;  %2010 = vmatpush3.bf16.msra.mxu0 %v2183_v18  ;;  %v2645_v16 = vrot.slane %v2572_v59, 7 }
  0x2e   : > { %2117 = vmatprep.subr.bf16.mxu1 %v2184_v56  ;;  %2011 = vmatprep.subr.bf16.mxu0 %v2185_v57 }
  0x2f   : > { %623 = vrot.lane.b32.xlu1 %v2528_v39, %s2252_s10 }
  0x30   : > { %599 = vrot.lane.b32.xlu0 %v2539_v44, %s2254_s12  ;;  %v799_v9 = vld [vmem:[#allocation2 + $0xc8] sm:$0x1] }
  0x31   : > { %2118 = vmatpush3.bf16.msra.mxu1 %v2184_v56  ;;  %2012 = vmatpush3.bf16.msra.mxu0 %v2186_v58  ;;  %v800_v10 = vsel %vm2464_vm8, %v2581_v4, %v799_v9  ;;  %v2676_v56 = vsel %vm3157_vm0, %v2645_v16, %v2664_v51  ;;  %v924_v58 = vshrl.u32 %v2435_v55, 16  ;;  %v285_v9 = vld [vmem:[#allocation2 + $0xc0] sm:$0x1] }
  0x32   : > { %2119 = vmatprep.subr.bf16.mxu1 %v2187_v3  ;;  %2013 = vmatprep.subr.bf16.mxu0 %v2188_v8  ;;  %801 = vst [vmem:[#allocation2 + $0xc8] sm:$0x1] %v800_v10  ;;  %v303_v10 = vld [vmem:[#allocation2 + $0x110] sm:$0x1] }
  0x33   : > { %551 = vrot.lane.b32.xlu1 %v2508_v28, %s2252_s10 }
  0x34   : > { %458 = vrot.lane.b32.xlu0 %v2356_v17, %s2254_s12  ;;  %v2189_v17 = vld [vmem:[%s3152_s2 + $0x30] sm:$0xff]  }
  0x35   : > { %2120 = vmatpush3.bf16.msra.mxu1 %v2187_v3  ;;  %2014 = vmatpush3.bf16.msra.mxu0 %v2189_v17  ;;  %v291_v3 = vld [vmem:[#allocation2 + $0xd0] sm:$0x1]  ;;  %v286_v17 = vsel %vm2299_vm2, 0, %v285_v9 }
  0x36   : > { %2121 = vmatprep.subr.bf16.mxu1 %v2190_v11  ;;  %v292_v8 = vsel %vm2299_vm2, 0, %v291_v3  ;;  %287 = vst [vmem:[#allocation2 + $0xc0] sm:$0x1] %v286_v17 }
  0x37   : > { %576 = vrot.lane.b32.xlu1 %v2448_v60, %s2253_s11  ;;  %v2191_v60 = vld [vmem:[%s3152_s2 + $0x78] sm:$0xff]   ;;  %293 = vst [vmem:[#allocation2 + $0xd0] sm:$0x1] %v292_v8 }
  0x38   : > { %731 = vrot.lane.b32.xlu0 %v2572_v59, %s2252_s10  ;;  %2015 = vmatprep.subr.bf16.mxu0 %v2191_v60  ;;  %v306_v60 = vld [vmem:[#allocation2 + $0x118] sm:$0x1] }
  0x39   : > { %2122 = vmatpush3.bf16.msra.mxu1 %v2190_v11  ;;  %2016 = vmatpush3.bf16.msra.mxu0 %v2192_v15  ;;  %v2733_v11 = vld [vmem:[%s2347_s9 + $0x38] sm:$0xff]   ;;  %v304_v15 = vsel %vm2299_vm2, 0, %v303_v10 }
  0x3a   : > { %2123 = vmatprep.subr.bf16.mxu1 %v2193_v22  ;;  %305 = vst [vmem:[#allocation2 + $0x110] sm:$0x1] %v304_v15  ;;  %v931_v25 = vshrl.u32 %v2733_v11, 16  ;;  %v974_v33 = vrot.slane %v2733_v11, 7  ;;  %v934_v34 = vshll.u32 %v2733_v11, 16 }
  0x3b   : > { %601 = vrot.lane.b32.xlu1 %v2600_v13, %s2254_s12 }
  0x3c   : > { %625 = vrot.lane.b32.xlu0 %v2608_v14, %s2252_s10 }
  0x3d   : > { %2124 = vmatpush3.bf16.msra.mxu1 %v2193_v22  ;;  %v1895_v22 = vld [vmem:[%s2335_s28 + $0x70] sm:$0xff] }
  0x3e   : > { %v2755_v27 = vpack.c.bf16 %v1896_v24, %v1895_v22 }
  0x3f   : > { %756 = vrot.lane.b32.xlu1 %v2458_v2, %s2253_s11  ;;  %v1893_v2 = vld [vmem:[%s2335_s28 + $0x60] sm:$0xff] }
  0x40   : > { %627 = vrot.lane.b32.xlu0 %v2575_v62, %s2252_s10  ;;  %2126 = vmatmul.mubr.bf16.vlgmr.msra.gmra.mrb[0].mxu1 %v2251_v1  ;;  %v2652_v18 = vpack.c.bf16 %v1894_v47, %v1893_v2  ;;  %v774_v1 = vshrl.u32 %v2654_v50, 16  ;;  %v956_v5 = vshrl.u32 %v2755_v27, 16  ;;  %v337_v47 = vsel %vm2770_vm11, %v2364_v19, 0 }
  0x43   : > { %637 = vrot.lane.b32.xlu1 %v2383_v29, %s2253_s11 }
  0x44   : > { %639 = vrot.lane.b32.xlu0 %v2386_v30, %s2253_s11 }
  0x47   : > { %781 = vrot.lane.b32.xlu1 %v2634_v43, %s2254_s12 }
  0x48   : > { %647 = vrot.lane.b32.xlu0 %v2349_v12, %s2254_s12  ;;  %v261_v12 = vld [vmem:[#allocation2 + $0x40] sm:$0x1] }
  0x49   : > { %v262_v53 = vsel %vm2299_vm2, 0, %v261_v12 }
  0x4a   : > { %263 = vst [vmem:[#allocation2 + $0x40] sm:$0x1] %v262_v53 }
  0x4b   : > { %649 = vrot.lane.b32.xlu1 %v2508_v28, %s2254_s12  ;;  %v776_v28 = vrot.slane %v774_v1, 7 }
  0x4c   : > { %805 = vrot.lane.b32.xlu0 %v2645_v16, %s2252_s10 }
  0x4d   : > { %v779_v57 = vor.u32 %v777_v52, %v776_v28  ;;  %v300_v52 = vld [vmem:[#allocation2 + $0x108] sm:$0x1] }
  0x4f   : > { %913 = vrot.lane.b32.xlu1 %v2652_v18, %s2252_s10  ;;  %v2684_v61 = vsel %vm3158_vm1, %v769_v37, %v779_v57  ;;  %v981_v37 = vld [vmem:[#allocation2 + $0x110] sm:$0x1] }
  0x50   : > { %733 = vrot.lane.b32.xlu0 %v2654_v50, %s2252_s10 }
  0x53   : > { %758 = vrot.lane.b32.xlu1 %v2511_v32, %s2253_s11  ;;  %v1009_v32 = vld [vmem:[#allocation2 + $0x40] sm:$0xff] }
  0x54   : > { %474 = vrot.lane.b32.xlu0 %v2420_v46, %s2252_s10  ;;  %2129 = vmatprep.mubr.bf16.mxu1 %v1009_v32  ;;  %v2690_v46 = vrot.slane %v924_v58, 7  ;;  %v301_v32 = vsel %vm2299_vm2, 0, %v300_v52 }
  0x55   : > { %302 = vst [vmem:[#allocation2 + $0x108] sm:$0x1] %v301_v32 }
  0x57   : > { %489 = vrot.lane.b32.xlu1 %v2469_v6, %s2253_s11  ;;  %v927_v6 = vshll.u32 %v2435_v55, 16 }
  0x58   : > { %807 = vrot.lane.b32.xlu0 %v2676_v56, %s2252_s10 }
  0x5b   : > { %485 = vrot.lane.b32.xlu1 %v2472_v7, %s2253_s11  ;;  %v929_v7 = vor.u32 %v927_v6, %v2690_v46  ;;  %v2817_v6 = vrot.slane %v2416_v45, 7 }
  0x5c   : > { %783 = vrot.lane.b32.xlu0 %v2684_v61, %s2254_s12 }
  0x5f   : > { %809 = vrot.lane.b32.xlu1 %v2664_v51, %s2252_s10 }
  0x60   : > { %502 = vrot.lane.b32.xlu0 %v2369_v20, %s2254_s12  ;;  %v949_v20 = vshrl.u32 %v2652_v18, 16 }
  0x63   : > { %476 = vrot.lane.b32.xlu1 %v2454_v63, %s2252_s10  ;;  %v2718_v63 = vrot.slane %v949_v20, 7 }
  0x64   : > { %938 = vrot.lane.b32.xlu0 %v929_v7, %s2253_s11 }
  0x67   : > { %504 = vrot.lane.b32.xlu1 %v2402_v35, %s2254_s12  ;;  %v952_v35 = vshll.u32 %v2652_v18, 16 }
  0x68   : > { %487 = vrot.lane.b32.xlu0 %v2495_v23, %s2253_s11  ;;  %v984_v23 = vrot.slane %v2652_v18, 7  ;;  %v958_v18 = vrot.slane %v956_v5, 7 }
  0x6b   : > { %821 = vrot.lane.b32.xlu1 %v2432_v54, %s2253_s11 }
  0x6c   : > { %506 = vrot.lane.b32.xlu0 %v2372_v21, %s2254_s12  ;;  %v954_v21 = vor.u32 %v952_v35, %v2718_v63 }
  0x6f   : > { %829 = vrot.lane.b32.xlu1 %v2572_v59, %s2254_s12  ;;  %v2729_v59 = vrot.slane %v2383_v29, 7 }
  0x70   : > { %819 = vrot.lane.b32.xlu0 %v2416_v45, %s2253_s11 }
  0x71   : > { %v2746_v29 = vsel %vm3157_vm0, %v2729_v59, %v2503_v26 }
  0x73   : > { %677 = vrot.lane.b32.xlu1 %v2503_v26, %s2253_s11  ;;  %v982_v26 = vsel %vm2464_vm8, %v974_v33, %v981_v37  ;;  %vm2812_vm8 = vmand %vm404_vm15, %vm376_vm4 }
  0x74   : > { %663 = vrot.lane.b32.xlu0 %v2539_v44, %s2252_s10  ;;  %v307_v44 = vsel %vm2299_vm2, 0, %v306_v60  ;;  %983 = vst [vmem:[#allocation2 + $0x110] sm:$0x1] %v982_v26 }
  0x75   : > { %308 = vst [vmem:[#allocation2 + $0x118] sm:$0x1] %v307_v44 }
  0x77   : > { %987 = vrot.lane.b32.xlu1 %v984_v23, %s2252_s10 }
  0x78   : > { %963 = vrot.lane.b32.xlu0 %v954_v21, %s2254_s12  ;;  %v2845_v21 = vsel %vm3157_vm0, %v2817_v6, %v2581_v4 }
  0x7b   : > { %673 = vrot.lane.b32.xlu1 %v2729_v59, %s2253_s11 }
  0x7c   : > { %665 = vrot.lane.b32.xlu0 %v2600_v13, %s2252_s10  ;;  %v933_v13 = vrot.slane %v931_v25, 7 }
  0x7e   : > { %v936_v41 = vor.u32 %v934_v34, %v933_v13  ;;  %v1007_v13 = vld [vmem:[#allocation2 + $0x30] sm:$0xff] }
  0x7f   : > { %687 = vrot.lane.b32.xlu1 %v2528_v39, %s2254_s12  ;;  %v985_v39 = vrot.slane %v2755_v27, 7 }
  0x80   : > { %675 = vrot.lane.b32.xlu0 %v2746_v29, %s2253_s11 }
  0x81   : > { %v986_v48 = vsel %vm3157_vm0, %v984_v23, %v985_v39  ;;  %vm2875_vm0 = vmand %vm404_vm15, %vm334_vm9 }
  0x83   : > { %831 = vrot.lane.b32.xlu1 %v2654_v50, %s2254_s12  ;;  %v959_v50 = vshll.u32 %v2755_v27, 16 }
  0x84   : > { %689 = vrot.lane.b32.xlu0 %v2608_v14, %s2254_s12 }
  0x85   : > { %v550_v38 = vpop.permute.xlu1 %549  ;;  %v961_v28 = vor.u32 %v959_v50, %v958_v18 }
  0x86   : > { %555 = vst.msk [vmem:[#allocation2 + $0x48] sm:$0xff] %vm3156_vm10, %v550_v38  ;;  %v342_v2 = vpop.permute.xlu0 %341 }
  0x87   : > { %348 = vst.msk [vmem:[#allocation2] sm:$0xff] %vm3156_vm10, %v342_v2  ;;  %845 = vrot.lane.b32.xlu1 %v2634_v43, %s2252_s10  ;;  %v937_v43 = vsel %vm3158_vm1, %v2690_v46, %v936_v41  ;;  %v962_v7 = vsel %vm3158_vm1, %v2718_v63, %v961_v28 }
  0x88   : > { %915 = vrot.lane.b32.xlu0 %v2755_v27, %s2252_s10 }
  0x89   : > { %v429_v49 = vpop.permute.xlu1 %428 }
  0x8a   : > { %v344_v1 = vpop.permute.xlu0 %343  ;;  %438 = vst.msk [vmem:[#allocation2 + $0x8] sm:$0xfe] %vm3159_vm12, %v429_v49 }
  0x8b   : > { %v352_v12 = vsel %vm2783_vm13, %v344_v1, %v337_v47  ;;  %989 = vrot.lane.b32.xlu1 %v986_v48, %s2252_s10  ;;  %v634_v48 = vld [vmem:[#allocation2 + $0x80] sm:$0x1] }
  0x8c   : > { %353 = vst [vmem:[#allocation2 + $0x18] sm:$0xff] %v352_v12  ;;  %940 = vrot.lane.b32.xlu0 %v937_v43, %s2253_s11 }
  0x8d   : > { %v431_v19 = vpop.permute.xlu1 %430 }
  0x8e   : > { %439 = vst.msk [vmem:[#allocation2 + $0x20] sm:$0xff] %vm3156_vm10, %v431_v19  ;;  %v370_v57 = vpop.permute.xlu0 %369  ;;  %v378_v58 = vld [vmem:[#allocation2] sm:$0xff]  ;;  %vm440_vm10 = vcmask 516352  }
  0x8f   : > { %859 = vrot.lane.b32.xlu1 %v2581_v4, %s2253_s11  ;;  %v379_v0 = vsel %vm2802_vm6, %v370_v57, %v378_v58  ;;  %vm2831_vm2 = vmand %vm440_vm10, %vm3158_vm1  ;;  %v580_v4 = vld [vmem:[#allocation2 + $0x48] sm:$0xff] }
  0x90   : > { %691 = vrot.lane.b32.xlu0 %v2575_v62, %s2254_s12  ;;  %v442_v62 = vld [vmem:[#allocation2 + $0x38] sm:$0x1]  ;;  %vm2867_vm10 = vmand %vm375_vm14, %vm334_vm9  ;;  %vm3184_vm9 = vcmask 523520  }
  0x91   : > { %v399_v3 = vpop.permute.xlu1 %398  ;;  %v1002_v8 = vld [vmem:[#allocation2 + $0x8] sm:$0xff]  ;;  %vm3185_vm1 = vmmov %vm3184_vm9 }
  0x92   : > { %v407_v9 = vsel %vm2812_vm8, %v399_v3, %v379_v0  ;;  %v372_v17 = vpop.permute.xlu0 %371  ;;  %1261 = vmatprep.mubr.bf16.mxu0 %v1002_v8  ;;  %v2901_v0 = vld [vmem:[#allocation2 + $0x10] sm:$0xff] }
  0x93   : > { %408 = vst [vmem:[#allocation2] sm:$0xff] %v407_v9  ;;  %382 = vst.msk [vmem:[#allocation2 + $0x18] sm:$0xff] %vm375_vm14, %v372_v17  ;;  %855 = vrot.lane.b32.xlu1 %v2817_v6, %s2253_s11  ;;  %1262 = vmatmul.mubr.bf16.vlgmr.msra.gmra.mrb[0].mxu0 %v407_v9 }
  0x94   : > { %965 = vrot.lane.b32.xlu0 %v962_v7, %s2254_s12  ;;  %v1016_v7 = vld [vmem:[#allocation2 + $0x78] sm:$0xff] }
  0x95   : > { %v433_v20 = vpop.permute.xlu1 %432  ;;  %v1005_v63 = vld [vmem:[#allocation2 + $0x20] sm:$0xff] }
  0x96   : > { %v443_v35 = vsel %vm2831_vm2, %v433_v20, %v442_v62  ;;  %v401_v23 = vpop.permute.xlu0 %400  ;;  %1269 = vmatprep.mubr.bf16.mxu0 %v1005_v63 }
  0x97   : > { %444 = vst [vmem:[#allocation2 + $0x38] sm:$0x1] %v443_v35  ;;  %410 = vst.msk [vmem:[#allocation2 + $0x18] sm:$0xff] %vm404_vm15, %v401_v23  ;;  %991 = vrot.lane.b32.xlu1 %v985_v39, %s2252_s10 }
  0x98   : > { %869 = vrot.lane.b32.xlu0 %v2645_v16, %s2254_s12 }
  0x99   : > { %v448_v10 = vpop.permute.xlu1 %447 }
  0x9a   : > { %v575_v60 = vpop.permute.xlu0 %574 }
  0x9b   : > { %857 = vrot.lane.b32.xlu1 %v2845_v21, %s2253_s11 }
  0x9c   : > { %847 = vrot.lane.b32.xlu0 %v2684_v61, %s2252_s10  ;;  %v581_v61 = vsel %vm2802_vm6, %v575_v60, %v580_v4 }
  0x9d   : > { %v457_v15 = vpop.permute.xlu1 %456 }
  0x9e   : > { %v446_v44 = vpop.permute.xlu0 %445  ;;  %v1004_v22 = vld [vmem:[#allocation2 + $0x18] sm:$0xff] }
  0x9f   : > { %v1008_v24 = vld [vmem:[#allocation2 + $0x38] sm:$0xff]  ;;  %451 = vst.msk [vmem:[#allocation2 + $0x50] sm:$0xff] %vm375_vm14, %v446_v44  ;;  %873 = vrot.lane.b32.xlu1 %v2664_v51, %s2254_s12  ;;  %1270 = vmatmul.mubr.bf16.gmra.mrb[4].mxu0 %v1004_v22  ;;  %v545_v51 = vsel %vm2770_vm11, %v2386_v30, 0  ;;  %v454_v30 = vsel %vm2867_vm10, %v448_v10, 0 }
  0xa0   : > { %462 = vst.msk [vmem:[#allocation2 + $0x50] sm:$0xff] %vm404_vm15, %v457_v15  ;;  %871 = vrot.lane.b32.xlu0 %v2676_v56, %s2254_s12  ;;  %1277 = vmatprep.mubr.bf16.mxu0 %v1008_v24  ;;  %v499_v15 = vld [vmem:[#allocation2 + $0x88] sm:$0x1]  ;;  %s2149_s12 = smul.u32 96, %s3207_s19 }
  0xa1   : > { %615 = vst.msk [vmem:[#allocation2 + $0x50] sm:$0xfe] %vm3160_vm7, %v2729_v59  ;;  %v624_v16 = vpop.permute.xlu1 %623 }
  0xa2   : > { %632 = vst.msk [vmem:[#allocation2 + $0x50] sm:$0xfe] %vm3159_vm12, %v624_v16  ;;  %v600_v25 = vpop.permute.xlu0 %599  ;;  %s3031_s19 = scalar_lea.vmem %s3155_s5, %s2149_s12 }
  0xa3   : > { %v606_v59 = vsel %vm2812_vm8, %v600_v25, %v581_v61 }
  0xa4   : > { %607 = vst [vmem:[#allocation2 + $0x48] sm:$0xff] %v606_v59 }
  0xa5   : > { %v552_v34 = vpop.permute.xlu1 %551 }
  0xa6   : > { %v557_v37 = vsel %vm2783_vm13, %v552_v34, %v545_v51  ;;  %v459_v26 = vpop.permute.xlu0 %458 }
  0xa7   : > { %558 = vst [vmem:[#allocation2 + $0x60] sm:$0xff] %v557_v37  ;;  %v465_v39 = vsel %vm2875_vm0, %v459_v26, %v454_v30  ;;  %1278 = vmatmul.mubr.bf16.gmra.mrb[8].mxu0 %v1007_v13 }
  0xa8   : > { %466 = vst [vmem:[#allocation2 + $0x68] sm:$0xff] %v465_v39 }
  0xa9   : > { %616 = vst.msk [vmem:[#allocation2 + $0x68] sm:$0xff] %vm3161_vm3, %v2746_v29  ;;  %v577_v38 = vpop.permute.xlu1 %576  ;;  %v1011_v41 = vld [vmem:[#allocation2 + $0x50] sm:$0xff] }
  0xaa   : > { %583 = vst.msk [vmem:[#allocation2 + $0x60] sm:$0xff] %vm375_vm14, %v577_v38  ;;  %v732_v5 = vpop.permute.xlu0 %731  ;;  %1285 = vmatprep.mubr.bf16.mxu0 %v1011_v41  ;;  %v1025_v38 = vld [vmem:[#allocation2 + $0xc0] sm:$0xff] }
  0xab   : > { %737 = vst.msk [vmem:[#allocation2 + $0x90] sm:$0xff] %vm3184_vm9, %v732_v5  ;;  %vm3186_vm9 = vmmov %vm3185_vm1 }
  0xad   : > { %v602_v2 = vpop.permute.xlu1 %601 }
  0xae   : > { %608 = vst.msk [vmem:[#allocation2 + $0x60] sm:$0xff] %vm404_vm15, %v602_v2  ;;  %v626_v47 = vpop.permute.xlu0 %625 }
  0xaf   : > { %633 = vst.msk [vmem:[#allocation2 + $0x68] sm:$0xff] %vm3185_vm1, %v626_v47  ;;  %1286 = vmatmul.mubr.bf16.gmra.mrb[12].mxu0 %v606_v59 }
  0xb1   : > { %v757_v49 = vpop.permute.xlu1 %756 }
  0xb2   : > { %v628_v43 = vpop.permute.xlu0 %627  ;;  %v762_v1 = vld [vmem:[#allocation2 + $0x90] sm:$0xff] }
  0xb3   : > { %v635_v29 = vsel %vm2831_vm2, %v628_v43, %v634_v48  ;;  %v763_v28 = vsel %vm2802_vm6, %v757_v49, %v762_v1  ;;  %v973_v49 = vrot.slane %v2435_v55, 7 }
  0xb4   : > { %636 = vst [vmem:[#allocation2 + $0x80] sm:$0x1] %v635_v29 }
  0xb5   : > { %v638_v18 = vpop.permute.xlu1 %637  ;;  %v1013_v50 = vld [vmem:[#allocation2 + $0x60] sm:$0xff] }
  0xb6   : > { %643 = vst.msk [vmem:[#allocation2 + $0x98] sm:$0xff] %vm375_vm14, %v638_v18  ;;  %v640_v12 = vpop.permute.xlu0 %639  ;;  %v1014_v19 = vld [vmem:[#allocation2 + $0x68] sm:$0xff]  ;;  %v684_v18 = vld [vmem:[#allocation2 + $0xd0] sm:$0x1] }
  0xb7   : > { %1293 = vmatprep.mubr.bf16.mxu0 %v1014_v19  ;;  %v645_v3 = vsel %vm2867_vm10, %v640_v12, %v2901_v0 }
  0xb8   : > { %1294 = vmatmul.mubr.bf16.gmra.mrb[16].mxu0 %v1013_v50  ;;  %v669_v50 = vld [vmem:[#allocation2 + $0xa0] sm:$0xff] }
  0xb9   : > { %v782_v52 = vpop.permute.xlu1 %781 }
  0xba   : > { %v788_v57 = vsel %vm2812_vm8, %v782_v52, %v763_v28  ;;  %v648_v58 = vpop.permute.xlu0 %647 }
  0xbb   : > { %789 = vst [vmem:[#allocation2 + $0x90] sm:$0xff] %v788_v57  ;;  %653 = vst.msk [vmem:[#allocation2 + $0x98] sm:$0xff] %vm404_vm15, %v648_v58  ;;  %v1017_v32 = vld [vmem:[#allocation2 + $0x80] sm:$0xff] }
  0xbc   : > { %797 = vst.msk [vmem:[#allocation2 + $0x98] sm:$0xfe] %vm3160_vm7, %v2817_v6  ;;  %1301 = vmatprep.mubr.bf16.mxu0 %v1017_v32  ;;  %v727_v6 = vsel %vm2770_vm11, %v2432_v54, %v2901_v0  ;;  %vm497_vm7 = vcmask 778752  }
  0xbd   : > { %v650_v8 = vpop.permute.xlu1 %649 }
  0xbe   : > { %v655_v9 = vsel %vm2875_vm0, %v650_v8, %v645_v3  ;;  %v806_v17 = vpop.permute.xlu0 %805 }
  0xbf   : > { %656 = vst [vmem:[#allocation2 + $0xb0] sm:$0xff] %v655_v9  ;;  %814 = vst.msk [vmem:[#allocation2 + $0x98] sm:$0xfe] %vm3159_vm12, %v806_v17 }
  0xc0   : > { %798 = vst.msk [vmem:[#allocation2 + $0xb0] sm:$0xff] %vm3161_vm3, %v2845_v21  ;;  %1302 = vmatmul.mubr.bf16.gmra.mrb[20].mxu0 %v1016_v7  ;;  %vm2920_vm12 = vmand %vm3186_vm9, %vm376_vm4 }
  0xc1   : > { %v914_v62 = vpop.permute.xlu1 %913  ;;  %vm3192_vm4 = vmmov %vm3186_vm9 }
  0xc2   : > { %919 = vst.msk [vmem:[#allocation2 + $0xd8] sm:$0xff] %vm3185_vm1, %v914_v62  ;;  %v734_v20 = vpop.permute.xlu0 %733  ;;  %vm3189_vm1 = vsmask.f32 256  ;;  %vm3193_vm9 = vmmov %vm3192_vm4 }
  0xc3   : > { %v739_v63 = vsel %vm2783_vm13, %v734_v20, %v727_v6  ;;  %vm2932_vm3 = vmand %vm497_vm7, %vm3189_vm1  ;;  %vm3162_vm7 = vcmask 1048321   ;;  %vm514_vm1 = vcmask 1041152  }
  0xc4   : > { %740 = vst [vmem:[#allocation2 + $0xa8] sm:$0xff] %v739_v63 }
  0xc5   : > { %v759_v54 = vpop.permute.xlu1 %758 }
  0xc6   : > { %765 = vst.msk [vmem:[#allocation2 + $0xa8] sm:$0xff] %vm375_vm14, %v759_v54  ;;  %v475_v23 = vpop.permute.xlu0 %474  ;;  %v1020_v21 = vld [vmem:[#allocation2 + $0x98] sm:$0xff]  ;;  %v851_v54 = vld [vmem:[#allocation2 + $0xe8] sm:$0xff] }
  0xc7   : > { %v482_v10 = vsel %vm2920_vm12, %v475_v23, %v471_v42  ;;  %1309 = vmatprep.mubr.bf16.mxu0 %v1020_v21  ;;  %v816_v42 = vld [vmem:[#allocation2 + $0xc8] sm:$0x1]  ;;  %v909_v23 = vsel %vm2770_vm11, %v2733_v11, %v2901_v0  ;;  %v866_v11 = vld [vmem:[#allocation2 + $0x118] sm:$0x1] }
  0xc8   : > { %483 = vst [vmem:[#allocation2 + $0x58] sm:$0xff] %v482_v10  ;;  %1310 = vmatmul.mubr.bf16.gmra.mrb[24].mxu0 %v788_v57 }
  0xc9   : > { %v490_v44 = vpop.permute.xlu1 %489  ;;  %v944_v52 = vld [vmem:[#allocation2 + $0xd8] sm:$0xff] }
  0xca   : > { %v500_v22 = vsel %vm2932_vm3, %v490_v44, %v499_v15  ;;  %v808_v24 = vpop.permute.xlu0 %807 }
  0xcb   : > { %501 = vst [vmem:[#allocation2 + $0x88] sm:$0x1] %v500_v22  ;;  %815 = vst.msk [vmem:[#allocation2 + $0xb0] sm:$0xff] %vm3192_vm4, %v808_v24  ;;  %vm3194_vm4 = vsmask.f32 256 }
  0xcd   : > { %v486_v31 = vpop.permute.xlu1 %485 }
  0xce   : > { %495 = vst.msk [vmem:[#allocation2 + $0x58] sm:$0xfe] %vm494_vm5, %v486_v31  ;;  %v784_v36 = vpop.permute.xlu0 %783 }
  0xcf   : > { %790 = vst.msk [vmem:[#allocation2 + $0xa8] sm:$0xff] %vm404_vm15, %v784_v36 }
  0xd1   : > { %v810_v4 = vpop.permute.xlu1 %809 }
  0xd2   : > { %v817_v16 = vsel %vm2831_vm2, %v810_v4, %v816_v42  ;;  %v503_v61 = vpop.permute.xlu0 %502  ;;  %v1023_v25 = vld [vmem:[#allocation2 + $0xb0] sm:$0xff]  ;;  %v516_v5 = vld [vmem:[#allocation2 + $0x88] sm:$0x1] }
  0xd3   : > { %818 = vst [vmem:[#allocation2 + $0xc8] sm:$0x1] %v817_v16  ;;  %512 = vst.msk [vmem:[#allocation2 + $0x58] sm:$0xfe] %vm3162_vm7, %v503_v61  ;;  %1317 = vmatprep.mubr.bf16.mxu0 %v1023_v25  ;;  %v998_v4 = vld [vmem:[#allocation2 + $0x110] sm:$0x1] }
  0xd4   : > { %vm2948_vm7 = vmand %vm514_vm1, %vm3194_vm4  ;;  %vm3198_vm1 = vcmask 523521   ;;  %vm3199_vm4 = vcmask 523520  }
  0xd5   : > { %v477_v51 = vpop.permute.xlu1 %476 }
  0xd6   : > { %484 = vst.msk [vmem:[#allocation2 + $0x70] sm:$0xff] %vm3193_vm9, %v477_v51  ;;  %v939_v59 = vpop.permute.xlu0 %938  ;;  %v1022_v13 = vld [vmem:[#allocation2 + $0xa8] sm:$0xff]  ;;  %vm3197_vm9 = vcmask 261121  }
  0xd7   : > { %1318 = vmatmul.mubr.bf16.gmra.mrb[28].mxu0 %v1022_v13  ;;  %v945_v58 = vsel %vm2802_vm6, %v939_v59, %v944_v52  ;;  %vm3201_vm6 = vcmask 1040384  }
  0xd8   : > { %v975_v62 = vsel %vm3201_vm6, %v973_v49, %v974_v33 }
  0xd9   : > { %v505_v34 = vpop.permute.xlu1 %504 }
  0xda   : > { %v488_v30 = vpop.permute.xlu0 %487  ;;  %v1012_v37 = vld [vmem:[#allocation2 + $0x58] sm:$0xff]  ;;  %v1026_v26 = vld [vmem:[#allocation2 + $0xc8] sm:$0xff] }
  0xdb   : > { %496 = vst.msk [vmem:[#allocation2 + $0x70] sm:$0xff] %vm375_vm14, %v488_v30  ;;  %2130 = vmatmul.mubr.bf16.gmra.mrb[4].mxu1 %v1012_v37  ;;  %1325 = vmatprep.mubr.bf16.mxu0 %v1026_v26 }
  0xdc   : > { %513 = vst.msk [vmem:[#allocation2 + $0x70] sm:$0xff] %vm404_vm15, %v505_v34 }
  0xdd   : > { %v822_v41 = vpop.permute.xlu1 %821 }
  0xde   : > { %v507_v2 = vpop.permute.xlu0 %506  ;;  %v827_v53 = vsel %vm2867_vm10, %v822_v41, %v2901_v0  ;;  %v1034_v41 = vld [vmem:[#allocation2 + $0x108] sm:$0xff] }
  0xdf   : > { %v517_v47 = vsel %vm2948_vm7, %v507_v2, %v516_v5  ;;  %1326 = vmatmul.mubr.bf16.gmra.mrb[32].mxu0 %v1025_v38 }
  0xe0   : > { %518 = vst [vmem:[#allocation2 + $0x88] sm:$0x1] %v517_v47 }
  0xe1   : > { %v830_v48 = vpop.permute.xlu1 %829 }
  0xe2   : > { %v820_v43 = vpop.permute.xlu0 %819 }
  0xe3   : > { %825 = vst.msk [vmem:[#allocation2 + $0xe0] sm:$0xff] %vm375_vm14, %v820_v43  ;;  %v1015_v29 = vld [vmem:[#allocation2 + $0x70] sm:$0xff] }
  0xe4   : > { %835 = vst.msk [vmem:[#allocation2 + $0xe0] sm:$0xff] %vm404_vm15, %v830_v48  ;;  %2133 = vmatprep.mubr.bf16.mxu1 %v1015_v29 }
  0xe5   : > { %v678_v1 = vpop.permute.xlu1 %677  ;;  %979 = vst.msk [vmem:[#allocation2 + $0xe0] sm:$0xfe] %vm3197_vm9, %v973_v49  ;;  %vm3200_vm9 = vcmask 1048321  }
  0xe6   : > { %v685_v12 = vsel %vm2932_vm3, %v678_v1, %v684_v18  ;;  %v664_v19 = vpop.permute.xlu0 %663 }
  0xe7   : > { %686 = vst [vmem:[#allocation2 + $0xd0] sm:$0x1] %v685_v12  ;;  %v670_v55 = vsel %vm2920_vm12, %v664_v19, %v669_v50  ;;  %v1018_v28 = vld [vmem:[#allocation2 + $0x88] sm:$0xff]  ;;  %v3008_v12 = vld [vmem:[%s3153_s3] ss:$0 sm:$0xff] }
  0xe8   : > { %671 = vst [vmem:[#allocation2 + $0xa0] sm:$0xff] %v670_v55  ;;  %2134 = vmatmul.mubr.bf16.gmra.mrb[8].mxu1 %v1018_v28  ;;  %v3013_v28 = vld [vmem:[%s3154_s4] ss:$0 sm:$0xff] }
  0xe9   : > { %v988_v57 = vpop.permute.xlu1 %987 }
  0xea   : > { %996 = vst.msk [vmem:[#allocation2 + $0xe0] sm:$0xfe] %vm3198_vm1, %v988_v57  ;;  %v964_v32 = vpop.permute.xlu0 %963 }
  0xeb   : > { %v970_v3 = vsel %vm2812_vm8, %v964_v32, %v945_v58  ;;  %vm3202_vm8 = vcmask 261120  }
  0xec   : > { %971 = vst [vmem:[#allocation2 + $0xd8] sm:$0xff] %v970_v3 }
  0xed   : > { %v674_v8 = vpop.permute.xlu1 %673 }
  0xee   : > { %682 = vst.msk [vmem:[#allocation2 + $0xa0] sm:$0xfe] %vm494_vm5, %v674_v8  ;;  %v666_v7 = vpop.permute.xlu0 %665  ;;  %v698_v22 = vld [vmem:[#allocation2 + $0xd0] sm:$0x1] }
  0xef   : > { %672 = vst.msk [vmem:[#allocation2 + $0xb8] sm:$0xff] %vm3199_vm4, %v666_v7 }
  0xf1   : > { %v688_v9 = vpop.permute.xlu1 %687  ;;  %v1029_v17 = vld [vmem:[#allocation2 + $0xe0] sm:$0xff] }
  0xf2   : > { %696 = vst.msk [vmem:[#allocation2 + $0xa0] sm:$0xfe] %vm3200_vm9, %v688_v9  ;;  %v676_v6 = vpop.permute.xlu0 %675  ;;  %1333 = vmatprep.mubr.bf16.mxu0 %v1029_v17 }
  0xf3   : > { %683 = vst.msk [vmem:[#allocation2 + $0xb8] sm:$0xff] %vm375_vm14, %v676_v6  ;;  %1334 = vmatmul.mubr.bf16.gmra.mrb[36].mxu0 %v970_v3 }
  0xf5   : > { %v832_v46 = vpop.permute.xlu1 %831 }
  0xf6   : > { %v837_v20 = vsel %vm2875_vm0, %v832_v46, %v827_v53  ;;  %v690_v63 = vpop.permute.xlu0 %689  ;;  %vm3203_vm0 = vmmov %vm3199_vm4 }
  0xf7   : > { %838 = vst [vmem:[#allocation2 + $0xf8] sm:$0xff] %v837_v20  ;;  %697 = vst.msk [vmem:[#allocation2 + $0xb8] sm:$0xff] %vm404_vm15, %v690_v63 }
  0xf8   : > { %980 = vst.msk [vmem:[#allocation2 + $0xf8] sm:$0xff] %vm3202_vm8, %v975_v62  ;;  %vm3205_vm11 = vmmov %vm3203_vm0 }
  0xf9   : > { %v846_v56 = vpop.permute.xlu1 %845  ;;  %v1021_v21 = vld [vmem:[#allocation2 + $0xa0] sm:$0xff] }
  0xfa   : > { %v852_v33 = vsel %vm2920_vm12, %v846_v56, %v851_v54  ;;  %v916_v10 = vpop.permute.xlu0 %915  ;;  %2137 = vmatprep.mubr.bf16.mxu1 %v1021_v21 }
  0xfb   : > { %853 = vst [vmem:[#allocation2 + $0xe8] sm:$0xff] %v852_v33  ;;  %v921_v27 = vsel %vm2783_vm13, %v916_v10, %v909_v23  ;;  %vm1765_vm13 = vcmask 257024  }
  0xfc   : > { %922 = vst [vmem:[#allocation2 + $0xf0] sm:$0xff] %v921_v27 }
  0xfd   : > { %v990_v15 = vpop.permute.xlu1 %989 }
  0xfe   : > { %997 = vst.msk [vmem:[#allocation2 + $0xf8] sm:$0xff] %vm3203_vm0, %v990_v15  ;;  %v941_v44 = vpop.permute.xlu0 %940  ;;  %v1024_v40 = vld [vmem:[#allocation2 + $0xb8] sm:$0xff] }
  0xff   : > { %947 = vst.msk [vmem:[#allocation2 + $0xf0] sm:$0xff] %vm375_vm14, %v941_v44  ;;  %2138 = vmatmul.mubr.bf16.gmra.mrb[12].mxu1 %v1024_v40 }
 0x101   : > { %v860_v0 = vpop.permute.xlu1 %859 }
 0x102   : > { %v867_v35 = vsel %vm2932_vm3, %v860_v0, %v866_v11  ;;  %v692_v24 = vpop.permute.xlu0 %691  ;;  %vm3204_vm3 = vmmov %vm3200_vm9 }
 0x103   : > { %868 = vst [vmem:[#allocation2 + $0x118] sm:$0x1] %v867_v35  ;;  %v699_v14 = vsel %vm2948_vm7, %v692_v24, %v698_v22 }
 0x104   : > { %700 = vst [vmem:[#allocation2 + $0xd0] sm:$0x1] %v699_v14 }
 0x105   : > { %v856_v31 = vpop.permute.xlu1 %855  ;;  %v1032_v36 = vld [vmem:[#allocation2 + $0xf8] sm:$0xff] }
 0x106   : > { %864 = vst.msk [vmem:[#allocation2 + $0xe8] sm:$0xfe] %vm494_vm5, %v856_v31  ;;  %v966_v42 = vpop.permute.xlu0 %965  ;;  %1341 = vmatprep.mubr.bf16.mxu0 %v1032_v36 }
 0x107   : > { %972 = vst.msk [vmem:[#allocation2 + $0xf0] sm:$0xff] %vm404_vm15, %v966_v42 }
 0x109   : > { %v992_v16 = vpop.permute.xlu1 %991 }
 0x10a   : > { %v999_v60 = vsel %vm2831_vm2, %v992_v16, %v998_v4  ;;  %v870_v61 = vpop.permute.xlu0 %869  ;;  %v880_v34 = vld [vmem:[#allocation2 + $0x118] sm:$0x1] }
 0x10b   : > { %1000 = vst [vmem:[#allocation2 + $0x110] sm:$0x1] %v999_v60  ;;  %878 = vst.msk [vmem:[#allocation2 + $0xe8] sm:$0xfe] %vm3204_vm3, %v870_v61  ;;  %v1027_v25 = vld [vmem:[#allocation2 + $0xd0] sm:$0xff] }
 0x10c   : > { %2141 = vmatprep.mubr.bf16.mxu1 %v1027_v25 }
 0x10d   : > { %v858_v51 = vpop.permute.xlu1 %857 }
 0x10e   : > { %v848_v59 = vpop.permute.xlu0 %847  ;;  %v1031_v13 = vld [vmem:[#allocation2 + $0xf0] sm:$0xff] }
 0x10f   : > { %854 = vst.msk [vmem:[#allocation2 + $0x100] sm:$0xff] %vm3205_vm11, %v848_v59  ;;  %1342 = vmatmul.mubr.bf16.gmra.mrb[40].mxu0 %v1031_v13 }
 0x110   : > { %865 = vst.msk [vmem:[#allocation2 + $0x100] sm:$0xff] %vm375_vm14, %v858_v51 }
 0x111   : > { %v874_v30 = vpop.permute.xlu1 %873 }
 0x112   : > { %v881_v45 = vsel %vm2948_vm7, %v874_v30, %v880_v34  ;;  %v872_v37 = vpop.permute.xlu0 %871  ;;  %v1030_v26 = vld [vmem:[#allocation2 + $0xe8] sm:$0xff]  ;;  %v1035_v38 = vld [vmem:[#allocation2 + $0x110] sm:$0xff] }
 0x113   : > { %882 = vst [vmem:[#allocation2 + $0x118] sm:$0x1] %v881_v45  ;;  %879 = vst.msk [vmem:[#allocation2 + $0x100] sm:$0xff] %vm404_vm15, %v872_v37  ;;  %2142 = vmatmul.mubr.bf16.gmra.mrb[16].mxu1 %v1030_v26  ;;  %1349 = vmatprep.mubr.bf16.mxu0 %v1035_v38  ;;  %v2127_v5 = vpop.f32.mrb[0].mxu1 }
 0x114   : > { %v1392_v2 = vpop.f32.mrb[1].mxu1 }
 0x115   : > { %v2128_v47 = vpop.f32.mrb[2].mxu1 }
 0x116   : > { %v1395_v43 = vpop.f32.mrb[3].mxu1 }
 0x117   : > { %1350 = vmatmul.mubr.bf16.gmra.mrb[44].mxu0 %v1034_v41 }
 0x11a   : > { %v1033_v48 = vld [vmem:[#allocation2 + $0x100] sm:$0xff]  ;;  %v1036_v49 = vld [vmem:[#allocation2 + $0x118] sm:$0xff] }
 0x11b   : > { %2145 = vmatprep.mubr.bf16.mxu1 %v1033_v48 }
 0x11c   : > { %2146 = vmatmul.mubr.bf16.gmra.mrb[20].mxu1 %v1036_v49 }
 0x166   : > { %v2017_v39 = vpop.f32.mrb[0].mxu0 }
 0x167   : > { %v2018_v29 = vpop.f32.mrb[1].mxu0 }
 0x168   : > { %v2019_v18 = vadd.f32 %v2018_v29, %v2017_v39  ;;  %v2020_v50 = vpop.f32.mrb[2].mxu0 }
 0x169   : > { %v2021_v1 = vpop.f32.mrb[3].mxu0 }
 0x16a   : > { %v2022_v19 = vadd.f32 %v2021_v1, %v2020_v50  ;;  %v1393_v55 = vadd.f32 %v2019_v18, %v1392_v2 }
 0x16c   : > { %v1494_v52 = vmul.f32 %v3008_v12, %v1393_v55  ;;  %v1396_v57 = vadd.f32 %v2022_v19, %v1395_v43 }
 0x16e   : > { %v1525_v58 = vadd.f32 %v3013_v28, %v1494_v52  ;;  %v1495_v32 = vmul.f32 %v3008_v12, %v1396_v57 }
 0x170   : > { %v1573_v3 = vmul.f32 1.442695, %v1525_v58  ;;  %v1526_v8 = vadd.f32 %v3013_v28, %v1495_v32  ;;  %vm1549_vm12 = vcmp.gt.f32.partialorder %v1525_v58, 0.0 }
 0x172   : > { %2194 = vpow2.f32 %v1573_v3  ;;  %v1575_v7 = vmul.f32 1.442695, %v1526_v8  ;;  %v2023_v9 = vpop.f32.mrb[4].mxu0  ;;  %vm1550_vm14 = vcmp.gt.f32.partialorder %v1526_v8, 0.0 }
 0x173   : > { %v2024_v17 = vpop.f32.mrb[5].mxu0 }
 0x174   : > { %2196 = vpow2.f32 %v1575_v7  ;;  %v2025_v6 = vadd.f32 %v2024_v17, %v2023_v9  ;;  %v2026_v53 = vpop.f32.mrb[6].mxu0 }
 0x175   : > { %v2027_v46 = vpop.f32.mrb[7].mxu0 }
 0x176   : > { %v1401_v62 = vadd.f32 %v2127_v5, %v2025_v6  ;;  %v2028_v20 = vadd.f32 %v2027_v46, %v2026_v53 }
 0x178   : > { %v1496_v63 = vmul.f32 %v3008_v12, %v1401_v62  ;;  %v1404_v54 = vadd.f32 %v2128_v47, %v2028_v20 }
 0x17a   : > { %v1527_v23 = vadd.f32 %v3013_v28, %v1496_v63  ;;  %v1497_v56 = vmul.f32 %v3008_v12, %v1404_v54  ;;  %v2029_v21 = vpop.f32.mrb[8].mxu0 }
 0x17b   : > { %v2030_v33 = vpop.f32.mrb[9].mxu0 }
 0x17c   : > { %v2195_v10 = vpop.eup %2194  ;;  %v1577_v27 = vmul.f32 1.442695, %v1527_v23  ;;  %v1528_v15 = vadd.f32 %v3013_v28, %v1497_v56  ;;  %v3024_v44 = vadd.f32 %v2030_v33, %v2029_v21  ;;  %v2032_v40 = vpop.f32.mrb[10].mxu0  ;;  %vm1551_vm15 = vcmp.gt.f32.partialorder %v1527_v23, 0.0 }
 0x17d   : > { %v1925_v11 = vadd.f32 -1.0, %v2195_v10  ;;  %v2033_v0 = vpop.f32.mrb[11].mxu0 }
 0x17e   : > { %v2197_v35 = vpop.eup %2196  ;;  %2198 = vpow2.f32 %v1577_v27  ;;  %v1579_v22 = vmul.f32 1.442695, %v1528_v15  ;;  %v3026_v24 = vadd.f32 %v2033_v0, %v2032_v40  ;;  %vm1552_vm2 = vcmp.gt.f32.partialorder %v1528_v15, 0.0 }
 0x17f   : > { %v1645_v14 = vsel %vm1549_vm12, %v1525_v58, %v1925_v11  ;;  %v1926_v31 = vadd.f32 -1.0, %v2197_v35 }
 0x180   : > { %v1977_v36 = vpack.c.bf16 %v1645_v14, %v1645_v14  ;;  %2200 = vpow2.f32 %v1579_v22 }
 0x181   : > { %v1646_v42 = vsel %vm1550_vm14, %v1526_v8, %v1926_v31 }
 0x182   : > { %1766 = vst.msk [vmem:[%s3031_s19] sm:$0xf] %vm1765_vm13, %v1977_v36  ;;  %v1978_v4 = vpack.c.bf16 %v1646_v42, %v1646_v42  ;;  %v2035_v16 = vpop.f32.mrb[12].mxu0 }
 0x183   : > { %v2036_v60 = vpop.f32.mrb[13].mxu0 }
 0x184   : > { %1767 = vst.msk [vmem:[%s3031_s19 + $0x4] sm:$0xf] %vm1765_vm13, %v1978_v4  ;;  %v2037_v61 = vadd.f32 %v2036_v60, %v2035_v16  ;;  %v2038_v25 = vpop.f32.mrb[14].mxu0 }
 0x185   : > { %v2039_v51 = vpop.f32.mrb[15].mxu0 }
 0x186   : > { %v2040_v59 = vadd.f32 %v2039_v51, %v2038_v25 }
 0x188   : > { %v2199_v13 = vpop.eup %2198 }
 0x189   : > { %v1927_v34 = vadd.f32 -1.0, %v2199_v13 }
 0x18a   : > { %v2201_v30 = vpop.eup %2200 }
 0x18b   : > { %v1647_v45 = vsel %vm1551_vm15, %v1527_v23, %v1927_v34  ;;  %v1928_v37 = vadd.f32 -1.0, %v2201_v30  ;;  %v2041_v26 = vpop.f32.mrb[16].mxu0 }
 0x18c   : > { %v1979_v38 = vpack.c.bf16 %v1647_v45, %v1647_v45  ;;  %v2042_v41 = vpop.f32.mrb[17].mxu0 }
 0x18d   : > { %v1648_v5 = vsel %vm1552_vm2, %v1528_v15, %v1928_v37  ;;  %v2043_v2 = vadd.f32 %v2042_v41, %v2041_v26  ;;  %v2044_v47 = vpop.f32.mrb[18].mxu0 }
 0x18e   : > { %1768 = vst.msk [vmem:[%s3031_s19 + $0x8] sm:$0xf] %vm1765_vm13, %v1979_v38  ;;  %v1980_v48 = vpack.c.bf16 %v1648_v5, %v1648_v5  ;;  %v2045_v49 = vpop.f32.mrb[19].mxu0 }
 0x18f   : > { %v2046_v43 = vadd.f32 %v2045_v49, %v2044_v47 }
 0x190   : > { %1769 = vst.msk [vmem:[%s3031_s19 + $0xc] sm:$0xf] %vm1765_vm13, %v1980_v48 }
 0x193   : > { %v2047_v39 = vpop.f32.mrb[20].mxu0 }
 0x194   : > { %v2048_v29 = vpop.f32.mrb[21].mxu0 }
 0x195   : > { %v2049_v18 = vadd.f32 %v2048_v29, %v2047_v39  ;;  %v2050_v50 = vpop.f32.mrb[22].mxu0 }
 0x196   : > { %v2051_v1 = vpop.f32.mrb[23].mxu0 }
 0x197   : > { %v2052_v19 = vadd.f32 %v2051_v1, %v2050_v50 }
 0x19b   : > { %v2053_v55 = vpop.f32.mrb[24].mxu0 }
 0x19c   : > { %v2054_v52 = vpop.f32.mrb[25].mxu0 }
 0x19d   : > { %v3041_v57 = vadd.f32 %v2054_v52, %v2053_v55  ;;  %v2056_v58 = vpop.f32.mrb[26].mxu0 }
 0x19e   : > { %v2057_v32 = vpop.f32.mrb[27].mxu0 }
 0x19f   : > { %v3043_v3 = vadd.f32 %v2057_v32, %v2056_v58 }
 0x1aa   : > { %v2059_v8 = vpop.f32.mrb[28].mxu0 }
 0x1ab   : > { %v2060_v7 = vpop.f32.mrb[29].mxu0 }
 0x1ac   : > { %v3045_v9 = vadd.f32 %v2060_v7, %v2059_v8  ;;  %v2062_v17 = vpop.f32.mrb[30].mxu0 }
 0x1ad   : > { %v2063_v6 = vpop.f32.mrb[31].mxu0 }
 0x1ae   : > { %v2131_v53 = vpop.f32.mrb[4].mxu1  ;;  %v3047_v46 = vadd.f32 %v2063_v6, %v2062_v17 }
 0x1af   : > { %v1417_v62 = vadd.f32 %v2131_v53, %v2037_v61  ;;  %v1408_v20 = vpop.f32.mrb[5].mxu1 }
 0x1b0   : > { %v1409_v63 = vadd.f32 %v3024_v44, %v1408_v20  ;;  %v2132_v54 = vpop.f32.mrb[6].mxu1 }
 0x1b1   : > { %v1500_v23 = vmul.f32 %v3008_v12, %v1417_v62  ;;  %v1420_v56 = vadd.f32 %v2132_v54, %v2040_v59  ;;  %v1411_v21 = vpop.f32.mrb[7].mxu1 }
 0x1b2   : > { %v1498_v33 = vmul.f32 %v3008_v12, %v1409_v63  ;;  %v1412_v10 = vadd.f32 %v3026_v24, %v1411_v21  ;;  %v2065_v27 = vpop.f32.mrb[32].mxu0 }
 0x1b3   : > { %v1531_v15 = vadd.f32 %v3013_v28, %v1500_v23  ;;  %v1501_v40 = vmul.f32 %v3008_v12, %v1420_v56  ;;  %v2066_v11 = vpop.f32.mrb[33].mxu0 }
 0x1b4   : > { %v1529_v0 = vadd.f32 %v3013_v28, %v1498_v33  ;;  %v1499_v35 = vmul.f32 %v3008_v12, %v1412_v10  ;;  %v3057_v44 = vadd.f32 %v2066_v11, %v2065_v27  ;;  %v2068_v22 = vpop.f32.mrb[34].mxu0 }
 0x1b5   : > { %v1585_v14 = vmul.f32 1.442695, %v1531_v15  ;;  %v1532_v31 = vadd.f32 %v3013_v28, %v1501_v40  ;;  %v2069_v36 = vpop.f32.mrb[35].mxu0  ;;  %vm1555_vm10 = vcmp.gt.f32.partialorder %v1531_v15, 0.0 }
 0x1b6   : > { %v1581_v42 = vmul.f32 1.442695, %v1529_v0  ;;  %v1530_v24 = vadd.f32 %v3013_v28, %v1499_v35  ;;  %v3061_v4 = vadd.f32 %v2069_v36, %v2068_v22  ;;  %vm1553_vm5 = vcmp.gt.f32.partialorder %v1529_v0, 0.0 }
 0x1b7   : > { %2202 = vpow2.f32 %v1585_v14  ;;  %v1587_v16 = vmul.f32 1.442695, %v1532_v31  ;;  %vm1556_vm7 = vcmp.gt.f32.partialorder %v1532_v31, 0.0 }
 0x1b8   : > { %2204 = vpow2.f32 %v1581_v42  ;;  %v1583_v60 = vmul.f32 1.442695, %v1530_v24  ;;  %vm1554_vm1 = vcmp.gt.f32.partialorder %v1530_v24, 0.0 }
 0x1b9   : > { %2206 = vpow2.f32 %v1587_v16 }
 0x1ba   : > { %2208 = vpow2.f32 %v1583_v60 }
 0x1bb   : > { %v2135_v61 = vpop.f32.mrb[8].mxu1 }
 0x1bc   : > { %v1433_v25 = vadd.f32 %v2135_v61, %v2049_v18  ;;  %v1424_v51 = vpop.f32.mrb[9].mxu1 }
 0x1bd   : > { %v1425_v59 = vadd.f32 %v2043_v2, %v1424_v51  ;;  %v2136_v13 = vpop.f32.mrb[10].mxu1 }
 0x1be   : > { %v1504_v34 = vmul.f32 %v3008_v12, %v1433_v25  ;;  %v1436_v30 = vadd.f32 %v2136_v13, %v2052_v19  ;;  %v1427_v45 = vpop.f32.mrb[11].mxu1 }
 0x1bf   : > { %v1502_v37 = vmul.f32 %v3008_v12, %v1425_v59  ;;  %v1428_v26 = vadd.f32 %v2046_v43, %v1427_v45 }
 0x1c0   : > { %v1535_v38 = vadd.f32 %v3013_v28, %v1504_v34  ;;  %v1505_v41 = vmul.f32 %v3008_v12, %v1436_v30 }
 0x1c1   : > { %v2203_v5 = vpop.eup %2202  ;;  %v1533_v47 = vadd.f32 %v3013_v28, %v1502_v37  ;;  %v1503_v48 = vmul.f32 %v3008_v12, %v1428_v26 }
 0x1c2   : > { %v2205_v49 = vpop.eup %2204  ;;  %v1931_v2 = vadd.f32 -1.0, %v2203_v5  ;;  %v1593_v39 = vmul.f32 1.442695, %v1535_v38  ;;  %v1536_v29 = vadd.f32 %v3013_v28, %v1505_v41  ;;  %vm1559_vm4 = vcmp.gt.f32.partialorder %v1535_v38, 0.0 }
 0x1c3   : > { %v2207_v18 = vpop.eup %2206  ;;  %v1929_v50 = vadd.f32 -1.0, %v2205_v49  ;;  %v1589_v1 = vmul.f32 1.442695, %v1533_v47  ;;  %v1534_v43 = vadd.f32 %v3013_v28, %v1503_v48  ;;  %vm1557_vm9 = vcmp.gt.f32.partialorder %v1533_v47, 0.0 }
 0x1c4   : > { %v2209_v19 = vpop.eup %2208  ;;  %v1651_v55 = vsel %vm1555_vm10, %v1531_v15, %v1931_v2  ;;  %v1932_v52 = vadd.f32 -1.0, %v2207_v18  ;;  %2210 = vpow2.f32 %v1593_v39  ;;  %v1595_v6 = vmul.f32 1.442695, %v1536_v29 }
 0x1c5   : > { %v1983_v58 = vpack.c.bf16 %v1651_v55, %v1651_v55  ;;  %v1649_v32 = vsel %vm1553_vm5, %v1529_v0, %v1929_v50  ;;  %v1930_v8 = vadd.f32 -1.0, %v2209_v19  ;;  %2212 = vpow2.f32 %v1589_v1 }
 0x1c6   : > { %v1981_v7 = vpack.c.bf16 %v1649_v32, %v1649_v32  ;;  %v1652_v17 = vsel %vm1556_vm7, %v1532_v31, %v1932_v52  ;;  %v2071_v53 = vpop.f32.mrb[36].mxu0  ;;  %v1591_v63 = vmul.f32 1.442695, %v1534_v43  ;;  %2214 = vpow2.f32 %v1595_v6 }
 0x1c7   : > { %1772 = vst.msk [vmem:[%s3031_s19 + $0x18] sm:$0xf] %vm1765_vm13, %v1983_v58  ;;  %v1984_v62 = vpack.c.bf16 %v1652_v17, %v1652_v17  ;;  %v1650_v20 = vsel %vm1554_vm1, %v1530_v24, %v1930_v8  ;;  %v2072_v54 = vpop.f32.mrb[37].mxu0  ;;  %vm1560_vm6 = vcmp.gt.f32.partialorder %v1536_v29, 0.0  ;;  %vm1558_vm8 = vcmp.gt.f32.partialorder %v1534_v43, 0.0 }
 0x1c8   : > { %1770 = vst.msk [vmem:[%s3031_s19 + $0x10] sm:$0xf] %vm1765_vm13, %v1981_v7  ;;  %v1982_v23 = vpack.c.bf16 %v1650_v20, %v1650_v20  ;;  %v3075_v56 = vadd.f32 %v2072_v54, %v2071_v53  ;;  %v2074_v21 = vpop.f32.mrb[38].mxu0  ;;  %2216 = vpow2.f32 %v1591_v63 }
 0x1c9   : > { %1773 = vst.msk [vmem:[%s3031_s19 + $0x1c] sm:$0xf] %vm1765_vm13, %v1984_v62  ;;  %v2075_v33 = vpop.f32.mrb[39].mxu0 }
 0x1ca   : > { %1771 = vst.msk [vmem:[%s3031_s19 + $0x14] sm:$0xf] %vm1765_vm13, %v1982_v23  ;;  %v3081_v10 = vadd.f32 %v2075_v33, %v2074_v21 }
 0x1ce   : > { %v2211_v27 = vpop.eup %2210 }
 0x1cf   : > { %v2213_v15 = vpop.eup %2212  ;;  %v1935_v40 = vadd.f32 -1.0, %v2211_v27 }
 0x1d0   : > { %v1933_v11 = vadd.f32 -1.0, %v2213_v15  ;;  %v2215_v35 = vpop.eup %2214 }
 0x1d1   : > { %v1655_v0 = vsel %vm1559_vm4, %v1535_v38, %v1935_v40  ;;  %v1936_v24 = vadd.f32 -1.0, %v2215_v35 }
 0x1d2   : > { %v1987_v22 = vpack.c.bf16 %v1655_v0, %v1655_v0  ;;  %v1653_v14 = vsel %vm1557_vm9, %v1533_v47, %v1933_v11  ;;  %v2139_v31 = vpop.f32.mrb[12].mxu1  ;;  %v2217_v36 = vpop.eup %2216 }
 0x1d3   : > { %v1985_v42 = vpack.c.bf16 %v1653_v14, %v1653_v14  ;;  %v1449_v16 = vadd.f32 %v2139_v31, %v3045_v9  ;;  %v1440_v60 = vpop.f32.mrb[13].mxu1  ;;  %v1934_v61 = vadd.f32 -1.0, %v2217_v36  ;;  %v1656_v59 = vsel %vm1560_vm6, %v1536_v29, %v1936_v24 }
 0x1d4   : > { %1776 = vst.msk [vmem:[%s3031_s19 + $0x28] sm:$0xf] %vm1765_vm13, %v1987_v22  ;;  %v1441_v25 = vadd.f32 %v3041_v57, %v1440_v60  ;;  %v2140_v51 = vpop.f32.mrb[14].mxu1  ;;  %v1988_v9 = vpack.c.bf16 %v1656_v59, %v1656_v59 }
 0x1d5   : > { %1774 = vst.msk [vmem:[%s3031_s19 + $0x20] sm:$0xf] %vm1765_vm13, %v1985_v42  ;;  %v1508_v13 = vmul.f32 %v3008_v12, %v1449_v16  ;;  %v1452_v34 = vadd.f32 %v2140_v51, %v3047_v46  ;;  %v1443_v30 = vpop.f32.mrb[15].mxu1  ;;  %v1654_v45 = vsel %vm1558_vm8, %v1534_v43, %v1934_v61 }
 0x1d6   : > { %v1506_v37 = vmul.f32 %v3008_v12, %v1441_v25  ;;  %v1444_v26 = vadd.f32 %v3043_v3, %v1443_v30  ;;  %v1986_v38 = vpack.c.bf16 %v1654_v45, %v1654_v45  ;;  %1777 = vst.msk [vmem:[%s3031_s19 + $0x2c] sm:$0xf] %vm1765_vm13, %v1988_v9 }
 0x1d7   : > { %v1539_v57 = vadd.f32 %v3013_v28, %v1508_v13  ;;  %v1509_v41 = vmul.f32 %v3008_v12, %v1452_v34 }
 0x1d8   : > { %v1537_v5 = vadd.f32 %v3013_v28, %v1506_v37  ;;  %v1507_v47 = vmul.f32 %v3008_v12, %v1444_v26  ;;  %1775 = vst.msk [vmem:[%s3031_s19 + $0x24] sm:$0xf] %vm1765_vm13, %v1986_v38 }
 0x1d9   : > { %v1601_v46 = vmul.f32 1.442695, %v1539_v57  ;;  %v1540_v48 = vadd.f32 %v3013_v28, %v1509_v41  ;;  %vm1563_vm0 = vcmp.gt.f32.partialorder %v1539_v57, 0.0 }
 0x1da   : > { %v1597_v49 = vmul.f32 1.442695, %v1537_v5  ;;  %v1538_v2 = vadd.f32 %v3013_v28, %v1507_v47  ;;  %vm1561_vm3 = vcmp.gt.f32.partialorder %v1537_v5, 0.0 }
 0x1db   : > { %2218 = vpow2.f32 %v1601_v46  ;;  %v1603_v3 = vmul.f32 1.442695, %v1540_v48  ;;  %vm1564_vm11 = vcmp.gt.f32.partialorder %v1540_v48, 0.0 }
 0x1dc   : > { %2220 = vpow2.f32 %v1597_v49  ;;  %v1599_v39 = vmul.f32 1.442695, %v1538_v2  ;;  %vm1562_vm12 = vcmp.gt.f32.partialorder %v1538_v2, 0.0 }
 0x1dd   : > { %2222 = vpow2.f32 %v1603_v3 }
 0x1de   : > { %2224 = vpow2.f32 %v1599_v39 }
 0x1e2   : > { %v2077_v29 = vpop.f32.mrb[40].mxu0 }
 0x1e3   : > { %v2078_v18 = vpop.f32.mrb[41].mxu0 }
 0x1e4   : > { %v2079_v50 = vadd.f32 %v2078_v18, %v2077_v29  ;;  %v2080_v1 = vpop.f32.mrb[42].mxu0 }
 0x1e5   : > { %v2219_v43 = vpop.eup %2218  ;;  %v2081_v19 = vpop.f32.mrb[43].mxu0 }
 0x1e6   : > { %v2221_v55 = vpop.eup %2220  ;;  %v1939_v52 = vadd.f32 -1.0, %v2219_v43  ;;  %v2082_v58 = vadd.f32 %v2081_v19, %v2080_v1  ;;  %v2143_v32 = vpop.f32.mrb[16].mxu1 }
 0x1e7   : > { %v2223_v8 = vpop.eup %2222  ;;  %v1937_v7 = vadd.f32 -1.0, %v2221_v55  ;;  %v1465_v17 = vadd.f32 %v2143_v32, %v3075_v56  ;;  %v1456_v6 = vpop.f32.mrb[17].mxu1 }
 0x1e8   : > { %v2225_v53 = vpop.eup %2224  ;;  %v1659_v62 = vsel %vm1563_vm0, %v1539_v57, %v1939_v52  ;;  %v1940_v20 = vadd.f32 -1.0, %v2223_v8  ;;  %v1457_v63 = vadd.f32 %v3057_v44, %v1456_v6  ;;  %v2144_v54 = vpop.f32.mrb[18].mxu1 }
 0x1e9   : > { %v1991_v23 = vpack.c.bf16 %v1659_v62, %v1659_v62  ;;  %v1657_v21 = vsel %vm1561_vm3, %v1537_v5, %v1937_v7  ;;  %v1938_v33 = vadd.f32 -1.0, %v2225_v53  ;;  %v1512_v27 = vmul.f32 %v3008_v12, %v1465_v17  ;;  %v1459_v15 = vpop.f32.mrb[19].mxu1 }
 0x1ea   : > { %v1989_v40 = vpack.c.bf16 %v1657_v21, %v1657_v21  ;;  %v1660_v11 = vsel %vm1564_vm11, %v1540_v48, %v1940_v20  ;;  %v1510_v56 = vmul.f32 %v3008_v12, %v1457_v63  ;;  %v1468_v0 = vadd.f32 %v2144_v54, %v3081_v10  ;;  %v2083_v35 = vpop.f32.mrb[44].mxu0 }
 0x1eb   : > { %1780 = vst.msk [vmem:[%s3031_s19 + $0x38] sm:$0xf] %vm1765_vm13, %v1991_v23  ;;  %v1992_v44 = vpack.c.bf16 %v1660_v11, %v1660_v11  ;;  %v1658_v22 = vsel %vm1562_vm12, %v1538_v2, %v1938_v33  ;;  %v1543_v14 = vadd.f32 %v3013_v28, %v1512_v27  ;;  %v1460_v31 = vadd.f32 %v3061_v4, %v1459_v15  ;;  %v2084_v36 = vpop.f32.mrb[45].mxu0 }
 0x1ec   : > { %1778 = vst.msk [vmem:[%s3031_s19 + $0x30] sm:$0xf] %vm1765_vm13, %v1989_v40  ;;  %v1990_v42 = vpack.c.bf16 %v1658_v22, %v1658_v22  ;;  %v1541_v24 = vadd.f32 %v3013_v28, %v1510_v56  ;;  %v1513_v16 = vmul.f32 %v3008_v12, %v1468_v0  ;;  %v2085_v60 = vadd.f32 %v2084_v36, %v2083_v35  ;;  %v2086_v10 = vpop.f32.mrb[46].mxu0 }
 0x1ed   : > { %1781 = vst.msk [vmem:[%s3031_s19 + $0x3c] sm:$0xf] %vm1765_vm13, %v1992_v44  ;;  %v1609_v61 = vmul.f32 1.442695, %v1543_v14  ;;  %v1511_v25 = vmul.f32 %v3008_v12, %v1460_v31  ;;  %v2087_v51 = vpop.f32.mrb[47].mxu0  ;;  %vm1567_vm14 = vcmp.gt.f32.partialorder %v1543_v14, 0.0 }
 0x1ee   : > { %1779 = vst.msk [vmem:[%s3031_s19 + $0x34] sm:$0xf] %vm1765_vm13, %v1990_v42  ;;  %v1605_v59 = vmul.f32 1.442695, %v1541_v24  ;;  %v1544_v4 = vadd.f32 %v3013_v28, %v1513_v16  ;;  %v2088_v13 = vadd.f32 %v2087_v51, %v2086_v10  ;;  %vm1565_vm15 = vcmp.gt.f32.partialorder %v1541_v24, 0.0 }
 0x1ef   : > { %2226 = vpow2.f32 %v1609_v61  ;;  %v1542_v34 = vadd.f32 %v3013_v28, %v1511_v25  ;;  %v2147_v30 = vpop.f32.mrb[20].mxu1 }
 0x1f0   : > { %2228 = vpow2.f32 %v1605_v59  ;;  %v1611_v9 = vmul.f32 1.442695, %v1544_v4  ;;  %v1481_v45 = vadd.f32 %v2147_v30, %v2085_v60  ;;  %v1472_v37 = vpop.f32.mrb[21].mxu1  ;;  %vm1568_vm2 = vcmp.gt.f32.partialorder %v1544_v4, 0.0 }
 0x1f1   : > { %v1607_v26 = vmul.f32 1.442695, %v1542_v34  ;;  %v1473_v38 = vadd.f32 %v2079_v50, %v1472_v37  ;;  %v2148_v57 = vpop.f32.mrb[22].mxu1  ;;  %vm1566_vm10 = vcmp.gt.f32.partialorder %v1542_v34, 0.0 }
 0x1f2   : > { %2230 = vpow2.f32 %v1611_v9  ;;  %v1516_v41 = vmul.f32 %v3008_v12, %v1481_v45  ;;  %v1484_v5 = vadd.f32 %v2148_v57, %v2088_v13  ;;  %v1475_v47 = vpop.f32.mrb[23].mxu1 }
 0x1f3   : > { %2232 = vpow2.f32 %v1607_v26  ;;  %v1514_v46 = vmul.f32 %v3008_v12, %v1473_v38  ;;  %v1476_v48 = vadd.f32 %v2082_v58, %v1475_v47 }
 0x1f4   : > { %v1547_v49 = vadd.f32 %v3013_v28, %v1516_v41  ;;  %v1517_v2 = vmul.f32 %v3008_v12, %v1484_v5 }
 0x1f5   : > { %v1545_v3 = vadd.f32 %v3013_v28, %v1514_v46  ;;  %v1515_v39 = vmul.f32 %v3008_v12, %v1476_v48 }
 0x1f6   : > { %v1617_v29 = vmul.f32 1.442695, %v1547_v49  ;;  %v1548_v18 = vadd.f32 %v3013_v28, %v1517_v2  ;;  %vm1571_vm5 = vcmp.gt.f32.partialorder %v1547_v49, 0.0 }
 0x1f7   : > { %v1613_v50 = vmul.f32 1.442695, %v1545_v3  ;;  %v1546_v1 = vadd.f32 %v3013_v28, %v1515_v39  ;;  %vm1569_vm7 = vcmp.gt.f32.partialorder %v1545_v3, 0.0 }
 0x1f8   : > { %2234 = vpow2.f32 %v1617_v29  ;;  %v1619_v43 = vmul.f32 1.442695, %v1548_v18  ;;  %vm1572_vm1 = vcmp.gt.f32.partialorder %v1548_v18, 0.0 }
 0x1f9   : > { %v2227_v19 = vpop.eup %2226  ;;  %2236 = vpow2.f32 %v1613_v50  ;;  %v1615_v55 = vmul.f32 1.442695, %v1546_v1  ;;  %vm1570_vm4 = vcmp.gt.f32.partialorder %v1546_v1, 0.0 }
 0x1fa   : > { %v2229_v52 = vpop.eup %2228  ;;  %v1943_v58 = vadd.f32 -1.0, %v2227_v19  ;;  %2238 = vpow2.f32 %v1619_v43 }
 0x1fb   : > { %v1941_v32 = vadd.f32 -1.0, %v2229_v52  ;;  %2240 = vpow2.f32 %v1615_v55 }
 0x1fc   : > { %v2231_v12 = vpop.eup %2230  ;;  %v1663_v8 = vsel %vm1567_vm14, %v1543_v14, %v1943_v58 }
 0x1fd   : > { %v2233_v7 = vpop.eup %2232  ;;  %v1995_v17 = vpack.c.bf16 %v1663_v8, %v1663_v8  ;;  %v1661_v28 = vsel %vm1565_vm15, %v1541_v24, %v1941_v32  ;;  %v1944_v6 = vadd.f32 -1.0, %v2231_v12 }
 0x1fe   : > { %v1993_v53 = vpack.c.bf16 %v1661_v28, %v1661_v28  ;;  %v1942_v62 = vadd.f32 -1.0, %v2233_v7 }
 0x1ff   : > { %1784 = vst.msk [vmem:[%s3031_s19 + $0x48] sm:$0xf] %vm1765_vm13, %v1995_v17  ;;  %v1664_v20 = vsel %vm1568_vm2, %v1544_v4, %v1944_v6 }
 0x200   : > { %1782 = vst.msk [vmem:[%s3031_s19 + $0x40] sm:$0xf] %vm1765_vm13, %v1993_v53  ;;  %v1996_v63 = vpack.c.bf16 %v1664_v20, %v1664_v20  ;;  %v1662_v54 = vsel %vm1566_vm10, %v1542_v34, %v1942_v62 }
 0x201   : > { %v1994_v23 = vpack.c.bf16 %v1662_v54, %v1662_v54 }
 0x202   : > { %v2235_v21 = vpop.eup %2234  ;;  %1785 = vst.msk [vmem:[%s3031_s19 + $0x4c] sm:$0xf] %vm1765_vm13, %v1996_v63 }
 0x203   : > { %v2237_v33 = vpop.eup %2236  ;;  %1783 = vst.msk [vmem:[%s3031_s19 + $0x44] sm:$0xf] %vm1765_vm13, %v1994_v23  ;;  %v1947_v27 = vadd.f32 -1.0, %v2235_v21 }
 0x204   : > { %v2239_v15 = vpop.eup %2238  ;;  %v1945_v40 = vadd.f32 -1.0, %v2237_v33 }
 0x205   : > { %v2241_v11 = vpop.eup %2240  ;;  %v1667_v56 = vsel %vm1571_vm5, %v1547_v49, %v1947_v27  ;;  %v1948_v0 = vadd.f32 -1.0, %v2239_v15 }
 0x206   : > { %v1999_v35 = vpack.c.bf16 %v1667_v56, %v1667_v56  ;;  %v1665_v44 = vsel %vm1569_vm7, %v1545_v3, %v1945_v40  ;;  %v1946_v22 = vadd.f32 -1.0, %v2241_v11 }
 0x207   : > { %v1997_v14 = vpack.c.bf16 %v1665_v44, %v1665_v44  ;;  %v1668_v31 = vsel %vm1572_vm1, %v1548_v18, %v1948_v0 }
 0x208   : > { %1788 = vst.msk [vmem:[%s3031_s19 + $0x58] sm:$0xf] %vm1765_vm13, %v1999_v35  ;;  %v2000_v36 = vpack.c.bf16 %v1668_v31, %v1668_v31  ;;  %v1666_v42 = vsel %vm1570_vm4, %v1546_v1, %v1946_v22 }
 0x209   : > { %1786 = vst.msk [vmem:[%s3031_s19 + $0x50] sm:$0xf] %vm1765_vm13, %v1997_v14  ;;  %v1998_v24 = vpack.c.bf16 %v1666_v42, %v1666_v42 }
 0x20a   : > { %1789 = vst.msk [vmem:[%s3031_s19 + $0x5c] sm:$0xf] %vm1765_vm13, %v2000_v36 }
 0x20b   : > { %1787 = vst.msk [vmem:[%s3031_s19 + $0x54] sm:$0xf] %vm1765_vm13, %v1998_v24 }
 0x20c PF: > { %s15_s18 = sadd.s32 1, %s2249_s18  }
 0x20d   : > { %p12_p4 = scmp.ge.s32.totalorder %s15_s18, 4  }
 0x20f   :  { %14 = sbr.rel (!%p12_p4) target bundleno = 1 (0x1), region = 79 }

// kernel: adecoder_forward.9
= control target key start
LH: loop header
LB: loop body
LE: loop exit
PB: predicated region body
PF: predicated region fallthrough
CT: control target
= control target key end

     0   :  { %s2968_s18 = smov 0   ;;  %s4485_s0 = inlined_call_operand.vmem [shape: bf16[2,4,63,16], index: 0, kind: input, shape index: {}]   ;;  %s4486_s1 = inlined_call_operand.vmem [shape: f32[2,4,63,16], index: 1, kind: input, shape index: {}]   ;;  %s4487_s2 = inlined_call_operand.vmem [shape: bf16[192,32], index: 2, kind: input, shape index: {}]   ;;  %s4488_s3 = inlined_call_operand.vmem [shape: f32[1,32], index: 3, kind: input, shape index: {}]   ;;  %s4489_s4 = inlined_call_operand.vmem [shape: f32[1,32], index: 4, kind: input, shape index: {}]   ;;  %s4490_s5 = inlined_call_operand.vmem [shape: bf16[2,320,32], index: 5, kind: output, shape index: {}]  }
   0x1 LB: > { %s2537_s19 = sadd.s32 4294967295, %s2928_s18   ;;  %p2541_p0 = scmp.ge.s32.totalorder %s2928_s18, 1  ;;  %s2928_s18 = sphi %s2968_s18, %s15_s18  }
   0x2   : > { %p197_p1 = scmp.lt.s32.totalorder %s2928_s18, 3 }
   0x4   : > { %p198_p2 = pnand %p2541_p0, %p197_p1 }
   0x6   : > { %201 = sbr.rel (%p198_p2) target bundleno = 688 (0x2b0), region = 40 }
   0xd   : > { %p2978_p3 = scmp.lt.s32.totalorder %s2537_s19, 1  ;;  %vm4534_vm0 = vcmask 523264   ;;  %v2930_v0 = vmov 0   ;;  %v2820_v1 = vld [vmem:[%s4487_s2] sm:$0xff]   ;;  %v2821_v2 = vld [vmem:[%s4487_s2 + $0x8] sm:$0xff]   ;;  %v2823_v11 = vld [vmem:[%s4487_s2 + $0x10] sm:$0xff]  }
   0xe   : > { %295 = vst.msk [vmem:[#allocation2 + $0xf8] sm:$0xff] %vm4534_vm0, %v2930_v0  ;;  %246 = vst [vmem:[#allocation2] sm:$0xff] %v2930_v0  ;;  %1782 = vmatprep.subr.bf16.mxu0 %v2930_v0  ;;  %2769 = vmatprep.subr.bf16.mxu1 %v2930_v0  ;;  %s2931_s10 = smov 16   ;;  %s2932_s11 = smov 96   ;;  %vm4531_vm1 = vcmask 130048   ;;  %v2824_v27 = vld [vmem:[%s4487_s2 + $0x18] sm:$0xff]  }
   0xf   : > { %248 = vst.msk [vmem:[#allocation2 + $0x8] sm:$0xff] %vm4534_vm0, %v2930_v0  ;;  %249 = vst [vmem:[#allocation2 + $0x10] sm:$0xff] %v2930_v0  ;;  %s4717_s19 = smov (!%p2978_p3, %s2537_s19), 1  ;;  %1783 = vmatpush1.bf16.msra.mxu0 %v2820_v1  ;;  %2781 = vmatpush1.bf16.msra.mxu1 %v2820_v1  ;;  %s2933_s12 = smov 112   ;;  %vm431_vm2 = vsmask.f32 7938 }
  0x10   : > { %250 = vst.msk [vmem:[#allocation2 + $0x18] sm:$0xff] %vm4534_vm0, %v2930_v0  ;;  %251 = vst [vmem:[#allocation2 + $0x20] sm:$0xff] %v2930_v0  ;;  %s2728_s23 = sshll.u32 %s4717_s19, 8  ;;  %s2727_s27 = sshll.u32 %s4717_s19, 7  ;;  %1784 = vmatprep.subr.bf16.mxu0 %v2930_v0  ;;  %2770 = vmatprep.subr.bf16.mxu1 %v2930_v0  ;;  %vm4522_vm4 = vsmask.f32 256 }
  0x11   : > { %252 = vst.msk [vmem:[#allocation2 + $0x28] sm:$0xff] %vm4534_vm0, %v2930_v0  ;;  %254 = vst.msk [vmem:[#allocation2 + $0x38] sm:$0xff] %vm4534_vm0, %v2930_v0  ;;  %s3041_s26 = scalar_lea.vmem %s4486_s1, %s2728_s23  ;;  %s3052_s7 = scalar_lea.vmem %s4485_s0, %s2727_s27  ;;  %vm4535_vm5 = vcmask 1040384   ;;  %vm261_vm6 = vcmask 516096   ;;  %vm4533_vm9 = vcmask 261248   ;;  %vm4530_vm10 = vcmask 917248  }
  0x12   : > { %266 = vst [vmem:[#allocation2 + $0x50] sm:$0xff] %v2930_v0  ;;  %267 = vst.msk [vmem:[#allocation2 + $0x58] sm:$0xff] %vm4534_vm0, %v2930_v0  ;;  %v316_v3 = vld [vmem:[%s3041_s26] sm:$0xff]  ;;  %v317_v4 = vld [vmem:[%s3041_s26 + $0x8] sm:$0xff]  ;;  %s2934_s15 = smov 32   ;;  %s2935_s16 = smov 48  }
  0x13   : > { %268 = vst [vmem:[#allocation2 + $0x60] sm:$0xff] %v2930_v0  ;;  %269 = vst.msk [vmem:[#allocation2 + $0x68] sm:$0xff] %vm4534_vm0, %v2930_v0  ;;  %v2579_v5 = vld [vmem:[%s3041_s26 + $0x80] sm:$0xff]  ;;  %v3057_v6 = vpack.c.bf16 %v317_v4, %v316_v3  ;;  %v2580_v8 = vld [vmem:[%s3041_s26 + $0x88] sm:$0xff]  ;;  %1785 = vmatpush1.bf16.msra.mxu0 %v2821_v2  ;;  %2782 = vmatpush1.bf16.msra.mxu1 %v2821_v2  ;;  %s2936_s17 = smov 64   ;;  %s2937_s24 = smov 80  }
  0x14   : > { %270 = vst [vmem:[#allocation2 + $0x70] sm:$0xff] %v2930_v0  ;;  %271 = vst.msk [vmem:[#allocation2 + $0x78] sm:$0xff] %vm4534_vm0, %v2930_v0  ;;  %v3060_v7 = vld [vmem:[%s3052_s7 + $0x20] sm:$0xff]   ;;  %v2560_v10 = vld [vmem:[%s3041_s26 + $0x48] sm:$0xff]  ;;  %v3072_v12 = vpack.c.bf16 %v2580_v8, %v2579_v5  ;;  %1786 = vmatprep.subr.bf16.mxu0 %v2930_v0  ;;  %2771 = vmatprep.subr.bf16.mxu1 %v2930_v0  ;;  %vm4532_vm11 = vcmask 1048448   ;;  %vm4536_vm12 = vcmask 392448  }
  0x15   : > { %273 = vst.msk [vmem:[#allocation2 + $0x88] sm:$0xff] %vm4534_vm0, %v2930_v0  ;;  %280 = vst [vmem:[#allocation2 + $0xa0] sm:$0xff] %v2930_v0  ;;  %v2559_v9 = vld [vmem:[%s3041_s26 + $0x40] sm:$0xff]  ;;  %366 = vrot.lane.b32.xlu1 %v3057_v6, %s2931_s10  ;;  %910 = vrot.lane.b32.xlu0 %v3060_v7, %s2932_s11  ;;  %v3092_v19 = vld [vmem:[%s3052_s7 + $0x38] sm:$0xff]   ;;  %v441_v22 = vshrl.u32 %v3057_v6, 16  ;;  %v444_v35 = vshll.u32 %v3057_v6, 16 }
  0x16   : > { %281 = vst.msk [vmem:[#allocation2 + $0xa8] sm:$0xff] %vm4534_vm0, %v2930_v0  ;;  %282 = vst [vmem:[#allocation2 + $0xb0] sm:$0xff] %v2930_v0  ;;  %v3074_v13 = vpack.c.bf16 %v2560_v10, %v2559_v9  ;;  %v3077_v14 = vld [vmem:[%s3052_s7 + $0x40] sm:$0xff]   ;;  %v1142_v26 = vshrl.u32 %v3072_v12, 16  ;;  %v1288_v28 = vld [vmem:[#allocation2 + $0xf8] sm:$0xff]  ;;  %v1145_v40 = vshll.u32 %v3072_v12, 16 }
  0x17   : > { %283 = vst.msk [vmem:[#allocation2 + $0xb8] sm:$0xff] %vm4534_vm0, %v2930_v0  ;;  %284 = vst [vmem:[#allocation2 + $0xc0] sm:$0xff] %v2930_v0  ;;  %v3081_v16 = vld [vmem:[%s3052_s7] sm:$0xff]   ;;  %v1093_v17 = vshrl.u32 %v3077_v14, 16  ;;  %v1096_v18 = vshll.u32 %v3077_v14, 16  ;;  %1787 = vmatpush1.bf16.msra.mxu0 %v2823_v11  ;;  %2783 = vmatpush1.bf16.msra.mxu1 %v2823_v11  ;;  %v3116_v34 = vrot.slane %v441_v22, 7 }
  0x18   : > { %285 = vst.msk [vmem:[#allocation2 + $0xc8] sm:$0xff] %vm4534_vm0, %v2930_v0  ;;  %287 = vst.msk [vmem:[#allocation2 + $0xd8] sm:$0xff] %vm4534_vm0, %v2930_v0  ;;  %v804_v15 = vshrl.u32 %v3074_v13, 16  ;;  %v388_v20 = vshrl.u32 %v3081_v16, 16  ;;  %v391_v21 = vshll.u32 %v3081_v16, 16  ;;  %v807_v25 = vshll.u32 %v3074_v13, 16  ;;  %1788 = vmatprep.subr.bf16.mxu0 %v2930_v0  ;;  %2772 = vmatprep.subr.bf16.mxu1 %v2930_v0 }
  0x19   : > { %294 = vst [vmem:[#allocation2 + $0xf0] sm:$0xff] %v2930_v0  ;;  %296 = vst [vmem:[#allocation2 + $0x100] sm:$0xff] %v2930_v0  ;;  %1074 = vrot.lane.b32.xlu1 %v3072_v12, %s2931_s10  ;;  %928 = vrot.lane.b32.xlu0 %v3074_v13, %s2933_s12  ;;  %v1095_v23 = vrot.slane %v1093_v17, 7  ;;  %v605_v31 = vld [vmem:[#allocation2 + $0x58] sm:$0xff]  ;;  %v3120_v36 = vld [vmem:[%s3052_s7 + $0x8] sm:$0xff]   ;;  %v3128_v39 = vrot.slane %v1142_v26, 7  ;;  %v3144_v45 = vor.u32 %v444_v35, %v3116_v34 }
  0x1a   : > { %297 = vst.msk [vmem:[#allocation2 + $0x108] sm:$0xff] %vm4534_vm0, %v2930_v0  ;;  %298 = vst [vmem:[#allocation2 + $0x110] sm:$0xff] %v2930_v0  ;;  %v3099_v24 = vrot.slane %v804_v15, 7  ;;  %v390_v29 = vrot.slane %v388_v20, 7  ;;  %v395_v42 = vshrl.u32 %v3120_v36, 16  ;;  %v398_v43 = vshll.u32 %v3120_v36, 16 }
  0x1b   : > { %299 = vst.msk [vmem:[#allocation2 + $0x118] sm:$0xff] %vm4534_vm0, %v2930_v0  ;;  %301 = vst.msk [vmem:[#allocation2 + $0x128] sm:$0xff] %vm4534_vm0, %v2930_v0  ;;  %v1098_v30 = vor.u32 %v1096_v18, %v1095_v23  ;;  %1789 = vmatpush1.bf16.msra.mxu0 %v2824_v27  ;;  %2784 = vmatpush1.bf16.msra.mxu1 %v2824_v27  ;;  %v3139_v44 = vld [vmem:[%s3052_s7 + $0x48] sm:$0xff]   ;;  %v3149_v47 = vor.u32 %v1145_v40, %v3128_v39  ;;  %v3156_v52 = vrot.slane %v3060_v7, 7  ;;  %v3162_v54 = vld [vmem:[%s3052_s7 + $0x10] sm:$0xff]   ;;  %vm4527_vm14 = vcmask 523648  }
  0x1c   : > { %353 = vst.msk [vmem:[#allocation2] sm:$0xff] %vm4531_vm1, %v3081_v16  ;;  %vm3110_vm3 = vmand %vm4531_vm1, %vm431_vm2  ;;  %v393_v33 = vor.u32 %v391_v21, %v390_v29  ;;  %v3126_v38 = vor.u32 %v807_v25, %v3099_v24  ;;  %1790 = vmatprep.subr.bf16.mxu0 %v2930_v0  ;;  %2773 = vmatprep.subr.bf16.mxu1 %v2930_v0  ;;  %v397_v46 = vrot.slane %v395_v42, 7  ;;  %v1100_v48 = vshrl.u32 %v3139_v44, 16  ;;  %v3165_v55 = vld [vmem:[%s3052_s7 + $0x50] sm:$0xff]   ;;  %v2562_v2 = vld [vmem:[%s3041_s26 + $0x58] sm:$0xff] }
  0x1d   : > { %916 = vrot.lane.b32.xlu0 %v3092_v19, %s2932_s11  ;;  %1123 = vrot.lane.b32.xlu1 %v1098_v30, %s2934_s15  ;;  %v1289_v37 = vsel %vm3110_vm3, %v1098_v30, %v1288_v28  ;;  %354 = vst.msk [vmem:[#allocation2 + $0x10] sm:$0xff] %vm4531_vm1, %v3120_v36  ;;  %v1103_v49 = vshll.u32 %v3139_v44, 16  ;;  %v3170_v56 = vrot.slane %v3081_v16, 7  ;;  %355 = vst.msk [vmem:[#allocation2 + $0x20] sm:$0xff] %vm4531_vm1, %v3162_v54  ;;  %v3182_v59 = vrot.slane %v3074_v13, 7  ;;  %v2561_v1 = vld [vmem:[%s3041_s26 + $0x50] sm:$0xff] }
  0x1e   : > { %1290 = vst [vmem:[#allocation2 + $0xf8] sm:$0xff] %v1289_v37  ;;  %v606_v41 = vsel %vm3110_vm3, %v393_v33, %v605_v31  ;;  %v400_v50 = vor.u32 %v398_v43, %v397_v46  ;;  %v1102_v51 = vrot.slane %v1100_v48, 7  ;;  %v403_v60 = vshrl.u32 %v3162_v54, 16  ;;  %v2565_v9 = vld [vmem:[%s3041_s26 + $0x70] sm:$0xff]  ;;  %v2566_v10 = vld [vmem:[%s3041_s26 + $0x78] sm:$0x7f]  ;;  %vm3544_vm7 = vmand %vm261_vm6, %vm4522_vm4 }
  0x1f   : > { %607 = vst [vmem:[#allocation2 + $0x58] sm:$0xff] %v606_v41  ;;  %v406_v61 = vshll.u32 %v3162_v54, 16  ;;  %v1108_v62 = vshrl.u32 %v3165_v55, 16  ;;  %v3192_v63 = vrot.slane %v3077_v14, 7  ;;  %v1111_v5 = vshll.u32 %v3165_v55, 16  ;;  %v3208_v17 = vld [vmem:[%s3052_s7 + $0x18] sm:$0xff]   ;;  %vm3577_vm8 = vmand %vm4535_vm5, %vm4522_vm4 }
  0x20   : > { %v3159_v53 = vsel %vm4522_vm4, %v390_v29, %v400_v50  ;;  %v1105_v57 = vor.u32 %v1103_v49, %v1102_v51  ;;  %v405_v3 = vrot.slane %v403_v60, 7  ;;  %v3202_v8 = vrot.slane %v3057_v6, 7  ;;  %v2826_v21 = vld [vmem:[%s4487_s2 + $0x20] sm:$0xff]   ;;  %v3221_v22 = vld [vmem:[%s3052_s7 + $0x28] sm:$0xff]   ;;  %v319_v25 = vld [vmem:[%s3041_s26 + $0x18] sm:$0xff] }
  0x21   : > { %418 = vrot.lane.b32.xlu0 %v393_v33, %s2934_s15  ;;  %956 = vrot.lane.b32.xlu1 %v3126_v38, %s2931_s10  ;;  %608 = vst.msk [vmem:[#allocation2 + $0x68] sm:$0xff] %vm4531_vm1, %v3159_v53  ;;  %v3196_v4 = vrot.slane %v1108_v62, 7  ;;  %v3213_v18 = vrot.slane %v3072_v12, 7  ;;  %v3215_v20 = vpack.c.bf16 %v2562_v2, %v2561_v1  ;;  %4542 = vst [vmem:[#allocation3_spill] sm:$0xff] %v3221_v22  ;;  %v2827_v28 = vld [vmem:[%s4487_s2 + $0x28] sm:$0xff]   ;;  %v3241_v29 = vld [vmem:[%s3052_s7 + $0x58] sm:$0xff]  }
  0x22   : > { %v3177_v58 = vsel %vm4522_vm4, %v1095_v23, %v1105_v57  ;;  %v408_v11 = vor.u32 %v406_v61, %v405_v3  ;;  %v318_v23 = vld [vmem:[%s3041_s26 + $0x10] sm:$0xff]  ;;  %1791 = vmatpush1.bf16.msra.mxu0 %v2826_v21  ;;  %2785 = vmatpush1.bf16.msra.mxu1 %v2826_v21  ;;  %v3246_v30 = vpack.c.bf16 %v2566_v10, %v2565_v9  ;;  %v411_v33 = vshrl.u32 %v3208_v17, 16  ;;  %v2582_v43 = vld [vmem:[%s3041_s26 + $0x98] sm:$0xff]  ;;  %v1587_v2 = vld [vmem:[#allocation2 + $0x8] sm:$0xff] }
  0x23   : > { %1291 = vst.msk [vmem:[#allocation2 + $0x108] sm:$0xff] %vm4531_vm1, %v3177_v58  ;;  %v1113_v15 = vor.u32 %v1111_v5, %v3196_v4  ;;  %1792 = vmatprep.subr.bf16.mxu0 %v2930_v0  ;;  %v811_v31 = vshrl.u32 %v3215_v20, 16  ;;  %v414_v35 = vshll.u32 %v3208_v17, 16  ;;  %2774 = vmatprep.subr.bf16.mxu1 %v2930_v0  ;;  %v3252_v37 = vpack.c.bf16 %v319_v25, %v318_v23  ;;  %v2828_v41 = vld [vmem:[%s4487_s2 + $0x30] sm:$0xff]   ;;  %v2829_v61 = vld [vmem:[%s4487_s2 + $0x38] sm:$0xff]   ;;  %v3298_v25 = vld [vmem:[#allocation2 + $0xa8] sm:$0xff] }
  0x24   : > { %v3226_v26 = vsel %vm4522_vm4, %v397_v46, %v408_v11  ;;  %v413_v40 = vrot.slane %v411_v33, 7  ;;  %v2581_v42 = vld [vmem:[%s3041_s26 + $0x90] sm:$0xff]  ;;  %v1116_v46 = vshrl.u32 %v3241_v29, 16  ;;  %v1119_v48 = vshll.u32 %v3241_v29, 16  ;;  %2623 = vmatprep.mubr.msk.bf16.mxu0 %vm4534_vm0, %v1587_v2  ;;  %vm3667_vm13 = vmand %vm4533_vm9, %vm431_vm2 }
  0x25   : > { %471 = vrot.lane.b32.xlu0 %v3144_v45, %s2935_s16  ;;  %1172 = vrot.lane.b32.xlu1 %v3149_v47, %s2935_s16  ;;  %v3229_v27 = vsel %vm4522_vm4, %v1102_v51, %v1113_v15  ;;  %609 = vst.msk [vmem:[#allocation2 + $0x78] sm:$0xff] %vm4531_vm1, %v3226_v26  ;;  %v3266_v49 = vrot.slane %v811_v31, 7  ;;  %v814_v50 = vshll.u32 %v3215_v20, 16  ;;  %v448_v51 = vshrl.u32 %v3252_v37, 16  ;;  %v2830_v31 = vld [vmem:[%s4487_s2 + $0x40] sm:$0xff]   ;;  %vm3688_vm15 = vmand %vm4536_vm12, %vm431_vm2 }
  0x26   : > { %1292 = vst.msk [vmem:[#allocation2 + $0x118] sm:$0xff] %vm4531_vm1, %v3229_v27  ;;  %1793 = vmatpush1.bf16.msra.mxu0 %v2827_v28  ;;  %2786 = vmatpush1.bf16.msra.mxu1 %v2827_v28  ;;  %v416_v57 = vor.u32 %v414_v35, %v413_v40  ;;  %v1118_v60 = vrot.slane %v1116_v46, 7  ;;  %v3274_v62 = vpack.c.bf16 %v2582_v43, %v2581_v42  ;;  %v451_v5 = vshll.u32 %v3252_v37, 16  ;;  %v2583_v43 = vld [vmem:[%s3041_s26 + $0xa0] sm:$0xff]  ;;  %vm3703_vm6 = vmand %vm4527_vm14, %vm431_vm2 }
  0x27   : > { %1794 = vmatprep.subr.bf16.mxu0 %v2930_v0  ;;  %2775 = vmatprep.subr.bf16.mxu1 %v2930_v0  ;;  %v755_v10 = vshrl.u32 %v3060_v7, 16  ;;  %v758_v11 = vshll.u32 %v3060_v7, 16  ;;  %v3290_v15 = vrot.slane %v448_v51, 7  ;;  %v4495_v42 = vrot.slane %v3221_v22, 7 }
  0x28   : > { %v3277_v1 = vsel %vm4522_vm4, %v405_v3, %v416_v57  ;;  %v1121_v9 = vor.u32 %v1119_v48, %v1118_v60  ;;  %v816_v3 = vor.u32 %v814_v50, %v3266_v49  ;;  %v1149_v21 = vshrl.u32 %v3274_v62, 16 }
  0x29   : > { %974 = vrot.lane.b32.xlu0 %v3156_v52, %s2934_s15  ;;  %499 = vrot.lane.b32.xlu1 %v3170_v56, %s2936_s17  ;;  %610 = vst.msk [vmem:[#allocation2 + $0x88] sm:$0xff] %vm4531_vm1, %v3277_v1  ;;  %v757_v28 = vrot.slane %v755_v10, 7  ;;  %v453_v35 = vor.u32 %v451_v5, %v3290_v15  ;;  %v765_v46 = vshll.u32 %v3221_v22, 16  ;;  %v3347_v57 = vsel %vm4535_vm5, %v3156_v52, %v4495_v42 }
  0x2a   : > { %1795 = vmatpush1.bf16.msra.mxu0 %v2828_v41  ;;  %2787 = vmatpush1.bf16.msra.mxu1 %v2828_v41  ;;  %v3296_v23 = vsel %vm4522_vm4, %v3196_v4, %v1121_v9  ;;  %v3315_v4 = vsel %vm4522_vm4, %v3099_v24, %v816_v3  ;;  %v3318_v40 = vrot.slane %v1149_v21, 7  ;;  %v1152_v41 = vshll.u32 %v3274_v62, 16  ;;  %v2831_v24 = vld [vmem:[%s4487_s2 + $0x48] sm:$0xff]   ;;  %v2834_v21 = vld [vmem:[%s4487_s2 + $0x58] sm:$0xff]  }
  0x2b   : > { %1796 = vmatprep.subr.bf16.mxu0 %v2930_v0  ;;  %2776 = vmatprep.subr.bf16.mxu1 %v2930_v0  ;;  %1293 = vst.msk [vmem:[#allocation2 + $0x128] sm:$0xff] %vm4531_vm1, %v3296_v23  ;;  %v3308_v33 = vor.u32 %v758_v11, %v757_v28  ;;  %v3339_v48 = vsel %vm4522_vm4, %v3116_v34, %v453_v35  ;;  %v4494_v60 = vrot.slane %v3120_v36, 7  ;;  %v2833_v34 = vld [vmem:[%s4487_s2 + $0x50] sm:$0xff]   ;;  %v4493_v2 = vrot.slane %v3215_v20, 7  ;;  %v2564_v3 = vld [vmem:[%s3041_s26 + $0x68] sm:$0xff] }
  0x2c   : > { %v1154_v50 = vor.u32 %v1152_v41, %v3318_v40  ;;  %v4491_v10 = vrot.slane %v3139_v44, 7  ;;  %v3375_v11 = vld [vmem:[%s3052_s7 + $0x30] sm:$0xff]   ;;  %v4492_v35 = vrot.slane %v3274_v62, 7  ;;  %v526_v41 = vrot.slane %v3252_v37, 7 }
  0x2d   : > { %996 = vrot.lane.b32.xlu0 %v3182_v59, %s2935_s16  ;;  %1197 = vrot.lane.b32.xlu1 %v3192_v63, %s2936_s17  ;;  %v3371_v9 = vsel %vm4535_vm5, %v3170_v56, %v4494_v60  ;;  %4543 = vst [vmem:[#allocation4_spill] sm:$0xff] %v3375_v11  ;;  %v4580_v32 = vrot.slane %v3165_v55, 7  ;;  %vm4523_vm2 = vcmask 392449  }
  0x2e   : > { %1797 = vmatpush1.bf16.msra.mxu0 %v2829_v61  ;;  %2788 = vmatpush1.bf16.msra.mxu1 %v2829_v61  ;;  %v3360_v61 = vsel %vm4522_vm4, %v3128_v39, %v1154_v50  ;;  %v2563_v39 = vld [vmem:[%s3041_s26 + $0x60] sm:$0xff]  ;;  %v773_v50 = vshll.u32 %v3375_v11, 16 }
  0x2f   : > { %1798 = vmatprep.subr.bf16.mxu0 %v2930_v0  ;;  %2777 = vmatprep.subr.bf16.mxu1 %v2930_v0 }
  0x31   : > { %532 = vrot.lane.b32.xlu0 %v3202_v8, %s2937_s24  ;;  %1226 = vrot.lane.b32.xlu1 %v3213_v18, %s2937_s24 }
  0x32   : > { %1799 = vmatpush1.bf16.msra.mxu0 %v2830_v31  ;;  %2789 = vmatpush1.bf16.msra.mxu1 %v2830_v31  ;;  %v3394_v31 = vsel %vm4535_vm5, %v3182_v59, %v4493_v2 }
  0x33   : > { %1800 = vmatprep.subr.bf16.mxu0 %v2930_v0  ;;  %2778 = vmatprep.subr.bf16.mxu1 %v2930_v0 }
  0x35   : > { %912 = vrot.lane.b32.xlu0 %v3221_v22, %s2932_s11  ;;  %934 = vrot.lane.b32.xlu1 %v3246_v30, %s2933_s12 }
  0x36   : > { %1801 = vmatpush1.bf16.msra.mxu0 %v2831_v24  ;;  %2790 = vmatpush1.bf16.msra.mxu1 %v2831_v24  ;;  %v3403_v24 = vsel %vm4535_vm5, %v3192_v63, %v4491_v10  ;;  %v2584_v10 = vld [vmem:[%s3041_s26 + $0xa8] sm:$0xff] }
  0x37   : > { %1802 = vmatprep.subr.bf16.mxu0 %v2930_v0  ;;  %2779 = vmatprep.subr.bf16.mxu1 %v2930_v0 }
  0x39   : > { %930 = vrot.lane.b32.xlu0 %v3215_v20, %s2933_s12  ;;  %368 = vrot.lane.b32.xlu1 %v3252_v37, %s2931_s10 }
  0x3a   : > { %1803 = vmatpush1.bf16.msra.mxu0 %v2833_v34  ;;  %2791 = vmatpush1.bf16.msra.mxu1 %v2833_v34  ;;  %v3417_v34 = vsel %vm4535_vm5, %v3202_v8, %v526_v41 }
  0x3b   : > { %1804 = vmatprep.subr.bf16.mxu0 %v2930_v0  ;;  %2780 = vmatprep.subr.bf16.mxu1 %v2930_v0 }
  0x3d   : > { %1076 = vrot.lane.b32.xlu0 %v3274_v62, %s2931_s10  ;;  %420 = vrot.lane.b32.xlu1 %v3159_v53, %s2934_s15  ;;  %v762_v53 = vshrl.u32 %v3221_v22, 16 }
  0x3e   : > { %1805 = vmatpush1.bf16.msra.mxu0 %v2834_v21  ;;  %2792 = vmatpush1.bf16.msra.mxu1 %v2834_v21 }
  0x3f   : > { %v764_v51 = vrot.slane %v762_v53, 7  ;;  %v3405_v53 = vpack.c.bf16 %v2564_v3, %v2563_v39  ;;  %v321_v39 = vld [vmem:[%s3041_s26 + $0x28] sm:$0xff]  ;;  %v3425_v3 = vsel %vm4535_vm5, %v3213_v18, %v4492_v35 }
  0x41   : > { %958 = vrot.lane.b32.xlu0 %v3315_v4, %s2931_s10  ;;  %1125 = vrot.lane.b32.xlu1 %v3177_v58, %s2934_s15  ;;  %v767_v58 = vor.u32 %v765_v46, %v764_v51  ;;  %v819_v21 = vshrl.u32 %v3405_v53, 16  ;;  %v822_v2 = vshll.u32 %v3405_v53, 16 }
  0x43   : > { %v3365_v5 = vsel %vm4522_vm4, %v757_v28, %v767_v58  ;;  %v770_v28 = vshrl.u32 %v3375_v11, 16  ;;  %v320_v58 = vld [vmem:[%s3041_s26 + $0x20] sm:$0xff]  ;;  %v3441_v35 = vrot.slane %v819_v21, 7 }
  0x44   : > { %953 = vst.msk [vmem:[#allocation2 + $0xb8] sm:$0xff] %vm4531_vm1, %v3365_v5 }
  0x45   : > { %473 = vrot.lane.b32.xlu0 %v3339_v48, %s2935_s16  ;;  %976 = vrot.lane.b32.xlu1 %v3347_v57, %s2934_s15  ;;  %v3407_v46 = vrot.slane %v770_v28, 7 }
  0x47   : > { %v775_v0 = vor.u32 %v773_v50, %v3407_v46  ;;  %v3435_v50 = vpack.c.bf16 %v321_v39, %v320_v58  ;;  %v824_v58 = vor.u32 %v822_v2, %v3441_v35 }
  0x49   : > { %1174 = vrot.lane.b32.xlu0 %v3360_v61, %s2935_s16  ;;  %501 = vrot.lane.b32.xlu1 %v3371_v9, %s2936_s17  ;;  %v3429_v28 = vsel %vm4522_vm4, %v764_v51, %v775_v0  ;;  %v456_v51 = vshrl.u32 %v3435_v50, 16  ;;  %v3447_v0 = vpack.c.bf16 %v2584_v10, %v2583_v43  ;;  %v459_v60 = vshll.u32 %v3435_v50, 16 }
  0x4a   : > { %4544 = vst [vmem:[#allocation5_spill] sm:$0xff] %v3429_v28  ;;  %954 = vst.msk [vmem:[#allocation2 + $0xc8] sm:$0xff] %vm4531_vm1, %v3429_v28  ;;  %v3462_v43 = vsel %vm4522_vm4, %v3266_v49, %v824_v58  ;;  %v4497_v58 = vrot.slane %v3162_v54, 7 }
  0x4b   : > { %v3452_v39 = vrot.slane %v456_v51, 7  ;;  %v1157_v21 = vshrl.u32 %v3447_v0, 16  ;;  %4545 = vst [vmem:[#allocation6_spill] sm:$0xff] %v3462_v43  ;;  %v1160_v2 = vshll.u32 %v3447_v0, 16  ;;  %v4499_v51 = vrot.slane %v3375_v11, 7 }
  0x4d   : > { %998 = vrot.lane.b32.xlu0 %v3394_v31, %s2935_s16  ;;  %1199 = vrot.lane.b32.xlu1 %v3403_v24, %s2936_s17  ;;  %v461_v10 = vor.u32 %v459_v60, %v3452_v39  ;;  %v3465_v42 = vrot.slane %v1157_v21, 7  ;;  %v4498_v21 = vrot.slane %v3405_v53, 7 }
  0x4f   : > { %v3475_v28 = vsel %vm4522_vm4, %v3290_v15, %v461_v10  ;;  %v1162_v49 = vor.u32 %v1160_v2, %v3465_v42  ;;  %v4500_v2 = vrot.slane %v3165_v55, 7 }
  0x51   : > { %534 = vrot.lane.b32.xlu0 %v3417_v34, %s2937_s24  ;;  %1228 = vrot.lane.b32.xlu1 %v3425_v3, %s2937_s24  ;;  %v3492_v15 = vsel %vm4522_vm4, %v3318_v40, %v1162_v49  ;;  %v4549_v40 = vrot.slane %v3215_v20, 7 }
  0x53   : > { %v3512_v49 = vsel %vm4535_vm5, %v4549_v40, %v4498_v21  ;;  %v4503_v40 = vrot.slane %v3447_v0, 7 }
  0x54   : > { %4550 = vst [vmem:[#allocation8_spill] sm:$0xff] %v3512_v49 }
  0x55   : > { %914 = vrot.lane.b32.xlu0 %v3375_v11, %s2932_s11  ;;  %932 = vrot.lane.b32.xlu1 %v3405_v53, %s2933_s12 }
  0x59   : > { %370 = vrot.lane.b32.xlu0 %v3435_v50, %s2931_s10  ;;  %1078 = vrot.lane.b32.xlu1 %v3447_v0, %s2931_s10 }
  0x5d   : > { %422 = vrot.lane.b32.xlu0 %v3226_v26, %s2934_s15  ;;  %960 = vrot.lane.b32.xlu1 %v3462_v43, %s2931_s10  ;;  %v4546_v26 = vrot.slane %v3221_v22, 7  ;;  %v778_v22 = vshrl.u32 %v3092_v19, 16 }
  0x5f   : > { %v3487_v60 = vsel %vm4535_vm5, %v4546_v26, %v4499_v51  ;;  %v4501_v26 = vrot.slane %v3435_v50, 7  ;;  %v4554_v51 = vrot.slane %v3274_v62, 7 }
  0x60   : > { %4547 = vst [vmem:[#allocation7_spill] sm:$0xff] %v3487_v60 }
  0x61   : > { %1127 = vrot.lane.b32.xlu0 %v3229_v27, %s2934_s15  ;;  %475 = vrot.lane.b32.xlu1 %v3475_v28, %s2935_s16  ;;  %v4548_v27 = vrot.slane %v3120_v36, 7  ;;  %v3530_v21 = vsel %vm4535_vm5, %v526_v41, %v4501_v26  ;;  %v291_v41 = vld [vmem:[#allocation2 + $0xe8] sm:$0x1] }
  0x62   : > { %4553 = vst [vmem:[#allocation10_spill] sm:$0xff] %v3530_v21  ;;  %v292_v26 = vsel %vm3544_vm7, 0, %v291_v41 }
  0x63   : > { %v3504_v10 = vsel %vm4535_vm5, %v4548_v27, %v4497_v58  ;;  %v4551_v27 = vrot.slane %v3139_v44, 7  ;;  %293 = vst [vmem:[#allocation2 + $0xe8] sm:$0x1] %v292_v26  ;;  %v2585_v26 = vld [vmem:[%s3041_s26 + $0xb0] sm:$0xff] }
  0x65   : > { %978 = vrot.lane.b32.xlu0 %v3487_v60, %s2934_s15  ;;  %1176 = vrot.lane.b32.xlu1 %v3492_v15, %s2935_s16  ;;  %v3524_v58 = vsel %vm4535_vm5, %v4551_v27, %v4500_v2  ;;  %v3541_v27 = vsel %vm4535_vm5, %v4554_v51, %v4503_v40  ;;  %v322_v51 = vld [vmem:[%s3041_s26 + $0x30] sm:$0xff]  ;;  %v323_v40 = vld [vmem:[%s3041_s26 + $0x38] sm:$0x7f]  ;;  %v781_v60 = vshll.u32 %v3092_v19, 16 }
  0x66   : > { %4552 = vst [vmem:[#allocation9_spill] sm:$0xff] %v3524_v58  ;;  %4555 = vst [vmem:[#allocation11_spill] sm:$0xff] %v3541_v27  ;;  %v3562_v41 = vpack.c.bf16 %v323_v40, %v322_v51  ;;  %v830_v51 = vshll.u32 %v3246_v30, 16  ;;  %v2606_v2 = vld [vmem:[%s3041_s26 + $0xf8] sm:$0x7f] }
  0x69   : > { %503 = vrot.lane.b32.xlu0 %v3504_v10, %s2936_s17  ;;  %1000 = vrot.lane.b32.xlu1 %v3512_v49, %s2935_s16  ;;  %v780_v49 = vrot.slane %v778_v22, 7 }
  0x6d   : > { %1201 = vrot.lane.b32.xlu0 %v3524_v58, %s2936_s17  ;;  %536 = vrot.lane.b32.xlu1 %v3530_v21, %s2937_s24  ;;  %v783_v21 = vor.u32 %v781_v60, %v780_v49  ;;  %v263_v58 = vld [vmem:[#allocation2 + $0x48] sm:$0x1]  ;;  %v258_v60 = vld [vmem:[#allocation2 + $0x40] sm:$0x1] }
  0x6e   : > { %v264_v22 = vsel %vm3544_vm7, 0, %v263_v58  ;;  %v2599_v58 = vld [vmem:[%s3041_s26 + $0xc0] sm:$0xff] }
  0x6f   : > { %v3571_v43 = vsel %vm4522_vm4, %v3407_v46, %v783_v21  ;;  %265 = vst [vmem:[#allocation2 + $0x48] sm:$0x1] %v264_v22  ;;  %v259_v46 = vsel %vm3577_vm8, 0, %v258_v60  ;;  %v2600_v21 = vld [vmem:[%s3041_s26 + $0xc8] sm:$0xff]  ;;  %v464_v22 = vshrl.u32 %v3562_v41, 16  ;;  %v467_v60 = vshll.u32 %v3562_v41, 16 }
  0x70   : > { %4558 = vst [vmem:[#allocation12_spill] sm:$0xff] %v3571_v43  ;;  %955 = vst.msk [vmem:[#allocation2 + $0xd8] sm:$0xff] %vm4531_vm1, %v3571_v43  ;;  %v288_v43 = vld [vmem:[#allocation2 + $0xe0] sm:$0x1] }
  0x71   : > { %1230 = vrot.lane.b32.xlu0 %v3541_v27, %s2937_s24  ;;  %558 = vrot.lane.b32.xlu1 %v3081_v16, %s2932_s11  ;;  %v2586_v27 = vld [vmem:[%s3041_s26 + $0xb8] sm:$0x7f]  ;;  %v827_v16 = vshrl.u32 %v3246_v30, 16  ;;  %260 = vst [vmem:[#allocation2 + $0x40] sm:$0x1] %v259_v46 }
  0x72   : > { %v3583_v49 = vpack.c.bf16 %v2586_v27, %v2585_v26  ;;  %v3597_v27 = vpack.c.bf16 %v2600_v21, %v2599_v58 }
  0x73   : > { %v829_v40 = vrot.slane %v827_v16, 7  ;;  %v466_v16 = vrot.slane %v464_v22, 7 }
  0x74   : > { %v1165_v58 = vshrl.u32 %v3583_v49, 16 }
  0x75   : > { %1248 = vrot.lane.b32.xlu0 %v3077_v14, %s2932_s11  ;;  %579 = vrot.lane.b32.xlu1 %v3057_v6, %s2933_s12  ;;  %v832_v26 = vor.u32 %v830_v51, %v829_v40  ;;  %v3628_v51 = vrot.slane %v3208_v17, 7 }
  0x76   : > { %v1167_v21 = vrot.slane %v1165_v58, 7 }
  0x77   : > { %v3611_v46 = vsel %vm4522_vm4, %v3441_v35, %v832_v26  ;;  %4563 = vst [vmem:[#allocation15_spill] sm:$0xff] %v3628_v51 }
  0x78   : > { %4562 = vst [vmem:[#allocation14_spill] sm:$0xff] %v3611_v46 }
  0x79   : > { %1266 = vrot.lane.b32.xlu0 %v3072_v12, %s2933_s12  ;;  %372 = vrot.lane.b32.xlu1 %v3562_v41, %s2931_s10  ;;  %v289_v12 = vsel %vm3577_vm8, 0, %v288_v43  ;;  %v3607_v43 = vrot.slane %v3092_v19, 7 }
  0x7a   : > { %290 = vst [vmem:[#allocation2 + $0xe0] sm:$0x1] %v289_v12 }
  0x7b   : > { %4561 = vst [vmem:[#allocation13_spill] sm:$0xff] %v3607_v43 }
  0x7d   : > { %1080 = vrot.lane.b32.xlu0 %v3583_v49, %s2931_s10  ;;  %736 = vrot.lane.b32.xlu1 %v3074_v13, %s2931_s10  ;;  %v469_v13 = vor.u32 %v467_v60, %v466_v16 }
  0x7f   : > { %v3621_v35 = vsel %vm4522_vm4, %v3452_v39, %v469_v13  ;;  %v4564_v39 = vrot.slane %v3375_v11, 7  ;;  %v3656_v13 = vrot.slane %v3246_v30, 7 }
  0x81   : > { %1412 = vrot.lane.b32.xlu0 %v3597_v27, %s2931_s10  ;;  %424 = vrot.lane.b32.xlu1 %v3277_v1, %s2934_s15  ;;  %v1168_v1 = vshll.u32 %v3583_v49, 16  ;;  %v3636_v16 = vsel %vm4535_vm5, %v4564_v39, %v3607_v43 }
  0x82   : > { %4565 = vst [vmem:[#allocation16_spill] sm:$0xff] %v3636_v16 }
  0x83   : > { %v1170_v22 = vor.u32 %v1168_v1, %v1167_v21  ;;  %v3661_v21 = vld [vmem:[%s3052_s7 + $0x60] sm:$0xff]   ;;  %v4571_v1 = vrot.slane %v3162_v54, 7 }
  0x85   : > { %962 = vrot.lane.b32.xlu0 %v3611_v46, %s2931_s10  ;;  %982 = vrot.lane.b32.xlu1 %v3607_v43, %s2934_s15  ;;  %v3651_v60 = vsel %vm4522_vm4, %v3465_v42, %v1170_v22  ;;  %v4568_v42 = vmov 0  ;;  %v4573_v22 = vrot.slane %v3405_v53, 7  ;;  %v1431_v46 = vshrl.u32 %v3661_v21, 16  ;;  %v4632_v43 = vld [vmem:[#allocation14_spill] sm:$0xff] }
  0x86   : > { %4567 = vst [vmem:[#allocation18_spill] sm:$0xff] %v3651_v60  ;;  %v4569_v42 = vsel %vm3667_vm13, 4294967295, %v4568_v42  ;;  %vm4526_vm4 = vcmask 523649  }
  0x87   : > { %v367_v19 = vpop.permute.xlu1 %366  ;;  %v911_v40 = vpop.permute.xlu0 %910  ;;  %4570 = vst [vmem:[#allocation19_spill] sm:$0xff] %v4569_v42 }
  0x88   : > { %379 = vst.msk [vmem:[#allocation2] sm:$0xff] %vm4533_vm9, %v367_v19  ;;  %v3675_v19 = vsel %vm4535_vm5, %v4571_v1, %v3628_v51 }
  0x89   : > { %922 = vst.msk [vmem:[#allocation2 + $0xa0] sm:$0xff] %vm4530_vm10, %v911_v40  ;;  %1129 = vrot.lane.b32.xlu0 %v3296_v23, %s2934_s15  ;;  %477 = vrot.lane.b32.xlu1 %v3621_v35, %s2935_s16  ;;  %v3647_v23 = vrot.slane %v3241_v29, 7  ;;  %4572 = vst [vmem:[#allocation20_spill] sm:$0xff] %v3675_v19 }
  0x8b   : > { %v1075_v12 = vpop.permute.xlu1 %1074  ;;  %v929_v26 = vpop.permute.xlu0 %928  ;;  %4566 = vst [vmem:[#allocation17_spill] sm:$0xff] %v3647_v23 }
  0x8c   : > { %940 = vst.msk [vmem:[#allocation2 + $0xa0] sm:$0xff] %vm4532_vm11, %v929_v26  ;;  %v3684_v26 = vrot.slane %v3562_v41, 7 }
  0x8d   : > { %1064 = vst.msk [vmem:[#allocation2 + $0xa0] sm:$0xff] %vm4531_vm1, %v3077_v14  ;;  %507 = vrot.lane.b32.xlu0 %v3628_v51, %s2936_s17  ;;  %980 = vrot.lane.b32.xlu1 %v3636_v16, %s2934_s15  ;;  %v4577_v16 = vsel %vm3110_vm3, %v3308_v33, %v3298_v25  ;;  %v3714_v25 = vsel %vm4535_vm5, %v4580_v32, %v3647_v23  ;;  %vm4525_vm3 = vcmask 654849   ;;  %v4626_v6 = vld [vmem:[#allocation18_spill] sm:$0xff] }
  0x8e   : > { %1086 = vst.msk [vmem:[#allocation2 + $0xa0] sm:$0xff] %vm4533_vm9, %v1075_v12  ;;  %v3681_v12 = vsel %vm4535_vm5, %v4573_v22, %v3656_v13 }
  0x8f   : > { %v3653_v58 = vpop.permute.xlu0 %916  ;;  %v1124_v14 = vpop.permute.xlu1 %1123  ;;  %4574 = vst [vmem:[#allocation21_spill] sm:$0xff] %v3681_v12 }
  0x91   : > { %1178 = vrot.lane.b32.xlu0 %v3651_v60, %s2935_s16  ;;  %1205 = vrot.lane.b32.xlu1 %v3647_v23, %s2936_s17  ;;  %v433_v60 = vld [vmem:[#allocation2] sm:$0xff] }
  0x93   : > { %v419_v40 = vpop.permute.xlu0 %418  ;;  %v957_v11 = vpop.permute.xlu1 %956 }
  0x94   : > { %v969_v22 = vsel %vm3667_vm13, %v957_v11, %v4577_v16  ;;  %v3717_v11 = vrot.slane %v3583_v49, 7  ;;  %v434_v16 = vsel %vm3688_vm15, %v419_v40, %v433_v60  ;;  %v3735_v60 = vrot.slane %v1431_v46, 7 }
  0x95   : > { %v1135_v1 = vld [vmem:[#allocation2 + $0xa0] sm:$0xff]  ;;  %505 = vrot.lane.b32.xlu0 %v3675_v19, %s2936_s17  ;;  %970 = vst [vmem:[#allocation2 + $0xa8] sm:$0xff] %v969_v22  ;;  %1002 = vrot.lane.b32.xlu1 %v3681_v12, %s2935_s16  ;;  %v4581_v22 = vrot.slane %v3435_v50, 7  ;;  %v1434_v40 = vshll.u32 %v3661_v21, 16 }
  0x96   : > { %v1136_v12 = vsel %vm3688_vm15, %v1124_v14, %v1135_v1  ;;  %v4582_v14 = vrot.slane %v3447_v0, 7 }
  0x97   : > { %v472_v19 = vpop.permute.xlu0 %471  ;;  %v3725_v42 = vsel %vm4535_vm5, %v4581_v22, %v3684_v26  ;;  %v1173_v51 = vpop.permute.xlu1 %1172  ;;  %v1436_v46 = vor.u32 %v1434_v40, %v3735_v60 }
  0x98   : > { %v486_v32 = vsel %vm3703_vm6, %v472_v19, %v434_v16  ;;  %v1185_v23 = vsel %vm3703_vm6, %v1173_v51, %v1136_v12  ;;  %v3744_v19 = vsel %vm4535_vm5, %v4582_v14, %v3717_v11 }
  0x99   : > { %487 = vst [vmem:[#allocation2] sm:$0xff] %v486_v32  ;;  %1203 = vrot.lane.b32.xlu0 %v3714_v25, %s2936_s17  ;;  %1186 = vst [vmem:[#allocation2 + $0xa0] sm:$0xff] %v1185_v23  ;;  %538 = vrot.lane.b32.xlu1 %v3725_v42, %s2937_s24 }
  0x9b   : > { %v975_v51 = vpop.permute.xlu0 %974  ;;  %v500_v12 = vpop.permute.xlu1 %499 }
  0x9c   : > { %989 = vst.msk [vmem:[#allocation2 + $0xa8] sm:$0xfe] %vm4523_vm2, %v975_v51  ;;  %vm4524_vm2 = vcmask 786049  }
  0x9d   : > { %515 = vst.msk [vmem:[#allocation2] sm:$0xfe] %vm4525_vm3, %v500_v12  ;;  %1232 = vrot.lane.b32.xlu0 %v3744_v19, %s2937_s24  ;;  %785 = vrot.lane.b32.xlu1 %v3308_v33, %s2934_s15  ;;  %v1480_v33 = vshrl.u32 %v3597_v27, 16  ;;  %v1483_v12 = vshll.u32 %v3597_v27, 16 }
  0x9f   : > { %v997_v23 = vpop.permute.xlu0 %996  ;;  %v1198_v1 = vpop.permute.xlu1 %1197  ;;  %v3773_v51 = vrot.slane %v1480_v33, 7 }
  0xa0   : > { %1011 = vst.msk [vmem:[#allocation2 + $0xa8] sm:$0xfe] %vm4526_vm4, %v997_v23  ;;  %vm4583_vm4 = vsmask.f32 256 }
  0xa1   : > { %1212 = vst.msk [vmem:[#allocation2 + $0xa0] sm:$0xfe] %vm4525_vm3, %v1198_v1  ;;  %1461 = vrot.lane.b32.xlu0 %v1436_v46, %s2934_s15  ;;  %1004 = vrot.lane.b32.xlu1 %v3656_v13, %s2935_s16  ;;  %v1589_v1 = vld [vmem:[#allocation2 + $0x18] sm:$0xff]  ;;  %v1485_v33 = vor.u32 %v1483_v12, %v3773_v51  ;;  %vm4528_vm3 = vcmask 786048  }
  0xa3   : > { %v533_v16 = vpop.permute.xlu0 %532  ;;  %v1227_v22 = vpop.permute.xlu1 %1226 }
  0xa4   : > { %548 = vst.msk [vmem:[#allocation2] sm:$0xfe] %vm4524_vm2, %v533_v16  ;;  %1241 = vst.msk [vmem:[#allocation2 + $0xa0] sm:$0xfe] %vm4524_vm2, %v1227_v22  ;;  %vm4529_vm2 = vcmask 654848  }
  0xa5   : > { %540 = vrot.lane.b32.xlu0 %v3684_v26, %s2937_s24  ;;  %1234 = vrot.lane.b32.xlu1 %v3717_v11, %s2937_s24 }
  0xa7   : > { %v913_v32 = vpop.permute.xlu0 %912  ;;  %v1607_v40 = vld [vmem:[#allocation2 + $0xa8] sm:$0xff]  ;;  %v3765_v14 = vpop.permute.xlu1 %934 }
  0xa8   : > { %923 = vst.msk [vmem:[#allocation2 + $0xb0] sm:$0xff] %vm4530_vm10, %v913_v32  ;;  %2633 = vmatprep.mubr.msk.bf16.mxu1 %vm4534_vm0, %v1607_v40 }
  0xa9   : > { %564 = vrot.lane.b32.xlu0 %v3208_v17, %s2932_s11  ;;  %1254 = vrot.lane.b32.xlu1 %v3241_v29, %s2932_s11 }
  0xab   : > { %v931_v46 = vpop.permute.xlu0 %930  ;;  %v1586_v23 = vld [vmem:[#allocation2] sm:$0xff]  ;;  %v369_v16 = vpop.permute.xlu1 %368 }
  0xac   : > { %941 = vst.msk [vmem:[#allocation2 + $0xb0] sm:$0xff] %vm4532_vm11, %v931_v46  ;;  %1815 = vmatmul.mubr.bf16.vlgmr.msra.gmra.mrb[0].mxu0 %v1586_v23  ;;  %v1606_v22 = vld [vmem:[#allocation2 + $0xa0] sm:$0xff] }
  0xad   : > { %380 = vst.msk [vmem:[#allocation2 + $0x10] sm:$0xff] %vm4533_vm9, %v369_v16  ;;  %1895 = vmatmul.mubr.bf16.vlgmr.msra.gmra.mrb[0].mxu1 %v1606_v22  ;;  %611 = vrot.lane.b32.xlu0 %v3144_v45, %s2931_s10  ;;  %v3826_v22 = vld [vmem:[%s3052_s7 + $0x68] sm:$0xff]  }
  0xae   : > { %1065 = vst.msk [vmem:[#allocation2 + $0xb0] sm:$0xff] %vm4531_vm1, %v3139_v44  ;;  %1294 = vrot.lane.b32.xlu1 %v3149_v47, %s2931_s10  ;;  %2624 = vmatprep.mubr.msk.bf16.mxu0 %vm4534_vm0, %v1589_v1 }
  0xaf   : > { %v1077_v32 = vpop.permute.xlu0 %1076  ;;  %v421_v40 = vpop.permute.xlu1 %420 }
  0xb0   : > { %1087 = vst.msk [vmem:[#allocation2 + $0xb0] sm:$0xff] %vm4533_vm9, %v1077_v32 }
  0xb1   : > { %437 = vst.msk [vmem:[#allocation2 + $0x10] sm:$0xff] %vm4536_vm12, %v421_v40  ;;  %834 = vrot.lane.b32.xlu0 %v3126_v38, %s2935_s16  ;;  %v1528_v38 = vrot.slane %v3661_v21, 7  ;;  %v2602_v40 = vld [vmem:[%s3041_s26 + $0xd8] sm:$0xff] }
  0xb2   : > { %1510 = vrot.lane.b32.xlu1 %v1485_v33, %s2935_s16 }
  0xb3   : > { %v959_v46 = vpop.permute.xlu0 %958  ;;  %v1126_v45 = vpop.permute.xlu1 %1125 }
  0xb4   : > { %971 = vst.msk [vmem:[#allocation2 + $0xb8] sm:$0xff] %vm4533_vm9, %v959_v46  ;;  %v1438_v46 = vshrl.u32 %v3826_v22, 16 }
  0xb5   : > { %1138 = vst.msk [vmem:[#allocation2 + $0xb0] sm:$0xff] %vm4536_vm12, %v1126_v45  ;;  %630 = vrot.lane.b32.xlu0 %v3170_v56, %s2934_s15  ;;  %v1591_v45 = vld [vmem:[#allocation2 + $0x28] sm:$0xff] }
  0xb6   : > { %1312 = vrot.lane.b32.xlu1 %v3192_v63, %s2934_s15  ;;  %v1557_v63 = vrot.slane %v3597_v27, 7 }
  0xb7   : > { %v474_v47 = vpop.permute.xlu0 %473  ;;  %v977_v12 = vpop.permute.xlu1 %976 }
  0xb8   : > { %489 = vst.msk [vmem:[#allocation2 + $0x10] sm:$0xff] %vm4527_vm14, %v474_v47 }
  0xb9   : > { %990 = vst.msk [vmem:[#allocation2 + $0xb8] sm:$0xff] %vm4536_vm12, %v977_v12  ;;  %655 = vrot.lane.b32.xlu0 %v3202_v8, %s2935_s16 }
  0xba   : > { %859 = vrot.lane.b32.xlu1 %v3156_v52, %s2936_s17 }
  0xbb   : > { %v1175_v23 = vpop.permute.xlu0 %1174  ;;  %v502_v56 = vpop.permute.xlu1 %501 }
  0xbc   : > { %1187 = vst.msk [vmem:[#allocation2 + $0xb0] sm:$0xff] %vm4527_vm14, %v1175_v23  ;;  %v3849_v23 = vrot.slane %v1438_v46, 7 }
  0xbd   : > { %517 = vst.msk [vmem:[#allocation2 + $0x10] sm:$0xff] %vm4529_vm2, %v502_v56  ;;  %1334 = vrot.lane.b32.xlu0 %v3213_v18, %s2935_s16  ;;  %v1441_v56 = vshll.u32 %v3826_v22, 16 }
  0xbe   : > { %1535 = vrot.lane.b32.xlu1 %v1528_v38, %s2936_s17 }
  0xbf   : > { %v999_v52 = vpop.permute.xlu0 %998  ;;  %v1200_v8 = vpop.permute.xlu1 %1199 }
  0xc0   : > { %1012 = vst.msk [vmem:[#allocation2 + $0xb8] sm:$0xff] %vm4527_vm14, %v999_v52 }
  0xc1   : > { %1213 = vst.msk [vmem:[#allocation2 + $0xb0] sm:$0xff] %vm4529_vm2, %v1200_v8  ;;  %888 = vrot.lane.b32.xlu0 %v3182_v59, %s2937_s24 }
  0xc2   : > { %1564 = vrot.lane.b32.xlu1 %v1557_v63, %s2937_s24 }
  0xc3   : > { %v535_v18 = vpop.permute.xlu0 %534  ;;  %v1229_v1 = vpop.permute.xlu1 %1228 }
  0xc4   : > { %550 = vst.msk [vmem:[#allocation2 + $0x10] sm:$0xff] %vm4528_vm3, %v535_v18  ;;  %1242 = vst.msk [vmem:[#allocation2 + $0xb0] sm:$0xff] %vm4528_vm3, %v1229_v1 }
  0xc5   : > { %560 = vrot.lane.b32.xlu0 %v3120_v36, %s2932_s11  ;;  %v2601_v36 = vld [vmem:[%s3041_s26 + $0xd0] sm:$0xff] }
  0xc6   : > { %585 = vrot.lane.b32.xlu1 %v3562_v41, %s2933_s12 }
  0xc7   : > { %v915_v59 = vpop.permute.xlu0 %914  ;;  %v1609_v16 = vld [vmem:[#allocation2 + $0xb8] sm:$0xff]  ;;  %v933_v33 = vpop.permute.xlu1 %932 }
  0xc8   : > { %924 = vst.msk [vmem:[#allocation2 + $0xc0] sm:$0xff] %vm4530_vm10, %v915_v59  ;;  %2634 = vmatprep.mubr.msk.bf16.mxu1 %vm4534_vm0, %v1609_v16 }
  0xc9   : > { %942 = vst.msk [vmem:[#allocation2 + $0xc0] sm:$0xff] %vm4532_vm11, %v933_v33  ;;  %1250 = vrot.lane.b32.xlu0 %v3139_v44, %s2932_s11  ;;  %v3846_v44 = vpack.c.bf16 %v2602_v40, %v2601_v36 }
  0xca   : > { %1066 = vst.msk [vmem:[#allocation2 + $0xc0] sm:$0xff] %vm4531_vm1, %v3165_v55  ;;  %1272 = vrot.lane.b32.xlu1 %v3583_v49, %s2933_s12 }
  0xcb   : > { %v371_v41 = vpop.permute.xlu0 %370  ;;  %v1588_v32 = vld [vmem:[#allocation2 + $0x10] sm:$0xff]  ;;  %v1079_v47 = vpop.permute.xlu1 %1078  ;;  %v1487_v8 = vshrl.u32 %v3846_v44, 16  ;;  %v1490_v16 = vshll.u32 %v3846_v44, 16 }
  0xcc   : > { %381 = vst.msk [vmem:[#allocation2 + $0x20] sm:$0xff] %vm4533_vm9, %v371_v41  ;;  %1823 = vmatmul.mubr.bf16.gmra.mrb[4].mxu0 %v1588_v32  ;;  %v1608_v12 = vld [vmem:[#allocation2 + $0xb0] sm:$0xff]  ;;  %1088 = vst.msk [vmem:[#allocation2 + $0xc0] sm:$0xff] %vm4533_vm9, %v1079_v47  ;;  %v1593_v47 = vld [vmem:[#allocation2 + $0x38] sm:$0xff] }
  0xcd   : > { %1903 = vmatmul.mubr.bf16.gmra.mrb[4].mxu1 %v1608_v12  ;;  %581 = vrot.lane.b32.xlu0 %v3252_v37, %s2933_s12  ;;  %v3868_v59 = vrot.slane %v1487_v8, 7 }
  0xce   : > { %1268 = vrot.lane.b32.xlu1 %v3274_v62, %s2933_s12  ;;  %2625 = vmatprep.mubr.msk.bf16.mxu0 %vm4534_vm0, %v1591_v45  ;;  %v1443_v62 = vor.u32 %v1441_v56, %v3849_v23  ;;  %v1558_v45 = vrot.slane %v3846_v44, 7 }
  0xcf   : > { %v423_v49 = vpop.permute.xlu0 %422  ;;  %v961_v52 = vpop.permute.xlu1 %960 }
  0xd0   : > { %438 = vst.msk [vmem:[#allocation2 + $0x20] sm:$0xff] %vm4536_vm12, %v423_v49  ;;  %v1444_v1 = vsel %vm4583_vm4, %v3735_v60, %v1443_v62 }
  0xd1   : > { %972 = vst.msk [vmem:[#allocation2 + $0xc8] sm:$0xff] %vm4533_vm9, %v961_v52  ;;  %738 = vrot.lane.b32.xlu0 %v3215_v20, %s2931_s10 }
  0xd2   : > { %1414 = vrot.lane.b32.xlu1 %v3846_v44, %s2931_s10 }
  0xd3   : > { %v1128_v37 = vpop.permute.xlu0 %1127  ;;  %v476_v18 = vpop.permute.xlu1 %475 }
  0xd4   : > { %1139 = vst.msk [vmem:[#allocation2 + $0xc0] sm:$0xff] %vm4536_vm12, %v1128_v37 }
  0xd5   : > { %490 = vst.msk [vmem:[#allocation2 + $0x20] sm:$0xff] %vm4527_vm14, %v476_v18  ;;  %613 = vrot.lane.b32.xlu0 %v3339_v48, %s2931_s10 }
  0xd6   : > { %787 = vrot.lane.b32.xlu1 %v3365_v5, %s2934_s15  ;;  %v1492_v5 = vor.u32 %v1490_v16, %v3868_v59 }
  0xd7   : > { %v979_v20 = vpop.permute.xlu0 %978  ;;  %v1177_v33 = vpop.permute.xlu1 %1176 }
  0xd8   : > { %991 = vst.msk [vmem:[#allocation2 + $0xc8] sm:$0xff] %vm4536_vm12, %v979_v20 }
  0xd9   : > { %1188 = vst.msk [vmem:[#allocation2 + $0xc0] sm:$0xff] %vm4527_vm14, %v1177_v33  ;;  %1296 = vrot.lane.b32.xlu0 %v3360_v61, %s2931_s10  ;;  %v1493_v61 = vsel %vm4583_vm4, %v3773_v51, %v1492_v5 }
  0xda   : > { %1463 = vrot.lane.b32.xlu1 %v1444_v1, %s2934_s15 }
  0xdb   : > { %v504_v48 = vpop.permute.xlu0 %503  ;;  %v1001_v36 = vpop.permute.xlu1 %1000 }
  0xdc   : > { %518 = vst.msk [vmem:[#allocation2 + $0x20] sm:$0xff] %vm4529_vm2, %v504_v48 }
  0xdd   : > { %1013 = vst.msk [vmem:[#allocation2 + $0xc8] sm:$0xff] %vm4527_vm14, %v1001_v36  ;;  %632 = vrot.lane.b32.xlu0 %v3371_v9, %s2934_s15  ;;  %v1529_v9 = vrot.slane %v3826_v22, 7  ;;  %vm357_vm14 = vsmask.f32 7424 }
  0xde   : > { %836 = vrot.lane.b32.xlu1 %v3315_v4, %s2935_s16  ;;  %vm3900_vm4 = vmand %vm4531_vm1, %vm357_vm14 }
  0xdf   : > { %v1202_v60 = vpop.permute.xlu0 %1201  ;;  %v537_v41 = vpop.permute.xlu1 %536  ;;  %v1530_v46 = vsel %vm4535_vm5, %v1528_v38, %v1529_v9  ;;  %v3926_v38 = vld [vmem:[#allocation2 + $0x60] sm:$0xff] }
  0xe0   : > { %1214 = vst.msk [vmem:[#allocation2 + $0xc0] sm:$0xff] %vm4529_vm2, %v1202_v60  ;;  %vm3919_vm2 = vmand %vm4532_vm11, %vm357_vm14  ;;  %v360_v56 = vsel %vm3900_vm4, %v3208_v17, %v3926_v38 }
  0xe1   : > { %551 = vst.msk [vmem:[#allocation2 + $0x20] sm:$0xff] %vm4528_vm3, %v537_v41  ;;  %1314 = vrot.lane.b32.xlu0 %v3403_v24, %s2934_s15 }
  0xe2   : > { %1512 = vrot.lane.b32.xlu1 %v1493_v61, %s2935_s16 }
  0xe3   : > { %v1231_v32 = vpop.permute.xlu0 %1230  ;;  %v559_v40 = vpop.permute.xlu1 %558 }
  0xe4   : > { %1243 = vst.msk [vmem:[#allocation2 + $0xc0] sm:$0xff] %vm4528_vm3, %v1231_v32  ;;  %v1611_v4 = vld [vmem:[#allocation2 + $0xc8] sm:$0xff]  ;;  %vm3912_vm3 = vmand %vm4530_vm10, %vm357_vm14 }
  0xe5   : > { %571 = vst.msk [vmem:[#allocation2 + $0x50] sm:$0xff] %vm4530_vm10, %v559_v40  ;;  %2635 = vmatprep.mubr.msk.bf16.mxu1 %vm4534_vm0, %v1611_v4  ;;  %657 = vrot.lane.b32.xlu0 %v3417_v34, %s2935_s16  ;;  %v522_v40 = vld [vmem:[#allocation2 + $0x40] sm:$0x1]  ;;  %v4599_v4 = vld [vmem:[#allocation5_spill] sm:$0xff] }
  0xe6   : > { %861 = vrot.lane.b32.xlu1 %v3347_v57, %s2936_s17  ;;  %v4651_v57 = vld [vmem:[#allocation3_spill] sm:$0xff] }
  0xe7   : > { %v1249_v51 = vpop.permute.xlu0 %1248  ;;  %v580_v34 = vpop.permute.xlu1 %579 }
  0xe8   : > { %1260 = vst.msk [vmem:[#allocation2 + $0xf0] sm:$0xff] %vm4530_vm10, %v1249_v51  ;;  %v1590_v12 = vld [vmem:[#allocation2 + $0x20] sm:$0xff]  ;;  %vm3937_vm10 = vmand %vm4533_vm9, %vm357_vm14  ;;  %vm650_vm14 = vcmask 385280  }
  0xe9   : > { %592 = vst.msk [vmem:[#allocation2 + $0x50] sm:$0xff] %vm4532_vm11, %v580_v34  ;;  %1831 = vmatmul.mubr.bf16.gmra.mrb[8].mxu0 %v1590_v12  ;;  %1336 = vrot.lane.b32.xlu0 %v3425_v3, %s2935_s16  ;;  %v926_v3 = vsel %vm3912_vm3, %v3653_v58, %v3926_v38 }
  0xea   : > { %726 = vst.msk [vmem:[#allocation2 + $0x50] sm:$0xff] %vm4531_vm1, %v3060_v7  ;;  %1537 = vrot.lane.b32.xlu1 %v1530_v46, %s2936_s17  ;;  %2626 = vmatprep.mubr.msk.bf16.mxu0 %vm4534_vm0, %v1593_v47  ;;  %v1559_v7 = vsel %vm4535_vm5, %v1557_v63, %v1558_v45  ;;  %v944_v62 = vsel %vm3919_vm2, %v3765_v14, %v926_v3  ;;  %v3966_v14 = vld [vmem:[%s3052_s7 + $0x70] sm:$0xff]  }
  0xeb   : > { %v1267_v17 = vpop.permute.xlu0 %1266  ;;  %v1610_v37 = vld [vmem:[#allocation2 + $0xc0] sm:$0xff]  ;;  %v373_v8 = vpop.permute.xlu1 %372  ;;  %v1068_v27 = vsel %vm3900_vm4, %v3241_v29, %v944_v62  ;;  %v2604_v29 = vld [vmem:[%s3041_s26 + $0xe8] sm:$0xff]  ;;  %v1446_v1 = vshrl.u32 %v3966_v14, 16  ;;  %v1449_v36 = vshll.u32 %v3966_v14, 16 }
  0xec   : > { %1278 = vst.msk [vmem:[#allocation2 + $0xf0] sm:$0xff] %vm4532_vm11, %v1267_v17  ;;  %1911 = vmatmul.mubr.bf16.gmra.mrb[8].mxu1 %v1610_v37  ;;  %v385_v18 = vsel %vm3937_vm10, %v373_v8, %v360_v56  ;;  %v1216_v56 = vld [vmem:[#allocation2 + $0xe0] sm:$0x1] }
  0xed   : > { %1402 = vst.msk [vmem:[#allocation2 + $0xf0] sm:$0xff] %vm4531_vm1, %v3661_v21  ;;  %890 = vrot.lane.b32.xlu0 %v3394_v31, %s2937_s24  ;;  %386 = vst [vmem:[#allocation2 + $0x30] sm:$0xff] %v385_v18  ;;  %v2603_v21 = vld [vmem:[%s3041_s26 + $0xe0] sm:$0xff]  ;;  %vm4592_vm1 = vsmask.f32 256  ;;  %v3991_v5 = vrot.slane %v1446_v1, 7 }
  0xee   : > { %1566 = vrot.lane.b32.xlu1 %v1559_v7, %s2937_s24  ;;  %vm3985_vm11 = vmand %vm650_vm14, %vm4592_vm1  ;;  %v3989_v33 = vpack.c.bf16 %v2604_v29, %v2603_v21  ;;  %vm520_vm1 = vcmask 647680   ;;  %vm4595_vm14 = vcmask 523648   ;;  %v4602_v7 = vld [vmem:[#allocation6_spill] sm:$0xff] }
  0xef   : > { %v1081_v58 = vpop.permute.xlu0 %1080  ;;  %v737_v63 = vpop.permute.xlu1 %736  ;;  %v1451_v61 = vor.u32 %v1449_v36, %v3991_v5  ;;  %v277_v18 = vld [vmem:[#allocation2 + $0x98] sm:$0x1]  ;;  %v4613_v36 = vld [vmem:[#allocation11_spill] sm:$0xff] }
  0xf0   : > { %v1090_v20 = vsel %vm3937_vm10, %v1081_v58, %v1068_v27  ;;  %748 = vst.msk [vmem:[#allocation2 + $0x50] sm:$0xff] %vm4533_vm9, %v737_v63  ;;  %v1495_v41 = vshrl.u32 %v3989_v33, 16  ;;  %v1498_v34 = vshll.u32 %v3989_v33, 16  ;;  %v4605_v27 = vld [vmem:[#allocation9_spill] sm:$0xff]  ;;  %v1531_v63 = vrot.slane %v3966_v14, 7 }
  0xf1   : > { %1091 = vst [vmem:[#allocation2 + $0xd0] sm:$0xff] %v1090_v20  ;;  %562 = vrot.lane.b32.xlu0 %v3162_v54, %s2932_s11  ;;  %v1560_v1 = vrot.slane %v3989_v33, 7 }
  0xf2   : > { %1252 = vrot.lane.b32.xlu1 %v3165_v55, %s2932_s11  ;;  %v993_v55 = vld [vmem:[#allocation2 + $0xe8] sm:$0x1]  ;;  %v4016_v47 = vrot.slane %v1495_v41, 7 }
  0xf3   : > { %v1413_v31 = vpop.permute.xlu0 %1412  ;;  %v425_v16 = vpop.permute.xlu1 %424  ;;  %v1595_v41 = vld [vmem:[#allocation2 + $0x48] sm:$0xff] }
  0xf4   : > { %1424 = vst.msk [vmem:[#allocation2 + $0xf0] sm:$0xff] %vm4533_vm9, %v1413_v31  ;;  %v4609_v31 = vld [vmem:[#allocation7_spill] sm:$0xff] }
  0xf5   : > { %439 = vst.msk [vmem:[#allocation2 + $0x30] sm:$0xff] %vm4536_vm12, %v425_v16  ;;  %583 = vrot.lane.b32.xlu0 %v3435_v50, %s2933_s12 }
  0xf6   : > { %1270 = vrot.lane.b32.xlu1 %v3447_v0, %s2933_s12 }
  0xf7   : > { %v963_v48 = vpop.permute.xlu0 %962  ;;  %v983_v60 = vpop.permute.xlu1 %982 }
  0xf8   : > { %973 = vst.msk [vmem:[#allocation2 + $0xd8] sm:$0xff] %vm4533_vm9, %v963_v48  ;;  %v994_v50 = vsel %vm3985_vm11, %v983_v60, %v993_v55  ;;  %vm4596_vm9 = vsmask.f32 256  ;;  %v305_v48 = vld [vmem:[#allocation2 + $0x138] sm:$0x1] }
  0xf9   : > { %740 = vrot.lane.b32.xlu0 %v3405_v53, %s2931_s10  ;;  %995 = vst [vmem:[#allocation2 + $0xe8] sm:$0x1] %v994_v50  ;;  %vm4008_vm0 = vmand %vm520_vm1, %vm4596_vm9  ;;  %v4597_v53 = vmov 0  ;;  %vm4603_vm1 = vcmask 654848   ;;  %v306_v60 = vsel %vm3544_vm7, 0, %v305_v48  ;;  %v2605_v50 = vld [vmem:[%s3041_s26 + $0xf0] sm:$0xff] }
  0xfa   : > { %1416 = vrot.lane.b32.xlu1 %v3989_v33, %s2931_s10  ;;  %v4598_v53 = vsel %vm4008_vm0, 4294967295, %v4597_v53  ;;  %vm4600_vm5 = vmmov %vm4596_vm9  ;;  %307 = vst [vmem:[#allocation2 + $0x138] sm:$0x1] %v306_v60  ;;  %v4091_v44 = vpack.c.bf16 %v2606_v2, %v2605_v50 }
  0xfb   : > { %v1130_v0 = vpop.permute.xlu0 %1129  ;;  %v478_v32 = vpop.permute.xlu1 %477  ;;  %v1452_v46 = vsel %vm4600_vm5, %v3849_v23, %v1451_v61  ;;  %v1500_v23 = vor.u32 %v1498_v34, %v4016_v47  ;;  %vm4601_vm5 = vmmov %vm4595_vm14  ;;  %v4618_v34 = vld [vmem:[#allocation8_spill] sm:$0xff] }
  0xfc   : > { %1140 = vst.msk [vmem:[#allocation2 + $0xd0] sm:$0xff] %vm4536_vm12, %v1130_v0 }
  0xfd   : > { %491 = vst.msk [vmem:[#allocation2 + $0x30] sm:$0xff] %vm4595_vm14, %v478_v32  ;;  %615 = vrot.lane.b32.xlu0 %v3475_v28, %s2931_s10  ;;  %v1501_v62 = vsel %vm4596_vm9, %v3868_v59, %v1500_v23  ;;  %vm4604_vm14 = vmmov %vm4601_vm5  ;;  %vm4607_vm9 = vcmask 786048   ;;  %v4608_v59 = vld [vmem:[#allocation10_spill] sm:$0xff] }
  0xfe   : > { %789 = vrot.lane.b32.xlu1 %v4599_v4, %s2934_s15  ;;  %v4079_v32 = vld [vmem:[%s3052_s7 + $0x78] sm:$0xff]  }
  0xff   : > { %v508_v51 = vpop.permute.xlu0 %507  ;;  %v981_v12 = vpop.permute.xlu1 %980 }
 0x100   : > { %v523_v28 = vsel %vm4008_vm0, %v508_v51, %v522_v40  ;;  %992 = vst.msk [vmem:[#allocation2 + $0xd8] sm:$0xff] %vm4536_vm12, %v981_v12  ;;  %v1015_v40 = vld [vmem:[#allocation2 + $0xe8] sm:$0x1] }
 0x101   : > { %524 = vst [vmem:[#allocation2 + $0x40] sm:$0x1] %v523_v28  ;;  %1298 = vrot.lane.b32.xlu0 %v3492_v15, %s2931_s10 }
 0x102   : > { %1465 = vrot.lane.b32.xlu1 %v1452_v46, %s2934_s15 }
 0x103   : > { %v1179_v3 = vpop.permute.xlu0 %1178  ;;  %v1206_v17 = vpop.permute.xlu1 %1205 }
 0x104   : > { %1189 = vst.msk [vmem:[#allocation2 + $0xd0] sm:$0xff] %vm4601_vm5, %v1179_v3  ;;  %v1217_v37 = vsel %vm4008_vm0, %v1206_v17, %v1216_v56  ;;  %vm4606_vm5 = vmmov %vm4603_vm1  ;;  %vm553_vm0 = vcmask 778880   ;;  %v1454_v3 = vshrl.u32 %v4079_v32, 16 }
 0x105   : > { %634 = vrot.lane.b32.xlu0 %v3504_v10, %s2934_s15  ;;  %1218 = vst [vmem:[#allocation2 + $0xe0] sm:$0x1] %v1217_v37  ;;  %v278_v10 = vsel %vm3544_vm7, 0, %v277_v18 }
 0x106   : > { %838 = vrot.lane.b32.xlu1 %v4602_v7, %s2935_s16  ;;  %279 = vst [vmem:[#allocation2 + $0x98] sm:$0x1] %v278_v10  ;;  %v274_v7 = vld [vmem:[#allocation2 + $0x90] sm:$0x1]  ;;  %v1456_v18 = vrot.slane %v1454_v3, 7 }
 0x107   : > { %v506_v15 = vpop.permute.xlu0 %505  ;;  %v1003_v8 = vpop.permute.xlu1 %1002 }
 0x108   : > { %519 = vst.msk [vmem:[#allocation2 + $0x30] sm:$0xff] %vm4603_vm1, %v506_v15  ;;  %vm4610_vm1 = vcmask 1040384  }
 0x109   : > { %1014 = vst.msk [vmem:[#allocation2 + $0xd8] sm:$0xff] %vm4604_vm14, %v1003_v8  ;;  %1316 = vrot.lane.b32.xlu0 %v4605_v27, %s2934_s15  ;;  %v1532_v29 = vsel %vm4610_vm1, %v1529_v9, %v1531_v63  ;;  %vm675_vm14 = vcmask 516480   ;;  %vm4614_vm1 = vsmask.f32 256  ;;  %v1457_v27 = vshll.u32 %v4079_v32, 16 }
 0x10a   : > { %1514 = vrot.lane.b32.xlu1 %v1501_v62, %s2935_s16  ;;  %vm4065_vm12 = vmand %vm675_vm14, %vm4614_vm1  ;;  %v275_v62 = vsel %vm3577_vm8, 0, %v274_v7 }
 0x10b   : > { %v1204_v58 = vpop.permute.xlu0 %1203  ;;  %v539_v20 = vpop.permute.xlu1 %538  ;;  %vm4619_vm7 = vmmov %vm4614_vm1  ;;  %276 = vst [vmem:[#allocation2 + $0x90] sm:$0x1] %v275_v62  ;;  %v4635_v62 = vld [vmem:[#allocation13_spill] sm:$0xff] }
 0x10c   : > { %1215 = vst.msk [vmem:[#allocation2 + $0xd0] sm:$0xff] %vm4606_vm5, %v1204_v58  ;;  %vm4611_vm5 = vmmov %vm4607_vm9  ;;  %v1245_v23 = vld [vmem:[#allocation2 + $0xe0] sm:$0x1] }
 0x10d   : > { %552 = vst.msk [vmem:[#allocation2 + $0x30] sm:$0xff] %vm4607_vm9, %v539_v20  ;;  %659 = vrot.lane.b32.xlu0 %v4608_v59, %s2935_s16  ;;  %vm4612_vm9 = vcmask 523264   ;;  %vm4086_vm14 = vmand %vm553_vm0, %vm4619_vm7  ;;  %v302_v20 = vld [vmem:[#allocation2 + $0x130] sm:$0x1]  ;;  %v4622_v59 = vld [vmem:[#allocation15_spill] sm:$0xff] }
 0x10e   : > { %863 = vrot.lane.b32.xlu1 %v4609_v31, %s2936_s17  ;;  %vm4623_vm0 = vmmov %vm4612_vm9  ;;  %v1306_v31 = vld [vmem:[#allocation2 + $0xf8] sm:$0xff] }
 0x10f   : > { %v1233_v21 = vpop.permute.xlu0 %1232  ;;  %v4055_v16 = vpop.permute.xlu1 %785 }
 0x110   : > { %1244 = vst.msk [vmem:[#allocation2 + $0xd0] sm:$0xff] %vm4611_vm5, %v1233_v21  ;;  %v1613_v55 = vld [vmem:[#allocation2 + $0xd8] sm:$0xff]  ;;  %vm4617_vm5 = vcmask 1040384   ;;  %v303_v21 = vsel %vm3577_vm8, 0, %v302_v20  ;;  %vm4627_vm8 = vmmov %vm4614_vm1  ;;  %vm4634_vm1 = vcmask 654849  }
 0x111   : > { %2636 = vmatprep.mubr.msk.bf16.mxu1 %vm4612_vm9, %v1613_v55  ;;  %1338 = vrot.lane.b32.xlu0 %v4613_v36, %s2935_s16  ;;  %v1561_v61 = vsel %vm4617_vm5, %v1558_v45, %v1560_v1  ;;  %v555_v45 = vld [vmem:[#allocation2 + $0x40] sm:$0x1]  ;;  %v1459_v55 = vor.u32 %v1457_v27, %v1456_v18  ;;  %304 = vst [vmem:[#allocation2 + $0x130] sm:$0x1] %v303_v21  ;;  %v1533_v18 = vrot.slane %v4079_v32, 7  ;;  %vm4636_vm5 = vmmov %vm4619_vm7 }
 0x112   : > { %1539 = vrot.lane.b32.xlu1 %v1532_v29, %s2936_s17 }
 0x113   : > { %v4070_v0 = vpop.permute.xlu0 %1461  ;;  %v1005_v4 = vpop.permute.xlu1 %1004 }
 0x114   : > { %v1592_v51 = vld [vmem:[#allocation2 + $0x30] sm:$0xff]  ;;  %v1016_v46 = vsel %vm4065_vm12, %v1005_v4, %v1015_v40  ;;  %v1503_v40 = vshrl.u32 %v4091_v44, 16 }
 0x115   : > { %1839 = vmatmul.mubr.bf16.gmra.mrb[12].mxu0 %v1592_v51  ;;  %892 = vrot.lane.b32.xlu0 %v4618_v34, %s2937_s24  ;;  %1017 = vst [vmem:[#allocation2 + $0xe8] sm:$0x1] %v1016_v46  ;;  %v1473_v51 = vld [vmem:[#allocation2 + $0xf0] sm:$0xff]  ;;  %v1460_v34 = vsel %vm4627_vm8, %v3991_v5, %v1459_v55  ;;  %v1506_v5 = vshll.u32 %v4091_v44, 16  ;;  %vm4640_vm8 = vcmask 523264   ;;  %v1562_v55 = vrot.slane %v4091_v44, 7 }
 0x116   : > { %1568 = vrot.lane.b32.xlu1 %v1561_v61, %s2937_s24  ;;  %2627 = vmatprep.mubr.msk.bf16.mxu0 %vm4612_vm9, %v1595_v41  ;;  %v4625_v61 = vld [vmem:[#allocation12_spill] sm:$0xff]  ;;  %v797_v41 = vld [vmem:[#allocation2 + $0x50] sm:$0xff]  ;;  %vm4638_vm9 = vmmov %vm4634_vm1 }
 0x117   : > { %v541_v28 = vpop.permute.xlu0 %540  ;;  %v1612_v56 = vld [vmem:[#allocation2 + $0xd0] sm:$0xff]  ;;  %v1235_v17 = vpop.permute.xlu1 %1234  ;;  %v798_v4 = vsel %vm3688_vm15, %v4055_v16, %v797_v41  ;;  %v1505_v16 = vrot.slane %v1503_v40, 7 }
 0x118   : > { %v556_v37 = vsel %vm4086_vm14, %v541_v28, %v555_v45  ;;  %1919 = vmatmul.mubr.bf16.gmra.mrb[12].mxu1 %v1612_v56  ;;  %v1246_v15 = vsel %vm4086_vm14, %v1235_v17, %v1245_v23  ;;  %v1474_v45 = vsel %vm3688_vm15, %v4070_v0, %v1473_v51  ;;  %v4628_v23 = vld [vmem:[#allocation17_spill] sm:$0xff]  ;;  %v4631_v0 = vld [vmem:[#allocation20_spill] sm:$0xff] }
 0x119   : > { %557 = vst [vmem:[#allocation2 + $0x40] sm:$0x1] %v556_v37  ;;  %742 = vrot.lane.b32.xlu0 %v3246_v30, %s2931_s10  ;;  %1247 = vst [vmem:[#allocation2 + $0xe0] sm:$0x1] %v1246_v15  ;;  %v624_v30 = vld [vmem:[#allocation2 + $0x58] sm:$0xff]  ;;  %v1508_v37 = vor.u32 %v1506_v5, %v1505_v16 }
 0x11a   : > { %1418 = vrot.lane.b32.xlu1 %v4091_v44, %s2931_s10 }
 0x11b   : > { %v4105_v8 = vpop.permute.xlu0 %564  ;;  %v4108_v10 = vpop.permute.xlu1 %1254  ;;  %v1509_v27 = vsel %vm4636_vm5, %v4016_v47, %v1508_v37 }
 0x11c   : > { %v1615_v58 = vld [vmem:[#allocation2 + $0xe8] sm:$0xff] }
 0x11d   : > { %617 = vrot.lane.b32.xlu0 %v3621_v35, %s2931_s10  ;;  %2637 = vmatprep.mubr.msk.bf16.mxu1 %vm4623_vm0, %v1615_v58  ;;  %vm4639_vm0 = vcmask 786049  }
 0x11e   : > { %638 = vrot.lane.b32.xlu1 %v4622_v59, %s2934_s15 }
 0x11f   : > { %v612_v29 = vpop.permute.xlu0 %611 }
 0x120   : > { %v1295_v48 = vpop.permute.xlu1 %1294  ;;  %v625_v60 = vsel %vm3667_vm13, %v612_v29, %v624_v30  ;;  %v1594_v35 = vld [vmem:[#allocation2 + $0x40] sm:$0xff] }
 0x121   : > { %v1307_v50 = vsel %vm3667_vm13, %v1295_v48, %v1306_v31  ;;  %626 = vst [vmem:[#allocation2 + $0x58] sm:$0xff] %v625_v60  ;;  %791 = vrot.lane.b32.xlu0 %v4625_v61, %s2934_s15  ;;  %1847 = vmatmul.mubr.bf16.gmra.mrb[16].mxu0 %v1594_v35  ;;  %v1614_v2 = vld [vmem:[#allocation2 + $0xe0] sm:$0xff]  ;;  %vm4629_vm13 = vcmask 392449   ;;  %v577_v48 = vsel %vm3912_vm3, %v4105_v8, %v3926_v38  ;;  %v4648_v61 = vld [vmem:[#allocation21_spill] sm:$0xff] }
 0x122   : > { %1308 = vst [vmem:[#allocation2 + $0xf8] sm:$0xff] %v1307_v50  ;;  %1300 = vrot.lane.b32.xlu1 %v4626_v6, %s2931_s10  ;;  %1927 = vmatmul.mubr.bf16.gmra.mrb[16].mxu1 %v1614_v2  ;;  %vm4630_vm15 = vmmov %vm4629_vm13  ;;  %v1264_v60 = vsel %vm3912_vm3, %v4108_v10, %v3926_v38 }
 0x123   : > { %v835_v46 = vpop.permute.xlu0 %834 }
 0x124   : > { %v1511_v28 = vpop.permute.xlu1 %1510  ;;  %v847_v56 = vsel %vm3703_vm6, %v835_v46, %v798_v4 }
 0x125   : > { %v1523_v3 = vsel %vm3703_vm6, %v1511_v28, %v1474_v45  ;;  %848 = vst [vmem:[#allocation2 + $0x50] sm:$0xff] %v847_v56  ;;  %1320 = vrot.lane.b32.xlu0 %v4628_v23, %s2934_s15  ;;  %vm4633_vm6 = vcmask 523649  }
 0x126   : > { %1524 = vst [vmem:[#allocation2 + $0xf0] sm:$0xff] %v1523_v3  ;;  %1467 = vrot.lane.b32.xlu1 %v1460_v34, %s2934_s15  ;;  %vm4637_vm7 = vmmov %vm4633_vm6 }
 0x127   : > { %v631_v17 = vpop.permute.xlu0 %630 }
 0x128   : > { %v1313_v39 = vpop.permute.xlu1 %1312  ;;  %646 = vst.msk [vmem:[#allocation2 + $0x58] sm:$0xfe] %vm4629_vm13, %v631_v17  ;;  %vm4641_vm13 = vmmov %vm4639_vm0 }
 0x129   : > { %1327 = vst.msk [vmem:[#allocation2 + $0xf8] sm:$0xfe] %vm4630_vm15, %v1313_v39  ;;  %636 = vrot.lane.b32.xlu0 %v4631_v0, %s2934_s15  ;;  %vm4643_vm15 = vcmask 1040384   ;;  %v4676_v0 = vld [vmem:[#allocation4_spill] sm:$0xff] }
 0x12a   : > { %840 = vrot.lane.b32.xlu1 %v4632_v43, %s2935_s16  ;;  %v1534_v29 = vsel %vm4643_vm15, %v1531_v63, %v1533_v18  ;;  %vm4646_vm5 = vmmov %vm4643_vm15 }
 0x12b   : > { %v656_v7 = vpop.permute.xlu0 %655  ;;  %v1563_v8 = vsel %vm4646_vm5, %v1560_v1, %v1562_v55 }
 0x12c   : > { %v860_v15 = vpop.permute.xlu1 %859  ;;  %671 = vst.msk [vmem:[#allocation2 + $0x58] sm:$0xfe] %vm4633_vm6, %v656_v7  ;;  %vm4644_vm6 = vcmask 917248  }
 0x12d   : > { %874 = vst.msk [vmem:[#allocation2 + $0x50] sm:$0xfe] %vm4634_vm1, %v860_v15  ;;  %867 = vrot.lane.b32.xlu0 %v4635_v62, %s2936_s17  ;;  %vm4645_vm1 = vmmov %vm4640_vm8 }
 0x12e   : > { %1318 = vrot.lane.b32.xlu1 %v3714_v25, %s2934_s15  ;;  %v4642_v25 = vld [vmem:[#allocation16_spill] sm:$0xff] }
 0x12f   : > { %v1335_v58 = vpop.permute.xlu0 %1334 }
 0x130   : > { %v1536_v30 = vpop.permute.xlu1 %1535  ;;  %1349 = vst.msk [vmem:[#allocation2 + $0xf8] sm:$0xfe] %vm4637_vm7, %v1335_v58  ;;  %vm4647_vm7 = vmmov %vm4644_vm6 }
 0x131   : > { %1550 = vst.msk [vmem:[#allocation2 + $0xf0] sm:$0xfe] %vm4638_vm9, %v1536_v30  ;;  %1516 = vrot.lane.b32.xlu0 %v1509_v27, %s2935_s16  ;;  %vm4649_vm9 = vcmask 1048448  }
 0x132   : > { %1543 = vrot.lane.b32.xlu1 %v1533_v18, %s2936_s17  ;;  %vm4650_vm3 = vmmov %vm4649_vm9 }
 0x133   : > { %v889_v20 = vpop.permute.xlu0 %888  ;;  %v1597_v59 = vld [vmem:[#allocation2 + $0x58] sm:$0xff] }
 0x134   : > { %v1565_v31 = vpop.permute.xlu1 %1564  ;;  %903 = vst.msk [vmem:[#allocation2 + $0x50] sm:$0xfe] %vm4639_vm0, %v889_v20  ;;  %2628 = vmatprep.mubr.msk.bf16.mxu0 %vm4640_vm8, %v1597_v59  ;;  %vm4652_vm0 = vcmask 130048   ;;  %vm4654_vm8 = vcmask 261248   ;;  %v4252_v20 = vld [vmem:[%s4488_s3] ss:$0 sm:$0xff] }
 0x135   : > { %1579 = vst.msk [vmem:[#allocation2 + $0xf0] sm:$0xfe] %vm4641_vm13, %v1565_v31  ;;  %661 = vrot.lane.b32.xlu0 %v3725_v42, %s2935_s16  ;;  %vm4655_vm13 = vmmov %vm4654_vm8  ;;  %v4257_v59 = vld [vmem:[%s4489_s4] ss:$0 sm:$0xff] }
 0x136   : > { %865 = vrot.lane.b32.xlu1 %v4642_v25, %s2936_s17  ;;  %vm4656_vm15 = vmmov %vm4654_vm8 }
 0x137   : > { %v561_v47 = vpop.permute.xlu0 %560  ;;  %v1617_v21 = vld [vmem:[#allocation2 + $0xf8] sm:$0xff] }
 0x138   : > { %v586_v36 = vpop.permute.xlu1 %585  ;;  %572 = vst.msk [vmem:[#allocation2 + $0x60] sm:$0xff] %vm4644_vm6, %v561_v47  ;;  %2638 = vmatprep.mubr.msk.bf16.mxu1 %vm4645_vm1, %v1617_v21  ;;  %vm4657_vm6 = vcmask 392448   ;;  %vm4658_vm1 = vmmov %vm4654_vm8 }
 0x139   : > { %v4180_v42 = vsel %vm3919_vm2, %v586_v36, %v577_v48  ;;  %1340 = vrot.lane.b32.xlu0 %v3744_v19, %s2935_s16  ;;  %vm4659_vm5 = vmmov %vm4657_vm6 }
 0x13a   : > { %1541 = vrot.lane.b32.xlu1 %v1534_v29, %s2936_s17 }
 0x13b   : > { %v1251_v63 = vpop.permute.xlu0 %1250  ;;  %v1596_v44 = vld [vmem:[#allocation2 + $0x50] sm:$0xff] }
 0x13c   : > { %v1273_v35 = vpop.permute.xlu1 %1272  ;;  %1261 = vst.msk [vmem:[#allocation2 + $0x100] sm:$0xff] %vm4647_vm7, %v1251_v63  ;;  %1855 = vmatmul.mubr.bf16.gmra.mrb[20].mxu0 %v1596_v44  ;;  %v1616_v50 = vld [vmem:[#allocation2 + $0xf0] sm:$0xff]  ;;  %vm4660_vm7 = vmmov %vm4659_vm5 }
 0x13d   : > { %v4195_v19 = vsel %vm3919_vm2, %v1273_v35, %v1264_v60  ;;  %1935 = vmatmul.mubr.bf16.gmra.mrb[20].mxu1 %v1616_v50  ;;  %894 = vrot.lane.b32.xlu0 %v4648_v61, %s2937_s24  ;;  %vm4653_vm2 = vmmov %vm4652_vm0 }
 0x13e   : > { %1570 = vrot.lane.b32.xlu1 %v1563_v8, %s2937_s24 }
 0x13f   : > { %v582_v33 = vpop.permute.xlu0 %581 }
 0x140   : > { %v1269_v1 = vpop.permute.xlu1 %1268  ;;  %593 = vst.msk [vmem:[#allocation2 + $0x60] sm:$0xff] %vm4649_vm9, %v582_v33  ;;  %vm4661_vm9 = vcmask 523648  }
 0x141   : > { %1279 = vst.msk [vmem:[#allocation2 + $0x100] sm:$0xff] %vm4650_vm3, %v1269_v1  ;;  %663 = vrot.lane.b32.xlu0 %v3684_v26, %s2935_s16  ;;  %vm4662_vm3 = vmmov %vm4659_vm5 }
 0x142   : > { %727 = vst.msk [vmem:[#allocation2 + $0x60] sm:$0xff] %vm4652_vm0, %v4651_v57  ;;  %1342 = vrot.lane.b32.xlu1 %v3717_v11, %s2935_s16  ;;  %vm4663_vm0 = vmmov %vm4661_vm9 }
 0x143   : > { %1403 = vst.msk [vmem:[#allocation2 + $0x100] sm:$0xff] %vm4653_vm2, %v3826_v22  ;;  %v739_v49 = vpop.permute.xlu0 %738  ;;  %vm4664_vm2 = vmmov %vm4663_vm0 }
 0x144   : > { %v1415_v38 = vpop.permute.xlu1 %1414  ;;  %749 = vst.msk [vmem:[#allocation2 + $0x60] sm:$0xff] %vm4654_vm8, %v739_v49  ;;  %vm4665_vm8 = vcmask 654848  }
 0x145   : > { %1425 = vst.msk [vmem:[#allocation2 + $0x100] sm:$0xff] %vm4655_vm13, %v1415_v38  ;;  %896 = vrot.lane.b32.xlu0 %v3656_v13, %s2937_s24  ;;  %vm4666_vm13 = vmmov %vm4663_vm0 }
 0x146   : > { %1572 = vrot.lane.b32.xlu1 %v1562_v55, %s2937_s24 }
 0x147   : > { %v614_v10 = vpop.permute.xlu0 %613 }
 0x148   : > { %v788_v2 = vpop.permute.xlu1 %787  ;;  %627 = vst.msk [vmem:[#allocation2 + $0x68] sm:$0xff] %vm4656_vm15, %v614_v10  ;;  %vm4667_vm15 = vmmov %vm4665_vm8 }
 0x149   : > { %800 = vst.msk [vmem:[#allocation2 + $0x60] sm:$0xff] %vm4657_vm6, %v788_v2  ;;  %vm4668_vm6 = vcmask 786048  }
 0x14b   : > { %v1297_v26 = vpop.permute.xlu0 %1296 }
 0x14c   : > { %v1464_v22 = vpop.permute.xlu1 %1463  ;;  %1309 = vst.msk [vmem:[#allocation2 + $0x108] sm:$0xff] %vm4658_vm1, %v1297_v26  ;;  %vm4669_vm1 = vcmask 523264  }
 0x14d   : > { %1476 = vst.msk [vmem:[#allocation2 + $0x100] sm:$0xff] %vm4659_vm5, %v1464_v22  ;;  %vm4670_vm5 = vmmov %vm4668_vm6 }
 0x14f   : > { %v633_v11 = vpop.permute.xlu0 %632 }
 0x150   : > { %v837_v41 = vpop.permute.xlu1 %836  ;;  %647 = vst.msk [vmem:[#allocation2 + $0x68] sm:$0xff] %vm4660_vm7, %v633_v11  ;;  %vm4671_vm7 = vcmask 917248  }
 0x151   : > { %849 = vst.msk [vmem:[#allocation2 + $0x60] sm:$0xff] %vm4661_vm9, %v837_v41  ;;  %vm4672_vm9 = vmmov %vm4669_vm1 }
 0x153   : > { %v1315_v13 = vpop.permute.xlu0 %1314 }
 0x154   : > { %v1513_v6 = vpop.permute.xlu1 %1512  ;;  %1328 = vst.msk [vmem:[#allocation2 + $0x108] sm:$0xff] %vm4662_vm3, %v1315_v13  ;;  %vm4673_vm3 = vmmov %vm4671_vm7 }
 0x155   : > { %1525 = vst.msk [vmem:[#allocation2 + $0x100] sm:$0xff] %vm4663_vm0, %v1513_v6  ;;  %vm4674_vm0 = vcmask 1048448   ;;  %v2919_v6 = vld [vmem:[%s3052_s7 + $0x38] sm:$0xff]   ;;  %s2793_s7 = smul.u32 160, %s4717_s19 }
 0x157   : > { %v658_v40 = vpop.permute.xlu0 %657  ;;  %s4297_s16 = scalar_lea.vmem %s4490_s5, %s2793_s7 }
 0x158   : > { %v862_v4 = vpop.permute.xlu1 %861  ;;  %672 = vst.msk [vmem:[#allocation2 + $0x68] sm:$0xff] %vm4664_vm2, %v658_v40  ;;  %vm4675_vm2 = vmmov %vm4674_vm0  ;;  %v730_v40 = vsel %vm3900_vm4, %v2919_v6, %v4180_v42 }
 0x159   : > { %875 = vst.msk [vmem:[#allocation2 + $0x60] sm:$0xff] %vm4665_vm8, %v862_v4  ;;  %vm4677_vm8 = vcmask 130048   ;;  %v1406_v4 = vsel %vm3900_vm4, %v4079_v32, %v4195_v19  ;;  %vm4697_vm4 = vcmask 261248  }
 0x15b   : > { %v1337_v51 = vpop.permute.xlu0 %1336 }
 0x15c   : > { %v1538_v46 = vpop.permute.xlu1 %1537  ;;  %1350 = vst.msk [vmem:[#allocation2 + $0x108] sm:$0xff] %vm4666_vm13, %v1337_v51  ;;  %vm4678_vm13 = vmmov %vm4677_vm8 }
 0x15d   : > { %1551 = vst.msk [vmem:[#allocation2 + $0x100] sm:$0xff] %vm4667_vm15, %v1538_v46  ;;  %vm4679_vm15 = vcmask 261248  }
 0x15f   : > { %v891_v34 = vpop.permute.xlu0 %890  ;;  %v1599_v45 = vld [vmem:[#allocation2 + $0x68] sm:$0xff] }
 0x160   : > { %v1567_v28 = vpop.permute.xlu1 %1566  ;;  %904 = vst.msk [vmem:[#allocation2 + $0x60] sm:$0xff] %vm4668_vm6, %v891_v34  ;;  %2629 = vmatprep.mubr.msk.bf16.mxu0 %vm4669_vm1, %v1599_v45  ;;  %vm4680_vm6 = vmmov %vm4679_vm15 }
 0x161   : > { %1580 = vst.msk [vmem:[#allocation2 + $0x100] sm:$0xff] %vm4670_vm5, %v1567_v28  ;;  %vm4681_vm1 = vmmov %vm4680_vm6  ;;  %vm4682_vm5 = vcmask 392448  }
 0x163   : > { %v563_v56 = vpop.permute.xlu0 %562  ;;  %v1619_v3 = vld [vmem:[#allocation2 + $0x108] sm:$0xff] }
 0x164   : > { %v1253_v23 = vpop.permute.xlu1 %1252  ;;  %573 = vst.msk [vmem:[#allocation2 + $0x70] sm:$0xff] %vm4671_vm7, %v563_v56  ;;  %2639 = vmatprep.mubr.msk.bf16.mxu1 %vm4672_vm9, %v1619_v3  ;;  %vm4683_vm7 = vmmov %vm4681_vm1  ;;  %v652_v56 = vld [vmem:[#allocation2 + $0x98] sm:$0x1] }
 0x165   : > { %1262 = vst.msk [vmem:[#allocation2 + $0x110] sm:$0xff] %vm4673_vm3, %v1253_v23  ;;  %vm4684_vm9 = vmmov %vm4682_vm5 }
 0x166   : > { %vm4685_vm3 = vmmov %vm4682_vm5 }
 0x167   : > { %v584_v16 = vpop.permute.xlu0 %583  ;;  %v1598_v5 = vld [vmem:[#allocation2 + $0x60] sm:$0xff] }
 0x168   : > { %v1271_v17 = vpop.permute.xlu1 %1270  ;;  %594 = vst.msk [vmem:[#allocation2 + $0x70] sm:$0xff] %vm4674_vm0, %v584_v16  ;;  %1863 = vmatmul.mubr.bf16.gmra.mrb[24].mxu0 %v1598_v5  ;;  %v1618_v39 = vld [vmem:[#allocation2 + $0x100] sm:$0xff]  ;;  %vm4686_vm0 = vcmask 523648  }
 0x169   : > { %1280 = vst.msk [vmem:[#allocation2 + $0x110] sm:$0xff] %vm4675_vm2, %v1271_v17  ;;  %1943 = vmatmul.mubr.bf16.gmra.mrb[24].mxu1 %v1618_v39  ;;  %vm4687_vm2 = vmmov %vm4685_vm3 }
 0x16a   : > { %728 = vst.msk [vmem:[#allocation2 + $0x70] sm:$0xff] %vm4677_vm8, %v4676_v0  ;;  %vm4688_vm8 = vmmov %vm4686_vm0 }
 0x16b   : > { %1404 = vst.msk [vmem:[#allocation2 + $0x110] sm:$0xff] %vm4678_vm13, %v3966_v14  ;;  %v741_v43 = vpop.permute.xlu0 %740  ;;  %vm4689_vm13 = vmmov %vm4686_vm0 }
 0x16c   : > { %v1417_v37 = vpop.permute.xlu1 %1416  ;;  %750 = vst.msk [vmem:[#allocation2 + $0x70] sm:$0xff] %vm4679_vm15, %v741_v43  ;;  %vm4690_vm15 = vcmask 654848  }
 0x16d   : > { %1426 = vst.msk [vmem:[#allocation2 + $0x110] sm:$0xff] %vm4680_vm6, %v1417_v37  ;;  %vm4691_vm6 = vmmov %vm4690_vm15 }
 0x16f   : > { %v616_v7 = vpop.permute.xlu0 %615 }
 0x170   : > { %v790_v15 = vpop.permute.xlu1 %789  ;;  %628 = vst.msk [vmem:[#allocation2 + $0x78] sm:$0xff] %vm4681_vm1, %v616_v7  ;;  %vm4692_vm1 = vmmov %vm4686_vm0 }
 0x171   : > { %801 = vst.msk [vmem:[#allocation2 + $0x70] sm:$0xff] %vm4682_vm5, %v790_v15  ;;  %vm4693_vm5 = vcmask 523264  }
 0x173   : > { %v1299_v62 = vpop.permute.xlu0 %1298 }
 0x174   : > { %v1466_v18 = vpop.permute.xlu1 %1465  ;;  %1310 = vst.msk [vmem:[#allocation2 + $0x118] sm:$0xff] %vm4683_vm7, %v1299_v62  ;;  %vm4694_vm7 = vcmask 786048  }
 0x175   : > { %1477 = vst.msk [vmem:[#allocation2 + $0x110] sm:$0xff] %vm4684_vm9, %v1466_v18  ;;  %vm4695_vm9 = vmmov %vm4694_vm7 }
 0x177   : > { %v635_v27 = vpop.permute.xlu0 %634 }
 0x178   : > { %v839_v14 = vpop.permute.xlu1 %838  ;;  %648 = vst.msk [vmem:[#allocation2 + $0x78] sm:$0xff] %vm4685_vm3, %v635_v27  ;;  %vm4696_vm3 = vmmov %vm4693_vm5 }
 0x179   : > { %850 = vst.msk [vmem:[#allocation2 + $0x70] sm:$0xff] %vm4686_vm0, %v839_v14 }
 0x17b   : > { %v1317_v58 = vpop.permute.xlu0 %1316 }
 0x17c   : > { %v1515_v30 = vpop.permute.xlu1 %1514  ;;  %1329 = vst.msk [vmem:[#allocation2 + $0x118] sm:$0xff] %vm4687_vm2, %v1317_v58  ;;  %vm2429_vm2 = vcmask 257024   ;;  %v1331_v58 = vld [vmem:[#allocation2 + $0x138] sm:$0x1] }
 0x17d   : > { %1526 = vst.msk [vmem:[#allocation2 + $0x110] sm:$0xff] %vm4688_vm8, %v1515_v30 }
 0x17f   : > { %v660_v31 = vpop.permute.xlu0 %659  ;;  %v1816_v25 = vpop.f32.mrb[0].mxu0 }
 0x180   : > { %v864_v47 = vpop.permute.xlu1 %863  ;;  %v1896_v21 = vpop.f32.mrb[0].mxu1  ;;  %673 = vst.msk [vmem:[#allocation2 + $0x78] sm:$0xff] %vm4689_vm13, %v660_v31  ;;  %v1982_v29 = vmul.f32 %v4252_v20, %v1816_v25  ;;  %vm4698_vm13 = vmmov %vm4697_vm4 }
 0x181   : > { %876 = vst.msk [vmem:[#allocation2 + $0x70] sm:$0xff] %vm4690_vm15, %v864_v47  ;;  %v2002_v55 = vmul.f32 %v4252_v20, %v1896_v21  ;;  %v1818_v48 = vpop.f32.mrb[1].mxu0  ;;  %v1898_v36 = vpop.f32.mrb[1].mxu1  ;;  %vm4699_vm15 = vcmask 392448  }
 0x182   : > { %v2029_v63 = vadd.f32 %v4257_v59, %v1982_v29  ;;  %v1819_v44 = vpop.f32.mrb[2].mxu0  ;;  %v1899_v8 = vpop.f32.mrb[2].mxu1  ;;  %v878_v36 = vld [vmem:[#allocation2 + $0x90] sm:$0x1] }
 0x183   : > { %v2049_v60 = vadd.f32 %v4257_v59, %v2002_v55  ;;  %v1983_v35 = vmul.f32 %v4252_v20, %v1819_v44  ;;  %v2003_v50 = vmul.f32 %v4252_v20, %v1899_v8  ;;  %v1821_v61 = vpop.f32.mrb[3].mxu0  ;;  %v1901_v33 = vpop.f32.mrb[3].mxu1 }
 0x184   : > { %v2109_v1 = vmul.f32 1.442695, %v2029_v63  ;;  %v1540_v57 = vpop.permute.xlu1 %1539  ;;  %v1339_v49 = vpop.permute.xlu0 %1338 }
 0x185   : > { %v2149_v38 = vmul.f32 1.442695, %v2049_v60  ;;  %v2030_v10 = vadd.f32 %v4257_v59, %v1983_v35  ;;  %v4269_v2 = vadd.f32 %v4257_v59, %v2003_v50  ;;  %1552 = vst.msk [vmem:[#allocation2 + $0x110] sm:$0xff] %vm4691_vm6, %v1540_v57  ;;  %vm2089_vm0 = vcmp.gt.f32.partialorder %v2049_v60, 0.0 }
 0x186   : > { %1351 = vst.msk [vmem:[#allocation2 + $0x118] sm:$0xff] %vm4692_vm1, %v1339_v49  ;;  %2838 = vpow2.f32 %v2109_v1  ;;  %vm4700_vm1 = vmmov %vm4699_vm15  ;;  %v1554_v49 = vld [vmem:[#allocation2 + $0x130] sm:$0x1] }
 0x187   : > { %2840 = vpow2.f32 %v2149_v38  ;;  %v2111_v26 = vmul.f32 1.442695, %v2030_v10  ;;  %v1601_v22 = vld [vmem:[#allocation2 + $0x78] sm:$0xff]  ;;  %v2151_v11 = vmul.f32 1.442695, %v4269_v2  ;;  %vm2070_vm8 = vcmp.gt.f32.partialorder %v2030_v10, 0.0 }
 0x188   : > { %v1569_v41 = vpop.permute.xlu1 %1568  ;;  %v893_v13 = vpop.permute.xlu0 %892  ;;  %2630 = vmatprep.mubr.msk.bf16.mxu0 %vm4693_vm5, %v1601_v22  ;;  %vm2090_vm6 = vcmp.gt.f32.partialorder %v4269_v2, 0.0  ;;  %vm4701_vm5 = vcmask 523648  }
 0x189   : > { %2842 = vpow2.f32 %v2111_v26  ;;  %1581 = vst.msk [vmem:[#allocation2 + $0x110] sm:$0xff] %vm4694_vm7, %v1569_v41  ;;  %vm4702_vm7 = vmmov %vm4700_vm1 }
 0x18a   : > { %905 = vst.msk [vmem:[#allocation2 + $0x70] sm:$0xff] %vm4695_vm9, %v893_v13  ;;  %2844 = vpow2.f32 %v2151_v11  ;;  %vm4703_vm9 = vmmov %vm4700_vm1 }
 0x18c   : > { %v1419_v51 = vpop.permute.xlu1 %1418  ;;  %v743_v46 = vpop.permute.xlu0 %742 }
 0x18d   : > { %v1621_v34 = vld [vmem:[#allocation2 + $0x118] sm:$0xff]  ;;  %v1428_v45 = vsel %vm3937_vm10, %v1419_v51, %v1406_v4  ;;  %v752_v28 = vsel %vm3937_vm10, %v743_v46, %v730_v40  ;;  %vm2069_vm10 = vcmp.gt.f32.partialorder %v2029_v63, 0.0 }
 0x18e   : > { %2640 = vmatprep.mubr.msk.bf16.mxu1 %vm4696_vm3, %v1621_v34  ;;  %1429 = vst [vmem:[#allocation2 + $0x120] sm:$0xff] %v1428_v45  ;;  %753 = vst [vmem:[#allocation2 + $0x80] sm:$0xff] %v752_v28 }
 0x18f   : > { %vm4705_vm3 = vmmov %vm4701_vm5 }
 0x190   : > { %v2839_v42 = vpop.eup %2838  ;;  %v639_v3 = vpop.permute.xlu1 %638  ;;  %v1620_v32 = vld [vmem:[#allocation2 + $0x110] sm:$0xff] }
 0x191   : > { %v618_v23 = vpop.permute.xlu0 %617  ;;  %v1600_v24 = vld [vmem:[#allocation2 + $0x70] sm:$0xff]  ;;  %v2841_v19 = vpop.eup %2840  ;;  %v2645_v16 = vadd.f32 -1.0, %v2839_v42  ;;  %v653_v5 = vsel %vm3985_vm11, %v639_v3, %v652_v56  ;;  %1951 = vmatmul.mubr.bf16.gmra.mrb[28].mxu1 %v1620_v32 }
 0x192   : > { %629 = vst.msk [vmem:[#allocation2 + $0x88] sm:$0xff] %vm4697_vm4, %v618_v23  ;;  %1871 = vmatmul.mubr.bf16.gmra.mrb[28].mxu0 %v1600_v24  ;;  %v2665_v52 = vadd.f32 -1.0, %v2841_v19  ;;  %654 = vst [vmem:[#allocation2 + $0x98] sm:$0x1] %v653_v5  ;;  %vm4706_vm4 = vcmask 654848  }
 0x193   : > { %v2843_v17 = vpop.eup %2842  ;;  %v2229_v39 = vsel %vm2069_vm10, %v2029_v63, %v2645_v16  ;;  %vm4707_vm10 = vmmov %vm4705_vm3 }
 0x194   : > { %v2845_v0 = vpop.eup %2844  ;;  %v2249_v43 = vsel %vm2089_vm0, %v2049_v60, %v2665_v52  ;;  %v2729_v37 = vpack.c.bf16 %v2229_v39, %v2229_v39  ;;  %v2646_v7 = vadd.f32 -1.0, %v2843_v17  ;;  %v1301_v15 = vpop.permute.xlu1 %1300  ;;  %vm4708_vm0 = vmmov %vm4706_vm4 }
 0x195   : > { %v792_v62 = vpop.permute.xlu0 %791  ;;  %v2749_v18 = vpack.c.bf16 %v2249_v43, %v2249_v43  ;;  %v2666_v27 = vadd.f32 -1.0, %v2845_v0  ;;  %1311 = vst.msk [vmem:[#allocation2 + $0x128] sm:$0xff] %vm4698_vm13, %v1301_v15  ;;  %vm4710_vm13 = vcmask 786048  }
 0x196   : > { %802 = vst.msk [vmem:[#allocation2 + $0x80] sm:$0xff] %vm4699_vm15, %v792_v62  ;;  %v2230_v14 = vsel %vm2070_vm8, %v2030_v10, %v2646_v7  ;;  %vm4709_vm8 = vmmov %vm4705_vm3 }
 0x197   : > { %2430 = vst.msk [vmem:[%s4297_s16] sm:$0xf] %vm2429_vm2, %v2729_v37  ;;  %2450 = vst.msk [vmem:[%s4297_s16 + $0x50] sm:$0xf] %vm2429_vm2, %v2749_v18  ;;  %v2730_v30 = vpack.c.bf16 %v2230_v14, %v2230_v14  ;;  %v2250_v31 = vsel %vm2090_vm6, %v4269_v2, %v2666_v27 }
 0x198   : > { %v2750_v25 = vpack.c.bf16 %v2250_v31, %v2250_v31  ;;  %v1468_v47 = vpop.permute.xlu1 %1467  ;;  %vm4711_vm6 = vmmov %vm4710_vm13 }
 0x199   : > { %v1321_v21 = vpop.permute.xlu0 %1320  ;;  %2431 = vst.msk [vmem:[%s4297_s16 + $0x4] sm:$0xf] %vm2429_vm2, %v2730_v30  ;;  %v677_v14 = vld [vmem:[#allocation2 + $0x98] sm:$0x1] }
 0x19a   : > { %1478 = vst.msk [vmem:[#allocation2 + $0x120] sm:$0xff] %vm4700_vm1, %v1468_v47  ;;  %v1332_v29 = vsel %vm3985_vm11, %v1321_v21, %v1331_v58  ;;  %vm4704_vm11 = vnez %v4598_v53  ;;  %vm4712_vm1 = vcmask 523264  }
 0x19b   : > { %2451 = vst.msk [vmem:[%s4297_s16 + $0x54] sm:$0xf] %vm2429_vm2, %v2750_v25  ;;  %1333 = vst [vmem:[#allocation2 + $0x138] sm:$0x1] %v1332_v29 }
 0x19c   : > { %v841_v55 = vpop.permute.xlu1 %840 }
 0x19d   : > { %v637_v48 = vpop.permute.xlu0 %636  ;;  %851 = vst.msk [vmem:[#allocation2 + $0x80] sm:$0xff] %vm4701_vm5, %v841_v55 }
 0x19e   : > { %649 = vst.msk [vmem:[#allocation2 + $0x88] sm:$0xff] %vm4702_vm7, %v637_v48 }
 0x19f   : > { %v1824_v63 = vpop.f32.mrb[4].mxu0 }
 0x1a0   : > { %v1319_v44 = vpop.permute.xlu1 %1318  ;;  %v1904_v8 = vpop.f32.mrb[4].mxu1  ;;  %v1984_v60 = vmul.f32 %v4252_v20, %v1824_v63 }
 0x1a1   : > { %1330 = vst.msk [vmem:[#allocation2 + $0x128] sm:$0xff] %vm4703_vm9, %v1319_v44  ;;  %v2004_v54 = vmul.f32 %v4252_v20, %v1904_v8  ;;  %v868_v35 = vpop.permute.xlu0 %867  ;;  %v1826_v50 = vpop.f32.mrb[5].mxu0 }
 0x1a2   : > { %v879_v61 = vsel %vm4704_vm11, %v868_v35, %v878_v36  ;;  %v2031_v33 = vadd.f32 %v4257_v59, %v1984_v60  ;;  %v1906_v1 = vpop.f32.mrb[5].mxu1  ;;  %v1827_v57 = vpop.f32.mrb[6].mxu0  ;;  %v1353_v15 = vld [vmem:[#allocation2 + $0x138] sm:$0x1] }
 0x1a3   : > { %v2051_v38 = vadd.f32 %v4257_v59, %v2004_v54  ;;  %880 = vst [vmem:[#allocation2 + $0x90] sm:$0x1] %v879_v61  ;;  %v1985_v10 = vmul.f32 %v4252_v20, %v1827_v57  ;;  %v1907_v2 = vpop.f32.mrb[6].mxu1  ;;  %v1829_v26 = vpop.f32.mrb[7].mxu0 }
 0x1a4   : > { %v2113_v22 = vmul.f32 1.442695, %v2031_v33  ;;  %v2005_v11 = vmul.f32 %v4252_v20, %v1907_v2  ;;  %v1909_v41 = vpop.f32.mrb[7].mxu1  ;;  %v1544_v13 = vpop.permute.xlu1 %1543  ;;  %vm2071_vm15 = vcmp.gt.f32.partialorder %v2031_v33, 0.0 }
 0x1a5   : > { %v2153_v6 = vmul.f32 1.442695, %v2051_v38  ;;  %v2032_v40 = vadd.f32 %v4257_v59, %v1985_v10  ;;  %v1555_v4 = vsel %vm4704_vm11, %v1544_v13, %v1554_v49  ;;  %v1517_v51 = vpop.permute.xlu0 %1516  ;;  %vm2091_vm5 = vcmp.gt.f32.partialorder %v2051_v38, 0.0  ;;  %vm4713_vm11 = vmmov %vm4712_vm1 }
 0x1a6   : > { %2846 = vpow2.f32 %v2113_v22  ;;  %v2052_v46 = vadd.f32 %v4257_v59, %v2005_v11  ;;  %1556 = vst [vmem:[#allocation2 + $0x130] sm:$0x1] %v1555_v4  ;;  %1527 = vst.msk [vmem:[#allocation2 + $0x120] sm:$0xff] %vm4705_vm3, %v1517_v51 }
 0x1a7   : > { %2848 = vpow2.f32 %v2153_v6  ;;  %v2115_v34 = vmul.f32 1.442695, %v2032_v40  ;;  %vm2072_vm7 = vcmp.gt.f32.partialorder %v2032_v40, 0.0  ;;  %vm4715_vm3 = vmmov %vm4712_vm1 }
 0x1a8   : > { %v2155_v45 = vmul.f32 1.442695, %v2052_v46  ;;  %v866_v28 = vpop.permute.xlu1 %865  ;;  %vm2092_vm9 = vcmp.gt.f32.partialorder %v2052_v46, 0.0 }
 0x1a9   : > { %2850 = vpow2.f32 %v2115_v34  ;;  %877 = vst.msk [vmem:[#allocation2 + $0x80] sm:$0xff] %vm4706_vm4, %v866_v28  ;;  %v662_v56 = vpop.permute.xlu0 %661 }
 0x1aa   : > { %2852 = vpow2.f32 %v2155_v45  ;;  %674 = vst.msk [vmem:[#allocation2 + $0x88] sm:$0xff] %vm4707_vm10, %v662_v56  ;;  %v907_v44 = vld [vmem:[#allocation2 + $0x90] sm:$0x1] }
 0x1ac   : > { %v1542_v53 = vpop.permute.xlu1 %1541 }
 0x1ad   : > { %1553 = vst.msk [vmem:[#allocation2 + $0x120] sm:$0xff] %vm4708_vm0, %v1542_v53  ;;  %v1341_v42 = vpop.permute.xlu0 %1340  ;;  %v1583_v55 = vld [vmem:[#allocation2 + $0x130] sm:$0x1] }
 0x1ae   : > { %1352 = vst.msk [vmem:[#allocation2 + $0x128] sm:$0xff] %vm4709_vm8, %v1341_v42 }
 0x1b0   : > { %v2847_v3 = vpop.eup %2846  ;;  %v1571_v23 = vpop.permute.xlu1 %1570 }
 0x1b1   : > { %v2849_v24 = vpop.eup %2848  ;;  %v2647_v32 = vadd.f32 -1.0, %v2847_v3  ;;  %1582 = vst.msk [vmem:[#allocation2 + $0x120] sm:$0xff] %vm4710_vm13, %v1571_v23  ;;  %v895_v19 = vpop.permute.xlu0 %894  ;;  %v1603_v16 = vld [vmem:[#allocation2 + $0x88] sm:$0xff] }
 0x1b2   : > { %v2667_v5 = vadd.f32 -1.0, %v2849_v24  ;;  %906 = vst.msk [vmem:[#allocation2 + $0x80] sm:$0xff] %vm4711_vm6, %v895_v19  ;;  %2631 = vmatprep.mubr.msk.bf16.mxu0 %vm4712_vm1, %v1603_v16 }
 0x1b3   : > { %v2851_v52 = vpop.eup %2850  ;;  %v2231_v17 = vsel %vm2071_vm15, %v2031_v33, %v2647_v32 }
 0x1b4   : > { %v2853_v39 = vpop.eup %2852  ;;  %v2251_v0 = vsel %vm2091_vm5, %v2051_v38, %v2667_v5  ;;  %v2731_v43 = vpack.c.bf16 %v2231_v17, %v2231_v17  ;;  %v2648_v37 = vadd.f32 -1.0, %v2851_v52  ;;  %v1343_v7 = vpop.permute.xlu1 %1342 }
 0x1b5   : > { %v2751_v62 = vpack.c.bf16 %v2251_v0, %v2251_v0  ;;  %v2668_v18 = vadd.f32 -1.0, %v2853_v39  ;;  %v1354_v27 = vsel %vm4065_vm12, %v1343_v7, %v1353_v15  ;;  %v664_v58 = vpop.permute.xlu0 %663  ;;  %v1623_v30 = vld [vmem:[#allocation2 + $0x128] sm:$0xff] }
 0x1b6   : > { %2432 = vst.msk [vmem:[%s4297_s16 + $0x8] sm:$0xf] %vm2429_vm2, %v2731_v43  ;;  %v2232_v31 = vsel %vm2072_vm7, %v2032_v40, %v2648_v37  ;;  %1355 = vst [vmem:[#allocation2 + $0x138] sm:$0x1] %v1354_v27  ;;  %v678_v25 = vsel %vm4065_vm12, %v664_v58, %v677_v14  ;;  %2641 = vmatprep.mubr.msk.bf16.mxu1 %vm4713_vm11, %v1623_v30 }
 0x1b7   : > { %2452 = vst.msk [vmem:[%s4297_s16 + $0x58] sm:$0xf] %vm2429_vm2, %v2751_v62  ;;  %v2732_v47 = vpack.c.bf16 %v2232_v31, %v2232_v31  ;;  %v2252_v21 = vsel %vm2092_vm9, %v2052_v46, %v2668_v18  ;;  %679 = vst [vmem:[#allocation2 + $0x98] sm:$0x1] %v678_v25 }
 0x1b8   : > { %v2752_v29 = vpack.c.bf16 %v2252_v21, %v2252_v21  ;;  %v1573_v48 = vpop.permute.xlu1 %1572  ;;  %v1622_v36 = vld [vmem:[#allocation2 + $0x120] sm:$0xff]  ;;  %vm4714_vm12 = vmmov %vm4712_vm1 }
 0x1b9   : > { %2433 = vst.msk [vmem:[%s4297_s16 + $0xc] sm:$0xf] %vm2429_vm2, %v2732_v47  ;;  %v1584_v63 = vsel %vm4086_vm14, %v1573_v48, %v1583_v55  ;;  %v897_v9 = vpop.permute.xlu0 %896  ;;  %v1602_v8 = vld [vmem:[#allocation2 + $0x80] sm:$0xff]  ;;  %1959 = vmatmul.mubr.bf16.gmra.mrb[32].mxu1 %v1622_v36 }
 0x1ba   : > { %2453 = vst.msk [vmem:[%s4297_s16 + $0x5c] sm:$0xf] %vm2429_vm2, %v2752_v29  ;;  %1585 = vst [vmem:[#allocation2 + $0x130] sm:$0x1] %v1584_v63  ;;  %v908_v60 = vsel %vm4086_vm14, %v897_v9, %v907_v44  ;;  %1879 = vmatmul.mubr.bf16.gmra.mrb[32].mxu0 %v1602_v8 }
 0x1bb   : > { %909 = vst [vmem:[#allocation2 + $0x90] sm:$0x1] %v908_v60 }
 0x1bc   : > { %v1832_v54 = vpop.f32.mrb[8].mxu0 }
 0x1bd   : > { %v1986_v35 = vmul.f32 %v4252_v20, %v1832_v54  ;;  %v1834_v50 = vpop.f32.mrb[9].mxu0  ;;  %v1625_v61 = vld [vmem:[#allocation2 + $0x138] sm:$0xff] }
 0x1be   : > { %v1835_v33 = vpop.f32.mrb[10].mxu0  ;;  %v1605_v1 = vld [vmem:[#allocation2 + $0x98] sm:$0xff]  ;;  %2642 = vmatprep.mubr.msk.bf16.mxu1 %vm4714_vm12, %v1625_v61 }
 0x1bf   : > { %v2033_v57 = vadd.f32 %v4257_v59, %v1986_v35  ;;  %v1987_v49 = vmul.f32 %v4252_v20, %v1835_v33  ;;  %2632 = vmatprep.mubr.msk.bf16.mxu0 %vm4715_vm3, %v1605_v1  ;;  %v1837_v38 = vpop.f32.mrb[11].mxu0  ;;  %v1912_v12 = vpop.f32.mrb[8].mxu1 }
 0x1c0   : > { %v2006_v10 = vmul.f32 %v4252_v20, %v1912_v12  ;;  %v1914_v2 = vpop.f32.mrb[9].mxu1 }
 0x1c1   : > { %v2117_v26 = vmul.f32 1.442695, %v2033_v57  ;;  %v2034_v22 = vadd.f32 %v4257_v59, %v1987_v49  ;;  %v1915_v11 = vpop.f32.mrb[10].mxu1  ;;  %v1624_v41 = vld [vmem:[#allocation2 + $0x130] sm:$0xff]  ;;  %vm2073_vm14 = vcmp.gt.f32.partialorder %v2033_v57, 0.0 }
 0x1c2   : > { %v2053_v13 = vadd.f32 %v4257_v59, %v2006_v10  ;;  %v1604_v6 = vld [vmem:[#allocation2 + $0x90] sm:$0xff]  ;;  %v2007_v40 = vmul.f32 %v4252_v20, %v1915_v11  ;;  %1967 = vmatmul.mubr.bf16.gmra.mrb[36].mxu1 %v1624_v41  ;;  %v1917_v4 = vpop.f32.mrb[11].mxu1 }
 0x1c3   : > { %2854 = vpow2.f32 %v2117_v26  ;;  %v2119_v51 = vmul.f32 1.442695, %v2034_v22  ;;  %1887 = vmatmul.mubr.bf16.gmra.mrb[36].mxu0 %v1604_v6  ;;  %vm2074_vm4 = vcmp.gt.f32.partialorder %v2034_v22, 0.0 }
 0x1c4   : > { %v2157_v46 = vmul.f32 1.442695, %v2053_v13  ;;  %v2054_v34 = vadd.f32 %v4257_v59, %v2007_v40  ;;  %vm2093_vm10 = vcmp.gt.f32.partialorder %v2053_v13, 0.0 }
 0x1c5   : > { %2856 = vpow2.f32 %v2119_v51 }
 0x1c6   : > { %2858 = vpow2.f32 %v2157_v46  ;;  %v2159_v45 = vmul.f32 1.442695, %v2054_v34  ;;  %vm2094_vm0 = vcmp.gt.f32.partialorder %v2054_v34, 0.0 }
 0x1c8   : > { %2860 = vpow2.f32 %v2159_v45 }
 0x1cd   : > { %v2855_v28 = vpop.eup %2854 }
 0x1ce   : > { %v2649_v56 = vadd.f32 -1.0, %v2855_v28 }
 0x1cf   : > { %v2857_v53 = vpop.eup %2856 }
 0x1d0   : > { %v2859_v42 = vpop.eup %2858  ;;  %v2233_v3 = vsel %vm2073_vm14, %v2033_v57, %v2649_v56  ;;  %v2650_v23 = vadd.f32 -1.0, %v2857_v53 }
 0x1d1   : > { %v2733_v24 = vpack.c.bf16 %v2233_v3, %v2233_v3  ;;  %v2669_v32 = vadd.f32 -1.0, %v2859_v42 }
 0x1d2   : > { %v2861_v19 = vpop.eup %2860  ;;  %v2234_v16 = vsel %vm2074_vm4, %v2034_v22, %v2650_v23 }
 0x1d3   : > { %2434 = vst.msk [vmem:[%s4297_s16 + $0x10] sm:$0xf] %vm2429_vm2, %v2733_v24  ;;  %v2734_v5 = vpack.c.bf16 %v2234_v16, %v2234_v16  ;;  %v2253_v52 = vsel %vm2093_vm10, %v2053_v13, %v2669_v32  ;;  %v2670_v17 = vadd.f32 -1.0, %v2861_v19 }
 0x1d4   : > { %v2753_v39 = vpack.c.bf16 %v2253_v52, %v2253_v52 }
 0x1d5   : > { %2435 = vst.msk [vmem:[%s4297_s16 + $0x14] sm:$0xf] %vm2429_vm2, %v2734_v5  ;;  %v2254_v0 = vsel %vm2094_vm0, %v2054_v34, %v2670_v17 }
 0x1d6   : > { %2454 = vst.msk [vmem:[%s4297_s16 + $0x60] sm:$0xf] %vm2429_vm2, %v2753_v39  ;;  %v2754_v43 = vpack.c.bf16 %v2254_v0, %v2254_v0 }
 0x1d8   : > { %2455 = vst.msk [vmem:[%s4297_s16 + $0x64] sm:$0xf] %vm2429_vm2, %v2754_v43 }
 0x1e8   : > { %v1840_v37 = vpop.f32.mrb[12].mxu0 }
 0x1e9   : > { %v1988_v7 = vmul.f32 %v4252_v20, %v1840_v37  ;;  %v1842_v15 = vpop.f32.mrb[13].mxu0 }
 0x1ea   : > { %v1843_v62 = vpop.f32.mrb[14].mxu0 }
 0x1eb   : > { %v2035_v18 = vadd.f32 %v4257_v59, %v1988_v7  ;;  %v1989_v27 = vmul.f32 %v4252_v20, %v1843_v62  ;;  %v1845_v14 = vpop.f32.mrb[15].mxu0  ;;  %v1920_v58 = vpop.f32.mrb[12].mxu1 }
 0x1ec   : > { %v2008_v30 = vmul.f32 %v4252_v20, %v1920_v58  ;;  %v1922_v31 = vpop.f32.mrb[13].mxu1 }
 0x1ed   : > { %v2121_v25 = vmul.f32 1.442695, %v2035_v18  ;;  %v2036_v47 = vadd.f32 %v4257_v59, %v1989_v27  ;;  %v1923_v21 = vpop.f32.mrb[14].mxu1  ;;  %vm2075_vm8 = vcmp.gt.f32.partialorder %v2035_v18, 0.0 }
 0x1ee   : > { %v2055_v29 = vadd.f32 %v4257_v59, %v2008_v30  ;;  %v2009_v55 = vmul.f32 %v4252_v20, %v1923_v21  ;;  %v1925_v48 = vpop.f32.mrb[15].mxu1 }
 0x1ef   : > { %2862 = vpow2.f32 %v2121_v25  ;;  %v2123_v36 = vmul.f32 1.442695, %v2036_v47  ;;  %vm2076_vm13 = vcmp.gt.f32.partialorder %v2036_v47, 0.0 }
 0x1f0   : > { %v2161_v63 = vmul.f32 1.442695, %v2055_v29  ;;  %v2056_v44 = vadd.f32 %v4257_v59, %v2009_v55  ;;  %vm2095_vm15 = vcmp.gt.f32.partialorder %v2055_v29, 0.0 }
 0x1f1   : > { %2864 = vpow2.f32 %v2123_v36 }
 0x1f2   : > { %2866 = vpow2.f32 %v2161_v63  ;;  %v2163_v9 = vmul.f32 1.442695, %v2056_v44  ;;  %vm2096_vm6 = vcmp.gt.f32.partialorder %v2056_v44, 0.0 }
 0x1f4   : > { %2868 = vpow2.f32 %v2163_v9  ;;  %v1848_v8 = vpop.f32.mrb[16].mxu0 }
 0x1f5   : > { %v1990_v60 = vmul.f32 %v4252_v20, %v1848_v8  ;;  %v1928_v54 = vpop.f32.mrb[16].mxu1  ;;  %v1850_v35 = vpop.f32.mrb[17].mxu0 }
 0x1f6   : > { %v2010_v50 = vmul.f32 %v4252_v20, %v1928_v54  ;;  %v1930_v61 = vpop.f32.mrb[17].mxu1  ;;  %v1851_v33 = vpop.f32.mrb[18].mxu0 }
 0x1f7   : > { %v2037_v1 = vadd.f32 %v4257_v59, %v1990_v60  ;;  %v1991_v57 = vmul.f32 %v4252_v20, %v1851_v33  ;;  %v1931_v49 = vpop.f32.mrb[18].mxu1  ;;  %v1853_v38 = vpop.f32.mrb[19].mxu0 }
 0x1f8   : > { %v2057_v12 = vadd.f32 %v4257_v59, %v2010_v50  ;;  %v2011_v10 = vmul.f32 %v4252_v20, %v1931_v49  ;;  %v1933_v2 = vpop.f32.mrb[19].mxu1 }
 0x1f9   : > { %v2863_v26 = vpop.eup %2862  ;;  %v2125_v22 = vmul.f32 1.442695, %v2037_v1  ;;  %v2038_v11 = vadd.f32 %v4257_v59, %v1991_v57  ;;  %vm2077_vm1 = vcmp.gt.f32.partialorder %v2037_v1, 0.0 }
 0x1fa   : > { %v2651_v41 = vadd.f32 -1.0, %v2863_v26  ;;  %v2165_v13 = vmul.f32 1.442695, %v2057_v12  ;;  %v2058_v6 = vadd.f32 %v4257_v59, %v2011_v10  ;;  %vm2097_vm5 = vcmp.gt.f32.partialorder %v2057_v12, 0.0 }
 0x1fb   : > { %v2865_v40 = vpop.eup %2864  ;;  %2870 = vpow2.f32 %v2125_v22  ;;  %v2127_v4 = vmul.f32 1.442695, %v2038_v11  ;;  %vm2078_vm7 = vcmp.gt.f32.partialorder %v2038_v11, 0.0 }
 0x1fc   : > { %v2867_v51 = vpop.eup %2866  ;;  %v2235_v46 = vsel %vm2075_vm8, %v2035_v18, %v2651_v41  ;;  %v2652_v34 = vadd.f32 -1.0, %v2865_v40  ;;  %2872 = vpow2.f32 %v2165_v13  ;;  %v2167_v56 = vmul.f32 1.442695, %v2058_v6 }
 0x1fd   : > { %v2735_v45 = vpack.c.bf16 %v2235_v46, %v2235_v46  ;;  %v2671_v28 = vadd.f32 -1.0, %v2867_v51  ;;  %2874 = vpow2.f32 %v2127_v4  ;;  %vm2098_vm9 = vcmp.gt.f32.partialorder %v2058_v6, 0.0 }
 0x1fe   : > { %v2869_v53 = vpop.eup %2868  ;;  %v2236_v42 = vsel %vm2076_vm13, %v2036_v47, %v2652_v34  ;;  %2876 = vpow2.f32 %v2167_v56 }
 0x1ff   : > { %2436 = vst.msk [vmem:[%s4297_s16 + $0x18] sm:$0xf] %vm2429_vm2, %v2735_v45  ;;  %v2736_v3 = vpack.c.bf16 %v2236_v42, %v2236_v42  ;;  %v2255_v23 = vsel %vm2095_vm15, %v2055_v29, %v2671_v28  ;;  %v2672_v24 = vadd.f32 -1.0, %v2869_v53 }
 0x200   : > { %v2755_v32 = vpack.c.bf16 %v2255_v23, %v2255_v23 }
 0x201   : > { %2437 = vst.msk [vmem:[%s4297_s16 + $0x1c] sm:$0xf] %vm2429_vm2, %v2736_v3  ;;  %v2256_v19 = vsel %vm2096_vm6, %v2056_v44, %v2672_v24 }
 0x202   : > { %2456 = vst.msk [vmem:[%s4297_s16 + $0x68] sm:$0xf] %vm2429_vm2, %v2755_v32  ;;  %v2756_v16 = vpack.c.bf16 %v2256_v19, %v2256_v19 }
 0x204   : > { %2457 = vst.msk [vmem:[%s4297_s16 + $0x6c] sm:$0xf] %vm2429_vm2, %v2756_v16 }
 0x205   : > { %v2871_v5 = vpop.eup %2870 }
 0x206   : > { %v2873_v52 = vpop.eup %2872  ;;  %v2653_v17 = vadd.f32 -1.0, %v2871_v5 }
 0x207   : > { %v2875_v39 = vpop.eup %2874  ;;  %v2673_v0 = vadd.f32 -1.0, %v2873_v52 }
 0x208   : > { %v2237_v43 = vsel %vm2077_vm1, %v2037_v1, %v2653_v17  ;;  %v2654_v37 = vadd.f32 -1.0, %v2875_v39  ;;  %v2877_v7 = vpop.eup %2876 }
 0x209   : > { %v2737_v15 = vpack.c.bf16 %v2237_v43, %v2237_v43  ;;  %v2257_v62 = vsel %vm2097_vm5, %v2057_v12, %v2673_v0  ;;  %v2674_v14 = vadd.f32 -1.0, %v2877_v7 }
 0x20a   : > { %v2757_v18 = vpack.c.bf16 %v2257_v62, %v2257_v62  ;;  %v2238_v27 = vsel %vm2078_vm7, %v2038_v11, %v2654_v37 }
 0x20b   : > { %2438 = vst.msk [vmem:[%s4297_s16 + $0x20] sm:$0xf] %vm2429_vm2, %v2737_v15  ;;  %v2738_v58 = vpack.c.bf16 %v2238_v27, %v2238_v27  ;;  %v2258_v30 = vsel %vm2098_vm9, %v2058_v6, %v2674_v14 }
 0x20c   : > { %2458 = vst.msk [vmem:[%s4297_s16 + $0x70] sm:$0xf] %vm2429_vm2, %v2757_v18  ;;  %v2758_v31 = vpack.c.bf16 %v2258_v30, %v2258_v30 }
 0x20d   : > { %2439 = vst.msk [vmem:[%s4297_s16 + $0x24] sm:$0xf] %vm2429_vm2, %v2738_v58 }
 0x20e   : > { %2459 = vst.msk [vmem:[%s4297_s16 + $0x74] sm:$0xf] %vm2429_vm2, %v2758_v31 }
 0x20f   : > { %v1856_v25 = vpop.f32.mrb[20].mxu0 }
 0x210   : > { %v1992_v47 = vmul.f32 %v4252_v20, %v1856_v25  ;;  %v1936_v21 = vpop.f32.mrb[20].mxu1  ;;  %v1858_v29 = vpop.f32.mrb[21].mxu0 }
 0x211   : > { %v2012_v55 = vmul.f32 %v4252_v20, %v1936_v21  ;;  %v1938_v48 = vpop.f32.mrb[21].mxu1  ;;  %v1859_v36 = vpop.f32.mrb[22].mxu0 }
 0x212   : > { %v2039_v63 = vadd.f32 %v4257_v59, %v1992_v47  ;;  %v1993_v44 = vmul.f32 %v4252_v20, %v1859_v36  ;;  %v1939_v9 = vpop.f32.mrb[22].mxu1  ;;  %v1861_v8 = vpop.f32.mrb[23].mxu0 }
 0x213   : > { %v2059_v60 = vadd.f32 %v4257_v59, %v2012_v55  ;;  %v2013_v54 = vmul.f32 %v4252_v20, %v1939_v9  ;;  %v1941_v35 = vpop.f32.mrb[23].mxu1 }
 0x214   : > { %v2129_v50 = vmul.f32 1.442695, %v2039_v63  ;;  %v2040_v61 = vadd.f32 %v4257_v59, %v1993_v44  ;;  %vm2079_vm11 = vcmp.gt.f32.partialorder %v2039_v63, 0.0 }
 0x215   : > { %v2169_v33 = vmul.f32 1.442695, %v2059_v60  ;;  %v2060_v1 = vadd.f32 %v4257_v59, %v2013_v54  ;;  %vm2099_vm12 = vcmp.gt.f32.partialorder %v2059_v60, 0.0 }
 0x216   : > { %2878 = vpow2.f32 %v2129_v50  ;;  %v2131_v57 = vmul.f32 1.442695, %v2040_v61  ;;  %vm2080_vm3 = vcmp.gt.f32.partialorder %v2040_v61, 0.0 }
 0x217   : > { %2880 = vpow2.f32 %v2169_v33  ;;  %v2171_v49 = vmul.f32 1.442695, %v2060_v1  ;;  %vm2100_vm14 = vcmp.gt.f32.partialorder %v2060_v1, 0.0 }
 0x218   : > { %2882 = vpow2.f32 %v2131_v57 }
 0x219   : > { %2884 = vpow2.f32 %v2171_v49 }
 0x220   : > { %v2879_v38 = vpop.eup %2878 }
 0x221   : > { %v2881_v12 = vpop.eup %2880  ;;  %v2655_v10 = vadd.f32 -1.0, %v2879_v38 }
 0x222   : > { %v2883_v2 = vpop.eup %2882  ;;  %v2675_v26 = vadd.f32 -1.0, %v2881_v12 }
 0x223   : > { %v2885_v22 = vpop.eup %2884  ;;  %v2239_v11 = vsel %vm2079_vm11, %v2039_v63, %v2655_v10  ;;  %v2656_v41 = vadd.f32 -1.0, %v2883_v2 }
 0x224   : > { %v2739_v13 = vpack.c.bf16 %v2239_v11, %v2239_v11  ;;  %v2259_v6 = vsel %vm2099_vm12, %v2059_v60, %v2675_v26  ;;  %v2676_v40 = vadd.f32 -1.0, %v2885_v22 }
 0x225   : > { %v2759_v4 = vpack.c.bf16 %v2259_v6, %v2259_v6  ;;  %v2240_v51 = vsel %vm2080_vm3, %v2040_v61, %v2656_v41 }
 0x226   : > { %2440 = vst.msk [vmem:[%s4297_s16 + $0x28] sm:$0xf] %vm2429_vm2, %v2739_v13  ;;  %v2740_v46 = vpack.c.bf16 %v2240_v51, %v2240_v51  ;;  %v2260_v34 = vsel %vm2100_vm14, %v2060_v1, %v2676_v40 }
 0x227   : > { %2460 = vst.msk [vmem:[%s4297_s16 + $0x78] sm:$0xf] %vm2429_vm2, %v2759_v4  ;;  %v2760_v45 = vpack.c.bf16 %v2260_v34, %v2260_v34 }
 0x228   : > { %2441 = vst.msk [vmem:[%s4297_s16 + $0x2c] sm:$0xf] %vm2429_vm2, %v2740_v46 }
 0x229   : > { %2461 = vst.msk [vmem:[%s4297_s16 + $0x7c] sm:$0xf] %vm2429_vm2, %v2760_v45 }
 0x23b   : > { %v1864_v28 = vpop.f32.mrb[24].mxu0 }
 0x23c   : > { %v1994_v56 = vmul.f32 %v4252_v20, %v1864_v28  ;;  %v1944_v53 = vpop.f32.mrb[24].mxu1  ;;  %v1866_v42 = vpop.f32.mrb[25].mxu0 }
 0x23d   : > { %v2014_v3 = vmul.f32 %v4252_v20, %v1944_v53  ;;  %v1946_v23 = vpop.f32.mrb[25].mxu1  ;;  %v1867_v24 = vpop.f32.mrb[26].mxu0 }
 0x23e   : > { %v2041_v32 = vadd.f32 %v4257_v59, %v1994_v56  ;;  %v1995_v19 = vmul.f32 %v4252_v20, %v1867_v24  ;;  %v1947_v16 = vpop.f32.mrb[26].mxu1  ;;  %v1869_v5 = vpop.f32.mrb[27].mxu0 }
 0x23f   : > { %v2061_v52 = vadd.f32 %v4257_v59, %v2014_v3  ;;  %v2015_v17 = vmul.f32 %v4252_v20, %v1947_v16  ;;  %v1949_v39 = vpop.f32.mrb[27].mxu1 }
 0x240   : > { %v2133_v0 = vmul.f32 1.442695, %v2041_v32  ;;  %v2042_v43 = vadd.f32 %v4257_v59, %v1995_v19  ;;  %vm2081_vm4 = vcmp.gt.f32.partialorder %v2041_v32, 0.0 }
 0x241   : > { %v2173_v37 = vmul.f32 1.442695, %v2061_v52  ;;  %v2062_v7 = vadd.f32 %v4257_v59, %v2015_v17  ;;  %vm2101_vm10 = vcmp.gt.f32.partialorder %v2061_v52, 0.0 }
 0x242   : > { %2886 = vpow2.f32 %v2133_v0  ;;  %v2135_v15 = vmul.f32 1.442695, %v2042_v43  ;;  %vm2082_vm0 = vcmp.gt.f32.partialorder %v2042_v43, 0.0 }
 0x243   : > { %2888 = vpow2.f32 %v2173_v37  ;;  %v2175_v62 = vmul.f32 1.442695, %v2062_v7  ;;  %vm2102_vm8 = vcmp.gt.f32.partialorder %v2062_v7, 0.0 }
 0x244   : > { %2890 = vpow2.f32 %v2135_v15 }
 0x245   : > { %2892 = vpow2.f32 %v2175_v62 }
 0x24c   : > { %v2887_v18 = vpop.eup %2886 }
 0x24d   : > { %v2889_v27 = vpop.eup %2888  ;;  %v2657_v14 = vadd.f32 -1.0, %v2887_v18 }
 0x24e   : > { %v2891_v58 = vpop.eup %2890  ;;  %v2677_v30 = vadd.f32 -1.0, %v2889_v27 }
 0x24f   : > { %v2893_v31 = vpop.eup %2892  ;;  %v2241_v25 = vsel %vm2081_vm4, %v2041_v32, %v2657_v14  ;;  %v2658_v47 = vadd.f32 -1.0, %v2891_v58 }
 0x250   : > { %v2741_v21 = vpack.c.bf16 %v2241_v25, %v2241_v25  ;;  %v2261_v29 = vsel %vm2101_vm10, %v2061_v52, %v2677_v30  ;;  %v2678_v55 = vadd.f32 -1.0, %v2893_v31 }
 0x251   : > { %v2761_v48 = vpack.c.bf16 %v2261_v29, %v2261_v29  ;;  %v2242_v36 = vsel %vm2082_vm0, %v2042_v43, %v2658_v47 }
 0x252   : > { %2442 = vst.msk [vmem:[%s4297_s16 + $0x30] sm:$0xf] %vm2429_vm2, %v2741_v21  ;;  %v2742_v63 = vpack.c.bf16 %v2242_v36, %v2242_v36  ;;  %v2262_v44 = vsel %vm2102_vm8, %v2062_v7, %v2678_v55  ;;  %v2920_v36 = vld [vmem:[%s4488_s3] ss:$0 sm:$0xff] }
 0x253   : > { %2462 = vst.msk [vmem:[%s4297_s16 + $0x80] sm:$0xf] %vm2429_vm2, %v2761_v48  ;;  %v2762_v9 = vpack.c.bf16 %v2262_v44, %v2262_v44 }
 0x254   : > { %2443 = vst.msk [vmem:[%s4297_s16 + $0x34] sm:$0xf] %vm2429_vm2, %v2742_v63 }
 0x255   : > { %2463 = vst.msk [vmem:[%s4297_s16 + $0x84] sm:$0xf] %vm2429_vm2, %v2762_v9 }
 0x264   : > { %v1952_v60 = vpop.f32.mrb[28].mxu1 }
 0x265   : > { %v1872_v8 = vpop.f32.mrb[28].mxu0  ;;  %v2016_v35 = vmul.f32 %v4252_v20, %v1952_v60  ;;  %v1954_v61 = vpop.f32.mrb[29].mxu1 }
 0x266   : > { %v1996_v54 = vmul.f32 %v4252_v20, %v1872_v8  ;;  %v1874_v50 = vpop.f32.mrb[29].mxu0  ;;  %v1955_v1 = vpop.f32.mrb[30].mxu1 }
 0x267   : > { %v1875_v33 = vpop.f32.mrb[30].mxu0  ;;  %v2063_v49 = vadd.f32 %v4257_v59, %v2016_v35  ;;  %v2017_v12 = vmul.f32 %v4252_v20, %v1955_v1  ;;  %v1957_v2 = vpop.f32.mrb[31].mxu1 }
 0x268   : > { %v2043_v57 = vadd.f32 %v4257_v59, %v1996_v54  ;;  %v1997_v38 = vmul.f32 %v4252_v20, %v1875_v33  ;;  %v1877_v10 = vpop.f32.mrb[31].mxu0 }
 0x269   : > { %v2177_v22 = vmul.f32 1.442695, %v2063_v49  ;;  %v2064_v41 = vadd.f32 %v4257_v59, %v2017_v12  ;;  %vm2103_vm15 = vcmp.gt.f32.partialorder %v2063_v49, 0.0 }
 0x26a   : > { %v2137_v26 = vmul.f32 1.442695, %v2043_v57  ;;  %v2044_v11 = vadd.f32 %v4257_v59, %v1997_v38  ;;  %vm2083_vm13 = vcmp.gt.f32.partialorder %v2043_v57, 0.0 }
 0x26b   : > { %v2179_v6 = vmul.f32 1.442695, %v2064_v41  ;;  %vm2104_vm1 = vcmp.gt.f32.partialorder %v2064_v41, 0.0 }
 0x26c   : > { %2894 = vpow2.f32 %v2137_v26  ;;  %v2139_v13 = vmul.f32 1.442695, %v2044_v11  ;;  %vm2084_vm6 = vcmp.gt.f32.partialorder %v2044_v11, 0.0 }
 0x26d   : > { %2896 = vpow2.f32 %v2177_v22 }
 0x26e   : > { %2898 = vpow2.f32 %v2139_v13 }
 0x26f   : > { %2900 = vpow2.f32 %v2179_v6 }
 0x276   : > { %v2895_v40 = vpop.eup %2894 }
 0x277   : > { %v2897_v4 = vpop.eup %2896  ;;  %v2659_v51 = vadd.f32 -1.0, %v2895_v40 }
 0x278   : > { %v2679_v46 = vadd.f32 -1.0, %v2897_v4  ;;  %v2899_v34 = vpop.eup %2898 }
 0x279   : > { %v2243_v45 = vsel %vm2083_vm13, %v2043_v57, %v2659_v51  ;;  %v2901_v28 = vpop.eup %2900  ;;  %v2660_v42 = vadd.f32 -1.0, %v2899_v34 }
 0x27a   : > { %v2743_v56 = vpack.c.bf16 %v2243_v45, %v2243_v45  ;;  %v2263_v53 = vsel %vm2103_vm15, %v2063_v49, %v2679_v46  ;;  %v2680_v23 = vadd.f32 -1.0, %v2901_v28 }
 0x27b   : > { %v2763_v3 = vpack.c.bf16 %v2263_v53, %v2263_v53  ;;  %v2244_v24 = vsel %vm2084_vm6, %v2044_v11, %v2660_v42 }
 0x27c   : > { %2444 = vst.msk [vmem:[%s4297_s16 + $0x38] sm:$0xf] %vm2429_vm2, %v2743_v56  ;;  %v2744_v32 = vpack.c.bf16 %v2244_v24, %v2244_v24  ;;  %v2264_v19 = vsel %vm2104_vm1, %v2064_v41, %v2680_v23 }
 0x27d   : > { %2464 = vst.msk [vmem:[%s4297_s16 + $0x88] sm:$0xf] %vm2429_vm2, %v2763_v3  ;;  %v2764_v16 = vpack.c.bf16 %v2264_v19, %v2264_v19 }
 0x27e   : > { %2445 = vst.msk [vmem:[%s4297_s16 + $0x3c] sm:$0xf] %vm2429_vm2, %v2744_v32 }
 0x27f   : > { %2465 = vst.msk [vmem:[%s4297_s16 + $0x8c] sm:$0xf] %vm2429_vm2, %v2764_v16 }
 0x28c   : > { %v1960_v5 = vpop.f32.mrb[32].mxu1 }
 0x28d   : > { %v1880_v52 = vpop.f32.mrb[32].mxu0  ;;  %v2018_v17 = vmul.f32 %v4252_v20, %v1960_v5  ;;  %v1962_v39 = vpop.f32.mrb[33].mxu1 }
 0x28e   : > { %v1998_v0 = vmul.f32 %v4252_v20, %v1880_v52  ;;  %v1882_v43 = vpop.f32.mrb[33].mxu0  ;;  %v1963_v37 = vpop.f32.mrb[34].mxu1 }
 0x28f   : > { %v2065_v7 = vadd.f32 %v4257_v59, %v2018_v17  ;;  %v1883_v15 = vpop.f32.mrb[34].mxu0  ;;  %v2019_v62 = vmul.f32 %v4252_v20, %v1963_v37  ;;  %v1965_v18 = vpop.f32.mrb[35].mxu1 }
 0x290   : > { %v2045_v27 = vadd.f32 %v4257_v59, %v1998_v0  ;;  %v1999_v14 = vmul.f32 %v4252_v20, %v1883_v15  ;;  %v1885_v58 = vpop.f32.mrb[35].mxu0 }
 0x291   : > { %v2181_v30 = vmul.f32 1.442695, %v2065_v7  ;;  %v2066_v31 = vadd.f32 %v4257_v59, %v2019_v62  ;;  %vm2105_vm5 = vcmp.gt.f32.partialorder %v2065_v7, 0.0 }
 0x292   : > { %v2141_v25 = vmul.f32 1.442695, %v2045_v27  ;;  %v2046_v47 = vadd.f32 %v4257_v59, %v1999_v14  ;;  %v2921_v59 = vld [vmem:[%s4489_s4] ss:$0 sm:$0xff]  ;;  %vm2085_vm7 = vcmp.gt.f32.partialorder %v2045_v27, 0.0 }
 0x293   : > { %2902 = vpow2.f32 %v2181_v30  ;;  %v2183_v21 = vmul.f32 1.442695, %v2066_v31  ;;  %vm2106_vm9 = vcmp.gt.f32.partialorder %v2066_v31, 0.0 }
 0x294   : > { %2904 = vpow2.f32 %v2141_v25  ;;  %v2143_v29 = vmul.f32 1.442695, %v2046_v47  ;;  %vm2086_vm11 = vcmp.gt.f32.partialorder %v2046_v47, 0.0 }
 0x295   : > { %2906 = vpow2.f32 %v2183_v21  ;;  %v1968_v55 = vpop.f32.mrb[36].mxu1 }
 0x296   : > { %2908 = vpow2.f32 %v2143_v29  ;;  %v1888_v48 = vpop.f32.mrb[36].mxu0  ;;  %v2020_v20 = vmul.f32 %v2920_v36, %v1968_v55  ;;  %v1970_v63 = vpop.f32.mrb[37].mxu1 }
 0x297   : > { %v2000_v44 = vmul.f32 %v2920_v36, %v1888_v48  ;;  %v1890_v9 = vpop.f32.mrb[37].mxu0  ;;  %v1971_v8 = vpop.f32.mrb[38].mxu1 }
 0x298   : > { %v2067_v60 = vadd.f32 %v2921_v59, %v2020_v20  ;;  %v1891_v54 = vpop.f32.mrb[38].mxu0  ;;  %v2021_v35 = vmul.f32 %v2920_v36, %v1971_v8  ;;  %v1973_v50 = vpop.f32.mrb[39].mxu1 }
 0x299   : > { %v2047_v61 = vadd.f32 %v2921_v59, %v2000_v44  ;;  %v2001_v33 = vmul.f32 %v2920_v36, %v1891_v54  ;;  %v1893_v1 = vpop.f32.mrb[39].mxu0 }
 0x29a   : > { %v2185_v57 = vmul.f32 1.442695, %v2067_v60  ;;  %v2068_v49 = vadd.f32 %v2921_v59, %v2021_v35  ;;  %vm2107_vm12 = vcmp.gt.f32.partialorder %v2067_v60, 0.0 }
 0x29b   : > { %v2145_v38 = vmul.f32 1.442695, %v2047_v61  ;;  %v2048_v12 = vadd.f32 %v2921_v59, %v2001_v33  ;;  %vm2087_vm3 = vcmp.gt.f32.partialorder %v2047_v61, 0.0 }
 0x29c   : > { %2910 = vpow2.f32 %v2185_v57  ;;  %v2187_v10 = vmul.f32 1.442695, %v2068_v49  ;;  %vm2108_vm14 = vcmp.gt.f32.partialorder %v2068_v49, 0.0 }
 0x29d   : > { %v2903_v2 = vpop.eup %2902  ;;  %2912 = vpow2.f32 %v2145_v38  ;;  %v2147_v26 = vmul.f32 1.442695, %v2048_v12  ;;  %vm2088_vm4 = vcmp.gt.f32.partialorder %v2048_v12, 0.0 }
 0x29e   : > { %v2905_v22 = vpop.eup %2904  ;;  %v2681_v11 = vadd.f32 -1.0, %v2903_v2  ;;  %2914 = vpow2.f32 %v2187_v10 }
 0x29f   : > { %v2907_v41 = vpop.eup %2906  ;;  %v2661_v13 = vadd.f32 -1.0, %v2905_v22  ;;  %2916 = vpow2.f32 %v2147_v26 }
 0x2a0   : > { %v2909_v6 = vpop.eup %2908  ;;  %v2265_v40 = vsel %vm2105_vm5, %v2065_v7, %v2681_v11  ;;  %v2682_v4 = vadd.f32 -1.0, %v2907_v41 }
 0x2a1   : > { %v2245_v51 = vsel %vm2085_vm7, %v2045_v27, %v2661_v13  ;;  %v2765_v46 = vpack.c.bf16 %v2265_v40, %v2265_v40  ;;  %v2662_v34 = vadd.f32 -1.0, %v2909_v6 }
 0x2a2   : > { %v2745_v45 = vpack.c.bf16 %v2245_v51, %v2245_v51  ;;  %v2266_v28 = vsel %vm2106_vm9, %v2066_v31, %v2682_v4 }
 0x2a3   : > { %2466 = vst.msk [vmem:[%s4297_s16 + $0x90] sm:$0xf] %vm2429_vm2, %v2765_v46  ;;  %v2246_v56 = vsel %vm2086_vm11, %v2046_v47, %v2662_v34  ;;  %v2766_v53 = vpack.c.bf16 %v2266_v28, %v2266_v28 }
 0x2a4   : > { %2446 = vst.msk [vmem:[%s4297_s16 + $0x40] sm:$0xf] %vm2429_vm2, %v2745_v45  ;;  %v2746_v42 = vpack.c.bf16 %v2246_v56, %v2246_v56 }
 0x2a5   : > { %2467 = vst.msk [vmem:[%s4297_s16 + $0x94] sm:$0xf] %vm2429_vm2, %v2766_v53 }
 0x2a6   : > { %v2911_v3 = vpop.eup %2910  ;;  %2447 = vst.msk [vmem:[%s4297_s16 + $0x44] sm:$0xf] %vm2429_vm2, %v2746_v42 }
 0x2a7   : > { %v2913_v23 = vpop.eup %2912  ;;  %v2683_v24 = vadd.f32 -1.0, %v2911_v3 }
 0x2a8   : > { %v2915_v32 = vpop.eup %2914  ;;  %v2663_v19 = vadd.f32 -1.0, %v2913_v23 }
 0x2a9   : > { %v2917_v16 = vpop.eup %2916  ;;  %v2267_v5 = vsel %vm2107_vm12, %v2067_v60, %v2683_v24  ;;  %v2684_v52 = vadd.f32 -1.0, %v2915_v32 }
 0x2aa   : > { %v2247_v17 = vsel %vm2087_vm3, %v2047_v61, %v2663_v19  ;;  %v2767_v39 = vpack.c.bf16 %v2267_v5, %v2267_v5  ;;  %v2664_v0 = vadd.f32 -1.0, %v2917_v16 }
 0x2ab   : > { %v2747_v43 = vpack.c.bf16 %v2247_v17, %v2247_v17  ;;  %v2268_v37 = vsel %vm2108_vm14, %v2068_v49, %v2684_v52 }
 0x2ac   : > { %2468 = vst.msk [vmem:[%s4297_s16 + $0x98] sm:$0xf] %vm2429_vm2, %v2767_v39  ;;  %v2248_v7 = vsel %vm2088_vm4, %v2048_v12, %v2664_v0  ;;  %v2768_v15 = vpack.c.bf16 %v2268_v37, %v2268_v37 }
 0x2ad   : > { %2448 = vst.msk [vmem:[%s4297_s16 + $0x48] sm:$0xf] %vm2429_vm2, %v2747_v43  ;;  %v2748_v62 = vpack.c.bf16 %v2248_v7, %v2248_v7 }
 0x2ae   : > { %2469 = vst.msk [vmem:[%s4297_s16 + $0x9c] sm:$0xf] %vm2429_vm2, %v2768_v15 }
 0x2af   : > { %2449 = vst.msk [vmem:[%s4297_s16 + $0x4c] sm:$0xf] %vm2429_vm2, %v2748_v62 }
 0x2b0 PF: > { %s15_s18 = sadd.s32 1, %s2928_s18  }
 0x2b1   : > { %p12_p4 = scmp.ge.s32.totalorder %s15_s18, 4  }
 0x2b3   :  { %14 = sbr.rel (!%p12_p4) target bundleno = 1 (0x1), region = 79 }

</bundles_post_ra>
